<compile_context>
chip_gen: v7x
topology: tpu7x:2x2x1
jax: 0.10.0
libtpu: 0.0.40
codegen_flags: <defaults>
</compile_context>

<pallas_src>
import functools

import jax
import jax.numpy as jnp
from jax.experimental import pallas as pl
from jax.experimental.pallas import tpu as pltpu


# --------------------------------------------------------------------------
# One TDVP layer application (traced inline inside the fused kernel).
# --------------------------------------------------------------------------
def _tdvp_step(x, A_l, bl_l, br_l, *, N, d, D, BB, eps, scale, activation,
               out_norm, residual):
    # Site transfer matrices: T[b, n, a, e] = sum_i x[b, n, i] * A[i, a, e]
    # (VPU broadcast-FMA over the d=2 feature terms; no MXU.)
    T_all = x[:, :, 0, None, None] * A_l[0][None, None, :, :]
    for i in range(1, d):
        T_all = T_all + x[:, :, i, None, None] * A_l[i][None, None, :, :]
    # T_all: (BB, N, D, D)

    # Left / right environments, interleaved so the two independent serial
    # chains can be scheduled together.  Fully unrolled (N is a static int).
    #   L[0]   = bl,  L[n]   = L[n-1] @ T[n-1]
    #   R[N-1] = br,  R[n]   = T[n+1] @ R[n+1]
    L_list = [None] * N
    R_list = [None] * N
    l = jnp.broadcast_to(bl_l, (BB, D))     # (BB, D)
    r = jnp.broadcast_to(br_l, (BB, D))     # (BB, D)
    for k in range(N):
        kr = N - 1 - k
        L_list[k] = l
        R_list[kr] = r
        # l_new[b, e] = sum_a l[b, a] * T[b, k, a, e]
        l = jnp.sum(l[:, :, None] * T_all[:, k], axis=1)
        # r_new[b, a] = sum_e T[b, kr, a, e] * r[b, e]
        r = jnp.sum(T_all[:, kr] * r[:, None, :], axis=2)
    Ls = jnp.stack(L_list, axis=1)          # (BB, N, D)
    Rs = jnp.stack(R_list, axis=1)          # (BB, N, D)

    # Single-site derivative: y[b, n, i] = sum_{a,e} L[b,n,a] A[i,a,e] R[b,n,e]
    y_cols = []
    for i in range(d):
        ar = jnp.sum(A_l[i][None, None, :, :] * Rs[:, :, None, :], axis=3)  # (BB,N,D)
        y_cols.append(jnp.sum(Ls * ar, axis=2))                             # (BB,N)
    y = jnp.stack(y_cols, axis=-1)                                          # (BB,N,d)

    if activation == "tanh":
        y = jnp.tanh(y)
    y = y * scale
    if out_norm:
        y = y / (jnp.sqrt(jnp.sum(y * y, axis=-1, keepdims=True)) + eps)
    if residual:
        # TODO(synk): exact per-layer residual form of TDVP unavailable; using
        # y <- normalize(y + x) per site (same as previous version).
        y = y + x
        y = y / (jnp.sqrt(jnp.sum(y * y, axis=-1, keepdims=True)) + eps)
    return y


# --------------------------------------------------------------------------
# Fused CA_TDVP kernel: encode -> all layers -> global residual -> decode/nrm.
# One grid step handles BB batch rows; grid splits the batch across TCs.
# --------------------------------------------------------------------------
def _ca_tdvp_fused_kernel(coef_ref, inp_ref, a_ref, bl_ref, br_ref, w_ref, out_ref,
                          *, N, d, D, BB, n_layers, nrep, eps, scale, activation,
                          out_norm, residual, global_residual):
    s = inp_ref[...].reshape(BB, N).astype(jnp.float32)     # CA states in [0, 1]
    # linear_encoder: phi(s) = [1 - s, s]   (feature_dim == 2)
    x = jnp.stack([1.0 - s, s], axis=-1)                    # (BB, N, d)
    x0 = x

    A_all = a_ref[...].astype(jnp.float32)                  # (n_layers, d, D, D)
    bl_all = bl_ref[...].astype(jnp.float32)                # (n_layers, D)
    br_all = br_ref[...].astype(jnp.float32)                # (n_layers, D)

    # MultiTDVP: each distinct layer applied nrep times (static unroll).
    for li in range(n_layers):
        A_l = A_all[li]                                      # (d, D, D), static slice
        bl_l = bl_all[li:li + 1]                             # (1, D)
        br_l = br_all[li:li + 1]                             # (1, D)
        for _ in range(nrep):
            x = _tdvp_step(x, A_l, bl_l, br_l, N=N, d=d, D=D, BB=BB, eps=eps,
                           scale=scale, activation=activation,
                           out_norm=out_norm, residual=residual)

    if global_residual:
        x = x + x0 * coef_ref[0]                             # SMEM scalar
        x = x / jnp.sqrt(jnp.sum(x * x, axis=-1, keepdims=True))

    # linear_decoder + per-site norm (CA_TDVP finalize), fused here.
    w = w_ref[...].astype(jnp.float32)                       # (1, d)
    dx = jnp.sum(x * w[None, :, :], axis=-1)                 # (BB, N)
    nrm = jnp.sqrt(jnp.sum(x * x, axis=-1))                  # (BB, N)

    # Single lane-dense packed output: [x (N*d) | dx (N) | nrm (N)]
    packed = jnp.concatenate([x.reshape(BB, N * d), dx, nrm], axis=-1)
    out_ref[...] = packed[:, None, :].astype(out_ref.dtype)


# --------------------------------------------------------------------------
# Wrapper / forward.
# --------------------------------------------------------------------------
CONFIG = dict(
    input_dim=16, feature_dim=2, Dtdvp=8, ntdvp=2, nrep=2,
    out_norm=True, activation="tanh", mode="ca", eps_tdvp=1e-6,
    ti=True, ti_tdvp=True, mask_off=False, residual=True, ka=False,
    remove_trace=False, cyclic=False, scale=1.0,
    trainable_boundary=True, cinit="normal", cuda=False,
)


def init_params(key, cfg):
    d, D, ntdvp = cfg["feature_dim"], cfg["Dtdvp"], cfg["ntdvp"]
    tdvps = []
    for i in range(ntdvp):
        ka_, kb_, kc_ = jax.random.split(jax.random.fold_in(key, i), 3)
        A = jax.random.normal(ka_, (d, D, D), jnp.float32) / jnp.sqrt(float(d * D))
        bl = jax.random.normal(kb_, (1, D), jnp.float32) / jnp.sqrt(float(D))
        br = jax.random.normal(kc_, (1, D), jnp.float32) / jnp.sqrt(float(D))
        tdvps.append((A, bl, br))
    return dict(
        tdvps=tdvps,
        global_res_coef=jnp.float32(1.0),                    # torch init: 1.0
        w_dec=jnp.array([[0.0, 1.0]], dtype=jnp.float32),    # linear_decoder weights
    )


def ca_tdvp_forward(inputs, params, cfg):
    B, N = inputs.shape
    d, D = cfg["feature_dim"], cfg["Dtdvp"]
    n_layers, nrep = cfg["ntdvp"], cfg["nrep"]
    assert d == 2, "linear_encoder implemented for feature_dim == 2"

    # Stack per-layer weights so the kernel gets them in one DMA each.
    A_all = jnp.stack([A for (A, _, _) in params["tdvps"]], axis=0)          # (nl,d,D,D)
    bl_all = jnp.concatenate([bl for (_, bl, _) in params["tdvps"]], axis=0)  # (nl, D)
    br_all = jnp.concatenate([br for (_, _, br) in params["tdvps"]], axis=0)  # (nl, D)
    coef = jnp.reshape(params["global_res_coef"], (1,)).astype(jnp.float32)
    w_dec = params["w_dec"].astype(jnp.float32)                               # (1, d)

    # Split the batch across two grid steps ("parallel" -> both TCs on v7x).
    G = 2 if (B >= 2 and B % 2 == 0) else 1
    BB = B // G
    F = N * d + 2 * N
    inp3 = inputs.reshape(B, 1, N).astype(jnp.float32)

    kern = functools.partial(
        _ca_tdvp_fused_kernel, N=N, d=d, D=D, BB=BB, n_layers=n_layers,
        nrep=nrep, eps=cfg["eps_tdvp"], scale=cfg["scale"],
        activation=cfg["activation"], out_norm=cfg["out_norm"],
        residual=cfg["residual"],
        global_residual=cfg["residual"] and (n_layers * nrep > 1))

    packed = pl.pallas_call(
        kern,
        out_shape=jax.ShapeDtypeStruct((B, 1, F), jnp.float32),
        grid_spec=pltpu.PrefetchScalarGridSpec(
            num_scalar_prefetch=0,
            grid=(G,),
            in_specs=[
                pl.BlockSpec(memory_space=pltpu.MemorySpace.SMEM),          # coef
                pl.BlockSpec((BB, 1, N), lambda g: (g, 0, 0)),              # inputs
                pl.BlockSpec((n_layers, d, D, D), lambda g: (0, 0, 0, 0)),  # A (shared)
                pl.BlockSpec((n_layers, D), lambda g: (0, 0)),              # bl
                pl.BlockSpec((n_layers, D), lambda g: (0, 0)),              # br
                pl.BlockSpec((1, d), lambda g: (0, 0)),                     # w_dec
            ],
            out_specs=pl.BlockSpec((BB, 1, F), lambda g: (g, 0, 0)),
        ),
        compiler_params=pltpu.CompilerParams(dimension_semantics=("parallel",)),
    )(coef, inp3, A_all, bl_all, br_all, w_dec)

    packed = packed.reshape(B, F)
    x = packed[:, :N * d].reshape(B, N, d)
    dx = packed[:, N * d:N * d + N]
    nrm = packed[:, N * d + N:]
    return dx, nrm, x


# --------------------------------------------------------------------------
# Pure-JAX reference (same math) for a correctness cross-check.
# --------------------------------------------------------------------------
def _ref_forward(inputs, params, cfg):
    eps, scale = cfg["eps_tdvp"], cfg["scale"]
    x = jnp.stack([1.0 - inputs, inputs], axis=-1).astype(jnp.float32)
    x0 = x
    B, N, d = x.shape
    for (A, bl, br) in params["tdvps"]:
        D = A.shape[-1]
        for _ in range(cfg["nrep"]):
            T = jnp.einsum("bni,iae->bnae", x, A)
            l = jnp.broadcast_to(bl, (B, D))
            r = jnp.broadcast_to(br, (B, D))
            Ls, Rs = [None] * N, [None] * N
            for n in range(N):
                Ls[n] = l
                l = jnp.einsum("ba,bae->be", l, T[:, n])
            for n in range(N - 1, -1, -1):
                Rs[n] = r
                r = jnp.einsum("bae,be->ba", T[:, n], r)
            Ls = jnp.stack(Ls, axis=1)
            Rs = jnp.stack(Rs, axis=1)
            y = jnp.einsum("bna,iae,bne->bni", Ls, A, Rs)
            if cfg["activation"] == "tanh":
                y = jnp.tanh(y)
            y = y * scale
            if cfg["out_norm"]:
                y = y / (jnp.sqrt(jnp.sum(y * y, -1, keepdims=True)) + eps)
            if cfg["residual"]:
                y = y + x
                y = y / (jnp.sqrt(jnp.sum(y * y, -1, keepdims=True)) + eps)
            x = y
    if cfg["residual"] and cfg["ntdvp"] * cfg["nrep"] > 1:
        x = x + x0 * params["global_res_coef"]
        x = x / jnp.linalg.norm(x, axis=2, keepdims=True)
    dx = jnp.sum(x * params["w_dec"][None, :, :], axis=-1)
    nrm = jnp.linalg.norm(x, axis=-1)
    return dx, nrm, x


if __name__ == "__main__":
    key = jax.random.PRNGKey(0)
    k_in, k_par = jax.random.split(key)

    B, N = 2, CONFIG["input_dim"]
    inputs = jax.random.uniform(k_in, (B, N), dtype=jnp.float32)
    params = init_params(k_par, CONFIG)

    fwd = jax.jit(lambda inp: ca_tdvp_forward(inp, params, CONFIG))
    dx, nrm, x = fwd(inputs)
    jax.block_until_ready((dx, nrm, x))

    assert dx.shape == (B, N)
    assert nrm.shape == (B, N)
    assert x.shape == (B, N, CONFIG["feature_dim"])
    assert bool(jnp.all(jnp.isfinite(dx)))
    assert bool(jnp.all(jnp.isfinite(nrm)))
    assert bool(jnp.all(jnp.isfinite(x)))

    # Cross-check against the pure-JAX reference.
    dx_r, nrm_r, x_r = jax.jit(lambda inp: _ref_forward(inp, params, CONFIG))(inputs)
    jax.block_until_ready((dx_r, nrm_r, x_r))
    assert bool(jnp.allclose(dx, dx_r, rtol=1e-3, atol=1e-3))
    assert bool(jnp.allclose(nrm, nrm_r, rtol=1e-3, atol=1e-3))
    assert bool(jnp.allclose(x, x_r, rtol=1e-3, atol=1e-3))

    print("KERNEL_OK")
</pallas_src>

<mosaic_0001>
module attributes {stable_mosaic.version = 11 : i64} {
  func.func @_ca_tdvp_fused_kernel(%arg0: i32, %arg1: memref<1xf32, #tpu.memory_space<smem>>, %arg2: memref<1x1x16xf32, #tpu.memory_space<vmem>>, %arg3: memref<2x2x8x8xf32, #tpu.memory_space<vmem>>, %arg4: memref<2x8xf32, #tpu.memory_space<vmem>>, %arg5: memref<2x8xf32, #tpu.memory_space<vmem>>, %arg6: memref<1x2xf32, #tpu.memory_space<vmem>>, %arg7: memref<1x1x64xf32, #tpu.memory_space<vmem>>) attributes {dimension_semantics = [#tpu.dimension_semantics<parallel>], iteration_bounds = array<i64: 2>, scalar_prefetch = 0 : i64, scratch_operands = 0 : i64, tpu.core_type = #tpu.core_type<tc>, window_params = [{transform_indices = @transform_0, window_bounds = array<i64: 1>}, {transform_indices = @transform_1, window_bounds = array<i64: 1, 1, 16>}, {pipeline_mode = #tpu.pipeline_mode<synchronous>, transform_indices = @transform_2, window_bounds = array<i64: 2, 2, 8, 8>}, {pipeline_mode = #tpu.pipeline_mode<synchronous>, transform_indices = @transform_3, window_bounds = array<i64: 2, 8>}, {pipeline_mode = #tpu.pipeline_mode<synchronous>, transform_indices = @transform_4, window_bounds = array<i64: 2, 8>}, {pipeline_mode = #tpu.pipeline_mode<synchronous>, transform_indices = @transform_5, window_bounds = array<i64: 1, 2>}, {transform_indices = @transform_6, window_bounds = array<i64: 1, 1, 64>}]} {
    %c0 = arith.constant 0 : index
    %c0_0 = arith.constant 0 : index
    %c0_1 = arith.constant 0 : index
    %0 = vector.load %arg2[%c0, %c0_0, %c0_1] : memref<1x1x16xf32, #tpu.memory_space<vmem>>, vector<1x1x16xf32>
    %1 = vector.shape_cast %0 : vector<1x1x16xf32> to vector<1x16xf32>
    %cst = arith.constant 1.000000e+00 : f32
    %2 = vector.broadcast %cst : f32 to vector<1x16xf32>
    %3 = arith.subf %2, %1 : vector<1x16xf32>
    %4 = vector.shape_cast %3 : vector<1x16xf32> to vector<1x16x1xf32>
    %5 = vector.shape_cast %1 : vector<1x16xf32> to vector<1x16x1xf32>
    %6 = tpu.concatenate %4, %5 in 2 : vector<1x16x1xf32>, vector<1x16x1xf32> -> vector<1x16x2xf32>
    %c0_2 = arith.constant 0 : index
    %c0_3 = arith.constant 0 : index
    %c0_4 = arith.constant 0 : index
    %c0_5 = arith.constant 0 : index
    %7 = vector.load %arg3[%c0_2, %c0_3, %c0_4, %c0_5] : memref<2x2x8x8xf32, #tpu.memory_space<vmem>>, vector<2x2x8x8xf32>
    %c0_6 = arith.constant 0 : index
    %c0_7 = arith.constant 0 : index
    %8 = vector.load %arg4[%c0_6, %c0_7] : memref<2x8xf32, #tpu.memory_space<vmem>>, vector<2x8xf32>
    %c0_8 = arith.constant 0 : index
    %c0_9 = arith.constant 0 : index
    %9 = vector.load %arg5[%c0_8, %c0_9] : memref<2x8xf32, #tpu.memory_space<vmem>>, vector<2x8xf32>
    %10 = vector.extract_strided_slice %7 {offsets = [0, 0, 0, 0], sizes = [1, 2, 8, 8], strides = [1, 1, 1, 1]} : vector<2x2x8x8xf32> to vector<1x2x8x8xf32>
    %11 = vector.shape_cast %10 : vector<1x2x8x8xf32> to vector<2x8x8xf32>
    %12 = vector.extract_strided_slice %8 {offsets = [0, 0], sizes = [1, 8], strides = [1, 1]} : vector<2x8xf32> to vector<1x8xf32>
    %13 = vector.extract_strided_slice %9 {offsets = [0, 0], sizes = [1, 8], strides = [1, 1]} : vector<2x8xf32> to vector<1x8xf32>
    %14 = vector.extract_strided_slice %6 {offsets = [0, 0, 0], sizes = [1, 16, 1], strides = [1, 1, 1]} : vector<1x16x2xf32> to vector<1x16x1xf32>
    %15 = vector.shape_cast %14 : vector<1x16x1xf32> to vector<1x16xf32>
    %16 = vector.shape_cast %15 : vector<1x16xf32> to vector<1x16x1x1xf32>
    %17 = vector.extract_strided_slice %11 {offsets = [0, 0, 0], sizes = [1, 8, 8], strides = [1, 1, 1]} : vector<2x8x8xf32> to vector<1x8x8xf32>
    %18 = vector.shape_cast %17 : vector<1x8x8xf32> to vector<8x8xf32>
    %19 = vector.shape_cast %18 : vector<8x8xf32> to vector<1x1x8x8xf32>
    %20 = vector.broadcast %16 : vector<1x16x1x1xf32> to vector<1x16x8x8xf32>
    %21 = vector.broadcast %19 : vector<1x1x8x8xf32> to vector<1x16x8x8xf32>
    %22 = arith.mulf %20, %21 : vector<1x16x8x8xf32>
    %23 = vector.extract_strided_slice %6 {offsets = [0, 0, 1], sizes = [1, 16, 1], strides = [1, 1, 1]} : vector<1x16x2xf32> to vector<1x16x1xf32>
    %24 = vector.shape_cast %23 : vector<1x16x1xf32> to vector<1x16xf32>
    %25 = vector.shape_cast %24 : vector<1x16xf32> to vector<1x16x1x1xf32>
    %26 = vector.extract_strided_slice %11 {offsets = [1, 0, 0], sizes = [1, 8, 8], strides = [1, 1, 1]} : vector<2x8x8xf32> to vector<1x8x8xf32>
    %27 = vector.shape_cast %26 : vector<1x8x8xf32> to vector<8x8xf32>
    %28 = vector.shape_cast %27 : vector<8x8xf32> to vector<1x1x8x8xf32>
    %29 = vector.broadcast %25 : vector<1x16x1x1xf32> to vector<1x16x8x8xf32>
    %30 = vector.broadcast %28 : vector<1x1x8x8xf32> to vector<1x16x8x8xf32>
    %31 = arith.mulf %29, %30 : vector<1x16x8x8xf32>
    %32 = arith.addf %22, %31 : vector<1x16x8x8xf32>
    %33 = vector.shape_cast %12 : vector<1x8xf32> to vector<1x8x1xf32>
    %34 = vector.extract_strided_slice %32 {offsets = [0, 0, 0, 0], sizes = [1, 1, 8, 8], strides = [1, 1, 1, 1]} : vector<1x16x8x8xf32> to vector<1x1x8x8xf32>
    %35 = vector.shape_cast %34 : vector<1x1x8x8xf32> to vector<1x8x8xf32>
    %36 = vector.broadcast %33 : vector<1x8x1xf32> to vector<1x8x8xf32>
    %37 = arith.mulf %36, %35 : vector<1x8x8xf32>
    %cst_10 = arith.constant dense<0.000000e+00> : vector<1x8xf32>
    %38 = vector.multi_reduction <add>, %37, %cst_10 [1] : vector<1x8x8xf32> to vector<1x8xf32>
    %39 = vector.extract_strided_slice %32 {offsets = [0, 15, 0, 0], sizes = [1, 1, 8, 8], strides = [1, 1, 1, 1]} : vector<1x16x8x8xf32> to vector<1x1x8x8xf32>
    %40 = vector.shape_cast %39 : vector<1x1x8x8xf32> to vector<1x8x8xf32>
    %41 = vector.shape_cast %13 : vector<1x8xf32> to vector<1x1x8xf32>
    %42 = vector.broadcast %41 : vector<1x1x8xf32> to vector<1x8x8xf32>
    %43 = arith.mulf %40, %42 : vector<1x8x8xf32>
    %cst_11 = arith.constant dense<0.000000e+00> : vector<1x8xf32>
    %44 = vector.multi_reduction <add>, %43, %cst_11 [2] : vector<1x8x8xf32> to vector<1x8xf32>
    %45 = vector.shape_cast %38 : vector<1x8xf32> to vector<1x8x1xf32>
    %46 = vector.extract_strided_slice %32 {offsets = [0, 1, 0, 0], sizes = [1, 1, 8, 8], strides = [1, 1, 1, 1]} : vector<1x16x8x8xf32> to vector<1x1x8x8xf32>
    %47 = vector.shape_cast %46 : vector<1x1x8x8xf32> to vector<1x8x8xf32>
    %48 = vector.broadcast %45 : vector<1x8x1xf32> to vector<1x8x8xf32>
    %49 = arith.mulf %48, %47 : vector<1x8x8xf32>
    %cst_12 = arith.constant dense<0.000000e+00> : vector<1x8xf32>
    %50 = vector.multi_reduction <add>, %49, %cst_12 [1] : vector<1x8x8xf32> to vector<1x8xf32>
    %51 = vector.extract_strided_slice %32 {offsets = [0, 14, 0, 0], sizes = [1, 1, 8, 8], strides = [1, 1, 1, 1]} : vector<1x16x8x8xf32> to vector<1x1x8x8xf32>
    %52 = vector.shape_cast %51 : vector<1x1x8x8xf32> to vector<1x8x8xf32>
    %53 = vector.shape_cast %44 : vector<1x8xf32> to vector<1x1x8xf32>
    %54 = vector.broadcast %53 : vector<1x1x8xf32> to vector<1x8x8xf32>
    %55 = arith.mulf %52, %54 : vector<1x8x8xf32>
    %cst_13 = arith.constant dense<0.000000e+00> : vector<1x8xf32>
    %56 = vector.multi_reduction <add>, %55, %cst_13 [2] : vector<1x8x8xf32> to vector<1x8xf32>
    %57 = vector.shape_cast %50 : vector<1x8xf32> to vector<1x8x1xf32>
    %58 = vector.extract_strided_slice %32 {offsets = [0, 2, 0, 0], sizes = [1, 1, 8, 8], strides = [1, 1, 1, 1]} : vector<1x16x8x8xf32> to vector<1x1x8x8xf32>
    %59 = vector.shape_cast %58 : vector<1x1x8x8xf32> to vector<1x8x8xf32>
    %60 = vector.broadcast %57 : vector<1x8x1xf32> to vector<1x8x8xf32>
    %61 = arith.mulf %60, %59 : vector<1x8x8xf32>
    %cst_14 = arith.constant dense<0.000000e+00> : vector<1x8xf32>
    %62 = vector.multi_reduction <add>, %61, %cst_14 [1] : vector<1x8x8xf32> to vector<1x8xf32>
    %63 = vector.extract_strided_slice %32 {offsets = [0, 13, 0, 0], sizes = [1, 1, 8, 8], strides = [1, 1, 1, 1]} : vector<1x16x8x8xf32> to vector<1x1x8x8xf32>
    %64 = vector.shape_cast %63 : vector<1x1x8x8xf32> to vector<1x8x8xf32>
    %65 = vector.shape_cast %56 : vector<1x8xf32> to vector<1x1x8xf32>
    %66 = vector.broadcast %65 : vector<1x1x8xf32> to vector<1x8x8xf32>
    %67 = arith.mulf %64, %66 : vector<1x8x8xf32>
    %cst_15 = arith.constant dense<0.000000e+00> : vector<1x8xf32>
    %68 = vector.multi_reduction <add>, %67, %cst_15 [2] : vector<1x8x8xf32> to vector<1x8xf32>
    %69 = vector.shape_cast %62 : vector<1x8xf32> to vector<1x8x1xf32>
    %70 = vector.extract_strided_slice %32 {offsets = [0, 3, 0, 0], sizes = [1, 1, 8, 8], strides = [1, 1, 1, 1]} : vector<1x16x8x8xf32> to vector<1x1x8x8xf32>
    %71 = vector.shape_cast %70 : vector<1x1x8x8xf32> to vector<1x8x8xf32>
    %72 = vector.broadcast %69 : vector<1x8x1xf32> to vector<1x8x8xf32>
    %73 = arith.mulf %72, %71 : vector<1x8x8xf32>
    %cst_16 = arith.constant dense<0.000000e+00> : vector<1x8xf32>
    %74 = vector.multi_reduction <add>, %73, %cst_16 [1] : vector<1x8x8xf32> to vector<1x8xf32>
    %75 = vector.extract_strided_slice %32 {offsets = [0, 12, 0, 0], sizes = [1, 1, 8, 8], strides = [1, 1, 1, 1]} : vector<1x16x8x8xf32> to vector<1x1x8x8xf32>
    %76 = vector.shape_cast %75 : vector<1x1x8x8xf32> to vector<1x8x8xf32>
    %77 = vector.shape_cast %68 : vector<1x8xf32> to vector<1x1x8xf32>
    %78 = vector.broadcast %77 : vector<1x1x8xf32> to vector<1x8x8xf32>
    %79 = arith.mulf %76, %78 : vector<1x8x8xf32>
    %cst_17 = arith.constant dense<0.000000e+00> : vector<1x8xf32>
    %80 = vector.multi_reduction <add>, %79, %cst_17 [2] : vector<1x8x8xf32> to vector<1x8xf32>
    %81 = vector.shape_cast %74 : vector<1x8xf32> to vector<1x8x1xf32>
    %82 = vector.extract_strided_slice %32 {offsets = [0, 4, 0, 0], sizes = [1, 1, 8, 8], strides = [1, 1, 1, 1]} : vector<1x16x8x8xf32> to vector<1x1x8x8xf32>
    %83 = vector.shape_cast %82 : vector<1x1x8x8xf32> to vector<1x8x8xf32>
    %84 = vector.broadcast %81 : vector<1x8x1xf32> to vector<1x8x8xf32>
    %85 = arith.mulf %84, %83 : vector<1x8x8xf32>
    %cst_18 = arith.constant dense<0.000000e+00> : vector<1x8xf32>
    %86 = vector.multi_reduction <add>, %85, %cst_18 [1] : vector<1x8x8xf32> to vector<1x8xf32>
    %87 = vector.extract_strided_slice %32 {offsets = [0, 11, 0, 0], sizes = [1, 1, 8, 8], strides = [1, 1, 1, 1]} : vector<1x16x8x8xf32> to vector<1x1x8x8xf32>
    %88 = vector.shape_cast %87 : vector<1x1x8x8xf32> to vector<1x8x8xf32>
    %89 = vector.shape_cast %80 : vector<1x8xf32> to vector<1x1x8xf32>
    %90 = vector.broadcast %89 : vector<1x1x8xf32> to vector<1x8x8xf32>
    %91 = arith.mulf %88, %90 : vector<1x8x8xf32>
    %cst_19 = arith.constant dense<0.000000e+00> : vector<1x8xf32>
    %92 = vector.multi_reduction <add>, %91, %cst_19 [2] : vector<1x8x8xf32> to vector<1x8xf32>
    %93 = vector.shape_cast %86 : vector<1x8xf32> to vector<1x8x1xf32>
    %94 = vector.extract_strided_slice %32 {offsets = [0, 5, 0, 0], sizes = [1, 1, 8, 8], strides = [1, 1, 1, 1]} : vector<1x16x8x8xf32> to vector<1x1x8x8xf32>
    %95 = vector.shape_cast %94 : vector<1x1x8x8xf32> to vector<1x8x8xf32>
    %96 = vector.broadcast %93 : vector<1x8x1xf32> to vector<1x8x8xf32>
    %97 = arith.mulf %96, %95 : vector<1x8x8xf32>
    %cst_20 = arith.constant dense<0.000000e+00> : vector<1x8xf32>
    %98 = vector.multi_reduction <add>, %97, %cst_20 [1] : vector<1x8x8xf32> to vector<1x8xf32>
    %99 = vector.extract_strided_slice %32 {offsets = [0, 10, 0, 0], sizes = [1, 1, 8, 8], strides = [1, 1, 1, 1]} : vector<1x16x8x8xf32> to vector<1x1x8x8xf32>
    %100 = vector.shape_cast %99 : vector<1x1x8x8xf32> to vector<1x8x8xf32>
    %101 = vector.shape_cast %92 : vector<1x8xf32> to vector<1x1x8xf32>
    %102 = vector.broadcast %101 : vector<1x1x8xf32> to vector<1x8x8xf32>
    %103 = arith.mulf %100, %102 : vector<1x8x8xf32>
    %cst_21 = arith.constant dense<0.000000e+00> : vector<1x8xf32>
    %104 = vector.multi_reduction <add>, %103, %cst_21 [2] : vector<1x8x8xf32> to vector<1x8xf32>
    %105 = vector.shape_cast %98 : vector<1x8xf32> to vector<1x8x1xf32>
    %106 = vector.extract_strided_slice %32 {offsets = [0, 6, 0, 0], sizes = [1, 1, 8, 8], strides = [1, 1, 1, 1]} : vector<1x16x8x8xf32> to vector<1x1x8x8xf32>
    %107 = vector.shape_cast %106 : vector<1x1x8x8xf32> to vector<1x8x8xf32>
    %108 = vector.broadcast %105 : vector<1x8x1xf32> to vector<1x8x8xf32>
    %109 = arith.mulf %108, %107 : vector<1x8x8xf32>
    %cst_22 = arith.constant dense<0.000000e+00> : vector<1x8xf32>
    %110 = vector.multi_reduction <add>, %109, %cst_22 [1] : vector<1x8x8xf32> to vector<1x8xf32>
    %111 = vector.extract_strided_slice %32 {offsets = [0, 9, 0, 0], sizes = [1, 1, 8, 8], strides = [1, 1, 1, 1]} : vector<1x16x8x8xf32> to vector<1x1x8x8xf32>
    %112 = vector.shape_cast %111 : vector<1x1x8x8xf32> to vector<1x8x8xf32>
    %113 = vector.shape_cast %104 : vector<1x8xf32> to vector<1x1x8xf32>
    %114 = vector.broadcast %113 : vector<1x1x8xf32> to vector<1x8x8xf32>
    %115 = arith.mulf %112, %114 : vector<1x8x8xf32>
    %cst_23 = arith.constant dense<0.000000e+00> : vector<1x8xf32>
    %116 = vector.multi_reduction <add>, %115, %cst_23 [2] : vector<1x8x8xf32> to vector<1x8xf32>
    %117 = vector.shape_cast %110 : vector<1x8xf32> to vector<1x8x1xf32>
    %118 = vector.extract_strided_slice %32 {offsets = [0, 7, 0, 0], sizes = [1, 1, 8, 8], strides = [1, 1, 1, 1]} : vector<1x16x8x8xf32> to vector<1x1x8x8xf32>
    %119 = vector.shape_cast %118 : vector<1x1x8x8xf32> to vector<1x8x8xf32>
    %120 = vector.broadcast %117 : vector<1x8x1xf32> to vector<1x8x8xf32>
    %121 = arith.mulf %120, %119 : vector<1x8x8xf32>
    %cst_24 = arith.constant dense<0.000000e+00> : vector<1x8xf32>
    %122 = vector.multi_reduction <add>, %121, %cst_24 [1] : vector<1x8x8xf32> to vector<1x8xf32>
    %123 = vector.extract_strided_slice %32 {offsets = [0, 8, 0, 0], sizes = [1, 1, 8, 8], strides = [1, 1, 1, 1]} : vector<1x16x8x8xf32> to vector<1x1x8x8xf32>
    %124 = vector.shape_cast %123 : vector<1x1x8x8xf32> to vector<1x8x8xf32>
    %125 = vector.shape_cast %116 : vector<1x8xf32> to vector<1x1x8xf32>
    %126 = vector.broadcast %125 : vector<1x1x8xf32> to vector<1x8x8xf32>
    %127 = arith.mulf %124, %126 : vector<1x8x8xf32>
    %cst_25 = arith.constant dense<0.000000e+00> : vector<1x8xf32>
    %128 = vector.multi_reduction <add>, %127, %cst_25 [2] : vector<1x8x8xf32> to vector<1x8xf32>
    %129 = vector.shape_cast %122 : vector<1x8xf32> to vector<1x8x1xf32>
    %130 = vector.extract_strided_slice %32 {offsets = [0, 8, 0, 0], sizes = [1, 1, 8, 8], strides = [1, 1, 1, 1]} : vector<1x16x8x8xf32> to vector<1x1x8x8xf32>
    %131 = vector.shape_cast %130 : vector<1x1x8x8xf32> to vector<1x8x8xf32>
    %132 = vector.broadcast %129 : vector<1x8x1xf32> to vector<1x8x8xf32>
    %133 = arith.mulf %132, %131 : vector<1x8x8xf32>
    %cst_26 = arith.constant dense<0.000000e+00> : vector<1x8xf32>
    %134 = vector.multi_reduction <add>, %133, %cst_26 [1] : vector<1x8x8xf32> to vector<1x8xf32>
    %135 = vector.extract_strided_slice %32 {offsets = [0, 7, 0, 0], sizes = [1, 1, 8, 8], strides = [1, 1, 1, 1]} : vector<1x16x8x8xf32> to vector<1x1x8x8xf32>
    %136 = vector.shape_cast %135 : vector<1x1x8x8xf32> to vector<1x8x8xf32>
    %137 = vector.shape_cast %128 : vector<1x8xf32> to vector<1x1x8xf32>
    %138 = vector.broadcast %137 : vector<1x1x8xf32> to vector<1x8x8xf32>
    %139 = arith.mulf %136, %138 : vector<1x8x8xf32>
    %cst_27 = arith.constant dense<0.000000e+00> : vector<1x8xf32>
    %140 = vector.multi_reduction <add>, %139, %cst_27 [2] : vector<1x8x8xf32> to vector<1x8xf32>
    %141 = vector.shape_cast %134 : vector<1x8xf32> to vector<1x8x1xf32>
    %142 = vector.extract_strided_slice %32 {offsets = [0, 9, 0, 0], sizes = [1, 1, 8, 8], strides = [1, 1, 1, 1]} : vector<1x16x8x8xf32> to vector<1x1x8x8xf32>
    %143 = vector.shape_cast %142 : vector<1x1x8x8xf32> to vector<1x8x8xf32>
    %144 = vector.broadcast %141 : vector<1x8x1xf32> to vector<1x8x8xf32>
    %145 = arith.mulf %144, %143 : vector<1x8x8xf32>
    %cst_28 = arith.constant dense<0.000000e+00> : vector<1x8xf32>
    %146 = vector.multi_reduction <add>, %145, %cst_28 [1] : vector<1x8x8xf32> to vector<1x8xf32>
    %147 = vector.extract_strided_slice %32 {offsets = [0, 6, 0, 0], sizes = [1, 1, 8, 8], strides = [1, 1, 1, 1]} : vector<1x16x8x8xf32> to vector<1x1x8x8xf32>
    %148 = vector.shape_cast %147 : vector<1x1x8x8xf32> to vector<1x8x8xf32>
    %149 = vector.shape_cast %140 : vector<1x8xf32> to vector<1x1x8xf32>
    %150 = vector.broadcast %149 : vector<1x1x8xf32> to vector<1x8x8xf32>
    %151 = arith.mulf %148, %150 : vector<1x8x8xf32>
    %cst_29 = arith.constant dense<0.000000e+00> : vector<1x8xf32>
    %152 = vector.multi_reduction <add>, %151, %cst_29 [2] : vector<1x8x8xf32> to vector<1x8xf32>
    %153 = vector.shape_cast %146 : vector<1x8xf32> to vector<1x8x1xf32>
    %154 = vector.extract_strided_slice %32 {offsets = [0, 10, 0, 0], sizes = [1, 1, 8, 8], strides = [1, 1, 1, 1]} : vector<1x16x8x8xf32> to vector<1x1x8x8xf32>
    %155 = vector.shape_cast %154 : vector<1x1x8x8xf32> to vector<1x8x8xf32>
    %156 = vector.broadcast %153 : vector<1x8x1xf32> to vector<1x8x8xf32>
    %157 = arith.mulf %156, %155 : vector<1x8x8xf32>
    %cst_30 = arith.constant dense<0.000000e+00> : vector<1x8xf32>
    %158 = vector.multi_reduction <add>, %157, %cst_30 [1] : vector<1x8x8xf32> to vector<1x8xf32>
    %159 = vector.extract_strided_slice %32 {offsets = [0, 5, 0, 0], sizes = [1, 1, 8, 8], strides = [1, 1, 1, 1]} : vector<1x16x8x8xf32> to vector<1x1x8x8xf32>
    %160 = vector.shape_cast %159 : vector<1x1x8x8xf32> to vector<1x8x8xf32>
    %161 = vector.shape_cast %152 : vector<1x8xf32> to vector<1x1x8xf32>
    %162 = vector.broadcast %161 : vector<1x1x8xf32> to vector<1x8x8xf32>
    %163 = arith.mulf %160, %162 : vector<1x8x8xf32>
    %cst_31 = arith.constant dense<0.000000e+00> : vector<1x8xf32>
    %164 = vector.multi_reduction <add>, %163, %cst_31 [2] : vector<1x8x8xf32> to vector<1x8xf32>
    %165 = vector.shape_cast %158 : vector<1x8xf32> to vector<1x8x1xf32>
    %166 = vector.extract_strided_slice %32 {offsets = [0, 11, 0, 0], sizes = [1, 1, 8, 8], strides = [1, 1, 1, 1]} : vector<1x16x8x8xf32> to vector<1x1x8x8xf32>
    %167 = vector.shape_cast %166 : vector<1x1x8x8xf32> to vector<1x8x8xf32>
    %168 = vector.broadcast %165 : vector<1x8x1xf32> to vector<1x8x8xf32>
    %169 = arith.mulf %168, %167 : vector<1x8x8xf32>
    %cst_32 = arith.constant dense<0.000000e+00> : vector<1x8xf32>
    %170 = vector.multi_reduction <add>, %169, %cst_32 [1] : vector<1x8x8xf32> to vector<1x8xf32>
    %171 = vector.extract_strided_slice %32 {offsets = [0, 4, 0, 0], sizes = [1, 1, 8, 8], strides = [1, 1, 1, 1]} : vector<1x16x8x8xf32> to vector<1x1x8x8xf32>
    %172 = vector.shape_cast %171 : vector<1x1x8x8xf32> to vector<1x8x8xf32>
    %173 = vector.shape_cast %164 : vector<1x8xf32> to vector<1x1x8xf32>
    %174 = vector.broadcast %173 : vector<1x1x8xf32> to vector<1x8x8xf32>
    %175 = arith.mulf %172, %174 : vector<1x8x8xf32>
    %cst_33 = arith.constant dense<0.000000e+00> : vector<1x8xf32>
    %176 = vector.multi_reduction <add>, %175, %cst_33 [2] : vector<1x8x8xf32> to vector<1x8xf32>
    %177 = vector.shape_cast %170 : vector<1x8xf32> to vector<1x8x1xf32>
    %178 = vector.extract_strided_slice %32 {offsets = [0, 12, 0, 0], sizes = [1, 1, 8, 8], strides = [1, 1, 1, 1]} : vector<1x16x8x8xf32> to vector<1x1x8x8xf32>
    %179 = vector.shape_cast %178 : vector<1x1x8x8xf32> to vector<1x8x8xf32>
    %180 = vector.broadcast %177 : vector<1x8x1xf32> to vector<1x8x8xf32>
    %181 = arith.mulf %180, %179 : vector<1x8x8xf32>
    %cst_34 = arith.constant dense<0.000000e+00> : vector<1x8xf32>
    %182 = vector.multi_reduction <add>, %181, %cst_34 [1] : vector<1x8x8xf32> to vector<1x8xf32>
    %183 = vector.extract_strided_slice %32 {offsets = [0, 3, 0, 0], sizes = [1, 1, 8, 8], strides = [1, 1, 1, 1]} : vector<1x16x8x8xf32> to vector<1x1x8x8xf32>
    %184 = vector.shape_cast %183 : vector<1x1x8x8xf32> to vector<1x8x8xf32>
    %185 = vector.shape_cast %176 : vector<1x8xf32> to vector<1x1x8xf32>
    %186 = vector.broadcast %185 : vector<1x1x8xf32> to vector<1x8x8xf32>
    %187 = arith.mulf %184, %186 : vector<1x8x8xf32>
    %cst_35 = arith.constant dense<0.000000e+00> : vector<1x8xf32>
    %188 = vector.multi_reduction <add>, %187, %cst_35 [2] : vector<1x8x8xf32> to vector<1x8xf32>
    %189 = vector.shape_cast %182 : vector<1x8xf32> to vector<1x8x1xf32>
    %190 = vector.extract_strided_slice %32 {offsets = [0, 13, 0, 0], sizes = [1, 1, 8, 8], strides = [1, 1, 1, 1]} : vector<1x16x8x8xf32> to vector<1x1x8x8xf32>
    %191 = vector.shape_cast %190 : vector<1x1x8x8xf32> to vector<1x8x8xf32>
    %192 = vector.broadcast %189 : vector<1x8x1xf32> to vector<1x8x8xf32>
    %193 = arith.mulf %192, %191 : vector<1x8x8xf32>
    %cst_36 = arith.constant dense<0.000000e+00> : vector<1x8xf32>
    %194 = vector.multi_reduction <add>, %193, %cst_36 [1] : vector<1x8x8xf32> to vector<1x8xf32>
    %195 = vector.extract_strided_slice %32 {offsets = [0, 2, 0, 0], sizes = [1, 1, 8, 8], strides = [1, 1, 1, 1]} : vector<1x16x8x8xf32> to vector<1x1x8x8xf32>
    %196 = vector.shape_cast %195 : vector<1x1x8x8xf32> to vector<1x8x8xf32>
    %197 = vector.shape_cast %188 : vector<1x8xf32> to vector<1x1x8xf32>
    %198 = vector.broadcast %197 : vector<1x1x8xf32> to vector<1x8x8xf32>
    %199 = arith.mulf %196, %198 : vector<1x8x8xf32>
    %cst_37 = arith.constant dense<0.000000e+00> : vector<1x8xf32>
    %200 = vector.multi_reduction <add>, %199, %cst_37 [2] : vector<1x8x8xf32> to vector<1x8xf32>
    %201 = vector.shape_cast %194 : vector<1x8xf32> to vector<1x8x1xf32>
    %202 = vector.extract_strided_slice %32 {offsets = [0, 14, 0, 0], sizes = [1, 1, 8, 8], strides = [1, 1, 1, 1]} : vector<1x16x8x8xf32> to vector<1x1x8x8xf32>
    %203 = vector.shape_cast %202 : vector<1x1x8x8xf32> to vector<1x8x8xf32>
    %204 = vector.broadcast %201 : vector<1x8x1xf32> to vector<1x8x8xf32>
    %205 = arith.mulf %204, %203 : vector<1x8x8xf32>
    %cst_38 = arith.constant dense<0.000000e+00> : vector<1x8xf32>
    %206 = vector.multi_reduction <add>, %205, %cst_38 [1] : vector<1x8x8xf32> to vector<1x8xf32>
    %207 = vector.extract_strided_slice %32 {offsets = [0, 1, 0, 0], sizes = [1, 1, 8, 8], strides = [1, 1, 1, 1]} : vector<1x16x8x8xf32> to vector<1x1x8x8xf32>
    %208 = vector.shape_cast %207 : vector<1x1x8x8xf32> to vector<1x8x8xf32>
    %209 = vector.shape_cast %200 : vector<1x8xf32> to vector<1x1x8xf32>
    %210 = vector.broadcast %209 : vector<1x1x8xf32> to vector<1x8x8xf32>
    %211 = arith.mulf %208, %210 : vector<1x8x8xf32>
    %cst_39 = arith.constant dense<0.000000e+00> : vector<1x8xf32>
    %212 = vector.multi_reduction <add>, %211, %cst_39 [2] : vector<1x8x8xf32> to vector<1x8xf32>
    %213 = vector.shape_cast %12 : vector<1x8xf32> to vector<1x1x8xf32>
    %214 = vector.shape_cast %38 : vector<1x8xf32> to vector<1x1x8xf32>
    %215 = vector.shape_cast %50 : vector<1x8xf32> to vector<1x1x8xf32>
    %216 = vector.shape_cast %62 : vector<1x8xf32> to vector<1x1x8xf32>
    %217 = vector.shape_cast %74 : vector<1x8xf32> to vector<1x1x8xf32>
    %218 = vector.shape_cast %86 : vector<1x8xf32> to vector<1x1x8xf32>
    %219 = vector.shape_cast %98 : vector<1x8xf32> to vector<1x1x8xf32>
    %220 = vector.shape_cast %110 : vector<1x8xf32> to vector<1x1x8xf32>
    %221 = vector.shape_cast %122 : vector<1x8xf32> to vector<1x1x8xf32>
    %222 = vector.shape_cast %134 : vector<1x8xf32> to vector<1x1x8xf32>
    %223 = vector.shape_cast %146 : vector<1x8xf32> to vector<1x1x8xf32>
    %224 = vector.shape_cast %158 : vector<1x8xf32> to vector<1x1x8xf32>
    %225 = vector.shape_cast %170 : vector<1x8xf32> to vector<1x1x8xf32>
    %226 = vector.shape_cast %182 : vector<1x8xf32> to vector<1x1x8xf32>
    %227 = vector.shape_cast %194 : vector<1x8xf32> to vector<1x1x8xf32>
    %228 = vector.shape_cast %206 : vector<1x8xf32> to vector<1x1x8xf32>
    %229 = tpu.concatenate %213, %214, %215, %216, %217, %218, %219, %220, %221, %222, %223, %224, %225, %226, %227, %228 in 1 : vector<1x1x8xf32>, vector<1x1x8xf32>, vector<1x1x8xf32>, vector<1x1x8xf32>, vector<1x1x8xf32>, vector<1x1x8xf32>, vector<1x1x8xf32>, vector<1x1x8xf32>, vector<1x1x8xf32>, vector<1x1x8xf32>, vector<1x1x8xf32>, vector<1x1x8xf32>, vector<1x1x8xf32>, vector<1x1x8xf32>, vector<1x1x8xf32>, vector<1x1x8xf32> -> vector<1x16x8xf32>
    %230 = vector.shape_cast %212 : vector<1x8xf32> to vector<1x1x8xf32>
    %231 = vector.shape_cast %200 : vector<1x8xf32> to vector<1x1x8xf32>
    %232 = vector.shape_cast %188 : vector<1x8xf32> to vector<1x1x8xf32>
    %233 = vector.shape_cast %176 : vector<1x8xf32> to vector<1x1x8xf32>
    %234 = vector.shape_cast %164 : vector<1x8xf32> to vector<1x1x8xf32>
    %235 = vector.shape_cast %152 : vector<1x8xf32> to vector<1x1x8xf32>
    %236 = vector.shape_cast %140 : vector<1x8xf32> to vector<1x1x8xf32>
    %237 = vector.shape_cast %128 : vector<1x8xf32> to vector<1x1x8xf32>
    %238 = vector.shape_cast %116 : vector<1x8xf32> to vector<1x1x8xf32>
    %239 = vector.shape_cast %104 : vector<1x8xf32> to vector<1x1x8xf32>
    %240 = vector.shape_cast %92 : vector<1x8xf32> to vector<1x1x8xf32>
    %241 = vector.shape_cast %80 : vector<1x8xf32> to vector<1x1x8xf32>
    %242 = vector.shape_cast %68 : vector<1x8xf32> to vector<1x1x8xf32>
    %243 = vector.shape_cast %56 : vector<1x8xf32> to vector<1x1x8xf32>
    %244 = vector.shape_cast %44 : vector<1x8xf32> to vector<1x1x8xf32>
    %245 = vector.shape_cast %13 : vector<1x8xf32> to vector<1x1x8xf32>
    %246 = tpu.concatenate %230, %231, %232, %233, %234, %235, %236, %237, %238, %239, %240, %241, %242, %243, %244, %245 in 1 : vector<1x1x8xf32>, vector<1x1x8xf32>, vector<1x1x8xf32>, vector<1x1x8xf32>, vector<1x1x8xf32>, vector<1x1x8xf32>, vector<1x1x8xf32>, vector<1x1x8xf32>, vector<1x1x8xf32>, vector<1x1x8xf32>, vector<1x1x8xf32>, vector<1x1x8xf32>, vector<1x1x8xf32>, vector<1x1x8xf32>, vector<1x1x8xf32>, vector<1x1x8xf32> -> vector<1x16x8xf32>
    %247 = vector.extract_strided_slice %11 {offsets = [0, 0, 0], sizes = [1, 8, 8], strides = [1, 1, 1]} : vector<2x8x8xf32> to vector<1x8x8xf32>
    %248 = vector.shape_cast %247 : vector<1x8x8xf32> to vector<8x8xf32>
    %249 = vector.shape_cast %248 : vector<8x8xf32> to vector<1x1x8x8xf32>
    %250 = vector.shape_cast %246 : vector<1x16x8xf32> to vector<1x16x1x8xf32>
    %251 = vector.broadcast %249 : vector<1x1x8x8xf32> to vector<1x16x8x8xf32>
    %252 = vector.broadcast %250 : vector<1x16x1x8xf32> to vector<1x16x8x8xf32>
    %253 = arith.mulf %251, %252 : vector<1x16x8x8xf32>
    %cst_40 = arith.constant dense<0.000000e+00> : vector<1x16x8xf32>
    %254 = vector.multi_reduction <add>, %253, %cst_40 [3] : vector<1x16x8x8xf32> to vector<1x16x8xf32>
    %255 = arith.mulf %229, %254 : vector<1x16x8xf32>
    %cst_41 = arith.constant dense<0.000000e+00> : vector<1x16xf32>
    %256 = vector.multi_reduction <add>, %255, %cst_41 [2] : vector<1x16x8xf32> to vector<1x16xf32>
    %257 = vector.extract_strided_slice %11 {offsets = [1, 0, 0], sizes = [1, 8, 8], strides = [1, 1, 1]} : vector<2x8x8xf32> to vector<1x8x8xf32>
    %258 = vector.shape_cast %257 : vector<1x8x8xf32> to vector<8x8xf32>
    %259 = vector.shape_cast %258 : vector<8x8xf32> to vector<1x1x8x8xf32>
    %260 = vector.shape_cast %246 : vector<1x16x8xf32> to vector<1x16x1x8xf32>
    %261 = vector.broadcast %259 : vector<1x1x8x8xf32> to vector<1x16x8x8xf32>
    %262 = vector.broadcast %260 : vector<1x16x1x8xf32> to vector<1x16x8x8xf32>
    %263 = arith.mulf %261, %262 : vector<1x16x8x8xf32>
    %cst_42 = arith.constant dense<0.000000e+00> : vector<1x16x8xf32>
    %264 = vector.multi_reduction <add>, %263, %cst_42 [3] : vector<1x16x8x8xf32> to vector<1x16x8xf32>
    %265 = arith.mulf %229, %264 : vector<1x16x8xf32>
    %cst_43 = arith.constant dense<0.000000e+00> : vector<1x16xf32>
    %266 = vector.multi_reduction <add>, %265, %cst_43 [2] : vector<1x16x8xf32> to vector<1x16xf32>
    %267 = vector.shape_cast %256 : vector<1x16xf32> to vector<1x16x1xf32>
    %268 = vector.shape_cast %266 : vector<1x16xf32> to vector<1x16x1xf32>
    %269 = tpu.concatenate %267, %268 in 2 : vector<1x16x1xf32>, vector<1x16x1xf32> -> vector<1x16x2xf32>
    %270 = math.tanh %269 : vector<1x16x2xf32>
    %cst_44 = arith.constant 1.000000e+00 : f32
    %271 = vector.broadcast %cst_44 : f32 to vector<1x16x2xf32>
    %272 = arith.mulf %270, %271 : vector<1x16x2xf32>
    %273 = arith.mulf %272, %272 : vector<1x16x2xf32>
    %cst_45 = arith.constant dense<0.000000e+00> : vector<1x16xf32>
    %274 = vector.multi_reduction <add>, %273, %cst_45 [2] : vector<1x16x2xf32> to vector<1x16xf32>
    %275 = vector.shape_cast %274 : vector<1x16xf32> to vector<1x16x1xf32>
    %276 = math.sqrt %275 : vector<1x16x1xf32>
    %cst_46 = arith.constant 9.99999997E-7 : f32
    %277 = vector.broadcast %cst_46 : f32 to vector<1x16x1xf32>
    %278 = arith.addf %276, %277 : vector<1x16x1xf32>
    %279 = vector.broadcast %278 : vector<1x16x1xf32> to vector<1x16x2xf32>
    %280 = arith.divf %272, %279 : vector<1x16x2xf32>
    %281 = arith.addf %280, %6 : vector<1x16x2xf32>
    %282 = arith.mulf %281, %281 : vector<1x16x2xf32>
    %cst_47 = arith.constant dense<0.000000e+00> : vector<1x16xf32>
    %283 = vector.multi_reduction <add>, %282, %cst_47 [2] : vector<1x16x2xf32> to vector<1x16xf32>
    %284 = vector.shape_cast %283 : vector<1x16xf32> to vector<1x16x1xf32>
    %285 = math.sqrt %284 : vector<1x16x1xf32>
    %cst_48 = arith.constant 9.99999997E-7 : f32
    %286 = vector.broadcast %cst_48 : f32 to vector<1x16x1xf32>
    %287 = arith.addf %285, %286 : vector<1x16x1xf32>
    %288 = vector.broadcast %287 : vector<1x16x1xf32> to vector<1x16x2xf32>
    %289 = arith.divf %281, %288 : vector<1x16x2xf32>
    %290 = vector.extract_strided_slice %289 {offsets = [0, 0, 0], sizes = [1, 16, 1], strides = [1, 1, 1]} : vector<1x16x2xf32> to vector<1x16x1xf32>
    %291 = vector.shape_cast %290 : vector<1x16x1xf32> to vector<1x16xf32>
    %292 = vector.shape_cast %291 : vector<1x16xf32> to vector<1x16x1x1xf32>
    %293 = vector.extract_strided_slice %11 {offsets = [0, 0, 0], sizes = [1, 8, 8], strides = [1, 1, 1]} : vector<2x8x8xf32> to vector<1x8x8xf32>
    %294 = vector.shape_cast %293 : vector<1x8x8xf32> to vector<8x8xf32>
    %295 = vector.shape_cast %294 : vector<8x8xf32> to vector<1x1x8x8xf32>
    %296 = vector.broadcast %292 : vector<1x16x1x1xf32> to vector<1x16x8x8xf32>
    %297 = vector.broadcast %295 : vector<1x1x8x8xf32> to vector<1x16x8x8xf32>
    %298 = arith.mulf %296, %297 : vector<1x16x8x8xf32>
    %299 = vector.extract_strided_slice %289 {offsets = [0, 0, 1], sizes = [1, 16, 1], strides = [1, 1, 1]} : vector<1x16x2xf32> to vector<1x16x1xf32>
    %300 = vector.shape_cast %299 : vector<1x16x1xf32> to vector<1x16xf32>
    %301 = vector.shape_cast %300 : vector<1x16xf32> to vector<1x16x1x1xf32>
    %302 = vector.extract_strided_slice %11 {offsets = [1, 0, 0], sizes = [1, 8, 8], strides = [1, 1, 1]} : vector<2x8x8xf32> to vector<1x8x8xf32>
    %303 = vector.shape_cast %302 : vector<1x8x8xf32> to vector<8x8xf32>
    %304 = vector.shape_cast %303 : vector<8x8xf32> to vector<1x1x8x8xf32>
    %305 = vector.broadcast %301 : vector<1x16x1x1xf32> to vector<1x16x8x8xf32>
    %306 = vector.broadcast %304 : vector<1x1x8x8xf32> to vector<1x16x8x8xf32>
    %307 = arith.mulf %305, %306 : vector<1x16x8x8xf32>
    %308 = arith.addf %298, %307 : vector<1x16x8x8xf32>
    %309 = vector.shape_cast %12 : vector<1x8xf32> to vector<1x8x1xf32>
    %310 = vector.extract_strided_slice %308 {offsets = [0, 0, 0, 0], sizes = [1, 1, 8, 8], strides = [1, 1, 1, 1]} : vector<1x16x8x8xf32> to vector<1x1x8x8xf32>
    %311 = vector.shape_cast %310 : vector<1x1x8x8xf32> to vector<1x8x8xf32>
    %312 = vector.broadcast %309 : vector<1x8x1xf32> to vector<1x8x8xf32>
    %313 = arith.mulf %312, %311 : vector<1x8x8xf32>
    %cst_49 = arith.constant dense<0.000000e+00> : vector<1x8xf32>
    %314 = vector.multi_reduction <add>, %313, %cst_49 [1] : vector<1x8x8xf32> to vector<1x8xf32>
    %315 = vector.extract_strided_slice %308 {offsets = [0, 15, 0, 0], sizes = [1, 1, 8, 8], strides = [1, 1, 1, 1]} : vector<1x16x8x8xf32> to vector<1x1x8x8xf32>
    %316 = vector.shape_cast %315 : vector<1x1x8x8xf32> to vector<1x8x8xf32>
    %317 = vector.shape_cast %13 : vector<1x8xf32> to vector<1x1x8xf32>
    %318 = vector.broadcast %317 : vector<1x1x8xf32> to vector<1x8x8xf32>
    %319 = arith.mulf %316, %318 : vector<1x8x8xf32>
    %cst_50 = arith.constant dense<0.000000e+00> : vector<1x8xf32>
    %320 = vector.multi_reduction <add>, %319, %cst_50 [2] : vector<1x8x8xf32> to vector<1x8xf32>
    %321 = vector.shape_cast %314 : vector<1x8xf32> to vector<1x8x1xf32>
    %322 = vector.extract_strided_slice %308 {offsets = [0, 1, 0, 0], sizes = [1, 1, 8, 8], strides = [1, 1, 1, 1]} : vector<1x16x8x8xf32> to vector<1x1x8x8xf32>
    %323 = vector.shape_cast %322 : vector<1x1x8x8xf32> to vector<1x8x8xf32>
    %324 = vector.broadcast %321 : vector<1x8x1xf32> to vector<1x8x8xf32>
    %325 = arith.mulf %324, %323 : vector<1x8x8xf32>
    %cst_51 = arith.constant dense<0.000000e+00> : vector<1x8xf32>
    %326 = vector.multi_reduction <add>, %325, %cst_51 [1] : vector<1x8x8xf32> to vector<1x8xf32>
    %327 = vector.extract_strided_slice %308 {offsets = [0, 14, 0, 0], sizes = [1, 1, 8, 8], strides = [1, 1, 1, 1]} : vector<1x16x8x8xf32> to vector<1x1x8x8xf32>
    %328 = vector.shape_cast %327 : vector<1x1x8x8xf32> to vector<1x8x8xf32>
    %329 = vector.shape_cast %320 : vector<1x8xf32> to vector<1x1x8xf32>
    %330 = vector.broadcast %329 : vector<1x1x8xf32> to vector<1x8x8xf32>
    %331 = arith.mulf %328, %330 : vector<1x8x8xf32>
    %cst_52 = arith.constant dense<0.000000e+00> : vector<1x8xf32>
    %332 = vector.multi_reduction <add>, %331, %cst_52 [2] : vector<1x8x8xf32> to vector<1x8xf32>
    %333 = vector.shape_cast %326 : vector<1x8xf32> to vector<1x8x1xf32>
    %334 = vector.extract_strided_slice %308 {offsets = [0, 2, 0, 0], sizes = [1, 1, 8, 8], strides = [1, 1, 1, 1]} : vector<1x16x8x8xf32> to vector<1x1x8x8xf32>
    %335 = vector.shape_cast %334 : vector<1x1x8x8xf32> to vector<1x8x8xf32>
    %336 = vector.broadcast %333 : vector<1x8x1xf32> to vector<1x8x8xf32>
    %337 = arith.mulf %336, %335 : vector<1x8x8xf32>
    %cst_53 = arith.constant dense<0.000000e+00> : vector<1x8xf32>
    %338 = vector.multi_reduction <add>, %337, %cst_53 [1] : vector<1x8x8xf32> to vector<1x8xf32>
    %339 = vector.extract_strided_slice %308 {offsets = [0, 13, 0, 0], sizes = [1, 1, 8, 8], strides = [1, 1, 1, 1]} : vector<1x16x8x8xf32> to vector<1x1x8x8xf32>
    %340 = vector.shape_cast %339 : vector<1x1x8x8xf32> to vector<1x8x8xf32>
    %341 = vector.shape_cast %332 : vector<1x8xf32> to vector<1x1x8xf32>
    %342 = vector.broadcast %341 : vector<1x1x8xf32> to vector<1x8x8xf32>
    %343 = arith.mulf %340, %342 : vector<1x8x8xf32>
    %cst_54 = arith.constant dense<0.000000e+00> : vector<1x8xf32>
    %344 = vector.multi_reduction <add>, %343, %cst_54 [2] : vector<1x8x8xf32> to vector<1x8xf32>
    %345 = vector.shape_cast %338 : vector<1x8xf32> to vector<1x8x1xf32>
    %346 = vector.extract_strided_slice %308 {offsets = [0, 3, 0, 0], sizes = [1, 1, 8, 8], strides = [1, 1, 1, 1]} : vector<1x16x8x8xf32> to vector<1x1x8x8xf32>
    %347 = vector.shape_cast %346 : vector<1x1x8x8xf32> to vector<1x8x8xf32>
    %348 = vector.broadcast %345 : vector<1x8x1xf32> to vector<1x8x8xf32>
    %349 = arith.mulf %348, %347 : vector<1x8x8xf32>
    %cst_55 = arith.constant dense<0.000000e+00> : vector<1x8xf32>
    %350 = vector.multi_reduction <add>, %349, %cst_55 [1] : vector<1x8x8xf32> to vector<1x8xf32>
    %351 = vector.extract_strided_slice %308 {offsets = [0, 12, 0, 0], sizes = [1, 1, 8, 8], strides = [1, 1, 1, 1]} : vector<1x16x8x8xf32> to vector<1x1x8x8xf32>
    %352 = vector.shape_cast %351 : vector<1x1x8x8xf32> to vector<1x8x8xf32>
    %353 = vector.shape_cast %344 : vector<1x8xf32> to vector<1x1x8xf32>
    %354 = vector.broadcast %353 : vector<1x1x8xf32> to vector<1x8x8xf32>
    %355 = arith.mulf %352, %354 : vector<1x8x8xf32>
    %cst_56 = arith.constant dense<0.000000e+00> : vector<1x8xf32>
    %356 = vector.multi_reduction <add>, %355, %cst_56 [2] : vector<1x8x8xf32> to vector<1x8xf32>
    %357 = vector.shape_cast %350 : vector<1x8xf32> to vector<1x8x1xf32>
    %358 = vector.extract_strided_slice %308 {offsets = [0, 4, 0, 0], sizes = [1, 1, 8, 8], strides = [1, 1, 1, 1]} : vector<1x16x8x8xf32> to vector<1x1x8x8xf32>
    %359 = vector.shape_cast %358 : vector<1x1x8x8xf32> to vector<1x8x8xf32>
    %360 = vector.broadcast %357 : vector<1x8x1xf32> to vector<1x8x8xf32>
    %361 = arith.mulf %360, %359 : vector<1x8x8xf32>
    %cst_57 = arith.constant dense<0.000000e+00> : vector<1x8xf32>
    %362 = vector.multi_reduction <add>, %361, %cst_57 [1] : vector<1x8x8xf32> to vector<1x8xf32>
    %363 = vector.extract_strided_slice %308 {offsets = [0, 11, 0, 0], sizes = [1, 1, 8, 8], strides = [1, 1, 1, 1]} : vector<1x16x8x8xf32> to vector<1x1x8x8xf32>
    %364 = vector.shape_cast %363 : vector<1x1x8x8xf32> to vector<1x8x8xf32>
    %365 = vector.shape_cast %356 : vector<1x8xf32> to vector<1x1x8xf32>
    %366 = vector.broadcast %365 : vector<1x1x8xf32> to vector<1x8x8xf32>
    %367 = arith.mulf %364, %366 : vector<1x8x8xf32>
    %cst_58 = arith.constant dense<0.000000e+00> : vector<1x8xf32>
    %368 = vector.multi_reduction <add>, %367, %cst_58 [2] : vector<1x8x8xf32> to vector<1x8xf32>
    %369 = vector.shape_cast %362 : vector<1x8xf32> to vector<1x8x1xf32>
    %370 = vector.extract_strided_slice %308 {offsets = [0, 5, 0, 0], sizes = [1, 1, 8, 8], strides = [1, 1, 1, 1]} : vector<1x16x8x8xf32> to vector<1x1x8x8xf32>
    %371 = vector.shape_cast %370 : vector<1x1x8x8xf32> to vector<1x8x8xf32>
    %372 = vector.broadcast %369 : vector<1x8x1xf32> to vector<1x8x8xf32>
    %373 = arith.mulf %372, %371 : vector<1x8x8xf32>
    %cst_59 = arith.constant dense<0.000000e+00> : vector<1x8xf32>
    %374 = vector.multi_reduction <add>, %373, %cst_59 [1] : vector<1x8x8xf32> to vector<1x8xf32>
    %375 = vector.extract_strided_slice %308 {offsets = [0, 10, 0, 0], sizes = [1, 1, 8, 8], strides = [1, 1, 1, 1]} : vector<1x16x8x8xf32> to vector<1x1x8x8xf32>
    %376 = vector.shape_cast %375 : vector<1x1x8x8xf32> to vector<1x8x8xf32>
    %377 = vector.shape_cast %368 : vector<1x8xf32> to vector<1x1x8xf32>
    %378 = vector.broadcast %377 : vector<1x1x8xf32> to vector<1x8x8xf32>
    %379 = arith.mulf %376, %378 : vector<1x8x8xf32>
    %cst_60 = arith.constant dense<0.000000e+00> : vector<1x8xf32>
    %380 = vector.multi_reduction <add>, %379, %cst_60 [2] : vector<1x8x8xf32> to vector<1x8xf32>
    %381 = vector.shape_cast %374 : vector<1x8xf32> to vector<1x8x1xf32>
    %382 = vector.extract_strided_slice %308 {offsets = [0, 6, 0, 0], sizes = [1, 1, 8, 8], strides = [1, 1, 1, 1]} : vector<1x16x8x8xf32> to vector<1x1x8x8xf32>
    %383 = vector.shape_cast %382 : vector<1x1x8x8xf32> to vector<1x8x8xf32>
    %384 = vector.broadcast %381 : vector<1x8x1xf32> to vector<1x8x8xf32>
    %385 = arith.mulf %384, %383 : vector<1x8x8xf32>
    %cst_61 = arith.constant dense<0.000000e+00> : vector<1x8xf32>
    %386 = vector.multi_reduction <add>, %385, %cst_61 [1] : vector<1x8x8xf32> to vector<1x8xf32>
    %387 = vector.extract_strided_slice %308 {offsets = [0, 9, 0, 0], sizes = [1, 1, 8, 8], strides = [1, 1, 1, 1]} : vector<1x16x8x8xf32> to vector<1x1x8x8xf32>
    %388 = vector.shape_cast %387 : vector<1x1x8x8xf32> to vector<1x8x8xf32>
    %389 = vector.shape_cast %380 : vector<1x8xf32> to vector<1x1x8xf32>
    %390 = vector.broadcast %389 : vector<1x1x8xf32> to vector<1x8x8xf32>
    %391 = arith.mulf %388, %390 : vector<1x8x8xf32>
    %cst_62 = arith.constant dense<0.000000e+00> : vector<1x8xf32>
    %392 = vector.multi_reduction <add>, %391, %cst_62 [2] : vector<1x8x8xf32> to vector<1x8xf32>
    %393 = vector.shape_cast %386 : vector<1x8xf32> to vector<1x8x1xf32>
    %394 = vector.extract_strided_slice %308 {offsets = [0, 7, 0, 0], sizes = [1, 1, 8, 8], strides = [1, 1, 1, 1]} : vector<1x16x8x8xf32> to vector<1x1x8x8xf32>
    %395 = vector.shape_cast %394 : vector<1x1x8x8xf32> to vector<1x8x8xf32>
    %396 = vector.broadcast %393 : vector<1x8x1xf32> to vector<1x8x8xf32>
    %397 = arith.mulf %396, %395 : vector<1x8x8xf32>
    %cst_63 = arith.constant dense<0.000000e+00> : vector<1x8xf32>
    %398 = vector.multi_reduction <add>, %397, %cst_63 [1] : vector<1x8x8xf32> to vector<1x8xf32>
    %399 = vector.extract_strided_slice %308 {offsets = [0, 8, 0, 0], sizes = [1, 1, 8, 8], strides = [1, 1, 1, 1]} : vector<1x16x8x8xf32> to vector<1x1x8x8xf32>
    %400 = vector.shape_cast %399 : vector<1x1x8x8xf32> to vector<1x8x8xf32>
    %401 = vector.shape_cast %392 : vector<1x8xf32> to vector<1x1x8xf32>
    %402 = vector.broadcast %401 : vector<1x1x8xf32> to vector<1x8x8xf32>
    %403 = arith.mulf %400, %402 : vector<1x8x8xf32>
    %cst_64 = arith.constant dense<0.000000e+00> : vector<1x8xf32>
    %404 = vector.multi_reduction <add>, %403, %cst_64 [2] : vector<1x8x8xf32> to vector<1x8xf32>
    %405 = vector.shape_cast %398 : vector<1x8xf32> to vector<1x8x1xf32>
    %406 = vector.extract_strided_slice %308 {offsets = [0, 8, 0, 0], sizes = [1, 1, 8, 8], strides = [1, 1, 1, 1]} : vector<1x16x8x8xf32> to vector<1x1x8x8xf32>
    %407 = vector.shape_cast %406 : vector<1x1x8x8xf32> to vector<1x8x8xf32>
    %408 = vector.broadcast %405 : vector<1x8x1xf32> to vector<1x8x8xf32>
    %409 = arith.mulf %408, %407 : vector<1x8x8xf32>
    %cst_65 = arith.constant dense<0.000000e+00> : vector<1x8xf32>
    %410 = vector.multi_reduction <add>, %409, %cst_65 [1] : vector<1x8x8xf32> to vector<1x8xf32>
    %411 = vector.extract_strided_slice %308 {offsets = [0, 7, 0, 0], sizes = [1, 1, 8, 8], strides = [1, 1, 1, 1]} : vector<1x16x8x8xf32> to vector<1x1x8x8xf32>
    %412 = vector.shape_cast %411 : vector<1x1x8x8xf32> to vector<1x8x8xf32>
    %413 = vector.shape_cast %404 : vector<1x8xf32> to vector<1x1x8xf32>
    %414 = vector.broadcast %413 : vector<1x1x8xf32> to vector<1x8x8xf32>
    %415 = arith.mulf %412, %414 : vector<1x8x8xf32>
    %cst_66 = arith.constant dense<0.000000e+00> : vector<1x8xf32>
    %416 = vector.multi_reduction <add>, %415, %cst_66 [2] : vector<1x8x8xf32> to vector<1x8xf32>
    %417 = vector.shape_cast %410 : vector<1x8xf32> to vector<1x8x1xf32>
    %418 = vector.extract_strided_slice %308 {offsets = [0, 9, 0, 0], sizes = [1, 1, 8, 8], strides = [1, 1, 1, 1]} : vector<1x16x8x8xf32> to vector<1x1x8x8xf32>
    %419 = vector.shape_cast %418 : vector<1x1x8x8xf32> to vector<1x8x8xf32>
    %420 = vector.broadcast %417 : vector<1x8x1xf32> to vector<1x8x8xf32>
    %421 = arith.mulf %420, %419 : vector<1x8x8xf32>
    %cst_67 = arith.constant dense<0.000000e+00> : vector<1x8xf32>
    %422 = vector.multi_reduction <add>, %421, %cst_67 [1] : vector<1x8x8xf32> to vector<1x8xf32>
    %423 = vector.extract_strided_slice %308 {offsets = [0, 6, 0, 0], sizes = [1, 1, 8, 8], strides = [1, 1, 1, 1]} : vector<1x16x8x8xf32> to vector<1x1x8x8xf32>
    %424 = vector.shape_cast %423 : vector<1x1x8x8xf32> to vector<1x8x8xf32>
    %425 = vector.shape_cast %416 : vector<1x8xf32> to vector<1x1x8xf32>
    %426 = vector.broadcast %425 : vector<1x1x8xf32> to vector<1x8x8xf32>
    %427 = arith.mulf %424, %426 : vector<1x8x8xf32>
    %cst_68 = arith.constant dense<0.000000e+00> : vector<1x8xf32>
    %428 = vector.multi_reduction <add>, %427, %cst_68 [2] : vector<1x8x8xf32> to vector<1x8xf32>
    %429 = vector.shape_cast %422 : vector<1x8xf32> to vector<1x8x1xf32>
    %430 = vector.extract_strided_slice %308 {offsets = [0, 10, 0, 0], sizes = [1, 1, 8, 8], strides = [1, 1, 1, 1]} : vector<1x16x8x8xf32> to vector<1x1x8x8xf32>
    %431 = vector.shape_cast %430 : vector<1x1x8x8xf32> to vector<1x8x8xf32>
    %432 = vector.broadcast %429 : vector<1x8x1xf32> to vector<1x8x8xf32>
    %433 = arith.mulf %432, %431 : vector<1x8x8xf32>
    %cst_69 = arith.constant dense<0.000000e+00> : vector<1x8xf32>
    %434 = vector.multi_reduction <add>, %433, %cst_69 [1] : vector<1x8x8xf32> to vector<1x8xf32>
    %435 = vector.extract_strided_slice %308 {offsets = [0, 5, 0, 0], sizes = [1, 1, 8, 8], strides = [1, 1, 1, 1]} : vector<1x16x8x8xf32> to vector<1x1x8x8xf32>
    %436 = vector.shape_cast %435 : vector<1x1x8x8xf32> to vector<1x8x8xf32>
    %437 = vector.shape_cast %428 : vector<1x8xf32> to vector<1x1x8xf32>
    %438 = vector.broadcast %437 : vector<1x1x8xf32> to vector<1x8x8xf32>
    %439 = arith.mulf %436, %438 : vector<1x8x8xf32>
    %cst_70 = arith.constant dense<0.000000e+00> : vector<1x8xf32>
    %440 = vector.multi_reduction <add>, %439, %cst_70 [2] : vector<1x8x8xf32> to vector<1x8xf32>
    %441 = vector.shape_cast %434 : vector<1x8xf32> to vector<1x8x1xf32>
    %442 = vector.extract_strided_slice %308 {offsets = [0, 11, 0, 0], sizes = [1, 1, 8, 8], strides = [1, 1, 1, 1]} : vector<1x16x8x8xf32> to vector<1x1x8x8xf32>
    %443 = vector.shape_cast %442 : vector<1x1x8x8xf32> to vector<1x8x8xf32>
    %444 = vector.broadcast %441 : vector<1x8x1xf32> to vector<1x8x8xf32>
    %445 = arith.mulf %444, %443 : vector<1x8x8xf32>
    %cst_71 = arith.constant dense<0.000000e+00> : vector<1x8xf32>
    %446 = vector.multi_reduction <add>, %445, %cst_71 [1] : vector<1x8x8xf32> to vector<1x8xf32>
    %447 = vector.extract_strided_slice %308 {offsets = [0, 4, 0, 0], sizes = [1, 1, 8, 8], strides = [1, 1, 1, 1]} : vector<1x16x8x8xf32> to vector<1x1x8x8xf32>
    %448 = vector.shape_cast %447 : vector<1x1x8x8xf32> to vector<1x8x8xf32>
    %449 = vector.shape_cast %440 : vector<1x8xf32> to vector<1x1x8xf32>
    %450 = vector.broadcast %449 : vector<1x1x8xf32> to vector<1x8x8xf32>
    %451 = arith.mulf %448, %450 : vector<1x8x8xf32>
    %cst_72 = arith.constant dense<0.000000e+00> : vector<1x8xf32>
    %452 = vector.multi_reduction <add>, %451, %cst_72 [2] : vector<1x8x8xf32> to vector<1x8xf32>
    %453 = vector.shape_cast %446 : vector<1x8xf32> to vector<1x8x1xf32>
    %454 = vector.extract_strided_slice %308 {offsets = [0, 12, 0, 0], sizes = [1, 1, 8, 8], strides = [1, 1, 1, 1]} : vector<1x16x8x8xf32> to vector<1x1x8x8xf32>
    %455 = vector.shape_cast %454 : vector<1x1x8x8xf32> to vector<1x8x8xf32>
    %456 = vector.broadcast %453 : vector<1x8x1xf32> to vector<1x8x8xf32>
    %457 = arith.mulf %456, %455 : vector<1x8x8xf32>
    %cst_73 = arith.constant dense<0.000000e+00> : vector<1x8xf32>
    %458 = vector.multi_reduction <add>, %457, %cst_73 [1] : vector<1x8x8xf32> to vector<1x8xf32>
    %459 = vector.extract_strided_slice %308 {offsets = [0, 3, 0, 0], sizes = [1, 1, 8, 8], strides = [1, 1, 1, 1]} : vector<1x16x8x8xf32> to vector<1x1x8x8xf32>
    %460 = vector.shape_cast %459 : vector<1x1x8x8xf32> to vector<1x8x8xf32>
    %461 = vector.shape_cast %452 : vector<1x8xf32> to vector<1x1x8xf32>
    %462 = vector.broadcast %461 : vector<1x1x8xf32> to vector<1x8x8xf32>
    %463 = arith.mulf %460, %462 : vector<1x8x8xf32>
    %cst_74 = arith.constant dense<0.000000e+00> : vector<1x8xf32>
    %464 = vector.multi_reduction <add>, %463, %cst_74 [2] : vector<1x8x8xf32> to vector<1x8xf32>
    %465 = vector.shape_cast %458 : vector<1x8xf32> to vector<1x8x1xf32>
    %466 = vector.extract_strided_slice %308 {offsets = [0, 13, 0, 0], sizes = [1, 1, 8, 8], strides = [1, 1, 1, 1]} : vector<1x16x8x8xf32> to vector<1x1x8x8xf32>
    %467 = vector.shape_cast %466 : vector<1x1x8x8xf32> to vector<1x8x8xf32>
    %468 = vector.broadcast %465 : vector<1x8x1xf32> to vector<1x8x8xf32>
    %469 = arith.mulf %468, %467 : vector<1x8x8xf32>
    %cst_75 = arith.constant dense<0.000000e+00> : vector<1x8xf32>
    %470 = vector.multi_reduction <add>, %469, %cst_75 [1] : vector<1x8x8xf32> to vector<1x8xf32>
    %471 = vector.extract_strided_slice %308 {offsets = [0, 2, 0, 0], sizes = [1, 1, 8, 8], strides = [1, 1, 1, 1]} : vector<1x16x8x8xf32> to vector<1x1x8x8xf32>
    %472 = vector.shape_cast %471 : vector<1x1x8x8xf32> to vector<1x8x8xf32>
    %473 = vector.shape_cast %464 : vector<1x8xf32> to vector<1x1x8xf32>
    %474 = vector.broadcast %473 : vector<1x1x8xf32> to vector<1x8x8xf32>
    %475 = arith.mulf %472, %474 : vector<1x8x8xf32>
    %cst_76 = arith.constant dense<0.000000e+00> : vector<1x8xf32>
    %476 = vector.multi_reduction <add>, %475, %cst_76 [2] : vector<1x8x8xf32> to vector<1x8xf32>
    %477 = vector.shape_cast %470 : vector<1x8xf32> to vector<1x8x1xf32>
    %478 = vector.extract_strided_slice %308 {offsets = [0, 14, 0, 0], sizes = [1, 1, 8, 8], strides = [1, 1, 1, 1]} : vector<1x16x8x8xf32> to vector<1x1x8x8xf32>
    %479 = vector.shape_cast %478 : vector<1x1x8x8xf32> to vector<1x8x8xf32>
    %480 = vector.broadcast %477 : vector<1x8x1xf32> to vector<1x8x8xf32>
    %481 = arith.mulf %480, %479 : vector<1x8x8xf32>
    %cst_77 = arith.constant dense<0.000000e+00> : vector<1x8xf32>
    %482 = vector.multi_reduction <add>, %481, %cst_77 [1] : vector<1x8x8xf32> to vector<1x8xf32>
    %483 = vector.extract_strided_slice %308 {offsets = [0, 1, 0, 0], sizes = [1, 1, 8, 8], strides = [1, 1, 1, 1]} : vector<1x16x8x8xf32> to vector<1x1x8x8xf32>
    %484 = vector.shape_cast %483 : vector<1x1x8x8xf32> to vector<1x8x8xf32>
    %485 = vector.shape_cast %476 : vector<1x8xf32> to vector<1x1x8xf32>
    %486 = vector.broadcast %485 : vector<1x1x8xf32> to vector<1x8x8xf32>
    %487 = arith.mulf %484, %486 : vector<1x8x8xf32>
    %cst_78 = arith.constant dense<0.000000e+00> : vector<1x8xf32>
    %488 = vector.multi_reduction <add>, %487, %cst_78 [2] : vector<1x8x8xf32> to vector<1x8xf32>
    %489 = vector.shape_cast %12 : vector<1x8xf32> to vector<1x1x8xf32>
    %490 = vector.shape_cast %314 : vector<1x8xf32> to vector<1x1x8xf32>
    %491 = vector.shape_cast %326 : vector<1x8xf32> to vector<1x1x8xf32>
    %492 = vector.shape_cast %338 : vector<1x8xf32> to vector<1x1x8xf32>
    %493 = vector.shape_cast %350 : vector<1x8xf32> to vector<1x1x8xf32>
    %494 = vector.shape_cast %362 : vector<1x8xf32> to vector<1x1x8xf32>
    %495 = vector.shape_cast %374 : vector<1x8xf32> to vector<1x1x8xf32>
    %496 = vector.shape_cast %386 : vector<1x8xf32> to vector<1x1x8xf32>
    %497 = vector.shape_cast %398 : vector<1x8xf32> to vector<1x1x8xf32>
    %498 = vector.shape_cast %410 : vector<1x8xf32> to vector<1x1x8xf32>
    %499 = vector.shape_cast %422 : vector<1x8xf32> to vector<1x1x8xf32>
    %500 = vector.shape_cast %434 : vector<1x8xf32> to vector<1x1x8xf32>
    %501 = vector.shape_cast %446 : vector<1x8xf32> to vector<1x1x8xf32>
    %502 = vector.shape_cast %458 : vector<1x8xf32> to vector<1x1x8xf32>
    %503 = vector.shape_cast %470 : vector<1x8xf32> to vector<1x1x8xf32>
    %504 = vector.shape_cast %482 : vector<1x8xf32> to vector<1x1x8xf32>
    %505 = tpu.concatenate %489, %490, %491, %492, %493, %494, %495, %496, %497, %498, %499, %500, %501, %502, %503, %504 in 1 : vector<1x1x8xf32>, vector<1x1x8xf32>, vector<1x1x8xf32>, vector<1x1x8xf32>, vector<1x1x8xf32>, vector<1x1x8xf32>, vector<1x1x8xf32>, vector<1x1x8xf32>, vector<1x1x8xf32>, vector<1x1x8xf32>, vector<1x1x8xf32>, vector<1x1x8xf32>, vector<1x1x8xf32>, vector<1x1x8xf32>, vector<1x1x8xf32>, vector<1x1x8xf32> -> vector<1x16x8xf32>
    %506 = vector.shape_cast %488 : vector<1x8xf32> to vector<1x1x8xf32>
    %507 = vector.shape_cast %476 : vector<1x8xf32> to vector<1x1x8xf32>
    %508 = vector.shape_cast %464 : vector<1x8xf32> to vector<1x1x8xf32>
    %509 = vector.shape_cast %452 : vector<1x8xf32> to vector<1x1x8xf32>
    %510 = vector.shape_cast %440 : vector<1x8xf32> to vector<1x1x8xf32>
    %511 = vector.shape_cast %428 : vector<1x8xf32> to vector<1x1x8xf32>
    %512 = vector.shape_cast %416 : vector<1x8xf32> to vector<1x1x8xf32>
    %513 = vector.shape_cast %404 : vector<1x8xf32> to vector<1x1x8xf32>
    %514 = vector.shape_cast %392 : vector<1x8xf32> to vector<1x1x8xf32>
    %515 = vector.shape_cast %380 : vector<1x8xf32> to vector<1x1x8xf32>
    %516 = vector.shape_cast %368 : vector<1x8xf32> to vector<1x1x8xf32>
    %517 = vector.shape_cast %356 : vector<1x8xf32> to vector<1x1x8xf32>
    %518 = vector.shape_cast %344 : vector<1x8xf32> to vector<1x1x8xf32>
    %519 = vector.shape_cast %332 : vector<1x8xf32> to vector<1x1x8xf32>
    %520 = vector.shape_cast %320 : vector<1x8xf32> to vector<1x1x8xf32>
    %521 = vector.shape_cast %13 : vector<1x8xf32> to vector<1x1x8xf32>
    %522 = tpu.concatenate %506, %507, %508, %509, %510, %511, %512, %513, %514, %515, %516, %517, %518, %519, %520, %521 in 1 : vector<1x1x8xf32>, vector<1x1x8xf32>, vector<1x1x8xf32>, vector<1x1x8xf32>, vector<1x1x8xf32>, vector<1x1x8xf32>, vector<1x1x8xf32>, vector<1x1x8xf32>, vector<1x1x8xf32>, vector<1x1x8xf32>, vector<1x1x8xf32>, vector<1x1x8xf32>, vector<1x1x8xf32>, vector<1x1x8xf32>, vector<1x1x8xf32>, vector<1x1x8xf32> -> vector<1x16x8xf32>
    %523 = vector.extract_strided_slice %11 {offsets = [0, 0, 0], sizes = [1, 8, 8], strides = [1, 1, 1]} : vector<2x8x8xf32> to vector<1x8x8xf32>
    %524 = vector.shape_cast %523 : vector<1x8x8xf32> to vector<8x8xf32>
    %525 = vector.shape_cast %524 : vector<8x8xf32> to vector<1x1x8x8xf32>
    %526 = vector.shape_cast %522 : vector<1x16x8xf32> to vector<1x16x1x8xf32>
    %527 = vector.broadcast %525 : vector<1x1x8x8xf32> to vector<1x16x8x8xf32>
    %528 = vector.broadcast %526 : vector<1x16x1x8xf32> to vector<1x16x8x8xf32>
    %529 = arith.mulf %527, %528 : vector<1x16x8x8xf32>
    %cst_79 = arith.constant dense<0.000000e+00> : vector<1x16x8xf32>
    %530 = vector.multi_reduction <add>, %529, %cst_79 [3] : vector<1x16x8x8xf32> to vector<1x16x8xf32>
    %531 = arith.mulf %505, %530 : vector<1x16x8xf32>
    %cst_80 = arith.constant dense<0.000000e+00> : vector<1x16xf32>
    %532 = vector.multi_reduction <add>, %531, %cst_80 [2] : vector<1x16x8xf32> to vector<1x16xf32>
    %533 = vector.extract_strided_slice %11 {offsets = [1, 0, 0], sizes = [1, 8, 8], strides = [1, 1, 1]} : vector<2x8x8xf32> to vector<1x8x8xf32>
    %534 = vector.shape_cast %533 : vector<1x8x8xf32> to vector<8x8xf32>
    %535 = vector.shape_cast %534 : vector<8x8xf32> to vector<1x1x8x8xf32>
    %536 = vector.shape_cast %522 : vector<1x16x8xf32> to vector<1x16x1x8xf32>
    %537 = vector.broadcast %535 : vector<1x1x8x8xf32> to vector<1x16x8x8xf32>
    %538 = vector.broadcast %536 : vector<1x16x1x8xf32> to vector<1x16x8x8xf32>
    %539 = arith.mulf %537, %538 : vector<1x16x8x8xf32>
    %cst_81 = arith.constant dense<0.000000e+00> : vector<1x16x8xf32>
    %540 = vector.multi_reduction <add>, %539, %cst_81 [3] : vector<1x16x8x8xf32> to vector<1x16x8xf32>
    %541 = arith.mulf %505, %540 : vector<1x16x8xf32>
    %cst_82 = arith.constant dense<0.000000e+00> : vector<1x16xf32>
    %542 = vector.multi_reduction <add>, %541, %cst_82 [2] : vector<1x16x8xf32> to vector<1x16xf32>
    %543 = vector.shape_cast %532 : vector<1x16xf32> to vector<1x16x1xf32>
    %544 = vector.shape_cast %542 : vector<1x16xf32> to vector<1x16x1xf32>
    %545 = tpu.concatenate %543, %544 in 2 : vector<1x16x1xf32>, vector<1x16x1xf32> -> vector<1x16x2xf32>
    %546 = math.tanh %545 : vector<1x16x2xf32>
    %cst_83 = arith.constant 1.000000e+00 : f32
    %547 = vector.broadcast %cst_83 : f32 to vector<1x16x2xf32>
    %548 = arith.mulf %546, %547 : vector<1x16x2xf32>
    %549 = arith.mulf %548, %548 : vector<1x16x2xf32>
    %cst_84 = arith.constant dense<0.000000e+00> : vector<1x16xf32>
    %550 = vector.multi_reduction <add>, %549, %cst_84 [2] : vector<1x16x2xf32> to vector<1x16xf32>
    %551 = vector.shape_cast %550 : vector<1x16xf32> to vector<1x16x1xf32>
    %552 = math.sqrt %551 : vector<1x16x1xf32>
    %cst_85 = arith.constant 9.99999997E-7 : f32
    %553 = vector.broadcast %cst_85 : f32 to vector<1x16x1xf32>
    %554 = arith.addf %552, %553 : vector<1x16x1xf32>
    %555 = vector.broadcast %554 : vector<1x16x1xf32> to vector<1x16x2xf32>
    %556 = arith.divf %548, %555 : vector<1x16x2xf32>
    %557 = arith.addf %556, %289 : vector<1x16x2xf32>
    %558 = arith.mulf %557, %557 : vector<1x16x2xf32>
    %cst_86 = arith.constant dense<0.000000e+00> : vector<1x16xf32>
    %559 = vector.multi_reduction <add>, %558, %cst_86 [2] : vector<1x16x2xf32> to vector<1x16xf32>
    %560 = vector.shape_cast %559 : vector<1x16xf32> to vector<1x16x1xf32>
    %561 = math.sqrt %560 : vector<1x16x1xf32>
    %cst_87 = arith.constant 9.99999997E-7 : f32
    %562 = vector.broadcast %cst_87 : f32 to vector<1x16x1xf32>
    %563 = arith.addf %561, %562 : vector<1x16x1xf32>
    %564 = vector.broadcast %563 : vector<1x16x1xf32> to vector<1x16x2xf32>
    %565 = arith.divf %557, %564 : vector<1x16x2xf32>
    %566 = vector.extract_strided_slice %7 {offsets = [1, 0, 0, 0], sizes = [1, 2, 8, 8], strides = [1, 1, 1, 1]} : vector<2x2x8x8xf32> to vector<1x2x8x8xf32>
    %567 = vector.shape_cast %566 : vector<1x2x8x8xf32> to vector<2x8x8xf32>
    %568 = vector.extract_strided_slice %8 {offsets = [1, 0], sizes = [1, 8], strides = [1, 1]} : vector<2x8xf32> to vector<1x8xf32>
    %569 = vector.extract_strided_slice %9 {offsets = [1, 0], sizes = [1, 8], strides = [1, 1]} : vector<2x8xf32> to vector<1x8xf32>
    %570 = vector.extract_strided_slice %565 {offsets = [0, 0, 0], sizes = [1, 16, 1], strides = [1, 1, 1]} : vector<1x16x2xf32> to vector<1x16x1xf32>
    %571 = vector.shape_cast %570 : vector<1x16x1xf32> to vector<1x16xf32>
    %572 = vector.shape_cast %571 : vector<1x16xf32> to vector<1x16x1x1xf32>
    %573 = vector.extract_strided_slice %567 {offsets = [0, 0, 0], sizes = [1, 8, 8], strides = [1, 1, 1]} : vector<2x8x8xf32> to vector<1x8x8xf32>
    %574 = vector.shape_cast %573 : vector<1x8x8xf32> to vector<8x8xf32>
    %575 = vector.shape_cast %574 : vector<8x8xf32> to vector<1x1x8x8xf32>
    %576 = vector.broadcast %572 : vector<1x16x1x1xf32> to vector<1x16x8x8xf32>
    %577 = vector.broadcast %575 : vector<1x1x8x8xf32> to vector<1x16x8x8xf32>
    %578 = arith.mulf %576, %577 : vector<1x16x8x8xf32>
    %579 = vector.extract_strided_slice %565 {offsets = [0, 0, 1], sizes = [1, 16, 1], strides = [1, 1, 1]} : vector<1x16x2xf32> to vector<1x16x1xf32>
    %580 = vector.shape_cast %579 : vector<1x16x1xf32> to vector<1x16xf32>
    %581 = vector.shape_cast %580 : vector<1x16xf32> to vector<1x16x1x1xf32>
    %582 = vector.extract_strided_slice %567 {offsets = [1, 0, 0], sizes = [1, 8, 8], strides = [1, 1, 1]} : vector<2x8x8xf32> to vector<1x8x8xf32>
    %583 = vector.shape_cast %582 : vector<1x8x8xf32> to vector<8x8xf32>
    %584 = vector.shape_cast %583 : vector<8x8xf32> to vector<1x1x8x8xf32>
    %585 = vector.broadcast %581 : vector<1x16x1x1xf32> to vector<1x16x8x8xf32>
    %586 = vector.broadcast %584 : vector<1x1x8x8xf32> to vector<1x16x8x8xf32>
    %587 = arith.mulf %585, %586 : vector<1x16x8x8xf32>
    %588 = arith.addf %578, %587 : vector<1x16x8x8xf32>
    %589 = vector.shape_cast %568 : vector<1x8xf32> to vector<1x8x1xf32>
    %590 = vector.extract_strided_slice %588 {offsets = [0, 0, 0, 0], sizes = [1, 1, 8, 8], strides = [1, 1, 1, 1]} : vector<1x16x8x8xf32> to vector<1x1x8x8xf32>
    %591 = vector.shape_cast %590 : vector<1x1x8x8xf32> to vector<1x8x8xf32>
    %592 = vector.broadcast %589 : vector<1x8x1xf32> to vector<1x8x8xf32>
    %593 = arith.mulf %592, %591 : vector<1x8x8xf32>
    %cst_88 = arith.constant dense<0.000000e+00> : vector<1x8xf32>
    %594 = vector.multi_reduction <add>, %593, %cst_88 [1] : vector<1x8x8xf32> to vector<1x8xf32>
    %595 = vector.extract_strided_slice %588 {offsets = [0, 15, 0, 0], sizes = [1, 1, 8, 8], strides = [1, 1, 1, 1]} : vector<1x16x8x8xf32> to vector<1x1x8x8xf32>
    %596 = vector.shape_cast %595 : vector<1x1x8x8xf32> to vector<1x8x8xf32>
    %597 = vector.shape_cast %569 : vector<1x8xf32> to vector<1x1x8xf32>
    %598 = vector.broadcast %597 : vector<1x1x8xf32> to vector<1x8x8xf32>
    %599 = arith.mulf %596, %598 : vector<1x8x8xf32>
    %cst_89 = arith.constant dense<0.000000e+00> : vector<1x8xf32>
    %600 = vector.multi_reduction <add>, %599, %cst_89 [2] : vector<1x8x8xf32> to vector<1x8xf32>
    %601 = vector.shape_cast %594 : vector<1x8xf32> to vector<1x8x1xf32>
    %602 = vector.extract_strided_slice %588 {offsets = [0, 1, 0, 0], sizes = [1, 1, 8, 8], strides = [1, 1, 1, 1]} : vector<1x16x8x8xf32> to vector<1x1x8x8xf32>
    %603 = vector.shape_cast %602 : vector<1x1x8x8xf32> to vector<1x8x8xf32>
    %604 = vector.broadcast %601 : vector<1x8x1xf32> to vector<1x8x8xf32>
    %605 = arith.mulf %604, %603 : vector<1x8x8xf32>
    %cst_90 = arith.constant dense<0.000000e+00> : vector<1x8xf32>
    %606 = vector.multi_reduction <add>, %605, %cst_90 [1] : vector<1x8x8xf32> to vector<1x8xf32>
    %607 = vector.extract_strided_slice %588 {offsets = [0, 14, 0, 0], sizes = [1, 1, 8, 8], strides = [1, 1, 1, 1]} : vector<1x16x8x8xf32> to vector<1x1x8x8xf32>
    %608 = vector.shape_cast %607 : vector<1x1x8x8xf32> to vector<1x8x8xf32>
    %609 = vector.shape_cast %600 : vector<1x8xf32> to vector<1x1x8xf32>
    %610 = vector.broadcast %609 : vector<1x1x8xf32> to vector<1x8x8xf32>
    %611 = arith.mulf %608, %610 : vector<1x8x8xf32>
    %cst_91 = arith.constant dense<0.000000e+00> : vector<1x8xf32>
    %612 = vector.multi_reduction <add>, %611, %cst_91 [2] : vector<1x8x8xf32> to vector<1x8xf32>
    %613 = vector.shape_cast %606 : vector<1x8xf32> to vector<1x8x1xf32>
    %614 = vector.extract_strided_slice %588 {offsets = [0, 2, 0, 0], sizes = [1, 1, 8, 8], strides = [1, 1, 1, 1]} : vector<1x16x8x8xf32> to vector<1x1x8x8xf32>
    %615 = vector.shape_cast %614 : vector<1x1x8x8xf32> to vector<1x8x8xf32>
    %616 = vector.broadcast %613 : vector<1x8x1xf32> to vector<1x8x8xf32>
    %617 = arith.mulf %616, %615 : vector<1x8x8xf32>
    %cst_92 = arith.constant dense<0.000000e+00> : vector<1x8xf32>
    %618 = vector.multi_reduction <add>, %617, %cst_92 [1] : vector<1x8x8xf32> to vector<1x8xf32>
    %619 = vector.extract_strided_slice %588 {offsets = [0, 13, 0, 0], sizes = [1, 1, 8, 8], strides = [1, 1, 1, 1]} : vector<1x16x8x8xf32> to vector<1x1x8x8xf32>
    %620 = vector.shape_cast %619 : vector<1x1x8x8xf32> to vector<1x8x8xf32>
    %621 = vector.shape_cast %612 : vector<1x8xf32> to vector<1x1x8xf32>
    %622 = vector.broadcast %621 : vector<1x1x8xf32> to vector<1x8x8xf32>
    %623 = arith.mulf %620, %622 : vector<1x8x8xf32>
    %cst_93 = arith.constant dense<0.000000e+00> : vector<1x8xf32>
    %624 = vector.multi_reduction <add>, %623, %cst_93 [2] : vector<1x8x8xf32> to vector<1x8xf32>
    %625 = vector.shape_cast %618 : vector<1x8xf32> to vector<1x8x1xf32>
    %626 = vector.extract_strided_slice %588 {offsets = [0, 3, 0, 0], sizes = [1, 1, 8, 8], strides = [1, 1, 1, 1]} : vector<1x16x8x8xf32> to vector<1x1x8x8xf32>
    %627 = vector.shape_cast %626 : vector<1x1x8x8xf32> to vector<1x8x8xf32>
    %628 = vector.broadcast %625 : vector<1x8x1xf32> to vector<1x8x8xf32>
    %629 = arith.mulf %628, %627 : vector<1x8x8xf32>
    %cst_94 = arith.constant dense<0.000000e+00> : vector<1x8xf32>
    %630 = vector.multi_reduction <add>, %629, %cst_94 [1] : vector<1x8x8xf32> to vector<1x8xf32>
    %631 = vector.extract_strided_slice %588 {offsets = [0, 12, 0, 0], sizes = [1, 1, 8, 8], strides = [1, 1, 1, 1]} : vector<1x16x8x8xf32> to vector<1x1x8x8xf32>
    %632 = vector.shape_cast %631 : vector<1x1x8x8xf32> to vector<1x8x8xf32>
    %633 = vector.shape_cast %624 : vector<1x8xf32> to vector<1x1x8xf32>
    %634 = vector.broadcast %633 : vector<1x1x8xf32> to vector<1x8x8xf32>
    %635 = arith.mulf %632, %634 : vector<1x8x8xf32>
    %cst_95 = arith.constant dense<0.000000e+00> : vector<1x8xf32>
    %636 = vector.multi_reduction <add>, %635, %cst_95 [2] : vector<1x8x8xf32> to vector<1x8xf32>
    %637 = vector.shape_cast %630 : vector<1x8xf32> to vector<1x8x1xf32>
    %638 = vector.extract_strided_slice %588 {offsets = [0, 4, 0, 0], sizes = [1, 1, 8, 8], strides = [1, 1, 1, 1]} : vector<1x16x8x8xf32> to vector<1x1x8x8xf32>
    %639 = vector.shape_cast %638 : vector<1x1x8x8xf32> to vector<1x8x8xf32>
    %640 = vector.broadcast %637 : vector<1x8x1xf32> to vector<1x8x8xf32>
    %641 = arith.mulf %640, %639 : vector<1x8x8xf32>
    %cst_96 = arith.constant dense<0.000000e+00> : vector<1x8xf32>
    %642 = vector.multi_reduction <add>, %641, %cst_96 [1] : vector<1x8x8xf32> to vector<1x8xf32>
    %643 = vector.extract_strided_slice %588 {offsets = [0, 11, 0, 0], sizes = [1, 1, 8, 8], strides = [1, 1, 1, 1]} : vector<1x16x8x8xf32> to vector<1x1x8x8xf32>
    %644 = vector.shape_cast %643 : vector<1x1x8x8xf32> to vector<1x8x8xf32>
    %645 = vector.shape_cast %636 : vector<1x8xf32> to vector<1x1x8xf32>
    %646 = vector.broadcast %645 : vector<1x1x8xf32> to vector<1x8x8xf32>
    %647 = arith.mulf %644, %646 : vector<1x8x8xf32>
    %cst_97 = arith.constant dense<0.000000e+00> : vector<1x8xf32>
    %648 = vector.multi_reduction <add>, %647, %cst_97 [2] : vector<1x8x8xf32> to vector<1x8xf32>
    %649 = vector.shape_cast %642 : vector<1x8xf32> to vector<1x8x1xf32>
    %650 = vector.extract_strided_slice %588 {offsets = [0, 5, 0, 0], sizes = [1, 1, 8, 8], strides = [1, 1, 1, 1]} : vector<1x16x8x8xf32> to vector<1x1x8x8xf32>
    %651 = vector.shape_cast %650 : vector<1x1x8x8xf32> to vector<1x8x8xf32>
    %652 = vector.broadcast %649 : vector<1x8x1xf32> to vector<1x8x8xf32>
    %653 = arith.mulf %652, %651 : vector<1x8x8xf32>
    %cst_98 = arith.constant dense<0.000000e+00> : vector<1x8xf32>
    %654 = vector.multi_reduction <add>, %653, %cst_98 [1] : vector<1x8x8xf32> to vector<1x8xf32>
    %655 = vector.extract_strided_slice %588 {offsets = [0, 10, 0, 0], sizes = [1, 1, 8, 8], strides = [1, 1, 1, 1]} : vector<1x16x8x8xf32> to vector<1x1x8x8xf32>
    %656 = vector.shape_cast %655 : vector<1x1x8x8xf32> to vector<1x8x8xf32>
    %657 = vector.shape_cast %648 : vector<1x8xf32> to vector<1x1x8xf32>
    %658 = vector.broadcast %657 : vector<1x1x8xf32> to vector<1x8x8xf32>
    %659 = arith.mulf %656, %658 : vector<1x8x8xf32>
    %cst_99 = arith.constant dense<0.000000e+00> : vector<1x8xf32>
    %660 = vector.multi_reduction <add>, %659, %cst_99 [2] : vector<1x8x8xf32> to vector<1x8xf32>
    %661 = vector.shape_cast %654 : vector<1x8xf32> to vector<1x8x1xf32>
    %662 = vector.extract_strided_slice %588 {offsets = [0, 6, 0, 0], sizes = [1, 1, 8, 8], strides = [1, 1, 1, 1]} : vector<1x16x8x8xf32> to vector<1x1x8x8xf32>
    %663 = vector.shape_cast %662 : vector<1x1x8x8xf32> to vector<1x8x8xf32>
    %664 = vector.broadcast %661 : vector<1x8x1xf32> to vector<1x8x8xf32>
    %665 = arith.mulf %664, %663 : vector<1x8x8xf32>
    %cst_100 = arith.constant dense<0.000000e+00> : vector<1x8xf32>
    %666 = vector.multi_reduction <add>, %665, %cst_100 [1] : vector<1x8x8xf32> to vector<1x8xf32>
    %667 = vector.extract_strided_slice %588 {offsets = [0, 9, 0, 0], sizes = [1, 1, 8, 8], strides = [1, 1, 1, 1]} : vector<1x16x8x8xf32> to vector<1x1x8x8xf32>
    %668 = vector.shape_cast %667 : vector<1x1x8x8xf32> to vector<1x8x8xf32>
    %669 = vector.shape_cast %660 : vector<1x8xf32> to vector<1x1x8xf32>
    %670 = vector.broadcast %669 : vector<1x1x8xf32> to vector<1x8x8xf32>
    %671 = arith.mulf %668, %670 : vector<1x8x8xf32>
    %cst_101 = arith.constant dense<0.000000e+00> : vector<1x8xf32>
    %672 = vector.multi_reduction <add>, %671, %cst_101 [2] : vector<1x8x8xf32> to vector<1x8xf32>
    %673 = vector.shape_cast %666 : vector<1x8xf32> to vector<1x8x1xf32>
    %674 = vector.extract_strided_slice %588 {offsets = [0, 7, 0, 0], sizes = [1, 1, 8, 8], strides = [1, 1, 1, 1]} : vector<1x16x8x8xf32> to vector<1x1x8x8xf32>
    %675 = vector.shape_cast %674 : vector<1x1x8x8xf32> to vector<1x8x8xf32>
    %676 = vector.broadcast %673 : vector<1x8x1xf32> to vector<1x8x8xf32>
    %677 = arith.mulf %676, %675 : vector<1x8x8xf32>
    %cst_102 = arith.constant dense<0.000000e+00> : vector<1x8xf32>
    %678 = vector.multi_reduction <add>, %677, %cst_102 [1] : vector<1x8x8xf32> to vector<1x8xf32>
    %679 = vector.extract_strided_slice %588 {offsets = [0, 8, 0, 0], sizes = [1, 1, 8, 8], strides = [1, 1, 1, 1]} : vector<1x16x8x8xf32> to vector<1x1x8x8xf32>
    %680 = vector.shape_cast %679 : vector<1x1x8x8xf32> to vector<1x8x8xf32>
    %681 = vector.shape_cast %672 : vector<1x8xf32> to vector<1x1x8xf32>
    %682 = vector.broadcast %681 : vector<1x1x8xf32> to vector<1x8x8xf32>
    %683 = arith.mulf %680, %682 : vector<1x8x8xf32>
    %cst_103 = arith.constant dense<0.000000e+00> : vector<1x8xf32>
    %684 = vector.multi_reduction <add>, %683, %cst_103 [2] : vector<1x8x8xf32> to vector<1x8xf32>
    %685 = vector.shape_cast %678 : vector<1x8xf32> to vector<1x8x1xf32>
    %686 = vector.extract_strided_slice %588 {offsets = [0, 8, 0, 0], sizes = [1, 1, 8, 8], strides = [1, 1, 1, 1]} : vector<1x16x8x8xf32> to vector<1x1x8x8xf32>
    %687 = vector.shape_cast %686 : vector<1x1x8x8xf32> to vector<1x8x8xf32>
    %688 = vector.broadcast %685 : vector<1x8x1xf32> to vector<1x8x8xf32>
    %689 = arith.mulf %688, %687 : vector<1x8x8xf32>
    %cst_104 = arith.constant dense<0.000000e+00> : vector<1x8xf32>
    %690 = vector.multi_reduction <add>, %689, %cst_104 [1] : vector<1x8x8xf32> to vector<1x8xf32>
    %691 = vector.extract_strided_slice %588 {offsets = [0, 7, 0, 0], sizes = [1, 1, 8, 8], strides = [1, 1, 1, 1]} : vector<1x16x8x8xf32> to vector<1x1x8x8xf32>
    %692 = vector.shape_cast %691 : vector<1x1x8x8xf32> to vector<1x8x8xf32>
    %693 = vector.shape_cast %684 : vector<1x8xf32> to vector<1x1x8xf32>
    %694 = vector.broadcast %693 : vector<1x1x8xf32> to vector<1x8x8xf32>
    %695 = arith.mulf %692, %694 : vector<1x8x8xf32>
    %cst_105 = arith.constant dense<0.000000e+00> : vector<1x8xf32>
    %696 = vector.multi_reduction <add>, %695, %cst_105 [2] : vector<1x8x8xf32> to vector<1x8xf32>
    %697 = vector.shape_cast %690 : vector<1x8xf32> to vector<1x8x1xf32>
    %698 = vector.extract_strided_slice %588 {offsets = [0, 9, 0, 0], sizes = [1, 1, 8, 8], strides = [1, 1, 1, 1]} : vector<1x16x8x8xf32> to vector<1x1x8x8xf32>
    %699 = vector.shape_cast %698 : vector<1x1x8x8xf32> to vector<1x8x8xf32>
    %700 = vector.broadcast %697 : vector<1x8x1xf32> to vector<1x8x8xf32>
    %701 = arith.mulf %700, %699 : vector<1x8x8xf32>
    %cst_106 = arith.constant dense<0.000000e+00> : vector<1x8xf32>
    %702 = vector.multi_reduction <add>, %701, %cst_106 [1] : vector<1x8x8xf32> to vector<1x8xf32>
    %703 = vector.extract_strided_slice %588 {offsets = [0, 6, 0, 0], sizes = [1, 1, 8, 8], strides = [1, 1, 1, 1]} : vector<1x16x8x8xf32> to vector<1x1x8x8xf32>
    %704 = vector.shape_cast %703 : vector<1x1x8x8xf32> to vector<1x8x8xf32>
    %705 = vector.shape_cast %696 : vector<1x8xf32> to vector<1x1x8xf32>
    %706 = vector.broadcast %705 : vector<1x1x8xf32> to vector<1x8x8xf32>
    %707 = arith.mulf %704, %706 : vector<1x8x8xf32>
    %cst_107 = arith.constant dense<0.000000e+00> : vector<1x8xf32>
    %708 = vector.multi_reduction <add>, %707, %cst_107 [2] : vector<1x8x8xf32> to vector<1x8xf32>
    %709 = vector.shape_cast %702 : vector<1x8xf32> to vector<1x8x1xf32>
    %710 = vector.extract_strided_slice %588 {offsets = [0, 10, 0, 0], sizes = [1, 1, 8, 8], strides = [1, 1, 1, 1]} : vector<1x16x8x8xf32> to vector<1x1x8x8xf32>
    %711 = vector.shape_cast %710 : vector<1x1x8x8xf32> to vector<1x8x8xf32>
    %712 = vector.broadcast %709 : vector<1x8x1xf32> to vector<1x8x8xf32>
    %713 = arith.mulf %712, %711 : vector<1x8x8xf32>
    %cst_108 = arith.constant dense<0.000000e+00> : vector<1x8xf32>
    %714 = vector.multi_reduction <add>, %713, %cst_108 [1] : vector<1x8x8xf32> to vector<1x8xf32>
    %715 = vector.extract_strided_slice %588 {offsets = [0, 5, 0, 0], sizes = [1, 1, 8, 8], strides = [1, 1, 1, 1]} : vector<1x16x8x8xf32> to vector<1x1x8x8xf32>
    %716 = vector.shape_cast %715 : vector<1x1x8x8xf32> to vector<1x8x8xf32>
    %717 = vector.shape_cast %708 : vector<1x8xf32> to vector<1x1x8xf32>
    %718 = vector.broadcast %717 : vector<1x1x8xf32> to vector<1x8x8xf32>
    %719 = arith.mulf %716, %718 : vector<1x8x8xf32>
    %cst_109 = arith.constant dense<0.000000e+00> : vector<1x8xf32>
    %720 = vector.multi_reduction <add>, %719, %cst_109 [2] : vector<1x8x8xf32> to vector<1x8xf32>
    %721 = vector.shape_cast %714 : vector<1x8xf32> to vector<1x8x1xf32>
    %722 = vector.extract_strided_slice %588 {offsets = [0, 11, 0, 0], sizes = [1, 1, 8, 8], strides = [1, 1, 1, 1]} : vector<1x16x8x8xf32> to vector<1x1x8x8xf32>
    %723 = vector.shape_cast %722 : vector<1x1x8x8xf32> to vector<1x8x8xf32>
    %724 = vector.broadcast %721 : vector<1x8x1xf32> to vector<1x8x8xf32>
    %725 = arith.mulf %724, %723 : vector<1x8x8xf32>
    %cst_110 = arith.constant dense<0.000000e+00> : vector<1x8xf32>
    %726 = vector.multi_reduction <add>, %725, %cst_110 [1] : vector<1x8x8xf32> to vector<1x8xf32>
    %727 = vector.extract_strided_slice %588 {offsets = [0, 4, 0, 0], sizes = [1, 1, 8, 8], strides = [1, 1, 1, 1]} : vector<1x16x8x8xf32> to vector<1x1x8x8xf32>
    %728 = vector.shape_cast %727 : vector<1x1x8x8xf32> to vector<1x8x8xf32>
    %729 = vector.shape_cast %720 : vector<1x8xf32> to vector<1x1x8xf32>
    %730 = vector.broadcast %729 : vector<1x1x8xf32> to vector<1x8x8xf32>
    %731 = arith.mulf %728, %730 : vector<1x8x8xf32>
    %cst_111 = arith.constant dense<0.000000e+00> : vector<1x8xf32>
    %732 = vector.multi_reduction <add>, %731, %cst_111 [2] : vector<1x8x8xf32> to vector<1x8xf32>
    %733 = vector.shape_cast %726 : vector<1x8xf32> to vector<1x8x1xf32>
    %734 = vector.extract_strided_slice %588 {offsets = [0, 12, 0, 0], sizes = [1, 1, 8, 8], strides = [1, 1, 1, 1]} : vector<1x16x8x8xf32> to vector<1x1x8x8xf32>
    %735 = vector.shape_cast %734 : vector<1x1x8x8xf32> to vector<1x8x8xf32>
    %736 = vector.broadcast %733 : vector<1x8x1xf32> to vector<1x8x8xf32>
    %737 = arith.mulf %736, %735 : vector<1x8x8xf32>
    %cst_112 = arith.constant dense<0.000000e+00> : vector<1x8xf32>
    %738 = vector.multi_reduction <add>, %737, %cst_112 [1] : vector<1x8x8xf32> to vector<1x8xf32>
    %739 = vector.extract_strided_slice %588 {offsets = [0, 3, 0, 0], sizes = [1, 1, 8, 8], strides = [1, 1, 1, 1]} : vector<1x16x8x8xf32> to vector<1x1x8x8xf32>
    %740 = vector.shape_cast %739 : vector<1x1x8x8xf32> to vector<1x8x8xf32>
    %741 = vector.shape_cast %732 : vector<1x8xf32> to vector<1x1x8xf32>
    %742 = vector.broadcast %741 : vector<1x1x8xf32> to vector<1x8x8xf32>
    %743 = arith.mulf %740, %742 : vector<1x8x8xf32>
    %cst_113 = arith.constant dense<0.000000e+00> : vector<1x8xf32>
    %744 = vector.multi_reduction <add>, %743, %cst_113 [2] : vector<1x8x8xf32> to vector<1x8xf32>
    %745 = vector.shape_cast %738 : vector<1x8xf32> to vector<1x8x1xf32>
    %746 = vector.extract_strided_slice %588 {offsets = [0, 13, 0, 0], sizes = [1, 1, 8, 8], strides = [1, 1, 1, 1]} : vector<1x16x8x8xf32> to vector<1x1x8x8xf32>
    %747 = vector.shape_cast %746 : vector<1x1x8x8xf32> to vector<1x8x8xf32>
    %748 = vector.broadcast %745 : vector<1x8x1xf32> to vector<1x8x8xf32>
    %749 = arith.mulf %748, %747 : vector<1x8x8xf32>
    %cst_114 = arith.constant dense<0.000000e+00> : vector<1x8xf32>
    %750 = vector.multi_reduction <add>, %749, %cst_114 [1] : vector<1x8x8xf32> to vector<1x8xf32>
    %751 = vector.extract_strided_slice %588 {offsets = [0, 2, 0, 0], sizes = [1, 1, 8, 8], strides = [1, 1, 1, 1]} : vector<1x16x8x8xf32> to vector<1x1x8x8xf32>
    %752 = vector.shape_cast %751 : vector<1x1x8x8xf32> to vector<1x8x8xf32>
    %753 = vector.shape_cast %744 : vector<1x8xf32> to vector<1x1x8xf32>
    %754 = vector.broadcast %753 : vector<1x1x8xf32> to vector<1x8x8xf32>
    %755 = arith.mulf %752, %754 : vector<1x8x8xf32>
    %cst_115 = arith.constant dense<0.000000e+00> : vector<1x8xf32>
    %756 = vector.multi_reduction <add>, %755, %cst_115 [2] : vector<1x8x8xf32> to vector<1x8xf32>
    %757 = vector.shape_cast %750 : vector<1x8xf32> to vector<1x8x1xf32>
    %758 = vector.extract_strided_slice %588 {offsets = [0, 14, 0, 0], sizes = [1, 1, 8, 8], strides = [1, 1, 1, 1]} : vector<1x16x8x8xf32> to vector<1x1x8x8xf32>
    %759 = vector.shape_cast %758 : vector<1x1x8x8xf32> to vector<1x8x8xf32>
    %760 = vector.broadcast %757 : vector<1x8x1xf32> to vector<1x8x8xf32>
    %761 = arith.mulf %760, %759 : vector<1x8x8xf32>
    %cst_116 = arith.constant dense<0.000000e+00> : vector<1x8xf32>
    %762 = vector.multi_reduction <add>, %761, %cst_116 [1] : vector<1x8x8xf32> to vector<1x8xf32>
    %763 = vector.extract_strided_slice %588 {offsets = [0, 1, 0, 0], sizes = [1, 1, 8, 8], strides = [1, 1, 1, 1]} : vector<1x16x8x8xf32> to vector<1x1x8x8xf32>
    %764 = vector.shape_cast %763 : vector<1x1x8x8xf32> to vector<1x8x8xf32>
    %765 = vector.shape_cast %756 : vector<1x8xf32> to vector<1x1x8xf32>
    %766 = vector.broadcast %765 : vector<1x1x8xf32> to vector<1x8x8xf32>
    %767 = arith.mulf %764, %766 : vector<1x8x8xf32>
    %cst_117 = arith.constant dense<0.000000e+00> : vector<1x8xf32>
    %768 = vector.multi_reduction <add>, %767, %cst_117 [2] : vector<1x8x8xf32> to vector<1x8xf32>
    %769 = vector.shape_cast %568 : vector<1x8xf32> to vector<1x1x8xf32>
    %770 = vector.shape_cast %594 : vector<1x8xf32> to vector<1x1x8xf32>
    %771 = vector.shape_cast %606 : vector<1x8xf32> to vector<1x1x8xf32>
    %772 = vector.shape_cast %618 : vector<1x8xf32> to vector<1x1x8xf32>
    %773 = vector.shape_cast %630 : vector<1x8xf32> to vector<1x1x8xf32>
    %774 = vector.shape_cast %642 : vector<1x8xf32> to vector<1x1x8xf32>
    %775 = vector.shape_cast %654 : vector<1x8xf32> to vector<1x1x8xf32>
    %776 = vector.shape_cast %666 : vector<1x8xf32> to vector<1x1x8xf32>
    %777 = vector.shape_cast %678 : vector<1x8xf32> to vector<1x1x8xf32>
    %778 = vector.shape_cast %690 : vector<1x8xf32> to vector<1x1x8xf32>
    %779 = vector.shape_cast %702 : vector<1x8xf32> to vector<1x1x8xf32>
    %780 = vector.shape_cast %714 : vector<1x8xf32> to vector<1x1x8xf32>
    %781 = vector.shape_cast %726 : vector<1x8xf32> to vector<1x1x8xf32>
    %782 = vector.shape_cast %738 : vector<1x8xf32> to vector<1x1x8xf32>
    %783 = vector.shape_cast %750 : vector<1x8xf32> to vector<1x1x8xf32>
    %784 = vector.shape_cast %762 : vector<1x8xf32> to vector<1x1x8xf32>
    %785 = tpu.concatenate %769, %770, %771, %772, %773, %774, %775, %776, %777, %778, %779, %780, %781, %782, %783, %784 in 1 : vector<1x1x8xf32>, vector<1x1x8xf32>, vector<1x1x8xf32>, vector<1x1x8xf32>, vector<1x1x8xf32>, vector<1x1x8xf32>, vector<1x1x8xf32>, vector<1x1x8xf32>, vector<1x1x8xf32>, vector<1x1x8xf32>, vector<1x1x8xf32>, vector<1x1x8xf32>, vector<1x1x8xf32>, vector<1x1x8xf32>, vector<1x1x8xf32>, vector<1x1x8xf32> -> vector<1x16x8xf32>
    %786 = vector.shape_cast %768 : vector<1x8xf32> to vector<1x1x8xf32>
    %787 = vector.shape_cast %756 : vector<1x8xf32> to vector<1x1x8xf32>
    %788 = vector.shape_cast %744 : vector<1x8xf32> to vector<1x1x8xf32>
    %789 = vector.shape_cast %732 : vector<1x8xf32> to vector<1x1x8xf32>
    %790 = vector.shape_cast %720 : vector<1x8xf32> to vector<1x1x8xf32>
    %791 = vector.shape_cast %708 : vector<1x8xf32> to vector<1x1x8xf32>
    %792 = vector.shape_cast %696 : vector<1x8xf32> to vector<1x1x8xf32>
    %793 = vector.shape_cast %684 : vector<1x8xf32> to vector<1x1x8xf32>
    %794 = vector.shape_cast %672 : vector<1x8xf32> to vector<1x1x8xf32>
    %795 = vector.shape_cast %660 : vector<1x8xf32> to vector<1x1x8xf32>
    %796 = vector.shape_cast %648 : vector<1x8xf32> to vector<1x1x8xf32>
    %797 = vector.shape_cast %636 : vector<1x8xf32> to vector<1x1x8xf32>
    %798 = vector.shape_cast %624 : vector<1x8xf32> to vector<1x1x8xf32>
    %799 = vector.shape_cast %612 : vector<1x8xf32> to vector<1x1x8xf32>
    %800 = vector.shape_cast %600 : vector<1x8xf32> to vector<1x1x8xf32>
    %801 = vector.shape_cast %569 : vector<1x8xf32> to vector<1x1x8xf32>
    %802 = tpu.concatenate %786, %787, %788, %789, %790, %791, %792, %793, %794, %795, %796, %797, %798, %799, %800, %801 in 1 : vector<1x1x8xf32>, vector<1x1x8xf32>, vector<1x1x8xf32>, vector<1x1x8xf32>, vector<1x1x8xf32>, vector<1x1x8xf32>, vector<1x1x8xf32>, vector<1x1x8xf32>, vector<1x1x8xf32>, vector<1x1x8xf32>, vector<1x1x8xf32>, vector<1x1x8xf32>, vector<1x1x8xf32>, vector<1x1x8xf32>, vector<1x1x8xf32>, vector<1x1x8xf32> -> vector<1x16x8xf32>
    %803 = vector.extract_strided_slice %567 {offsets = [0, 0, 0], sizes = [1, 8, 8], strides = [1, 1, 1]} : vector<2x8x8xf32> to vector<1x8x8xf32>
    %804 = vector.shape_cast %803 : vector<1x8x8xf32> to vector<8x8xf32>
    %805 = vector.shape_cast %804 : vector<8x8xf32> to vector<1x1x8x8xf32>
    %806 = vector.shape_cast %802 : vector<1x16x8xf32> to vector<1x16x1x8xf32>
    %807 = vector.broadcast %805 : vector<1x1x8x8xf32> to vector<1x16x8x8xf32>
    %808 = vector.broadcast %806 : vector<1x16x1x8xf32> to vector<1x16x8x8xf32>
    %809 = arith.mulf %807, %808 : vector<1x16x8x8xf32>
    %cst_118 = arith.constant dense<0.000000e+00> : vector<1x16x8xf32>
    %810 = vector.multi_reduction <add>, %809, %cst_118 [3] : vector<1x16x8x8xf32> to vector<1x16x8xf32>
    %811 = arith.mulf %785, %810 : vector<1x16x8xf32>
    %cst_119 = arith.constant dense<0.000000e+00> : vector<1x16xf32>
    %812 = vector.multi_reduction <add>, %811, %cst_119 [2] : vector<1x16x8xf32> to vector<1x16xf32>
    %813 = vector.extract_strided_slice %567 {offsets = [1, 0, 0], sizes = [1, 8, 8], strides = [1, 1, 1]} : vector<2x8x8xf32> to vector<1x8x8xf32>
    %814 = vector.shape_cast %813 : vector<1x8x8xf32> to vector<8x8xf32>
    %815 = vector.shape_cast %814 : vector<8x8xf32> to vector<1x1x8x8xf32>
    %816 = vector.shape_cast %802 : vector<1x16x8xf32> to vector<1x16x1x8xf32>
    %817 = vector.broadcast %815 : vector<1x1x8x8xf32> to vector<1x16x8x8xf32>
    %818 = vector.broadcast %816 : vector<1x16x1x8xf32> to vector<1x16x8x8xf32>
    %819 = arith.mulf %817, %818 : vector<1x16x8x8xf32>
    %cst_120 = arith.constant dense<0.000000e+00> : vector<1x16x8xf32>
    %820 = vector.multi_reduction <add>, %819, %cst_120 [3] : vector<1x16x8x8xf32> to vector<1x16x8xf32>
    %821 = arith.mulf %785, %820 : vector<1x16x8xf32>
    %cst_121 = arith.constant dense<0.000000e+00> : vector<1x16xf32>
    %822 = vector.multi_reduction <add>, %821, %cst_121 [2] : vector<1x16x8xf32> to vector<1x16xf32>
    %823 = vector.shape_cast %812 : vector<1x16xf32> to vector<1x16x1xf32>
    %824 = vector.shape_cast %822 : vector<1x16xf32> to vector<1x16x1xf32>
    %825 = tpu.concatenate %823, %824 in 2 : vector<1x16x1xf32>, vector<1x16x1xf32> -> vector<1x16x2xf32>
    %826 = math.tanh %825 : vector<1x16x2xf32>
    %cst_122 = arith.constant 1.000000e+00 : f32
    %827 = vector.broadcast %cst_122 : f32 to vector<1x16x2xf32>
    %828 = arith.mulf %826, %827 : vector<1x16x2xf32>
    %829 = arith.mulf %828, %828 : vector<1x16x2xf32>
    %cst_123 = arith.constant dense<0.000000e+00> : vector<1x16xf32>
    %830 = vector.multi_reduction <add>, %829, %cst_123 [2] : vector<1x16x2xf32> to vector<1x16xf32>
    %831 = vector.shape_cast %830 : vector<1x16xf32> to vector<1x16x1xf32>
    %832 = math.sqrt %831 : vector<1x16x1xf32>
    %cst_124 = arith.constant 9.99999997E-7 : f32
    %833 = vector.broadcast %cst_124 : f32 to vector<1x16x1xf32>
    %834 = arith.addf %832, %833 : vector<1x16x1xf32>
    %835 = vector.broadcast %834 : vector<1x16x1xf32> to vector<1x16x2xf32>
    %836 = arith.divf %828, %835 : vector<1x16x2xf32>
    %837 = arith.addf %836, %565 : vector<1x16x2xf32>
    %838 = arith.mulf %837, %837 : vector<1x16x2xf32>
    %cst_125 = arith.constant dense<0.000000e+00> : vector<1x16xf32>
    %839 = vector.multi_reduction <add>, %838, %cst_125 [2] : vector<1x16x2xf32> to vector<1x16xf32>
    %840 = vector.shape_cast %839 : vector<1x16xf32> to vector<1x16x1xf32>
    %841 = math.sqrt %840 : vector<1x16x1xf32>
    %cst_126 = arith.constant 9.99999997E-7 : f32
    %842 = vector.broadcast %cst_126 : f32 to vector<1x16x1xf32>
    %843 = arith.addf %841, %842 : vector<1x16x1xf32>
    %844 = vector.broadcast %843 : vector<1x16x1xf32> to vector<1x16x2xf32>
    %845 = arith.divf %837, %844 : vector<1x16x2xf32>
    %846 = vector.extract_strided_slice %845 {offsets = [0, 0, 0], sizes = [1, 16, 1], strides = [1, 1, 1]} : vector<1x16x2xf32> to vector<1x16x1xf32>
    %847 = vector.shape_cast %846 : vector<1x16x1xf32> to vector<1x16xf32>
    %848 = vector.shape_cast %847 : vector<1x16xf32> to vector<1x16x1x1xf32>
    %849 = vector.extract_strided_slice %567 {offsets = [0, 0, 0], sizes = [1, 8, 8], strides = [1, 1, 1]} : vector<2x8x8xf32> to vector<1x8x8xf32>
    %850 = vector.shape_cast %849 : vector<1x8x8xf32> to vector<8x8xf32>
    %851 = vector.shape_cast %850 : vector<8x8xf32> to vector<1x1x8x8xf32>
    %852 = vector.broadcast %848 : vector<1x16x1x1xf32> to vector<1x16x8x8xf32>
    %853 = vector.broadcast %851 : vector<1x1x8x8xf32> to vector<1x16x8x8xf32>
    %854 = arith.mulf %852, %853 : vector<1x16x8x8xf32>
    %855 = vector.extract_strided_slice %845 {offsets = [0, 0, 1], sizes = [1, 16, 1], strides = [1, 1, 1]} : vector<1x16x2xf32> to vector<1x16x1xf32>
    %856 = vector.shape_cast %855 : vector<1x16x1xf32> to vector<1x16xf32>
    %857 = vector.shape_cast %856 : vector<1x16xf32> to vector<1x16x1x1xf32>
    %858 = vector.extract_strided_slice %567 {offsets = [1, 0, 0], sizes = [1, 8, 8], strides = [1, 1, 1]} : vector<2x8x8xf32> to vector<1x8x8xf32>
    %859 = vector.shape_cast %858 : vector<1x8x8xf32> to vector<8x8xf32>
    %860 = vector.shape_cast %859 : vector<8x8xf32> to vector<1x1x8x8xf32>
    %861 = vector.broadcast %857 : vector<1x16x1x1xf32> to vector<1x16x8x8xf32>
    %862 = vector.broadcast %860 : vector<1x1x8x8xf32> to vector<1x16x8x8xf32>
    %863 = arith.mulf %861, %862 : vector<1x16x8x8xf32>
    %864 = arith.addf %854, %863 : vector<1x16x8x8xf32>
    %865 = vector.shape_cast %568 : vector<1x8xf32> to vector<1x8x1xf32>
    %866 = vector.extract_strided_slice %864 {offsets = [0, 0, 0, 0], sizes = [1, 1, 8, 8], strides = [1, 1, 1, 1]} : vector<1x16x8x8xf32> to vector<1x1x8x8xf32>
    %867 = vector.shape_cast %866 : vector<1x1x8x8xf32> to vector<1x8x8xf32>
    %868 = vector.broadcast %865 : vector<1x8x1xf32> to vector<1x8x8xf32>
    %869 = arith.mulf %868, %867 : vector<1x8x8xf32>
    %cst_127 = arith.constant dense<0.000000e+00> : vector<1x8xf32>
    %870 = vector.multi_reduction <add>, %869, %cst_127 [1] : vector<1x8x8xf32> to vector<1x8xf32>
    %871 = vector.extract_strided_slice %864 {offsets = [0, 15, 0, 0], sizes = [1, 1, 8, 8], strides = [1, 1, 1, 1]} : vector<1x16x8x8xf32> to vector<1x1x8x8xf32>
    %872 = vector.shape_cast %871 : vector<1x1x8x8xf32> to vector<1x8x8xf32>
    %873 = vector.shape_cast %569 : vector<1x8xf32> to vector<1x1x8xf32>
    %874 = vector.broadcast %873 : vector<1x1x8xf32> to vector<1x8x8xf32>
    %875 = arith.mulf %872, %874 : vector<1x8x8xf32>
    %cst_128 = arith.constant dense<0.000000e+00> : vector<1x8xf32>
    %876 = vector.multi_reduction <add>, %875, %cst_128 [2] : vector<1x8x8xf32> to vector<1x8xf32>
    %877 = vector.shape_cast %870 : vector<1x8xf32> to vector<1x8x1xf32>
    %878 = vector.extract_strided_slice %864 {offsets = [0, 1, 0, 0], sizes = [1, 1, 8, 8], strides = [1, 1, 1, 1]} : vector<1x16x8x8xf32> to vector<1x1x8x8xf32>
    %879 = vector.shape_cast %878 : vector<1x1x8x8xf32> to vector<1x8x8xf32>
    %880 = vector.broadcast %877 : vector<1x8x1xf32> to vector<1x8x8xf32>
    %881 = arith.mulf %880, %879 : vector<1x8x8xf32>
    %cst_129 = arith.constant dense<0.000000e+00> : vector<1x8xf32>
    %882 = vector.multi_reduction <add>, %881, %cst_129 [1] : vector<1x8x8xf32> to vector<1x8xf32>
    %883 = vector.extract_strided_slice %864 {offsets = [0, 14, 0, 0], sizes = [1, 1, 8, 8], strides = [1, 1, 1, 1]} : vector<1x16x8x8xf32> to vector<1x1x8x8xf32>
    %884 = vector.shape_cast %883 : vector<1x1x8x8xf32> to vector<1x8x8xf32>
    %885 = vector.shape_cast %876 : vector<1x8xf32> to vector<1x1x8xf32>
    %886 = vector.broadcast %885 : vector<1x1x8xf32> to vector<1x8x8xf32>
    %887 = arith.mulf %884, %886 : vector<1x8x8xf32>
    %cst_130 = arith.constant dense<0.000000e+00> : vector<1x8xf32>
    %888 = vector.multi_reduction <add>, %887, %cst_130 [2] : vector<1x8x8xf32> to vector<1x8xf32>
    %889 = vector.shape_cast %882 : vector<1x8xf32> to vector<1x8x1xf32>
    %890 = vector.extract_strided_slice %864 {offsets = [0, 2, 0, 0], sizes = [1, 1, 8, 8], strides = [1, 1, 1, 1]} : vector<1x16x8x8xf32> to vector<1x1x8x8xf32>
    %891 = vector.shape_cast %890 : vector<1x1x8x8xf32> to vector<1x8x8xf32>
    %892 = vector.broadcast %889 : vector<1x8x1xf32> to vector<1x8x8xf32>
    %893 = arith.mulf %892, %891 : vector<1x8x8xf32>
    %cst_131 = arith.constant dense<0.000000e+00> : vector<1x8xf32>
    %894 = vector.multi_reduction <add>, %893, %cst_131 [1] : vector<1x8x8xf32> to vector<1x8xf32>
    %895 = vector.extract_strided_slice %864 {offsets = [0, 13, 0, 0], sizes = [1, 1, 8, 8], strides = [1, 1, 1, 1]} : vector<1x16x8x8xf32> to vector<1x1x8x8xf32>
    %896 = vector.shape_cast %895 : vector<1x1x8x8xf32> to vector<1x8x8xf32>
    %897 = vector.shape_cast %888 : vector<1x8xf32> to vector<1x1x8xf32>
    %898 = vector.broadcast %897 : vector<1x1x8xf32> to vector<1x8x8xf32>
    %899 = arith.mulf %896, %898 : vector<1x8x8xf32>
    %cst_132 = arith.constant dense<0.000000e+00> : vector<1x8xf32>
    %900 = vector.multi_reduction <add>, %899, %cst_132 [2] : vector<1x8x8xf32> to vector<1x8xf32>
    %901 = vector.shape_cast %894 : vector<1x8xf32> to vector<1x8x1xf32>
    %902 = vector.extract_strided_slice %864 {offsets = [0, 3, 0, 0], sizes = [1, 1, 8, 8], strides = [1, 1, 1, 1]} : vector<1x16x8x8xf32> to vector<1x1x8x8xf32>
    %903 = vector.shape_cast %902 : vector<1x1x8x8xf32> to vector<1x8x8xf32>
    %904 = vector.broadcast %901 : vector<1x8x1xf32> to vector<1x8x8xf32>
    %905 = arith.mulf %904, %903 : vector<1x8x8xf32>
    %cst_133 = arith.constant dense<0.000000e+00> : vector<1x8xf32>
    %906 = vector.multi_reduction <add>, %905, %cst_133 [1] : vector<1x8x8xf32> to vector<1x8xf32>
    %907 = vector.extract_strided_slice %864 {offsets = [0, 12, 0, 0], sizes = [1, 1, 8, 8], strides = [1, 1, 1, 1]} : vector<1x16x8x8xf32> to vector<1x1x8x8xf32>
    %908 = vector.shape_cast %907 : vector<1x1x8x8xf32> to vector<1x8x8xf32>
    %909 = vector.shape_cast %900 : vector<1x8xf32> to vector<1x1x8xf32>
    %910 = vector.broadcast %909 : vector<1x1x8xf32> to vector<1x8x8xf32>
    %911 = arith.mulf %908, %910 : vector<1x8x8xf32>
    %cst_134 = arith.constant dense<0.000000e+00> : vector<1x8xf32>
    %912 = vector.multi_reduction <add>, %911, %cst_134 [2] : vector<1x8x8xf32> to vector<1x8xf32>
    %913 = vector.shape_cast %906 : vector<1x8xf32> to vector<1x8x1xf32>
    %914 = vector.extract_strided_slice %864 {offsets = [0, 4, 0, 0], sizes = [1, 1, 8, 8], strides = [1, 1, 1, 1]} : vector<1x16x8x8xf32> to vector<1x1x8x8xf32>
    %915 = vector.shape_cast %914 : vector<1x1x8x8xf32> to vector<1x8x8xf32>
    %916 = vector.broadcast %913 : vector<1x8x1xf32> to vector<1x8x8xf32>
    %917 = arith.mulf %916, %915 : vector<1x8x8xf32>
    %cst_135 = arith.constant dense<0.000000e+00> : vector<1x8xf32>
    %918 = vector.multi_reduction <add>, %917, %cst_135 [1] : vector<1x8x8xf32> to vector<1x8xf32>
    %919 = vector.extract_strided_slice %864 {offsets = [0, 11, 0, 0], sizes = [1, 1, 8, 8], strides = [1, 1, 1, 1]} : vector<1x16x8x8xf32> to vector<1x1x8x8xf32>
    %920 = vector.shape_cast %919 : vector<1x1x8x8xf32> to vector<1x8x8xf32>
    %921 = vector.shape_cast %912 : vector<1x8xf32> to vector<1x1x8xf32>
    %922 = vector.broadcast %921 : vector<1x1x8xf32> to vector<1x8x8xf32>
    %923 = arith.mulf %920, %922 : vector<1x8x8xf32>
    %cst_136 = arith.constant dense<0.000000e+00> : vector<1x8xf32>
    %924 = vector.multi_reduction <add>, %923, %cst_136 [2] : vector<1x8x8xf32> to vector<1x8xf32>
    %925 = vector.shape_cast %918 : vector<1x8xf32> to vector<1x8x1xf32>
    %926 = vector.extract_strided_slice %864 {offsets = [0, 5, 0, 0], sizes = [1, 1, 8, 8], strides = [1, 1, 1, 1]} : vector<1x16x8x8xf32> to vector<1x1x8x8xf32>
    %927 = vector.shape_cast %926 : vector<1x1x8x8xf32> to vector<1x8x8xf32>
    %928 = vector.broadcast %925 : vector<1x8x1xf32> to vector<1x8x8xf32>
    %929 = arith.mulf %928, %927 : vector<1x8x8xf32>
    %cst_137 = arith.constant dense<0.000000e+00> : vector<1x8xf32>
    %930 = vector.multi_reduction <add>, %929, %cst_137 [1] : vector<1x8x8xf32> to vector<1x8xf32>
    %931 = vector.extract_strided_slice %864 {offsets = [0, 10, 0, 0], sizes = [1, 1, 8, 8], strides = [1, 1, 1, 1]} : vector<1x16x8x8xf32> to vector<1x1x8x8xf32>
    %932 = vector.shape_cast %931 : vector<1x1x8x8xf32> to vector<1x8x8xf32>
    %933 = vector.shape_cast %924 : vector<1x8xf32> to vector<1x1x8xf32>
    %934 = vector.broadcast %933 : vector<1x1x8xf32> to vector<1x8x8xf32>
    %935 = arith.mulf %932, %934 : vector<1x8x8xf32>
    %cst_138 = arith.constant dense<0.000000e+00> : vector<1x8xf32>
    %936 = vector.multi_reduction <add>, %935, %cst_138 [2] : vector<1x8x8xf32> to vector<1x8xf32>
    %937 = vector.shape_cast %930 : vector<1x8xf32> to vector<1x8x1xf32>
    %938 = vector.extract_strided_slice %864 {offsets = [0, 6, 0, 0], sizes = [1, 1, 8, 8], strides = [1, 1, 1, 1]} : vector<1x16x8x8xf32> to vector<1x1x8x8xf32>
    %939 = vector.shape_cast %938 : vector<1x1x8x8xf32> to vector<1x8x8xf32>
    %940 = vector.broadcast %937 : vector<1x8x1xf32> to vector<1x8x8xf32>
    %941 = arith.mulf %940, %939 : vector<1x8x8xf32>
    %cst_139 = arith.constant dense<0.000000e+00> : vector<1x8xf32>
    %942 = vector.multi_reduction <add>, %941, %cst_139 [1] : vector<1x8x8xf32> to vector<1x8xf32>
    %943 = vector.extract_strided_slice %864 {offsets = [0, 9, 0, 0], sizes = [1, 1, 8, 8], strides = [1, 1, 1, 1]} : vector<1x16x8x8xf32> to vector<1x1x8x8xf32>
    %944 = vector.shape_cast %943 : vector<1x1x8x8xf32> to vector<1x8x8xf32>
    %945 = vector.shape_cast %936 : vector<1x8xf32> to vector<1x1x8xf32>
    %946 = vector.broadcast %945 : vector<1x1x8xf32> to vector<1x8x8xf32>
    %947 = arith.mulf %944, %946 : vector<1x8x8xf32>
    %cst_140 = arith.constant dense<0.000000e+00> : vector<1x8xf32>
    %948 = vector.multi_reduction <add>, %947, %cst_140 [2] : vector<1x8x8xf32> to vector<1x8xf32>
    %949 = vector.shape_cast %942 : vector<1x8xf32> to vector<1x8x1xf32>
    %950 = vector.extract_strided_slice %864 {offsets = [0, 7, 0, 0], sizes = [1, 1, 8, 8], strides = [1, 1, 1, 1]} : vector<1x16x8x8xf32> to vector<1x1x8x8xf32>
    %951 = vector.shape_cast %950 : vector<1x1x8x8xf32> to vector<1x8x8xf32>
    %952 = vector.broadcast %949 : vector<1x8x1xf32> to vector<1x8x8xf32>
    %953 = arith.mulf %952, %951 : vector<1x8x8xf32>
    %cst_141 = arith.constant dense<0.000000e+00> : vector<1x8xf32>
    %954 = vector.multi_reduction <add>, %953, %cst_141 [1] : vector<1x8x8xf32> to vector<1x8xf32>
    %955 = vector.extract_strided_slice %864 {offsets = [0, 8, 0, 0], sizes = [1, 1, 8, 8], strides = [1, 1, 1, 1]} : vector<1x16x8x8xf32> to vector<1x1x8x8xf32>
    %956 = vector.shape_cast %955 : vector<1x1x8x8xf32> to vector<1x8x8xf32>
    %957 = vector.shape_cast %948 : vector<1x8xf32> to vector<1x1x8xf32>
    %958 = vector.broadcast %957 : vector<1x1x8xf32> to vector<1x8x8xf32>
    %959 = arith.mulf %956, %958 : vector<1x8x8xf32>
    %cst_142 = arith.constant dense<0.000000e+00> : vector<1x8xf32>
    %960 = vector.multi_reduction <add>, %959, %cst_142 [2] : vector<1x8x8xf32> to vector<1x8xf32>
    %961 = vector.shape_cast %954 : vector<1x8xf32> to vector<1x8x1xf32>
    %962 = vector.extract_strided_slice %864 {offsets = [0, 8, 0, 0], sizes = [1, 1, 8, 8], strides = [1, 1, 1, 1]} : vector<1x16x8x8xf32> to vector<1x1x8x8xf32>
    %963 = vector.shape_cast %962 : vector<1x1x8x8xf32> to vector<1x8x8xf32>
    %964 = vector.broadcast %961 : vector<1x8x1xf32> to vector<1x8x8xf32>
    %965 = arith.mulf %964, %963 : vector<1x8x8xf32>
    %cst_143 = arith.constant dense<0.000000e+00> : vector<1x8xf32>
    %966 = vector.multi_reduction <add>, %965, %cst_143 [1] : vector<1x8x8xf32> to vector<1x8xf32>
    %967 = vector.extract_strided_slice %864 {offsets = [0, 7, 0, 0], sizes = [1, 1, 8, 8], strides = [1, 1, 1, 1]} : vector<1x16x8x8xf32> to vector<1x1x8x8xf32>
    %968 = vector.shape_cast %967 : vector<1x1x8x8xf32> to vector<1x8x8xf32>
    %969 = vector.shape_cast %960 : vector<1x8xf32> to vector<1x1x8xf32>
    %970 = vector.broadcast %969 : vector<1x1x8xf32> to vector<1x8x8xf32>
    %971 = arith.mulf %968, %970 : vector<1x8x8xf32>
    %cst_144 = arith.constant dense<0.000000e+00> : vector<1x8xf32>
    %972 = vector.multi_reduction <add>, %971, %cst_144 [2] : vector<1x8x8xf32> to vector<1x8xf32>
    %973 = vector.shape_cast %966 : vector<1x8xf32> to vector<1x8x1xf32>
    %974 = vector.extract_strided_slice %864 {offsets = [0, 9, 0, 0], sizes = [1, 1, 8, 8], strides = [1, 1, 1, 1]} : vector<1x16x8x8xf32> to vector<1x1x8x8xf32>
    %975 = vector.shape_cast %974 : vector<1x1x8x8xf32> to vector<1x8x8xf32>
    %976 = vector.broadcast %973 : vector<1x8x1xf32> to vector<1x8x8xf32>
    %977 = arith.mulf %976, %975 : vector<1x8x8xf32>
    %cst_145 = arith.constant dense<0.000000e+00> : vector<1x8xf32>
    %978 = vector.multi_reduction <add>, %977, %cst_145 [1] : vector<1x8x8xf32> to vector<1x8xf32>
    %979 = vector.extract_strided_slice %864 {offsets = [0, 6, 0, 0], sizes = [1, 1, 8, 8], strides = [1, 1, 1, 1]} : vector<1x16x8x8xf32> to vector<1x1x8x8xf32>
    %980 = vector.shape_cast %979 : vector<1x1x8x8xf32> to vector<1x8x8xf32>
    %981 = vector.shape_cast %972 : vector<1x8xf32> to vector<1x1x8xf32>
    %982 = vector.broadcast %981 : vector<1x1x8xf32> to vector<1x8x8xf32>
    %983 = arith.mulf %980, %982 : vector<1x8x8xf32>
    %cst_146 = arith.constant dense<0.000000e+00> : vector<1x8xf32>
    %984 = vector.multi_reduction <add>, %983, %cst_146 [2] : vector<1x8x8xf32> to vector<1x8xf32>
    %985 = vector.shape_cast %978 : vector<1x8xf32> to vector<1x8x1xf32>
    %986 = vector.extract_strided_slice %864 {offsets = [0, 10, 0, 0], sizes = [1, 1, 8, 8], strides = [1, 1, 1, 1]} : vector<1x16x8x8xf32> to vector<1x1x8x8xf32>
    %987 = vector.shape_cast %986 : vector<1x1x8x8xf32> to vector<1x8x8xf32>
    %988 = vector.broadcast %985 : vector<1x8x1xf32> to vector<1x8x8xf32>
    %989 = arith.mulf %988, %987 : vector<1x8x8xf32>
    %cst_147 = arith.constant dense<0.000000e+00> : vector<1x8xf32>
    %990 = vector.multi_reduction <add>, %989, %cst_147 [1] : vector<1x8x8xf32> to vector<1x8xf32>
    %991 = vector.extract_strided_slice %864 {offsets = [0, 5, 0, 0], sizes = [1, 1, 8, 8], strides = [1, 1, 1, 1]} : vector<1x16x8x8xf32> to vector<1x1x8x8xf32>
    %992 = vector.shape_cast %991 : vector<1x1x8x8xf32> to vector<1x8x8xf32>
    %993 = vector.shape_cast %984 : vector<1x8xf32> to vector<1x1x8xf32>
    %994 = vector.broadcast %993 : vector<1x1x8xf32> to vector<1x8x8xf32>
    %995 = arith.mulf %992, %994 : vector<1x8x8xf32>
    %cst_148 = arith.constant dense<0.000000e+00> : vector<1x8xf32>
    %996 = vector.multi_reduction <add>, %995, %cst_148 [2] : vector<1x8x8xf32> to vector<1x8xf32>
    %997 = vector.shape_cast %990 : vector<1x8xf32> to vector<1x8x1xf32>
    %998 = vector.extract_strided_slice %864 {offsets = [0, 11, 0, 0], sizes = [1, 1, 8, 8], strides = [1, 1, 1, 1]} : vector<1x16x8x8xf32> to vector<1x1x8x8xf32>
    %999 = vector.shape_cast %998 : vector<1x1x8x8xf32> to vector<1x8x8xf32>
    %1000 = vector.broadcast %997 : vector<1x8x1xf32> to vector<1x8x8xf32>
    %1001 = arith.mulf %1000, %999 : vector<1x8x8xf32>
    %cst_149 = arith.constant dense<0.000000e+00> : vector<1x8xf32>
    %1002 = vector.multi_reduction <add>, %1001, %cst_149 [1] : vector<1x8x8xf32> to vector<1x8xf32>
    %1003 = vector.extract_strided_slice %864 {offsets = [0, 4, 0, 0], sizes = [1, 1, 8, 8], strides = [1, 1, 1, 1]} : vector<1x16x8x8xf32> to vector<1x1x8x8xf32>
    %1004 = vector.shape_cast %1003 : vector<1x1x8x8xf32> to vector<1x8x8xf32>
    %1005 = vector.shape_cast %996 : vector<1x8xf32> to vector<1x1x8xf32>
    %1006 = vector.broadcast %1005 : vector<1x1x8xf32> to vector<1x8x8xf32>
    %1007 = arith.mulf %1004, %1006 : vector<1x8x8xf32>
    %cst_150 = arith.constant dense<0.000000e+00> : vector<1x8xf32>
    %1008 = vector.multi_reduction <add>, %1007, %cst_150 [2] : vector<1x8x8xf32> to vector<1x8xf32>
    %1009 = vector.shape_cast %1002 : vector<1x8xf32> to vector<1x8x1xf32>
    %1010 = vector.extract_strided_slice %864 {offsets = [0, 12, 0, 0], sizes = [1, 1, 8, 8], strides = [1, 1, 1, 1]} : vector<1x16x8x8xf32> to vector<1x1x8x8xf32>
    %1011 = vector.shape_cast %1010 : vector<1x1x8x8xf32> to vector<1x8x8xf32>
    %1012 = vector.broadcast %1009 : vector<1x8x1xf32> to vector<1x8x8xf32>
    %1013 = arith.mulf %1012, %1011 : vector<1x8x8xf32>
    %cst_151 = arith.constant dense<0.000000e+00> : vector<1x8xf32>
    %1014 = vector.multi_reduction <add>, %1013, %cst_151 [1] : vector<1x8x8xf32> to vector<1x8xf32>
    %1015 = vector.extract_strided_slice %864 {offsets = [0, 3, 0, 0], sizes = [1, 1, 8, 8], strides = [1, 1, 1, 1]} : vector<1x16x8x8xf32> to vector<1x1x8x8xf32>
    %1016 = vector.shape_cast %1015 : vector<1x1x8x8xf32> to vector<1x8x8xf32>
    %1017 = vector.shape_cast %1008 : vector<1x8xf32> to vector<1x1x8xf32>
    %1018 = vector.broadcast %1017 : vector<1x1x8xf32> to vector<1x8x8xf32>
    %1019 = arith.mulf %1016, %1018 : vector<1x8x8xf32>
    %cst_152 = arith.constant dense<0.000000e+00> : vector<1x8xf32>
    %1020 = vector.multi_reduction <add>, %1019, %cst_152 [2] : vector<1x8x8xf32> to vector<1x8xf32>
    %1021 = vector.shape_cast %1014 : vector<1x8xf32> to vector<1x8x1xf32>
    %1022 = vector.extract_strided_slice %864 {offsets = [0, 13, 0, 0], sizes = [1, 1, 8, 8], strides = [1, 1, 1, 1]} : vector<1x16x8x8xf32> to vector<1x1x8x8xf32>
    %1023 = vector.shape_cast %1022 : vector<1x1x8x8xf32> to vector<1x8x8xf32>
    %1024 = vector.broadcast %1021 : vector<1x8x1xf32> to vector<1x8x8xf32>
    %1025 = arith.mulf %1024, %1023 : vector<1x8x8xf32>
    %cst_153 = arith.constant dense<0.000000e+00> : vector<1x8xf32>
    %1026 = vector.multi_reduction <add>, %1025, %cst_153 [1] : vector<1x8x8xf32> to vector<1x8xf32>
    %1027 = vector.extract_strided_slice %864 {offsets = [0, 2, 0, 0], sizes = [1, 1, 8, 8], strides = [1, 1, 1, 1]} : vector<1x16x8x8xf32> to vector<1x1x8x8xf32>
    %1028 = vector.shape_cast %1027 : vector<1x1x8x8xf32> to vector<1x8x8xf32>
    %1029 = vector.shape_cast %1020 : vector<1x8xf32> to vector<1x1x8xf32>
    %1030 = vector.broadcast %1029 : vector<1x1x8xf32> to vector<1x8x8xf32>
    %1031 = arith.mulf %1028, %1030 : vector<1x8x8xf32>
    %cst_154 = arith.constant dense<0.000000e+00> : vector<1x8xf32>
    %1032 = vector.multi_reduction <add>, %1031, %cst_154 [2] : vector<1x8x8xf32> to vector<1x8xf32>
    %1033 = vector.shape_cast %1026 : vector<1x8xf32> to vector<1x8x1xf32>
    %1034 = vector.extract_strided_slice %864 {offsets = [0, 14, 0, 0], sizes = [1, 1, 8, 8], strides = [1, 1, 1, 1]} : vector<1x16x8x8xf32> to vector<1x1x8x8xf32>
    %1035 = vector.shape_cast %1034 : vector<1x1x8x8xf32> to vector<1x8x8xf32>
    %1036 = vector.broadcast %1033 : vector<1x8x1xf32> to vector<1x8x8xf32>
    %1037 = arith.mulf %1036, %1035 : vector<1x8x8xf32>
    %cst_155 = arith.constant dense<0.000000e+00> : vector<1x8xf32>
    %1038 = vector.multi_reduction <add>, %1037, %cst_155 [1] : vector<1x8x8xf32> to vector<1x8xf32>
    %1039 = vector.extract_strided_slice %864 {offsets = [0, 1, 0, 0], sizes = [1, 1, 8, 8], strides = [1, 1, 1, 1]} : vector<1x16x8x8xf32> to vector<1x1x8x8xf32>
    %1040 = vector.shape_cast %1039 : vector<1x1x8x8xf32> to vector<1x8x8xf32>
    %1041 = vector.shape_cast %1032 : vector<1x8xf32> to vector<1x1x8xf32>
    %1042 = vector.broadcast %1041 : vector<1x1x8xf32> to vector<1x8x8xf32>
    %1043 = arith.mulf %1040, %1042 : vector<1x8x8xf32>
    %cst_156 = arith.constant dense<0.000000e+00> : vector<1x8xf32>
    %1044 = vector.multi_reduction <add>, %1043, %cst_156 [2] : vector<1x8x8xf32> to vector<1x8xf32>
    %1045 = vector.shape_cast %568 : vector<1x8xf32> to vector<1x1x8xf32>
    %1046 = vector.shape_cast %870 : vector<1x8xf32> to vector<1x1x8xf32>
    %1047 = vector.shape_cast %882 : vector<1x8xf32> to vector<1x1x8xf32>
    %1048 = vector.shape_cast %894 : vector<1x8xf32> to vector<1x1x8xf32>
    %1049 = vector.shape_cast %906 : vector<1x8xf32> to vector<1x1x8xf32>
    %1050 = vector.shape_cast %918 : vector<1x8xf32> to vector<1x1x8xf32>
    %1051 = vector.shape_cast %930 : vector<1x8xf32> to vector<1x1x8xf32>
    %1052 = vector.shape_cast %942 : vector<1x8xf32> to vector<1x1x8xf32>
    %1053 = vector.shape_cast %954 : vector<1x8xf32> to vector<1x1x8xf32>
    %1054 = vector.shape_cast %966 : vector<1x8xf32> to vector<1x1x8xf32>
    %1055 = vector.shape_cast %978 : vector<1x8xf32> to vector<1x1x8xf32>
    %1056 = vector.shape_cast %990 : vector<1x8xf32> to vector<1x1x8xf32>
    %1057 = vector.shape_cast %1002 : vector<1x8xf32> to vector<1x1x8xf32>
    %1058 = vector.shape_cast %1014 : vector<1x8xf32> to vector<1x1x8xf32>
    %1059 = vector.shape_cast %1026 : vector<1x8xf32> to vector<1x1x8xf32>
    %1060 = vector.shape_cast %1038 : vector<1x8xf32> to vector<1x1x8xf32>
    %1061 = tpu.concatenate %1045, %1046, %1047, %1048, %1049, %1050, %1051, %1052, %1053, %1054, %1055, %1056, %1057, %1058, %1059, %1060 in 1 : vector<1x1x8xf32>, vector<1x1x8xf32>, vector<1x1x8xf32>, vector<1x1x8xf32>, vector<1x1x8xf32>, vector<1x1x8xf32>, vector<1x1x8xf32>, vector<1x1x8xf32>, vector<1x1x8xf32>, vector<1x1x8xf32>, vector<1x1x8xf32>, vector<1x1x8xf32>, vector<1x1x8xf32>, vector<1x1x8xf32>, vector<1x1x8xf32>, vector<1x1x8xf32> -> vector<1x16x8xf32>
    %1062 = vector.shape_cast %1044 : vector<1x8xf32> to vector<1x1x8xf32>
    %1063 = vector.shape_cast %1032 : vector<1x8xf32> to vector<1x1x8xf32>
    %1064 = vector.shape_cast %1020 : vector<1x8xf32> to vector<1x1x8xf32>
    %1065 = vector.shape_cast %1008 : vector<1x8xf32> to vector<1x1x8xf32>
    %1066 = vector.shape_cast %996 : vector<1x8xf32> to vector<1x1x8xf32>
    %1067 = vector.shape_cast %984 : vector<1x8xf32> to vector<1x1x8xf32>
    %1068 = vector.shape_cast %972 : vector<1x8xf32> to vector<1x1x8xf32>
    %1069 = vector.shape_cast %960 : vector<1x8xf32> to vector<1x1x8xf32>
    %1070 = vector.shape_cast %948 : vector<1x8xf32> to vector<1x1x8xf32>
    %1071 = vector.shape_cast %936 : vector<1x8xf32> to vector<1x1x8xf32>
    %1072 = vector.shape_cast %924 : vector<1x8xf32> to vector<1x1x8xf32>
    %1073 = vector.shape_cast %912 : vector<1x8xf32> to vector<1x1x8xf32>
    %1074 = vector.shape_cast %900 : vector<1x8xf32> to vector<1x1x8xf32>
    %1075 = vector.shape_cast %888 : vector<1x8xf32> to vector<1x1x8xf32>
    %1076 = vector.shape_cast %876 : vector<1x8xf32> to vector<1x1x8xf32>
    %1077 = vector.shape_cast %569 : vector<1x8xf32> to vector<1x1x8xf32>
    %1078 = tpu.concatenate %1062, %1063, %1064, %1065, %1066, %1067, %1068, %1069, %1070, %1071, %1072, %1073, %1074, %1075, %1076, %1077 in 1 : vector<1x1x8xf32>, vector<1x1x8xf32>, vector<1x1x8xf32>, vector<1x1x8xf32>, vector<1x1x8xf32>, vector<1x1x8xf32>, vector<1x1x8xf32>, vector<1x1x8xf32>, vector<1x1x8xf32>, vector<1x1x8xf32>, vector<1x1x8xf32>, vector<1x1x8xf32>, vector<1x1x8xf32>, vector<1x1x8xf32>, vector<1x1x8xf32>, vector<1x1x8xf32> -> vector<1x16x8xf32>
    %1079 = vector.extract_strided_slice %567 {offsets = [0, 0, 0], sizes = [1, 8, 8], strides = [1, 1, 1]} : vector<2x8x8xf32> to vector<1x8x8xf32>
    %1080 = vector.shape_cast %1079 : vector<1x8x8xf32> to vector<8x8xf32>
    %1081 = vector.shape_cast %1080 : vector<8x8xf32> to vector<1x1x8x8xf32>
    %1082 = vector.shape_cast %1078 : vector<1x16x8xf32> to vector<1x16x1x8xf32>
    %1083 = vector.broadcast %1081 : vector<1x1x8x8xf32> to vector<1x16x8x8xf32>
    %1084 = vector.broadcast %1082 : vector<1x16x1x8xf32> to vector<1x16x8x8xf32>
    %1085 = arith.mulf %1083, %1084 : vector<1x16x8x8xf32>
    %cst_157 = arith.constant dense<0.000000e+00> : vector<1x16x8xf32>
    %1086 = vector.multi_reduction <add>, %1085, %cst_157 [3] : vector<1x16x8x8xf32> to vector<1x16x8xf32>
    %1087 = arith.mulf %1061, %1086 : vector<1x16x8xf32>
    %cst_158 = arith.constant dense<0.000000e+00> : vector<1x16xf32>
    %1088 = vector.multi_reduction <add>, %1087, %cst_158 [2] : vector<1x16x8xf32> to vector<1x16xf32>
    %1089 = vector.extract_strided_slice %567 {offsets = [1, 0, 0], sizes = [1, 8, 8], strides = [1, 1, 1]} : vector<2x8x8xf32> to vector<1x8x8xf32>
    %1090 = vector.shape_cast %1089 : vector<1x8x8xf32> to vector<8x8xf32>
    %1091 = vector.shape_cast %1090 : vector<8x8xf32> to vector<1x1x8x8xf32>
    %1092 = vector.shape_cast %1078 : vector<1x16x8xf32> to vector<1x16x1x8xf32>
    %1093 = vector.broadcast %1091 : vector<1x1x8x8xf32> to vector<1x16x8x8xf32>
    %1094 = vector.broadcast %1092 : vector<1x16x1x8xf32> to vector<1x16x8x8xf32>
    %1095 = arith.mulf %1093, %1094 : vector<1x16x8x8xf32>
    %cst_159 = arith.constant dense<0.000000e+00> : vector<1x16x8xf32>
    %1096 = vector.multi_reduction <add>, %1095, %cst_159 [3] : vector<1x16x8x8xf32> to vector<1x16x8xf32>
    %1097 = arith.mulf %1061, %1096 : vector<1x16x8xf32>
    %cst_160 = arith.constant dense<0.000000e+00> : vector<1x16xf32>
    %1098 = vector.multi_reduction <add>, %1097, %cst_160 [2] : vector<1x16x8xf32> to vector<1x16xf32>
    %1099 = vector.shape_cast %1088 : vector<1x16xf32> to vector<1x16x1xf32>
    %1100 = vector.shape_cast %1098 : vector<1x16xf32> to vector<1x16x1xf32>
    %1101 = tpu.concatenate %1099, %1100 in 2 : vector<1x16x1xf32>, vector<1x16x1xf32> -> vector<1x16x2xf32>
    %1102 = math.tanh %1101 : vector<1x16x2xf32>
    %cst_161 = arith.constant 1.000000e+00 : f32
    %1103 = vector.broadcast %cst_161 : f32 to vector<1x16x2xf32>
    %1104 = arith.mulf %1102, %1103 : vector<1x16x2xf32>
    %1105 = arith.mulf %1104, %1104 : vector<1x16x2xf32>
    %cst_162 = arith.constant dense<0.000000e+00> : vector<1x16xf32>
    %1106 = vector.multi_reduction <add>, %1105, %cst_162 [2] : vector<1x16x2xf32> to vector<1x16xf32>
    %1107 = vector.shape_cast %1106 : vector<1x16xf32> to vector<1x16x1xf32>
    %1108 = math.sqrt %1107 : vector<1x16x1xf32>
    %cst_163 = arith.constant 9.99999997E-7 : f32
    %1109 = vector.broadcast %cst_163 : f32 to vector<1x16x1xf32>
    %1110 = arith.addf %1108, %1109 : vector<1x16x1xf32>
    %1111 = vector.broadcast %1110 : vector<1x16x1xf32> to vector<1x16x2xf32>
    %1112 = arith.divf %1104, %1111 : vector<1x16x2xf32>
    %1113 = arith.addf %1112, %845 : vector<1x16x2xf32>
    %1114 = arith.mulf %1113, %1113 : vector<1x16x2xf32>
    %cst_164 = arith.constant dense<0.000000e+00> : vector<1x16xf32>
    %1115 = vector.multi_reduction <add>, %1114, %cst_164 [2] : vector<1x16x2xf32> to vector<1x16xf32>
    %1116 = vector.shape_cast %1115 : vector<1x16xf32> to vector<1x16x1xf32>
    %1117 = math.sqrt %1116 : vector<1x16x1xf32>
    %cst_165 = arith.constant 9.99999997E-7 : f32
    %1118 = vector.broadcast %cst_165 : f32 to vector<1x16x1xf32>
    %1119 = arith.addf %1117, %1118 : vector<1x16x1xf32>
    %1120 = vector.broadcast %1119 : vector<1x16x1xf32> to vector<1x16x2xf32>
    %1121 = arith.divf %1113, %1120 : vector<1x16x2xf32>
    %c0_166 = arith.constant 0 : index
    %1122 = memref.load %arg1[%c0_166] : memref<1xf32, #tpu.memory_space<smem>>
    %1123 = vector.broadcast %1122 : f32 to vector<1x16x2xf32>
    %1124 = arith.mulf %6, %1123 : vector<1x16x2xf32>
    %1125 = arith.addf %1121, %1124 : vector<1x16x2xf32>
    %1126 = arith.mulf %1125, %1125 : vector<1x16x2xf32>
    %cst_167 = arith.constant dense<0.000000e+00> : vector<1x16xf32>
    %1127 = vector.multi_reduction <add>, %1126, %cst_167 [2] : vector<1x16x2xf32> to vector<1x16xf32>
    %1128 = vector.shape_cast %1127 : vector<1x16xf32> to vector<1x16x1xf32>
    %1129 = math.sqrt %1128 : vector<1x16x1xf32>
    %1130 = vector.broadcast %1129 : vector<1x16x1xf32> to vector<1x16x2xf32>
    %1131 = arith.divf %1125, %1130 : vector<1x16x2xf32>
    %c0_168 = arith.constant 0 : index
    %c0_169 = arith.constant 0 : index
    %1132 = vector.load %arg6[%c0_168, %c0_169] : memref<1x2xf32, #tpu.memory_space<vmem>>, vector<1x2xf32>
    %1133 = vector.shape_cast %1132 : vector<1x2xf32> to vector<1x1x2xf32>
    %1134 = vector.broadcast %1133 : vector<1x1x2xf32> to vector<1x16x2xf32>
    %1135 = arith.mulf %1131, %1134 : vector<1x16x2xf32>
    %cst_170 = arith.constant dense<0.000000e+00> : vector<1x16xf32>
    %1136 = vector.multi_reduction <add>, %1135, %cst_170 [2] : vector<1x16x2xf32> to vector<1x16xf32>
    %1137 = arith.mulf %1131, %1131 : vector<1x16x2xf32>
    %cst_171 = arith.constant dense<0.000000e+00> : vector<1x16xf32>
    %1138 = vector.multi_reduction <add>, %1137, %cst_171 [2] : vector<1x16x2xf32> to vector<1x16xf32>
    %1139 = math.sqrt %1138 : vector<1x16xf32>
    %1140 = vector.shape_cast %1131 : vector<1x16x2xf32> to vector<1x32xf32>
    %1141 = tpu.concatenate %1140, %1136, %1139 in 1 : vector<1x32xf32>, vector<1x16xf32>, vector<1x16xf32> -> vector<1x64xf32>
    %1142 = vector.shape_cast %1141 : vector<1x64xf32> to vector<1x1x64xf32>
    %c0_172 = arith.constant 0 : index
    %c0_173 = arith.constant 0 : index
    %c0_174 = arith.constant 0 : index
    %1143 = vector.load %arg7[%c0_172, %c0_173, %c0_174] : memref<1x1x64xf32, #tpu.memory_space<vmem>>, vector<1x1x64xf32>
    tpu.vector_store %arg7[%c0_172, %c0_173, %c0_174], %1142 {strides = array<i32>} : memref<1x1x64xf32, #tpu.memory_space<vmem>>, vector<1x1x64xf32>,
    return
  }
  func.func @transform_0(%arg0: i32) -> i32 {
    %c0_i32 = arith.constant 0 : i32
    %c0_i32_0 = arith.constant 0 : i32
    return %c0_i32 : i32
  }
  func.func @transform_1(%arg0: i32) -> (i32, i32, i32) {
    %c0_i32 = arith.constant 0 : i32
    %c0_i32_0 = arith.constant 0 : i32
    %c0_i32_1 = arith.constant 0 : i32
    return %arg0, %c0_i32, %c0_i32_0 : i32, i32, i32
  }
  func.func @transform_2(%arg0: i32) -> (i32, i32, i32, i32) {
    %c0_i32 = arith.constant 0 : i32
    %c0_i32_0 = arith.constant 0 : i32
    %c0_i32_1 = arith.constant 0 : i32
    %c0_i32_2 = arith.constant 0 : i32
    %c0_i32_3 = arith.constant 0 : i32
    return %c0_i32, %c0_i32_0, %c0_i32_1, %c0_i32_2 : i32, i32, i32, i32
  }
  func.func @transform_3(%arg0: i32) -> (i32, i32) {
    %c0_i32 = arith.constant 0 : i32
    %c0_i32_0 = arith.constant 0 : i32
    %c0_i32_1 = arith.constant 0 : i32
    return %c0_i32, %c0_i32_0 : i32, i32
  }
  func.func @transform_4(%arg0: i32) -> (i32, i32) {
    %c0_i32 = arith.constant 0 : i32
    %c0_i32_0 = arith.constant 0 : i32
    %c0_i32_1 = arith.constant 0 : i32
    return %c0_i32, %c0_i32_0 : i32, i32
  }
  func.func @transform_5(%arg0: i32) -> (i32, i32) {
    %c0_i32 = arith.constant 0 : i32
    %c0_i32_0 = arith.constant 0 : i32
    %c0_i32_1 = arith.constant 0 : i32
    return %c0_i32, %c0_i32_0 : i32, i32
  }
  func.func @transform_6(%arg0: i32) -> (i32, i32, i32) {
    %c0_i32 = arith.constant 0 : i32
    %c0_i32_0 = arith.constant 0 : i32
    %c0_i32_1 = arith.constant 0 : i32
    return %arg0, %c0_i32, %c0_i32_0 : i32, i32, i32
  }
}

</mosaic_0001>

<bundles_post_ra>
// kernel: _lambda_.1
= control target key start
LH: loop header
LB: loop body
LE: loop exit
PB: predicated region body
PF: predicated region fallthrough
CT: control target
= control target key end

     0   :  { %s8613_s0 = inlined_call_operand.<no memory space> [shape: f32[1], index: 0, kind: input, shape index: {}]   ;;  %s8614_s1 = inlined_call_operand.vmem [shape: f32[2,1,16], index: 1, kind: input, shape index: {}]   ;;  %s8615_s2 = inlined_call_operand.hbm [shape: f32[2,2,8,8], index: 2, kind: input, shape index: {}]   ;;  %s8616_s3 = inlined_call_operand.vmem [shape: f32[2,8], index: 3, kind: input, shape index: {}]   ;;  %s8617_s4 = inlined_call_operand.vmem [shape: f32[2,8], index: 4, kind: input, shape index: {}]   ;;  %s8618_s5 = inlined_call_operand.vmem [shape: f32[1,2], index: 5, kind: input, shape index: {}]   ;;  %s8619_s6 = inlined_call_operand.vmem [shape: f32[2,1,64], index: 6, kind: output, shape index: {}]  }
   0x1   :  { %11 = sst [smem:[#allocation2]] %s8613_s0 }
   0x2   :  { %12 = vsyncpa [#allocation4], 0  ;;  %s6456_s23 = smov 0  }
   0x3 LB: > { %s6462_s24 = sadd.s32 4294967295, %s6392_s23   ;;  %p6112_p0 = scmp.ge.s32.totalorder %s6392_s23, 1  ;;  %s6392_s23 = sphi %s6456_s23, %s18_s23  }
   0x4   : > { %p180_p1 = scmp.lt.s32.totalorder %s6392_s23, 3  ;;  %s6394_s25 = smov [#allocation3]  }
   0x5   : > { %s195_s26 = sshll.u32 %s6394_s25, 4  ;;  %p8620_p3 = scmp.eq.s32.totalorder %s6462_s24, 0  ;;  %s196_s26 = int_to_ptr.vmem [resolvable:$true] %s195_s26 }
   0x6   : > { %p6466_p2 = pnand %p6112_p0, %p180_p1  ;;  %s6354_s30 = scalar_lea.hbm %s8615_s2, 512 }
   0x7   : > { %p6355_p6 = scmp.ne.s32.totalorder %s8615_s2, %s6354_s30  ;;  %p6361_p10 = scmp.lt.u32.totalorder %s6354_s30, %s8615_s2 }
   0x8   : > { %s8628_s0 = scalar_select %p6466_p2, 1, 0 }
   0x9   : > { %p6124_p4 = pneg %p6466_p2 }
   0xb   : > { %p6475_p5 = pnand %p8620_p3, %p6124_p4 }
   0xd   : > { %p6356_p7 = pneg %p6475_p5 }
   0xf   : > { %p6357_p8 = pnand %p6356_p7, %p6355_p6 }
  0x11   : > { %p6358_p9 = pneg %p6357_p8 }
  0x13   : > { %p6363_p11 = pnand %p6361_p10, %p6358_p9 }
  0x15   : > { %6366 = shalt.err (!%p6363_p11)
}
  0x16   : > { %s6367_s11 = scalar_lea.vmem %s196_s26, 512  ;;  %p6375_p1 = scmp.lt.s32.totalorder %s196_s26, %s196_s26 }
  0x17   : > { %p6368_p12 = scmp.ne.s32.totalorder %s196_s26, %s6367_s11  ;;  %p6376_p4 = scmp.lt.s32.totalorder %s6367_s11, %s6367_s11 }
  0x19   : > { %p6370_p13 = pnand %p6368_p12, %p6356_p7  ;;  %p6377_p3 = por %p6376_p4, %p6375_p1 }
  0x1b   : > { %p6371_p0 = pneg %p6370_p13 }
  0x1d   : > { %p6378_p2 = pnand %p6377_p3, %p6371_p0 }
  0x1f   : > { %6381 = shalt.err (!%p6378_p2)
}
  0x20   : > { %s6395_s12 = smov 128   ;;  %s6396_s13 = smov 8  }
  0x21   : > { %6127 = dma.hbm_to_vmem [thread:$0]  (!%p6475_p5), %s8615_s2, 512, %s196_s26, [#allocation4], %s6395_s12, %s6395_s12, %s6396_s13  }
  0x22   : > { %p8630_p6 = scmp.ne.s32.totalorder %s8628_s0, 0 }
  0x23   : > { %p8631_p8 = scmp.eq.s32.totalorder (!%p8630_p6), %s6462_s24, 0 }
  0x24   : > { %226 = sbr.rel (%p8630_p6) target bundleno = 12162 (0x2f82), region = 44 }
  0x2b   : > { %6387 = dma.done.wait (%p8631_p8), [#allocation4], 512   ;;  %p8632_p7 = pmov %p8631_p8 }
  0x2c   : > { %p252_p2 = scmp.lt.s32.totalorder %s6462_s24, 1  ;;  %v260_v0 = vlaneseq  ;;  %v6397_v3 = vmov 1   ;;  %v6398_v4 = vmov 0   ;;  %v6399_v9 = vmov 1966171168   ;;  %v6562_v36 = vld [vmem:[#allocation3] sm:$0xff] }
  0x2d   : > { %6389 = vsyncadd (%p8632_p7), [#allocation4], 4294966784  ;;  %6163 = vset.pattern.permute.xlu1 %v6397_v3  ;;  %6162 = vset.pattern.permute.xlu0 %v6398_v4  ;;  %v295_v10 = vunpack.c.l.s4 %v6399_v9  ;;  %vm282_vm0 = vcmask 7168   ;;  %v6545_v28 = vld [vmem:[%s8616_s3] sm:$0x3]  ;;  %v6564_v37 = vld [vmem:[#allocation3 + $0x8] sm:$0xff] }
  0x2e   : > { %s8694_s24 = smov (!%p252_p2, %s6462_s24), 1  ;;  %v6506_v1 = vshrl.u32 %v260_v0, 7  ;;  %v6569_v40 = vld [vmem:[%s8617_s4] sm:$0x3]  ;;  %vm639_vm1 = vcmask 64512   ;;  %vm1042_vm2 = vcmask 1040384  }
  0x2f   : > { %s254_s18 = scalar_lea.vmem %s8614_s1, %s8694_s24  ;;  %v296_v11 = vunpack.c.0.s8 %v295_v10  ;;  %vm1044_vm3 = vcmask 1041408   ;;  %vm1046_vm4 = vcmask 1042432   ;;  %vm1048_vm5 = vcmask 1043456   ;;  %s5763_s30 = sld [smem:[#allocation2]] }
  0x30   : > { %v6513_v2 = vsub.s32 0, %v6506_v1  ;;  %v258_v5 = vld [vmem:[%s254_s18] sm:$0x1]  ;;  %vm1050_vm6 = vcmask 1044480   ;;  %vm8624_vm7 = vcmask 1045504   ;;  %vm8623_vm8 = vcmask 1046528   ;;  %s257_s27 = scalar_lea.vmem %s8619_s6, %s8694_s24 }
  0x31   : > { %v259_v7 = vsub.f32 1.0, %v258_v5  ;;  %v6520_v13 = vsub.s32 %v296_v11, %v6506_v1  ;;  %vm673_vm9 = vcmask 1041409   ;;  %vm8627_vm10 = vcmask 1042434   ;;  %s6403_s9 = smov 16   ;;  %s6404_s10 = smov 2  }
  0x32   : > { %v274_v6 = vrot.slane %v258_v5, %v6513_v2  ;;  %v634_v32 = vrot.slane %v6545_v28, %v6513_v2  ;;  %v6577_v47 = vrot.slane %v6569_v40, %v6513_v2  ;;  %vm8626_vm11 = vcmask 1043459   ;;  %s6405_s11 = smov 8   ;;  %s6406_s12 = smov 20  }
  0x33   : > { %v263_v8 = vrot.slane %v259_v7, %v6513_v2  ;;  %vm8625_vm12 = vcmask 1044484   ;;  %vm680_vm13 = vcmask 1045509   ;;  %vm682_vm14 = vcmask 1046534   ;;  %s6407_s13 = smov 12   ;;  %s6408_s14 = smov 24  }
  0x34   : > { %276 = vbcast.lane.b32.xlu1 %v274_v6, 256  ;;  %vm8622_vm15 = vcmask 1047559   ;;  %s6409_s15 = smov 28   ;;  %s6410_s16 = smov 4  }
  0x35   : > { %265 = vbcast.lane.b32.xlu0 %v263_v8, 256  ;;  %s6411_s17 = smov 18   ;;  %s6412_s18 = smov 6  }
  0x36   : > { %s6413_s19 = smov 10   ;;  %s6414_s20 = smov 22  }
  0x37   : > { %s6415_s21 = smov 14   ;;  %s6416_s22 = smov 26  }
  0x38   : > { %280 = vbcast.lane.b32.xlu1 %v274_v6, 264  ;;  %s6417_s25 = smov 30  }
  0x39   : > { %269 = vbcast.lane.b32.xlu0 %v263_v8, 264 }
  0xa6   : > { %v277_v12 = vpop.permute.xlu1 %276 }
  0xa7   : > { %v266_v14 = vpop.permute.xlu0 %265 }
  0xa8   : > { %v6523_v15 = vsel %vm282_vm0, %v266_v14, %v277_v12 }
  0xa9   : > { %v300_v16 = vrot.slane %v6523_v15, %v6520_v13 }
  0xaa   : > { %v281_v17 = vpop.permute.xlu1 %280 }
  0xab   : > { %v270_v18 = vpop.permute.xlu0 %269  ;;  %v316_v19 = vrot.slane %v300_v16, %v6520_v13  ;;  %v308_v25 = vcombine.high %v300_v16, %v300_v16 }
  0xac   : > { %v6529_v20 = vsel %vm282_vm0, %v270_v18, %v281_v17  ;;  %v6594_v18 = vand.u32 127, %v260_v0 }
  0xad   : > { %v342_v21 = vcombine.high %v6529_v20, %v6529_v20  ;;  %v394_v22 = vrot.slane %v316_v19, %v6513_v2  ;;  %v6549_v30 = vrot.slane %v308_v25, %v6520_v13  ;;  %v338_v61 = vcombine.high %v316_v19, %v316_v19 }
  0xaf   : > { %v356_v23 = vrot.slane %v342_v21, %v6520_v13  ;;  %536 = vperm.xlu1 %6163, %v394_v22   ;;  %456 = vperm.xlu0 %6162, %v394_v22   ;;  %v398_v33 = vrot.slane %v6549_v30, %v6513_v2  ;;  %v402_v62 = vrot.slane %v338_v61, %v6513_v2 }
  0xb0   : > { %v6598_v22 = vsub.s32 %v6594_v18, %v6506_v1 }
  0xb1   : > { %v358_v24 = vcombine.high %v356_v23, %v356_v23  ;;  %v6552_v31 = vrot.slane %v356_v23, %v6520_v13 }
  0xb3   : > { %6164 = vset.pattern.permute.xlu1 %v6398_v4  ;;  %6165 = vset.pattern.permute.xlu0 %v6397_v3  ;;  %v6538_v26 = vrot.slane %v358_v24, %v6520_v13  ;;  %v388_v34 = vcombine.high %v6552_v31, %v6552_v31 }
  0xb5   : > { %v390_v27 = vcombine.high %v6538_v26, %v6538_v26  ;;  %v450_v35 = vrot.slane %v388_v34, %v6513_v2 }
  0xb7   : > { %v454_v29 = vrot.slane %v390_v27, %v6513_v2 }
  0xb9   : > { %596 = vperm.xlu0 %6165, %v454_v29   ;;  %516 = vperm.xlu1 %6164, %v454_v29  }
  0xbd   : > { %540 = vperm.xlu0 %6165, %v398_v33   ;;  %636 = vbcast.lane.b32.xlu1 %v634_v32, 256 }
  0xc1   : > { %592 = vperm.xlu0 %6165, %v450_v35   ;;  %460 = vperm.xlu1 %6164, %v398_v33  }
  0xc5   : > { %6166 = vset.pattern.permute.xlu0 %v6398_v4 }
  0xc6   : > { %512 = vperm.xlu0 %6166, %v450_v35   ;;  %v446_v35 = vrot.slane %v6538_v26, %v6513_v2  ;;  %v293_v26 = vcombine.high %v6523_v15, %v6523_v15 }
 0x12e   : > { %v537_v38 = vpop.permute.xlu1 %536  ;;  %v457_v39 = vpop.permute.xlu0 %456 }
 0x12f   : > { %v599_v41 = vmul.f32 %v537_v38, %v6564_v37  ;;  %v519_v42 = vmul.f32 %v457_v39, %v6562_v36  ;;  %v340_v39 = vcombine.high %v6549_v30, %v6549_v30  ;;  %v6626_v30 = vrot.slane %v293_v26, %v6520_v13 }
 0x131   : > { %v615_v48 = vadd.f32 %v599_v41, %v519_v42  ;;  %v406_v41 = vrot.slane %v340_v39, %v6513_v2  ;;  %v442_v42 = vrot.slane %v6552_v31, %v6513_v2  ;;  %v309_v26 = vcombine.high %v6626_v30, %v6626_v30 }
 0x138   : > { %v517_v43 = vpop.permute.xlu1 %516  ;;  %v597_v44 = vpop.permute.xlu0 %596 }
 0x139   : > { %v534_v45 = vmul.f32 %v517_v43, %v6562_v36  ;;  %v614_v46 = vmul.f32 %v597_v44, %v6564_v37  ;;  %v6631_v43 = vrot.slane %v6626_v30, %v6520_v13 }
 0x13b   : > { %v630_v49 = vadd.f32 %v614_v46, %v534_v45  ;;  %v410_v44 = vrot.slane %v6631_v43, %v6513_v2 }
 0x13c   : > { %v6579_v50 = vpop.permute.xlu1 %636  ;;  %v541_v63 = vpop.permute.xlu0 %540 }
 0x13d   : > { %v638_v51 = vmul.f32 %v6579_v50, %v615_v48  ;;  %v651_v52 = vmul.f32 %v6577_v47, %v630_v49  ;;  %v600_v9 = vmul.f32 %v541_v63, %v6564_v37 }
 0x13f   : > { %v640_v53 = vsel %vm639_vm1, %v638_v51, 0.0  ;;  %v652_v54 = vsel %vm639_vm1, %v651_v52, 0.0 }
 0x140   : > { %v641_v55 = vrot.slane %v640_v53, 4  ;;  %653 = vadd.xlane.f32.xlu1 %v652_v54  ;;  %v593_v5 = vpop.permute.xlu0 %592  ;;  %v461_v6 = vpop.permute.xlu1 %460 }
 0x141   : > { %v520_v7 = vmul.f32 %v461_v6, %v6562_v36  ;;  %v613_v25 = vmul.f32 %v593_v5, %v6564_v37 }
 0x142   : > { %v642_v56 = vadd.f32 %v641_v55, %v640_v53 }
 0x143   : > { %v6589_v10 = vadd.f32 %v600_v9, %v520_v7 }
 0x144   : > { %v643_v57 = vrot.slane %v642_v56, 2 }
 0x145   : > { %v513_v8 = vpop.permute.xlu0 %512 }
 0x146   : > { %v644_v58 = vadd.f32 %v643_v57, %v642_v56  ;;  %v533_v23 = vmul.f32 %v513_v8, %v6562_v36 }
 0x148   : > { %v645_v59 = vrot.slane %v644_v58, 1  ;;  %v6604_v0 = vadd.f32 %v613_v25, %v533_v23 }
 0x14a   : > { %v646_v60 = vadd.f32 %v645_v59, %v644_v58 }
 0x14c   : > { %656 = vbcast.lane.b32.xlu0 %v646_v60, 256  ;;  %v1043_v29 = vsel %vm1042_vm2, %v6545_v28, %v646_v60 }
 0x150   : > { %464 = vperm.xlu0 %6166, %v402_v62  }
 0x154   : > { %6167 = vset.pattern.permute.xlu0 %v6397_v3 }
 0x155   : > { %544 = vperm.xlu0 %6167, %v402_v62  }
 0x1be   : > { %v657_v11 = vpop.permute.xlu0 %656 }
 0x1bf   : > { %v658_v12 = vmul.f32 %v657_v11, %v6589_v10 }
 0x1c1   : > { %v659_v14 = vsel %vm639_vm1, %v658_v12, 0.0 }
 0x1c2   : > { %v660_v16 = vrot.slane %v659_v14, 4 }
 0x1c4   : > { %v661_v17 = vadd.f32 %v660_v16, %v659_v14 }
 0x1c6   : > { %v662_v19 = vrot.slane %v661_v17, 2 }
 0x1c8   : > { %v663_v21 = vadd.f32 %v662_v19, %v661_v17 }
 0x1ca   : > { %v664_v24 = vrot.slane %v663_v21, 1 }
 0x1cc   : > { %v665_v27 = vadd.f32 %v664_v24, %v663_v21  ;;  %v349_v24 = vrot.slane %v6529_v20, %v6520_v13 }
 0x1cd   : > { %v654_v32 = vpop.xlane.xlu1 %653 }
 0x1ce   : > { %v6607_v33 = vrot.slane %v654_v32, %v6598_v22  ;;  %692 = vbcast.lane.b32.xlu0 %v665_v27, 256  ;;  %v1045_v34 = vsel %vm1044_vm3, %v1043_v29, %v665_v27  ;;  %v357_v29 = vcombine.high %v349_v24, %v349_v24 }
 0x1cf   : > { %v465_v31 = vpop.permute.xlu0 %464 }
 0x1d0   : > { %v687_v38 = vmul.f32 %v6607_v33, %v6604_v0  ;;  %v521_v48 = vmul.f32 %v465_v31, %v6562_v36  ;;  %v6674_v31 = vrot.slane %v309_v26, %v6520_v13 }
 0x1d2   : > { %588 = vperm.xlu0 %6167, %v446_v35   ;;  %v688_v28 = vsel %vm639_vm1, %v687_v38, 0.0  ;;  %v6665_v38 = vrot.slane %v357_v29, %v6520_v13 }
 0x1d3   : > { %689 = vadd.xlane.f32.xlu1 %v688_v28 }
 0x1d4   : > { %v545_v45 = vpop.permute.xlu0 %544 }
 0x1d5   : > { %v601_v46 = vmul.f32 %v545_v45, %v6564_v37  ;;  %v414_v45 = vrot.slane %v6674_v31, %v6513_v2 }
 0x1d6   : > { %6168 = vset.pattern.permute.xlu0 %v6398_v4 }
 0x1d7   : > { %468 = vperm.xlu0 %6168, %v406_v41   ;;  %v6641_v49 = vadd.f32 %v601_v46, %v521_v48 }
 0x1db   : > { %6169 = vset.pattern.permute.xlu0 %v6397_v3 }
 0x1dc   : > { %548 = vperm.xlu0 %6169, %v406_v41   ;;  %v389_v41 = vcombine.high %v6665_v38, %v6665_v38 }
 0x1e0   : > { %6170 = vset.pattern.permute.xlu0 %v6398_v4 }
 0x1e1   : > { %504 = vperm.xlu0 %6170, %v442_v42  }
 0x1e4   : > { %508 = vperm.xlu1 %6164, %v446_v35  }
 0x1e5   : > { %6171 = vset.pattern.permute.xlu0 %v6397_v3 }
 0x1e6   : > { %584 = vperm.xlu0 %6171, %v442_v42  }
 0x1e8   : > { %6175 = vset.pattern.permute.xlu1 %v6397_v3 }
 0x1ea   : > { %6172 = vset.pattern.permute.xlu0 %v6398_v4 }
 0x1eb   : > { %472 = vperm.xlu0 %6172, %v410_v44  }
 0x1ef   : > { %6173 = vset.pattern.permute.xlu0 %v6397_v3 }
 0x1f0   : > { %552 = vperm.xlu0 %6173, %v410_v44   ;;  %v438_v44 = vrot.slane %v389_v41, %v6513_v2 }
 0x1f4   : > { %6174 = vset.pattern.permute.xlu0 %v6398_v4 }
 0x240   : > { %v693_v51 = vpop.permute.xlu0 %692 }
 0x241   : > { %v694_v52 = vmul.f32 %v693_v51, %v6641_v49 }
 0x243   : > { %v695_v53 = vsel %vm639_vm1, %v694_v52, 0.0 }
 0x244   : > { %v696_v54 = vrot.slane %v695_v53, 4 }
 0x246   : > { %v697_v55 = vadd.f32 %v696_v54, %v695_v53 }
 0x248   : > { %v698_v56 = vrot.slane %v697_v55, 2 }
 0x24a   : > { %v699_v57 = vadd.f32 %v698_v56, %v697_v55 }
 0x24c   : > { %v700_v58 = vrot.slane %v699_v57, 1 }
 0x24e   : > { %v701_v59 = vadd.f32 %v700_v58, %v699_v57 }
 0x250   : > { %719 = vbcast.lane.b32.xlu1 %v701_v59, 256  ;;  %v1047_v60 = vsel %vm1046_vm4, %v1045_v34, %v701_v59 }
 0x251   : > { %v589_v63 = vpop.permute.xlu0 %588 }
 0x252   : > { %v612_v6 = vmul.f32 %v589_v63, %v6564_v37 }
 0x256   : > { %v469_v12 = vpop.permute.xlu0 %468 }
 0x257   : > { %v522_v17 = vmul.f32 %v469_v12, %v6562_v36  ;;  %v6698_v12 = vrot.slane %v349_v24, %v6520_v13 }
 0x25b   : > { %v549_v14 = vpop.permute.xlu0 %548 }
 0x25c   : > { %v602_v16 = vmul.f32 %v549_v14, %v6564_v37 }
 0x25e   : > { %v6658_v19 = vadd.f32 %v602_v16, %v522_v17 }
 0x260   : > { %v690_v61 = vpop.xlane.xlu1 %689  ;;  %v505_v46 = vpop.permute.xlu0 %504 }
 0x261   : > { %v6651_v8 = vrot.slane %v690_v61, %v6598_v22  ;;  %v531_v51 = vmul.f32 %v505_v46, %v6562_v36 }
 0x264   : > { %v509_v62 = vpop.permute.xlu1 %508 }
 0x265   : > { %v532_v5 = vmul.f32 %v509_v62, %v6562_v36  ;;  %v585_v30 = vpop.permute.xlu0 %584 }
 0x266   : > { %v611_v48 = vmul.f32 %v585_v30, %v6564_v37 }
 0x267   : > { %v6648_v7 = vadd.f32 %v612_v6, %v532_v5 }
 0x268   : > { %v6682_v53 = vadd.f32 %v611_v48, %v531_v51 }
 0x269   : > { %v714_v9 = vmul.f32 %v6651_v8, %v6648_v7 }
 0x26a   : > { %v473_v57 = vpop.permute.xlu0 %472 }
 0x26b   : > { %v715_v11 = vsel %vm639_vm1, %v714_v9, 0.0 }
 0x26f   : > { %v553_v58 = vpop.permute.xlu0 %552 }
 0x270   : > { %v603_v59 = vmul.f32 %v553_v58, %v6564_v37 }
 0x274   : > { %716 = vadd.xlane.f32.xlu1 %v715_v11 }
 0x2c2   : > { %v720_v21 = vpop.permute.xlu1 %719 }
 0x2c3   : > { %v721_v23 = vmul.f32 %v720_v21, %v6658_v19  ;;  %v387_v21 = vcombine.high %v6698_v12, %v6698_v12 }
 0x2c5   : > { %v722_v25 = vsel %vm639_vm1, %v721_v23, 0.0 }
 0x2c6   : > { %v723_v27 = vrot.slane %v722_v25, 4 }
 0x2c8   : > { %v724_v32 = vadd.f32 %v723_v27, %v722_v25  ;;  %v434_v25 = vrot.slane %v387_v21, %v6513_v2  ;;  %v339_v27 = vcombine.high %v6631_v43, %v6631_v43 }
 0x2ca   : > { %v725_v34 = vrot.slane %v724_v32, 2  ;;  %v418_v24 = vrot.slane %v339_v27, %v6513_v2 }
 0x2cc   : > { %v726_v35 = vadd.f32 %v725_v34, %v724_v32 }
 0x2ce   : > { %v727_v39 = vrot.slane %v726_v35, 1 }
 0x2d0   : > { %v728_v28 = vadd.f32 %v727_v39, %v726_v35 }
 0x2d2   : > { %746 = vbcast.lane.b32.xlu0 %v728_v28, 256  ;;  %v1049_v42 = vsel %vm1048_vm5, %v1047_v60, %v728_v28  ;;  %v523_v60 = vmul.f32 %v473_v57, %v6562_v36 }
 0x2d4   : > { %v6693_v61 = vadd.f32 %v603_v59, %v523_v60 }
 0x2d6   : > { %500 = vperm.xlu0 %6174, %v438_v44  }
 0x2da   : > { %6176 = vset.pattern.permute.xlu0 %v6397_v3 }
 0x2db   : > { %556 = vperm.xlu0 %6176, %v414_v45  }
 0x2df   : > { %6177 = vset.pattern.permute.xlu0 %v6398_v4 }
 0x2e0   : > { %476 = vperm.xlu0 %6177, %v414_v45  }
 0x301   : > { %v717_v52 = vpop.xlane.xlu1 %716 }
 0x302   : > { %v6685_v54 = vrot.slane %v717_v52, %v6598_v22 }
 0x304   : > { %v741_v55 = vmul.f32 %v6685_v54, %v6682_v53 }
 0x306   : > { %v742_v56 = vsel %vm639_vm1, %v741_v55, 0.0 }
 0x307   : > { %743 = vadd.xlane.f32.xlu1 %v742_v56 }
 0x318   : > { %580 = vperm.xlu1 %6175, %v438_v44   ;;  %v341_v44 = vcombine.high %v6674_v31, %v6674_v31 }
 0x31a   : > { %v422_v46 = vrot.slane %v341_v44, %v6513_v2 }
 0x31c   : > { %6178 = vset.pattern.permute.xlu1 %v6398_v4 }
 0x344   : > { %v747_v62 = vpop.permute.xlu0 %746 }
 0x345   : > { %v748_v63 = vmul.f32 %v747_v62, %v6693_v61 }
 0x347   : > { %v749_v5 = vsel %vm639_vm1, %v748_v63, 0.0 }
 0x348   : > { %v750_v6 = vrot.slane %v749_v5, 4 }
 0x34a   : > { %v751_v9 = vadd.f32 %v750_v6, %v749_v5 }
 0x34c   : > { %v752_v11 = vrot.slane %v751_v9, 2 }
 0x34e   : > { %v753_v14 = vadd.f32 %v752_v11, %v751_v9 }
 0x350   : > { %v754_v16 = vrot.slane %v753_v14, 1 }
 0x352   : > { %v755_v17 = vadd.f32 %v754_v16, %v753_v14 }
 0x354   : > { %773 = vbcast.lane.b32.xlu1 %v755_v17, 256  ;;  %v1051_v23 = vsel %vm1050_vm6, %v1049_v42, %v755_v17  ;;  %v430_v42 = vrot.slane %v6665_v38, %v6513_v2 }
 0x355   : > { %v501_v32 = vpop.permute.xlu0 %500 }
 0x356   : > { %v530_v35 = vmul.f32 %v501_v32, %v6562_v36 }
 0x358   : > { %496 = vperm.xlu1 %6178, %v434_v25  }
 0x35a   : > { %v557_v45 = vpop.permute.xlu0 %556 }
 0x35b   : > { %v604_v51 = vmul.f32 %v557_v45, %v6564_v37 }
 0x35c   : > { %6179 = vset.pattern.permute.xlu1 %v6397_v3 }
 0x35d   : > { %576 = vperm.xlu1 %6179, %v434_v25  }
 0x35f   : > { %v477_v30 = vpop.permute.xlu0 %476 }
 0x360   : > { %v524_v48 = vmul.f32 %v477_v30, %v6562_v36 }
 0x361   : > { %6180 = vset.pattern.permute.xlu1 %v6398_v4 }
 0x362   : > { %480 = vperm.xlu1 %6180, %v418_v24   ;;  %v6727_v52 = vadd.f32 %v604_v51, %v524_v48 }
 0x366   : > { %6181 = vset.pattern.permute.xlu1 %v6397_v3 }
 0x367   : > { %560 = vperm.xlu1 %6181, %v418_v24  }
 0x394   : > { %v744_v29 = vpop.xlane.xlu1 %743 }
 0x395   : > { %v6713_v28 = vrot.slane %v744_v29, %v6598_v22 }
 0x398   : > { %v581_v34 = vpop.permute.xlu1 %580 }
 0x399   : > { %v610_v39 = vmul.f32 %v581_v34, %v6564_v37 }
 0x39b   : > { %v6715_v43 = vadd.f32 %v610_v39, %v530_v35 }
 0x39d   : > { %v768_v41 = vmul.f32 %v6713_v28, %v6715_v43 }
 0x39f   : > { %v769_v26 = vsel %vm639_vm1, %v768_v41, 0.0 }
 0x3a0   : > { %770 = vadd.xlane.f32.xlu0 %v769_v26 }
 0x3b6   : > { %492 = vperm.xlu0 %6177, %v430_v42  }
 0x3ba   : > { %484 = vperm.xlu0 %6177, %v422_v46  }
 0x3c6   : > { %v774_v55 = vpop.permute.xlu1 %773 }
 0x3c7   : > { %v775_v56 = vmul.f32 %v774_v55, %v6727_v52 }
 0x3c9   : > { %v776_v38 = vsel %vm639_vm1, %v775_v56, 0.0 }
 0x3ca   : > { %v777_v57 = vrot.slane %v776_v38, 4 }
 0x3cc   : > { %v778_v58 = vadd.f32 %v777_v57, %v776_v38 }
 0x3ce   : > { %v779_v31 = vrot.slane %v778_v58, 2 }
 0x3d0   : > { %v780_v59 = vadd.f32 %v779_v31, %v778_v58 }
 0x3d2   : > { %v781_v60 = vrot.slane %v780_v59, 1 }
 0x3d4   : > { %v782_v62 = vadd.f32 %v781_v60, %v780_v59 }
 0x3d6   : > { %800 = vbcast.lane.b32.xlu1 %v782_v62, 256  ;;  %v1053_v63 = vsel %vm8624_vm7, %v1051_v23, %v782_v62 }
 0x3d7   : > { %v497_v5 = vpop.permute.xlu1 %496 }
 0x3d8   : > { %v529_v11 = vmul.f32 %v497_v5, %v6562_v36 }
 0x3dc   : > { %v577_v6 = vpop.permute.xlu1 %576 }
 0x3dd   : > { %v609_v9 = vmul.f32 %v577_v6, %v6564_v37 }
 0x3df   : > { %v6734_v16 = vadd.f32 %v609_v9, %v529_v11 }
 0x3e1   : > { %v481_v27 = vpop.permute.xlu1 %480 }
 0x3e2   : > { %v525_v29 = vmul.f32 %v481_v27, %v6562_v36 }
 0x3e6   : > { %v561_v23 = vpop.permute.xlu1 %560 }
 0x3e7   : > { %v605_v24 = vmul.f32 %v561_v23, %v6564_v37 }
 0x3e9   : > { %v6744_v32 = vadd.f32 %v605_v24, %v525_v29 }
 0x42d   : > { %v771_v14 = vpop.xlane.xlu0 %770 }
 0x42e   : > { %v6737_v17 = vrot.slane %v771_v14, %v6598_v22 }
 0x430   : > { %v795_v21 = vmul.f32 %v6737_v17, %v6734_v16 }
 0x432   : > { %v796_v25 = vsel %vm639_vm1, %v795_v21, 0.0 }
 0x433   : > { %797 = vadd.xlane.f32.xlu1 %v796_v25 }
 0x435   : > { %v493_v51 = vpop.permute.xlu0 %492 }
 0x436   : > { %v528_v38 = vmul.f32 %v493_v51, %v6562_v36 }
 0x439   : > { %v485_v58 = vpop.permute.xlu0 %484 }
 0x43a   : > { %v526_v62 = vmul.f32 %v485_v58, %v6562_v36 }
 0x444   : > { %572 = vperm.xlu1 %6181, %v430_v42  }
 0x448   : > { %v801_v34 = vpop.permute.xlu1 %800  ;;  %564 = vperm.xlu1 %6181, %v422_v46   ;;  %v426_v46 = vrot.slane %v6698_v12, %v6513_v2 }
 0x449   : > { %v802_v35 = vmul.f32 %v801_v34, %v6744_v32 }
 0x44b   : > { %v803_v39 = vsel %vm639_vm1, %v802_v35, 0.0 }
 0x44c   : > { %v804_v41 = vrot.slane %v803_v39, 4  ;;  %6183 = vset.pattern.permute.xlu1 %v6398_v4 }
 0x44e   : > { %v805_v26 = vadd.f32 %v804_v41, %v803_v39 }
 0x450   : > { %v806_v44 = vrot.slane %v805_v26, 2 }
 0x452   : > { %v807_v45 = vadd.f32 %v806_v44, %v805_v26 }
 0x454   : > { %v808_v30 = vrot.slane %v807_v45, 1 }
 0x456   : > { %v809_v48 = vadd.f32 %v808_v30, %v807_v45 }
 0x458   : > { %827 = vbcast.lane.b32.xlu0 %v809_v48, 256  ;;  %v6750_v42 = vsel %vm8623_vm8, %v1053_v63, %v809_v48 }
 0x45c   : > { %488 = vperm.xlu0 %6177, %v426_v46  }
 0x460   : > { %6182 = vset.pattern.permute.xlu0 %v6397_v3 }
 0x461   : > { %568 = vperm.xlu0 %6182, %v426_v46  }
 0x4c0   : > { %v798_v55 = vpop.xlane.xlu1 %797 }
 0x4c1   : > { %v6758_v31 = vrot.slane %v798_v55, %v6598_v22 }
 0x4c4   : > { %v573_v56 = vpop.permute.xlu1 %572 }
 0x4c5   : > { %v608_v57 = vmul.f32 %v573_v56, %v6564_v37 }
 0x4c7   : > { %v624_v59 = vadd.f32 %v608_v57, %v528_v38 }
 0x4c8   : > { %v565_v60 = vpop.permute.xlu1 %564 }
 0x4c9   : > { %v606_v12 = vmul.f32 %v565_v60, %v6564_v37  ;;  %v822_v63 = vmul.f32 %v6758_v31, %v624_v59 }
 0x4ca   : > { %v828_v9 = vpop.permute.xlu0 %827 }
 0x4cb   : > { %v622_v5 = vadd.f32 %v606_v12, %v526_v62  ;;  %v823_v6 = vsel %vm639_vm1, %v822_v63, 0.0 }
 0x4cc   : > { %824 = vadd.xlane.f32.xlu1 %v823_v6 }
 0x4cd   : > { %v829_v11 = vmul.f32 %v828_v9, %v622_v5 }
 0x4cf   : > { %v830_v14 = vsel %vm639_vm1, %v829_v11, 0.0 }
 0x4d0   : > { %v831_v21 = vrot.slane %v830_v14, 4 }
 0x4d2   : > { %v832_v25 = vadd.f32 %v831_v21, %v830_v14 }
 0x4d4   : > { %v833_v27 = vrot.slane %v832_v25, 2 }
 0x4d6   : > { %v834_v23 = vadd.f32 %v833_v27, %v832_v25 }
 0x4d8   : > { %v835_v24 = vrot.slane %v834_v23, 1 }
 0x4da   : > { %v836_v29 = vadd.f32 %v835_v24, %v834_v23 }
 0x4db   : > { %v489_v34 = vpop.permute.xlu0 %488 }
 0x4dc   : > { %854 = vbcast.lane.b32.xlu0 %v836_v29, 256  ;;  %v527_v41 = vmul.f32 %v489_v34, %v6562_v36 }
 0x4e0   : > { %v569_v35 = vpop.permute.xlu0 %568 }
 0x4e1   : > { %v607_v39 = vmul.f32 %v569_v35, %v6564_v37 }
 0x4e3   : > { %v623_v26 = vadd.f32 %v607_v39, %v527_v41 }
 0x54e   : > { %v855_v44 = vpop.permute.xlu0 %854 }
 0x54f   : > { %v856_v45 = vmul.f32 %v855_v44, %v623_v26 }
 0x551   : > { %v857_v30 = vsel %vm639_vm1, %v856_v45, 0.0 }
 0x552   : > { %v858_v48 = vrot.slane %v857_v30, 4 }
 0x554   : > { %v859_v46 = vadd.f32 %v858_v48, %v857_v30 }
 0x556   : > { %v860_v51 = vrot.slane %v859_v46, 2 }
 0x558   : > { %v861_v55 = vadd.f32 %v860_v51, %v859_v46 }
 0x559   : > { %v825_v56 = vpop.xlane.xlu1 %824 }
 0x55a   : > { %v6769_v38 = vrot.slane %v825_v56, %v6598_v22  ;;  %v862_v57 = vrot.slane %v861_v55, 1 }
 0x55c   : > { %v863_v58 = vadd.f32 %v862_v57, %v861_v55  ;;  %v849_v60 = vmul.f32 %v6769_v38, %v623_v26 }
 0x55e   : > { %881 = vbcast.lane.b32.xlu1 %v863_v58, 256  ;;  %v850_v62 = vsel %vm639_vm1, %v849_v60, 0.0  ;;  %v1056_v23 = vsel %vm1042_vm2, %v836_v29, %v863_v58 }
 0x55f   : > { %851 = vadd.xlane.f32.xlu0 %v850_v62 }
 0x5d0   : > { %v882_v12 = vpop.permute.xlu1 %881 }
 0x5d1   : > { %v883_v63 = vmul.f32 %v882_v12, %v624_v59 }
 0x5d3   : > { %v884_v6 = vsel %vm639_vm1, %v883_v63, 0.0 }
 0x5d4   : > { %v885_v9 = vrot.slane %v884_v6, 4 }
 0x5d6   : > { %v886_v11 = vadd.f32 %v885_v9, %v884_v6 }
 0x5d8   : > { %v887_v14 = vrot.slane %v886_v11, 2 }
 0x5da   : > { %v888_v21 = vadd.f32 %v887_v14, %v886_v11 }
 0x5dc   : > { %v889_v25 = vrot.slane %v888_v21, 1 }
 0x5de   : > { %v890_v27 = vadd.f32 %v889_v25, %v888_v21 }
 0x5e0   : > { %908 = vbcast.lane.b32.xlu1 %v890_v27, 256  ;;  %v1057_v24 = vsel %vm1044_vm3, %v1056_v23, %v890_v27 }
 0x5ec   : > { %v852_v34 = vpop.xlane.xlu0 %851 }
 0x5ed   : > { %v6777_v35 = vrot.slane %v852_v34, %v6598_v22 }
 0x5ef   : > { %v876_v39 = vmul.f32 %v6777_v35, %v622_v5 }
 0x5f1   : > { %v877_v59 = vsel %vm639_vm1, %v876_v39, 0.0 }
 0x5f2   : > { %878 = vadd.xlane.f32.xlu0 %v877_v59 }
 0x652   : > { %v909_v41 = vpop.permute.xlu1 %908 }
 0x653   : > { %v910_v26 = vmul.f32 %v909_v41, %v6734_v16 }
 0x655   : > { %v911_v44 = vsel %vm639_vm1, %v910_v26, 0.0  ;;  %v1093_v26 = vsel %vm1042_vm2, %v6769_v38, %v6758_v31  ;;  %v1084_v31 = vrot.slane %v6569_v40, 1 }
 0x656   : > { %v912_v45 = vrot.slane %v911_v44, 4 }
 0x658   : > { %v913_v30 = vadd.f32 %v912_v45, %v911_v44 }
 0x65a   : > { %v914_v29 = vrot.slane %v913_v30, 2 }
 0x65c   : > { %v915_v48 = vadd.f32 %v914_v29, %v913_v30 }
 0x65e   : > { %v916_v46 = vrot.slane %v915_v48, 1 }
 0x660   : > { %v917_v51 = vadd.f32 %v916_v46, %v915_v48 }
 0x662   : > { %935 = vbcast.lane.b32.xlu1 %v917_v51, 256  ;;  %v1058_v55 = vsel %vm1046_vm4, %v1057_v24, %v917_v51 }
 0x67f   : > { %v879_v56 = vpop.xlane.xlu0 %878 }
 0x680   : > { %v6785_v5 = vrot.slane %v879_v56, %v6598_v22 }
 0x682   : > { %v903_v57 = vmul.f32 %v6785_v5, %v6744_v32 }
 0x684   : > { %v904_v16 = vsel %vm639_vm1, %v903_v57, 0.0 }
 0x685   : > { %905 = vadd.xlane.f32.xlu0 %v904_v16 }
 0x6d4   : > { %v936_v58 = vpop.permute.xlu1 %935 }
 0x6d5   : > { %v937_v60 = vmul.f32 %v936_v58, %v6715_v43 }
 0x6d7   : > { %v938_v62 = vsel %vm639_vm1, %v937_v60, 0.0 }
 0x6d8   : > { %v939_v12 = vrot.slane %v938_v62, 4 }
 0x6da   : > { %v940_v63 = vadd.f32 %v939_v12, %v938_v62 }
 0x6dc   : > { %v941_v6 = vrot.slane %v940_v63, 2 }
 0x6de   : > { %v942_v9 = vadd.f32 %v941_v6, %v940_v63 }
 0x6e0   : > { %v943_v11 = vrot.slane %v942_v9, 1 }
 0x6e2   : > { %v944_v14 = vadd.f32 %v943_v11, %v942_v9 }
 0x6e4   : > { %962 = vbcast.lane.b32.xlu1 %v944_v14, 256  ;;  %v1059_v21 = vsel %vm1048_vm5, %v1058_v55, %v944_v14 }
 0x712   : > { %v906_v25 = vpop.xlane.xlu0 %905 }
 0x713   : > { %v6794_v32 = vrot.slane %v906_v25, %v6598_v22 }
 0x715   : > { %v930_v27 = vmul.f32 %v6794_v32, %v6727_v52  ;;  %v1094_v52 = vsel %vm1044_vm3, %v1093_v26, %v6737_v17 }
 0x716   : > { %v1095_v29 = vsel %vm1046_vm4, %v1094_v52, %v6713_v28 }
 0x717   : > { %v931_v43 = vsel %vm639_vm1, %v930_v27, 0.0  ;;  %v1096_v48 = vsel %vm1048_vm5, %v1095_v29, %v6685_v54 }
 0x718   : > { %932 = vadd.xlane.f32.xlu0 %v931_v43  ;;  %v1097_v46 = vsel %vm1050_vm6, %v1096_v48, %v6651_v8 }
 0x719   : > { %v1098_v38 = vsel %vm8624_vm7, %v1097_v46, %v6607_v33 }
 0x71a   : > { %v1099_v17 = vsel %vm8623_vm8, %v1098_v38, %v1084_v31 }
 0x71b   : > { %v1151_v28 = vcombine.high %v1099_v17, %v1099_v17  ;;  %v1158_v51 = vrot.slane %v1099_v17, %v6520_v13 }
 0x71d   : > { %v1165_v55 = vrot.slane %v1151_v28, %v6520_v13  ;;  %v1174_v56 = vrot.slane %v1158_v51, %v6520_v13  ;;  %v1166_v43 = vcombine.high %v1158_v51, %v1158_v51 }
 0x71f   : > { %v1167_v54 = vcombine.high %v1165_v55, %v1165_v55  ;;  %v1235_v57 = vrot.slane %v1174_v56, %v6513_v2  ;;  %v6827_v16 = vrot.slane %v1165_v55, %v6520_v13  ;;  %v1196_v52 = vcombine.high %v1174_v56, %v1174_v56 }
 0x721   : > { %v1195_v8 = vrot.slane %v1167_v54, %v6520_v13  ;;  %v1288_v33 = vmul.f32 %v1235_v57, %v6562_v36  ;;  %v1197_v60 = vcombine.high %v6827_v16, %v6827_v16  ;;  %v1243_v48 = vrot.slane %v1196_v52, %v6513_v2 }
 0x723   : > { %v6831_v58 = vrot.slane %v1195_v8, %v6513_v2  ;;  %v1320_v62 = vsel %vm639_vm1, %v1288_v33, 0.0  ;;  %v6839_v63 = vrot.slane %v1197_v60, %v6513_v2  ;;  %v1199_v6 = vcombine.high %v1195_v8, %v1195_v8 }
 0x724   : > { %v1290_v46 = vmul.f32 %v1243_v48, %v6562_v36 }
 0x725   : > { %v1293_v12 = vmul.f32 %v6831_v58, %v6562_v36  ;;  %v1294_v11 = vmul.f32 %v6839_v63, %v6562_v36  ;;  %v6845_v14 = vrot.slane %v1199_v6, %v6513_v2 }
 0x726   : > { %v1326_v38 = vsel %vm639_vm1, %v1290_v46, 0.0 }
 0x727   : > { %v1335_v9 = vsel %vm639_vm1, %v1293_v12, 0.0  ;;  %v1295_v25 = vmul.f32 %v6845_v14, %v6562_v36 }
 0x729   : > { %v1341_v27 = vsel %vm639_vm1, %v1295_v25, 0.0 }
 0x756   : > { %v963_v23 = vpop.permute.xlu1 %962 }
 0x757   : > { %v964_v24 = vmul.f32 %v963_v23, %v6682_v53  ;;  %v1188_v23 = vrot.slane %v1166_v43, %v6520_v13 }
 0x759   : > { %v965_v34 = vsel %vm639_vm1, %v964_v24, 0.0  ;;  %v1198_v6 = vcombine.high %v1188_v23, %v1188_v23 }
 0x75a   : > { %v966_v39 = vrot.slane %v965_v34, 4 }
 0x75c   : > { %v967_v59 = vadd.f32 %v966_v39, %v965_v34  ;;  %v1239_v39 = vrot.slane %v1188_v23, %v6513_v2  ;;  %v1251_v23 = vrot.slane %v6827_v16, %v6513_v2  ;;  %v1462_v16 = vmul.f32 %v6839_v63, %v6564_v37 }
 0x75e   : > { %v968_v41 = vrot.slane %v967_v59, 2  ;;  %v1289_v26 = vmul.f32 %v1239_v39, %v6562_v36  ;;  %v1457_v29 = vmul.f32 %v1239_v39, %v6564_v37 }
 0x760   : > { %v969_v44 = vadd.f32 %v968_v41, %v967_v59 }
 0x762   : > { %v970_v45 = vrot.slane %v969_v44, 1 }
 0x764   : > { %v971_v30 = vadd.f32 %v970_v45, %v969_v44  ;;  %v1323_v44 = vsel %vm639_vm1, %v1289_v26, 0.0  ;;  %v1456_v45 = vmul.f32 %v1235_v57, %v6564_v37  ;;  %v1461_v26 = vmul.f32 %v6831_v58, %v6564_v37 }
 0x766   : > { %989 = vbcast.lane.b32.xlu1 %v971_v30, 256  ;;  %v6809_v53 = vsel %vm1050_vm6, %v1059_v21, %v971_v30  ;;  %v1338_v21 = vsel %vm639_vm1, %v1294_v11, 0.0  ;;  %v1488_v30 = vsel %vm639_vm1, %v1456_v45, 0.0  ;;  %v1458_v11 = vmul.f32 %v1243_v48, %v6564_v37 }
 0x767   : > { %v1463_v45 = vmul.f32 %v6845_v14, %v6564_v37 }
 0x768   : > { %v1494_v25 = vsel %vm639_vm1, %v1458_v11, 0.0 }
 0x769   : > { %v1509_v52 = vsel %vm639_vm1, %v1463_v45, 0.0 }
 0x78a   : > { %1321 = vadd.xlane.f32.xlu1 %v1320_v62 }
 0x78e   : > { %1336 = vadd.xlane.f32.xlu1 %v1335_v9 }
 0x792   : > { %1339 = vadd.xlane.f32.xlu1 %v1338_v21  ;;  %v1247_v21 = vrot.slane %v1198_v6, %v6513_v2 }
 0x794   : > { %v1459_v43 = vmul.f32 %v1247_v21, %v6564_v37 }
 0x796   : > { %1342 = vadd.xlane.f32.xlu1 %v1341_v27 }
 0x7a5   : > { %v933_v24 = vpop.xlane.xlu0 %932 }
 0x7a6   : > { %v6853_v34 = vrot.slane %v933_v24, %v6598_v22  ;;  %v1292_v24 = vmul.f32 %v1251_v23, %v6562_v36 }
 0x7a8   : > { %v957_v59 = vmul.f32 %v6853_v34, %v6693_v61  ;;  %v1491_v61 = vsel %vm639_vm1, %v1457_v29, 0.0  ;;  %v1332_v39 = vsel %vm639_vm1, %v1292_v24, 0.0 }
 0x7aa   : > { %v958_v41 = vsel %vm639_vm1, %v957_v59, 0.0  ;;  %v1460_v59 = vmul.f32 %v1251_v23, %v6564_v37 }
 0x7ab   : > { %959 = vadd.xlane.f32.xlu0 %v958_v41 }
 0x7ac   : > { %v1500_v41 = vsel %vm639_vm1, %v1460_v59, 0.0 }
 0x7af   : > { %1324 = vadd.xlane.f32.xlu0 %v1323_v44  ;;  %v1503_v44 = vsel %vm639_vm1, %v1461_v26, 0.0 }
 0x7b3   : > { %1489 = vadd.xlane.f32.xlu0 %v1488_v30 }
 0x7b7   : > { %1492 = vadd.xlane.f32.xlu0 %v1491_v61 }
 0x7bb   : > { %1327 = vadd.xlane.f32.xlu0 %v1326_v38 }
 0x7d8   : > { %v990_v17 = vpop.permute.xlu1 %989 }
 0x7d9   : > { %v991_v28 = vmul.f32 %v990_v17, %v6648_v7 }
 0x7db   : > { %v992_v51 = vsel %vm639_vm1, %v991_v28, 0.0 }
 0x7dc   : > { %v993_v55 = vrot.slane %v992_v51, 4 }
 0x7de   : > { %v994_v56 = vadd.f32 %v993_v55, %v992_v51 }
 0x7e0   : > { %v995_v54 = vrot.slane %v994_v56, 2 }
 0x7e2   : > { %v996_v57 = vadd.f32 %v995_v54, %v994_v56 }
 0x7e4   : > { %v997_v8 = vrot.slane %v996_v57, 1 }
 0x7e6   : > { %v998_v33 = vadd.f32 %v997_v8, %v996_v57 }
 0x7e8   : > { %1016 = vbcast.lane.b32.xlu1 %v998_v33, 256  ;;  %v6872_v60 = vsel %vm8624_vm7, %v6809_v53, %v998_v33  ;;  %v1291_v53 = vmul.f32 %v1247_v21, %v6562_v36  ;;  %v1506_v36 = vsel %vm639_vm1, %v1462_v16, 0.0 }
 0x7ea   : > { %v1329_v27 = vsel %vm639_vm1, %v1291_v53, 0.0 }
 0x817   : > { %v1322_v30 = vpop.xlane.xlu1 %1321 }
 0x818   : > { %v1395_v11 = vrot.slane %v1322_v30, %v6598_v22 }
 0x81b   : > { %v1337_v29 = vpop.xlane.xlu1 %1336 }
 0x81c   : > { %v1415_v23 = vrot.slane %v1337_v29, %v6598_v22 }
 0x81f   : > { %v1340_v48 = vpop.xlane.xlu1 %1339 }
 0x823   : > { %v1343_v61 = vpop.xlane.xlu1 %1342 }
 0x838   : > { %v960_v62 = vpop.xlane.xlu0 %959 }
 0x839   : > { %v6875_v12 = vrot.slane %v960_v62, %v6598_v22 }
 0x83b   : > { %v984_v7 = vmul.f32 %v6875_v12, %v6658_v19  ;;  %v1497_v19 = vsel %vm639_vm1, %v1459_v43, 0.0 }
 0x83c   : > { %v1325_v58 = vpop.xlane.xlu0 %1324 }
 0x83d   : > { %v985_v9 = vsel %vm639_vm1, %v984_v7, 0.0 }
 0x83e   : > { %986 = vadd.xlane.f32.xlu0 %v985_v9 }
 0x840   : > { %v1490_v46 = vpop.xlane.xlu0 %1489 }
 0x842   : > { %1495 = vadd.xlane.f32.xlu0 %v1494_v25 }
 0x844   : > { %v1493_v17 = vpop.xlane.xlu0 %1492 }
 0x845   : > { %v1567_v29 = vrot.slane %v1493_v17, %v6598_v22 }
 0x846   : > { %1330 = vadd.xlane.f32.xlu0 %v1329_v27 }
 0x848   : > { %v1328_v51 = vpop.xlane.xlu0 %1327 }
 0x849   : > { %v1403_v9 = vrot.slane %v1328_v51, %v6598_v22 }
 0x84a   : > { %1498 = vadd.xlane.f32.xlu0 %v1497_v19 }
 0x84e   : > { %1333 = vadd.xlane.f32.xlu0 %v1332_v39  ;;  %v1419_v39 = vrot.slane %v1340_v48, %v6598_v22 }
 0x852   : > { %1501 = vadd.xlane.f32.xlu0 %v1500_v41  ;;  %v1423_v41 = vrot.slane %v1343_v61, %v6598_v22  ;;  %v1563_v61 = vrot.slane %v1490_v46, %v6598_v22 }
 0x856   : > { %1504 = vadd.xlane.f32.xlu0 %v1503_v44 }
 0x85a   : > { %1507 = vadd.xlane.f32.xlu0 %v1506_v36  ;;  %v1017_v38 = vpop.permute.xlu1 %1016 }
 0x85b   : > { %v1018_v63 = vmul.f32 %v1017_v38, %v6604_v0  ;;  %v1399_v0 = vrot.slane %v1325_v58, %v6598_v22 }
 0x85d   : > { %v1019_v28 = vsel %vm639_vm1, %v1018_v63, 0.0 }
 0x85e   : > { %1510 = vadd.xlane.f32.xlu0 %v1509_v52  ;;  %v1020_v55 = vrot.slane %v1019_v28, 4 }
 0x860   : > { %v1021_v14 = vadd.f32 %v1020_v55, %v1019_v28 }
 0x862   : > { %v1022_v33 = vrot.slane %v1021_v14, 2 }
 0x864   : > { %v1023_v6 = vadd.f32 %v1022_v33, %v1021_v14 }
 0x866   : > { %v1024_v21 = vrot.slane %v1023_v6, 1 }
 0x868   : > { %v1025_v24 = vadd.f32 %v1024_v21, %v1023_v6 }
 0x86a   : > { %v1062_v36 = vsel %vm8623_vm8, %v6872_v60, %v1025_v24  ;;  %v1599_v60 = vsel %vm673_vm9, %v1567_v29, %v1563_v61  ;;  %v6973_v29 = vld [vmem:[#allocation3] sm:$0xff] }
 0x8cb   : > { %v987_v56 = vpop.xlane.xlu0 %986 }
 0x8cc   : > { %v6905_v37 = vrot.slane %v987_v56, %v6598_v22 }
 0x8ce   : > { %v1011_v54 = vmul.f32 %v6905_v37, %v6641_v49  ;;  %v1431_v49 = vsel %vm673_vm9, %v1399_v0, %v1395_v11 }
 0x8cf   : > { %v1496_v57 = vpop.xlane.xlu0 %1495  ;;  %v1432_v27 = vsel %vm8627_vm10, %v1403_v9, %v1431_v49 }
 0x8d0   : > { %v1012_v8 = vsel %vm639_vm1, %v1011_v54, 0.0  ;;  %v1571_v58 = vrot.slane %v1496_v57, %v6598_v22 }
 0x8d1   : > { %1013 = vadd.xlane.f32.xlu0 %v1012_v8 }
 0x8d2   : > { %v1600_v55 = vsel %vm8627_vm10, %v1571_v58, %v1599_v60  ;;  %v6978_v58 = vld [vmem:[#allocation3 + $0x8] sm:$0xff] }
 0x8d3   : > { %v1331_v62 = vpop.xlane.xlu0 %1330 }
 0x8d4   : > { %v1407_v25 = vrot.slane %v1331_v62, %v6598_v22 }
 0x8d6   : > { %v1433_v19 = vsel %vm8626_vm11, %v1407_v25, %v1432_v27 }
 0x8d7   : > { %v1499_v7 = vpop.xlane.xlu0 %1498 }
 0x8d8   : > { %v1575_v38 = vrot.slane %v1499_v7, %v6598_v22 }
 0x8da   : > { %v1601_v56 = vsel %vm8626_vm11, %v1575_v38, %v1600_v55 }
 0x8db   : > { %v1334_v53 = vpop.xlane.xlu0 %1333 }
 0x8dc   : > { %v1411_v43 = vrot.slane %v1334_v53, %v6598_v22 }
 0x8de   : > { %v1434_v59 = vsel %vm8625_vm12, %v1411_v43, %v1433_v19 }
 0x8df   : > { %v1502_v26 = vpop.xlane.xlu0 %1501  ;;  %v1435_v44 = vsel %vm680_vm13, %v1415_v23, %v1434_v59 }
 0x8e0   : > { %v1436_v16 = vsel %vm682_vm14, %v1419_v39, %v1435_v44  ;;  %v1579_v63 = vrot.slane %v1502_v26, %v6598_v22 }
 0x8e1   : > { %v1437_v45 = vsel %vm8622_vm15, %v1423_v41, %v1436_v16 }
 0x8e2   : > { %v1441_v52 = vmul.f32 %v1437_v45, %v1062_v36  ;;  %v1602_v14 = vsel %vm8625_vm12, %v1579_v63, %v1601_v56 }
 0x8e3   : > { %v1505_v30 = vpop.xlane.xlu0 %1504 }
 0x8e4   : > { %v1445_v48 = vsel %vm639_vm1, %v1441_v52, 0.0  ;;  %v1583_v51 = vrot.slane %v1505_v30, %v6598_v22 }
 0x8e5   : > { %1446 = vadd.xlane.f32.xlu0 %v1445_v48 }
 0x8e6   : > { %v1603_v46 = vsel %vm680_vm13, %v1583_v51, %v1602_v14 }
 0x8e7   : > { %v1508_v28 = vpop.xlane.xlu0 %1507 }
 0x8e8   : > { %v1587_v17 = vrot.slane %v1508_v28, %v6598_v22 }
 0x8ea   : > { %v1604_v8 = vsel %vm682_vm14, %v1587_v17, %v1603_v46 }
 0x8eb   : > { %v1511_v54 = vpop.xlane.xlu0 %1510 }
 0x8ec   : > { %v1591_v57 = vrot.slane %v1511_v54, %v6598_v22 }
 0x8ee   : > { %v1605_v33 = vsel %vm8622_vm15, %v1591_v57, %v1604_v8  ;;  %vm1622_vm15 = vcmask 15360  }
 0x8ef   : > { %v1609_v62 = vmul.f32 %v1605_v33, %v1062_v36 }
 0x8f1   : > { %v1613_v6 = vsel %vm639_vm1, %v1609_v62, 0.0 }
 0x8f2   : > { %1614 = vadd.xlane.f32.xlu0 %v1613_v6 }
 0x95e   : > { %v1014_v0 = vpop.xlane.xlu0 %1013 }
 0x95f   : > { %v1030_v7 = vrot.slane %v1014_v0, %v6598_v22 }
 0x961   : > { %v1038_v9 = vmul.f32 %v1030_v7, %v6589_v10 }
 0x963   : > { %v1039_v11 = vsel %vm639_vm1, %v1038_v9, 0.0 }
 0x964   : > { %1040 = vadd.xlane.f32.xlu0 %v1039_v11 }
 0x972   : > { %v1447_v21 = vpop.xlane.xlu0 %1446 }
 0x97f   : > { %v1615_v25 = vpop.xlane.xlu0 %1614 }
 0x980   : > { %v1617_v49 = vsel %vm282_vm0, %v1447_v21, %v1615_v25 }
 0x981   : > { %6251 = vtanh.f32 %v1617_v49 }
 0x98b   : > { %v6948_v53 = vpop.eup %6251 }
 0x98c   : > { %v1621_v27 = vmul.f32 %v6948_v53, %v6948_v53 }
 0x98e   : > { %v1626_v43 = vsel %vm1622_vm15, %v1621_v27, 0.0 }
 0x98f   : > { %1627 = vadd.xlane.f32.xlu1 %v1626_v43 }
 0x9f1   : > { %v1041_v23 = vpop.xlane.xlu0 %1040 }
 0x9f2   : > { %v1067_v10 = vrot.slane %v1041_v23, %v6598_v22 }
 0x9f4   : > { %v1086_v19 = vsel %vm1042_vm2, %v1067_v10, %v1030_v7 }
 0x9f5   : > { %v1087_v24 = vsel %vm1044_vm3, %v1086_v19, %v6905_v37 }
 0x9f6   : > { %v1088_v39 = vsel %vm1046_vm4, %v1087_v24, %v6875_v12 }
 0x9f7   : > { %v1089_v59 = vsel %vm1048_vm5, %v1088_v39, %v6853_v34 }
 0x9f8   : > { %v1090_v41 = vsel %vm1050_vm6, %v1089_v59, %v6794_v32 }
 0x9f9   : > { %v1091_v26 = vsel %vm8624_vm7, %v1090_v41, %v6785_v5 }
 0x9fa   : > { %v1092_v44 = vsel %vm8623_vm8, %v1091_v26, %v6777_v35 }
 0x9fb   : > { %v1109_v16 = vrot.slane %v1092_v44, %v6520_v13  ;;  %v1102_v36 = vcombine.high %v1092_v44, %v1092_v44 }
 0x9fd   : > { %v1125_v37 = vrot.slane %v1109_v16, %v6520_v13  ;;  %v1116_v45 = vrot.slane %v1102_v36, %v6520_v13  ;;  %v1117_v12 = vcombine.high %v1109_v16, %v1109_v16 }
 0x9ff   : > { %v1203_v52 = vrot.slane %v1125_v37, %v6513_v2  ;;  %v1132_v34 = vrot.slane %v1116_v45, %v6520_v13  ;;  %v1118_v30 = vcombine.high %v1116_v45, %v1116_v45  ;;  %v1139_v32 = vrot.slane %v1117_v12, %v6520_v13 }
 0xa00   : > { %v1147_v57 = vcombine.high %v1125_v37, %v1125_v37 }
 0xa01   : > { %v1280_v5 = vmul.f32 %v6973_v29, %v1203_v52  ;;  %v1219_v35 = vrot.slane %v1132_v34, %v6513_v2  ;;  %v1146_v48 = vrot.slane %v1118_v30, %v6520_v13  ;;  %v1448_v61 = vmul.f32 %v6978_v58, %v1203_v52 }
 0xa02   : > { %v1148_v38 = vcombine.high %v1132_v34, %v1132_v34  ;;  %v1207_v51 = vrot.slane %v1139_v32, %v6513_v2  ;;  %v1211_v7 = vrot.slane %v1147_v57, %v6513_v2  ;;  %v1149_v23 = vcombine.high %v1139_v32, %v1139_v32 }
 0xa03   : > { %v1296_v63 = vsel %vm639_vm1, %v1280_v5, 0.0  ;;  %v1452_v28 = vmul.f32 %v6978_v58, %v1219_v35  ;;  %v1223_v60 = vrot.slane %v1146_v48, %v6513_v2  ;;  %v1150_v14 = vcombine.high %v1146_v48, %v1146_v48 }
 0xa04   : > { %1297 = vadd.xlane.f32.xlu0 %v1296_v63  ;;  %v1227_v56 = vrot.slane %v1148_v38, %v6513_v2  ;;  %v1464_v54 = vsel %vm639_vm1, %v1448_v61, 0.0  ;;  %v1281_v46 = vmul.f32 %v6973_v29, %v1207_v51  ;;  %v1449_v0 = vmul.f32 %v6978_v58, %v1207_v51 }
 0xa05   : > { %v1476_v55 = vsel %vm639_vm1, %v1452_v28, 0.0  ;;  %v1453_v17 = vmul.f32 %v6978_v58, %v1223_v60  ;;  %v1231_v62 = vrot.slane %v1150_v14, %v6513_v2  ;;  %v1282_v25 = vmul.f32 %v6973_v29, %v1211_v7 }
 0xa06   : > { %1477 = vadd.xlane.f32.xlu1 %v1476_v55  ;;  %v1454_v33 = vmul.f32 %v6978_v58, %v1227_v56  ;;  %v1299_v6 = vsel %vm639_vm1, %v1281_v46, 0.0  ;;  %v1467_v21 = vsel %vm639_vm1, %v1449_v0, 0.0  ;;  %v1450_v43 = vmul.f32 %v6978_v58, %v1211_v7 }
 0xa07   : > { %v1479_v8 = vsel %vm639_vm1, %v1453_v17, 0.0  ;;  %v1455_v11 = vmul.f32 %v6978_v58, %v1231_v62  ;;  %v1302_v27 = vsel %vm639_vm1, %v1282_v25, 0.0  ;;  %v1284_v19 = vmul.f32 %v6973_v29, %v1219_v35 }
 0xa08   : > { %1465 = vadd.xlane.f32.xlu0 %v1464_v54  ;;  %v1482_v9 = vsel %vm639_vm1, %v1454_v33, 0.0  ;;  %v1470_v10 = vsel %vm639_vm1, %v1450_v43, 0.0  ;;  %v1215_v24 = vrot.slane %v1149_v23, %v6513_v2  ;;  %v1285_v36 = vmul.f32 %v6973_v29, %v1223_v60 }
 0xa09   : > { %v1485_v49 = vsel %vm639_vm1, %v1455_v11, 0.0  ;;  %v1308_v39 = vsel %vm639_vm1, %v1284_v19, 0.0  ;;  %v1286_v12 = vmul.f32 %v6973_v29, %v1227_v56  ;;  %v1287_v35 = vmul.f32 %v6973_v29, %v1231_v62 }
 0xa0a   : > { %1480 = vadd.xlane.f32.xlu1 %v1479_v8  ;;  %v1283_v59 = vmul.f32 %v6973_v29, %v1215_v24  ;;  %v1451_v44 = vmul.f32 %v6978_v58, %v1215_v24  ;;  %v1311_v45 = vsel %vm639_vm1, %v1285_v36, 0.0 }
 0xa0b   : > { %v1314_v5 = vsel %vm639_vm1, %v1286_v12, 0.0  ;;  %v1317_v61 = vsel %vm639_vm1, %v1287_v35, 0.0 }
 0xa0c   : > { %1300 = vadd.xlane.f32.xlu0 %v1299_v6  ;;  %v1305_v26 = vsel %vm639_vm1, %v1283_v59, 0.0  ;;  %v1473_v16 = vsel %vm639_vm1, %v1451_v44, 0.0 }
 0xa0e   : > { %1483 = vadd.xlane.f32.xlu1 %v1482_v9 }
 0xa10   : > { %1468 = vadd.xlane.f32.xlu0 %v1467_v21 }
 0xa12   : > { %1486 = vadd.xlane.f32.xlu1 %v1485_v49 }
 0xa14   : > { %1303 = vadd.xlane.f32.xlu0 %v1302_v27 }
 0xa18   : > { %1471 = vadd.xlane.f32.xlu0 %v1470_v10 }
 0xa1c   : > { %v1628_v41 = vpop.xlane.xlu1 %1627  ;;  %1309 = vadd.xlane.f32.xlu0 %v1308_v39 }
 0xa1d   : > { %6253 = vrsqrt.f32 %v1628_v41  ;;  %vm1638_vm8 = vcmp.eq.f32.partialorder %v1628_v41, inf  ;;  %v1641_v34 = vand.u32 2147483648, %v1628_v41  ;;  %vm1640_vm7 = vcmp.eq.f32.partialorder %v1628_v41, 0.0 }
 0xa20   : > { %1306 = vadd.xlane.f32.xlu0 %v1305_v26 }
 0xa24   : > { %1474 = vadd.xlane.f32.xlu0 %v1473_v16 }
 0xa27   : > { %v6254_v37 = vpop.eup %6253 }
 0xa28   : > { %v1637_v52 = vmul.f32 %v6254_v37, %v1628_v41  ;;  %1312 = vadd.xlane.f32.xlu0 %v1311_v45 }
 0xa2a   : > { %v1639_v30 = vsel %vm1638_vm8, %v1628_v41, %v1637_v52 }
 0xa2b   : > { %v1642_v32 = vsel %vm1640_vm7, %v1641_v34, %v1639_v30  ;;  %vm8633_vm7 = vcmask 1047559  }
 0xa2c   : > { %v1644_v48 = vadd.f32 1e-06, %v1642_v32  ;;  %1315 = vadd.xlane.f32.xlu0 %v1314_v5  ;;  %vm8634_vm8 = vmmov %vm8633_vm7 }
 0xa2e   : > { %6255 = vrcp.f32 %v1644_v48 }
 0xa30   : > { %1318 = vadd.xlane.f32.xlu0 %v1317_v61 }
 0xa38   : > { %v6256_v38 = vpop.eup %6255 }
 0xa39   : > { %v1648_v63 = vmul.f32 %v6256_v38, %v6948_v53 }
 0xa3b   : > { %v7019_v28 = vadd.f32 %v1648_v63, %v6529_v20 }
 0xa3d   : > { %v1652_v60 = vmul.f32 %v7019_v28, %v7019_v28 }
 0xa3f   : > { %v1656_v51 = vsel %vm1622_vm15, %v1652_v60, 0.0 }
 0xa40   : > { %1657 = vadd.xlane.f32.xlu0 %v1656_v51 }
 0xa91   : > { %v1298_v55 = vpop.xlane.xlu0 %1297 }
 0xa92   : > { %v1363_v41 = vrot.slane %v1298_v55, %v6598_v22 }
 0xa93   : > { %v1478_v54 = vpop.xlane.xlu1 %1477 }
 0xa94   : > { %v1547_v25 = vrot.slane %v1478_v54, %v6598_v22 }
 0xa95   : > { %v1466_v17 = vpop.xlane.xlu0 %1465 }
 0xa96   : > { %v1531_v7 = vrot.slane %v1466_v17, %v6598_v22 }
 0xa97   : > { %v1481_v8 = vpop.xlane.xlu1 %1480 }
 0xa98   : > { %v1551_v43 = vrot.slane %v1481_v8, %v6598_v22 }
 0xa99   : > { %v1301_v56 = vpop.xlane.xlu0 %1300 }
 0xa9a   : > { %v1367_v23 = vrot.slane %v1301_v56, %v6598_v22 }
 0xa9b   : > { %v1484_v62 = vpop.xlane.xlu1 %1483 }
 0xa9c   : > { %v1555_v19 = vrot.slane %v1484_v62, %v6598_v22  ;;  %v1424_v37 = vsel %vm673_vm9, %v1367_v23, %v1363_v41 }
 0xa9d   : > { %v1469_v14 = vpop.xlane.xlu0 %1468 }
 0xa9e   : > { %v1535_v6 = vrot.slane %v1469_v14, %v6598_v22 }
 0xa9f   : > { %v1487_v49 = vpop.xlane.xlu1 %1486 }
 0xaa0   : > { %v1592_v11 = vsel %vm673_vm9, %v1535_v6, %v1531_v7  ;;  %v1559_v26 = vrot.slane %v1487_v49, %v6598_v22 }
 0xaa1   : > { %v1304_v46 = vpop.xlane.xlu0 %1303 }
 0xaa2   : > { %v1371_v24 = vrot.slane %v1304_v46, %v6598_v22 }
 0xaa4   : > { %v1425_v12 = vsel %vm8627_vm10, %v1371_v24, %v1424_v37 }
 0xaa5   : > { %v1472_v57 = vpop.xlane.xlu0 %1471 }
 0xaa6   : > { %v1539_v0 = vrot.slane %v1472_v57, %v6598_v22 }
 0xaa8   : > { %v1593_v27 = vsel %vm8627_vm10, %v1539_v0, %v1592_v11 }
 0xaa9   : > { %v1310_v33 = vpop.xlane.xlu0 %1309 }
 0xaaa   : > { %v1379_v5 = vrot.slane %v1310_v33, %v6598_v22 }
 0xaad   : > { %v1307_v53 = vpop.xlane.xlu0 %1306 }
 0xaae   : > { %v1375_v44 = vrot.slane %v1307_v53, %v6598_v22 }
 0xab0   : > { %v1426_v30 = vsel %vm8626_vm11, %v1375_v44, %v1425_v12 }
 0xab1   : > { %v1475_v9 = vpop.xlane.xlu0 %1474  ;;  %v1427_v61 = vsel %vm8625_vm12, %v1379_v5, %v1426_v30 }
 0xab2   : > { %v1543_v21 = vrot.slane %v1475_v9, %v6598_v22 }
 0xab4   : > { %v1594_v10 = vsel %vm8626_vm11, %v1543_v21, %v1593_v27 }
 0xab5   : > { %v1595_v39 = vsel %vm8625_vm12, %v1547_v25, %v1594_v10  ;;  %v1313_v59 = vpop.xlane.xlu0 %1312 }
 0xab6   : > { %v1596_v16 = vsel %vm680_vm13, %v1551_v43, %v1595_v39  ;;  %v1383_v32 = vrot.slane %v1313_v59, %v6598_v22 }
 0xab7   : > { %v1597_v36 = vsel %vm682_vm14, %v1555_v19, %v1596_v16 }
 0xab8   : > { %v1598_v45 = vsel %vm8633_vm7, %v1559_v26, %v1597_v36  ;;  %v1428_v63 = vsel %vm680_vm13, %v1383_v32, %v1427_v61 }
 0xab9   : > { %v1316_v52 = vpop.xlane.xlu0 %1315  ;;  %v1608_v34 = vmul.f32 %v1598_v45, %v6750_v42 }
 0xaba   : > { %v1387_v35 = vrot.slane %v1316_v52, %v6598_v22 }
 0xabb   : > { %v1610_v48 = vsel %vm639_vm1, %v1608_v34, 0.0 }
 0xabc   : > { %1611 = vadd.xlane.f32.xlu0 %v1610_v48  ;;  %v1429_v51 = vsel %vm682_vm14, %v1387_v35, %v1428_v63 }
 0xabd   : > { %v1319_v38 = vpop.xlane.xlu0 %1318 }
 0xabe   : > { %v1391_v60 = vrot.slane %v1319_v38, %v6598_v22 }
 0xac0   : > { %v1430_v55 = vsel %vm8634_vm8, %v1391_v60, %v1429_v51 }
 0xac1   : > { %v1440_v17 = vmul.f32 %v1430_v55, %v6750_v42 }
 0xac3   : > { %v1442_v56 = vsel %vm639_vm1, %v1440_v17, 0.0 }
 0xac4   : > { %1443 = vadd.xlane.f32.xlu1 %v1442_v56 }
 0xacd   : > { %v1658_v14 = vpop.xlane.xlu0 %1657 }
 0xace   : > { %6257 = vrsqrt.f32 %v1658_v14  ;;  %vm1668_vm7 = vcmp.eq.f32.partialorder %v1658_v14, inf  ;;  %v1671_v57 = vand.u32 2147483648, %v1658_v14  ;;  %vm1670_vm12 = vcmp.eq.f32.partialorder %v1658_v14, 0.0 }
 0xad8   : > { %v6258_v54 = vpop.eup %6257 }
 0xad9   : > { %v1667_v46 = vmul.f32 %v6258_v54, %v1658_v14 }
 0xadb   : > { %v1669_v8 = vsel %vm1668_vm7, %v1658_v14, %v1667_v46 }
 0xadc   : > { %v1672_v33 = vsel %vm1670_vm12, %v1671_v57, %v1669_v8 }
 0xadd   : > { %v1674_v62 = vadd.f32 1e-06, %v1672_v33 }
 0xadf   : > { %6259 = vrcp.f32 %v1674_v62 }
 0xae9   : > { %v6260_v53 = vpop.eup %6259 }
 0xaea   : > { %v7059_v6 = vmul.f32 %v6260_v53, %v7019_v28 }
 0xaec   : > { %v1730_v42 = vcombine.high %v7059_v6, %v7059_v6 }
 0xaee   : > { %v1744_v0 = vrot.slane %v1730_v42, %v6520_v13 }
 0xaf0   : > { %v1746_v7 = vcombine.high %v1744_v0, %v1744_v0  ;;  %v7069_v10 = vrot.slane %v1744_v0, %v6520_v13 }
 0xaf2   : > { %v1774_v9 = vrot.slane %v1746_v7, %v6520_v13  ;;  %v1776_v19 = vcombine.high %v7069_v10, %v7069_v10 }
 0xaf4   : > { %v1778_v11 = vcombine.high %v1774_v9, %v1774_v9  ;;  %v1838_v24 = vrot.slane %v1776_v19, %v6513_v2  ;;  %v1834_v46 = vrot.slane %v1774_v9, %v6513_v2 }
 0xaf6   : > { %v1842_v21 = vrot.slane %v1778_v11, %v6513_v2 }
 0xaf8   : > { %1984 = vperm.xlu0 %6182, %v1842_v21   ;;  %1904 = vperm.xlu1 %6183, %v1842_v21  }
 0xb49   : > { %v1612_v25 = vpop.xlane.xlu0 %1611 }
 0xb51   : > { %v1444_v49 = vpop.xlane.xlu1 %1443 }
 0xb52   : > { %v1616_v27 = vsel %vm282_vm0, %v1444_v49, %v1612_v25 }
 0xb53   : > { %6261 = vtanh.f32 %v1616_v27 }
 0xb5d   : > { %v6262_v28 = vpop.eup %6261 }
 0xb5e   : > { %v1620_v43 = vmul.f32 %v6262_v28, %v6262_v28 }
 0xb60   : > { %v1623_v23 = vsel %vm1622_vm15, %v1620_v43, 0.0 }
 0xb61   : > { %1624 = vadd.xlane.f32.xlu1 %v1623_v23 }
 0xb72   : > { %1900 = vperm.xlu1 %6183, %v1838_v24  }
 0xb77   : > { %v1905_v39 = vpop.permute.xlu1 %1904  ;;  %v1985_v59 = vpop.permute.xlu0 %1984 }
 0xb78   : > { %v1922_v41 = vmul.f32 %v6973_v29, %v1905_v39  ;;  %v2002_v26 = vmul.f32 %v6978_v58, %v1985_v59 }
 0xb7a   : > { %v2018_v44 = vadd.f32 %v2002_v26, %v1922_v41 }
 0xb7c   : > { %v2027_v16 = vmul.f32 %v2018_v44, %v6577_v47 }
 0xb7e   : > { %v2028_v36 = vsel %vm639_vm1, %v2027_v16, 0.0 }
 0xb7f   : > { %2029 = vadd.xlane.f32.xlu0 %v2028_v36  ;;  %v1830_v36 = vrot.slane %v7069_v10, %v6513_v2 }
 0xb95   : > { %1980 = vperm.xlu0 %6182, %v1838_v24   ;;  %v7106_v24 = vrot.slane %v7059_v6, %v6520_v13 }
 0xb97   : > { %v1745_v41 = vcombine.high %v7106_v24, %v7106_v24 }
 0xb99   : > { %v7115_v44 = vrot.slane %v1745_v41, %v6520_v13 }
 0xb9b   : > { %v1777_v16 = vcombine.high %v7115_v44, %v7115_v44 }
 0xbee   : > { %v1625_v37 = vpop.xlane.xlu1 %1624 }
 0xbef   : > { %6263 = vrsqrt.f32 %v1625_v37  ;;  %vm1631_vm12 = vcmp.eq.f32.partialorder %v1625_v37, inf  ;;  %v1634_v52 = vand.u32 2147483648, %v1625_v37  ;;  %vm1633_vm8 = vcmp.eq.f32.partialorder %v1625_v37, 0.0 }
 0xbf2   : > { %v1901_v63 = vpop.permute.xlu1 %1900 }
 0xbf3   : > { %v1921_v51 = vmul.f32 %v6973_v29, %v1901_v63 }
 0xbf9   : > { %v6264_v45 = vpop.eup %6263 }
 0xbfa   : > { %v1630_v12 = vmul.f32 %v6264_v45, %v1625_v37  ;;  %v1826_v45 = vrot.slane %v1777_v16, %v6513_v2 }
 0xbfc   : > { %v1632_v34 = vsel %vm1631_vm12, %v1625_v37, %v1630_v12 }
 0xbfd   : > { %v1635_v30 = vsel %vm1633_vm8, %v1634_v52, %v1632_v34  ;;  %vm8635_vm8 = vcmask 1045504  }
 0xbfe   : > { %v1643_v32 = vadd.f32 1e-06, %v1635_v30 }
 0xc00   : > { %6265 = vrcp.f32 %v1643_v32 }
 0xc0a   : > { %v6266_v5 = vpop.eup %6265 }
 0xc0b   : > { %v1646_v35 = vmul.f32 %v6266_v5, %v6262_v28 }
 0xc0c   : > { %v2030_v61 = vpop.xlane.xlu0 %2029 }
 0xc0d   : > { %v1649_v48 = vadd.f32 %v1646_v35, %v6523_v15  ;;  %v7083_v17 = vrot.slane %v2030_v61, %v6598_v22 }
 0xc0f   : > { %v1651_v47 = vmul.f32 %v1649_v48, %v1649_v48 }
 0xc11   : > { %v1653_v38 = vsel %vm1622_vm15, %v1651_v47, 0.0 }
 0xc12   : > { %1654 = vadd.xlane.f32.xlu1 %v1653_v38 }
 0xc14   : > { %v1981_v60 = vpop.permute.xlu0 %1980 }
 0xc15   : > { %v2001_v55 = vmul.f32 %v6978_v58, %v1981_v60 }
 0xc17   : > { %v7085_v56 = vadd.f32 %v2001_v55, %v1921_v51 }
 0xc19   : > { %v2054_v14 = vmul.f32 %v7083_v17, %v7085_v56 }
 0xc1b   : > { %v2055_v54 = vsel %vm639_vm1, %v2054_v14, 0.0 }
 0xc1c   : > { %2056 = vadd.xlane.f32.xlu0 %v2055_v54 }
 0xc23   : > { %1896 = vperm.xlu1 %6183, %v1834_v46  }
 0xc32   : > { %1976 = vperm.xlu0 %6182, %v1834_v46  }
 0xc36   : > { %6189 = vset.pattern.permute.xlu0 %v6398_v4 }
 0xc9f   : > { %v1655_v57 = vpop.xlane.xlu1 %1654 }
 0xca0   : > { %6267 = vrsqrt.f32 %v1655_v57  ;;  %vm1661_vm7 = vcmp.eq.f32.partialorder %v1655_v57, inf  ;;  %v1664_v62 = vand.u32 2147483648, %v1655_v57  ;;  %vm1663_vm12 = vcmp.eq.f32.partialorder %v1655_v57, 0.0 }
 0xca3   : > { %v1897_v11 = vpop.permute.xlu1 %1896 }
 0xca4   : > { %v1920_v9 = vmul.f32 %v6973_v29, %v1897_v11 }
 0xca9   : > { %v2057_v42 = vpop.xlane.xlu0 %2056 }
 0xcaa   : > { %v6268_v8 = vpop.eup %6267  ;;  %v7095_v49 = vrot.slane %v2057_v42, %v6598_v22 }
 0xcab   : > { %v1660_v33 = vmul.f32 %v6268_v8, %v1655_v57 }
 0xcad   : > { %v1662_v53 = vsel %vm1661_vm7, %v1655_v57, %v1660_v33  ;;  %vm8636_vm7 = vcmask 1046528  }
 0xcae   : > { %v1665_v0 = vsel %vm1663_vm12, %v1664_v62, %v1662_v53  ;;  %vm8637_vm12 = vmmov %vm8635_vm8 }
 0xcaf   : > { %v1673_v7 = vadd.f32 1e-06, %v1665_v0 }
 0xcb1   : > { %6269 = vrcp.f32 %v1673_v7  ;;  %v1977_v21 = vpop.permute.xlu0 %1976 }
 0xcb2   : > { %v2000_v25 = vmul.f32 %v6978_v58, %v1977_v21 }
 0xcb4   : > { %v7097_v27 = vadd.f32 %v2000_v25, %v1920_v9 }
 0xcb6   : > { %v2081_v28 = vmul.f32 %v7095_v49, %v7097_v27 }
 0xcb8   : > { %v2082_v43 = vsel %vm639_vm1, %v2081_v28, 0.0 }
 0xcb9   : > { %2083 = vadd.xlane.f32.xlu0 %v2082_v43 }
 0xcbb   : > { %v6270_v23 = vpop.eup %6269 }
 0xcbc   : > { %v7102_v19 = vmul.f32 %v6270_v23, %v1649_v48 }
 0xcbe   : > { %v1688_v39 = vrot.slane %v7102_v19, %v6520_v13 }
 0xcc0   : > { %v1704_v59 = vrot.slane %v1688_v39, %v6520_v13  ;;  %v1696_v12 = vcombine.high %v1688_v39, %v1688_v39 }
 0xcc2   : > { %v1782_v26 = vrot.slane %v1704_v59, %v6513_v2  ;;  %v1726_v37 = vcombine.high %v1704_v59, %v1704_v59  ;;  %v1718_v34 = vrot.slane %v1696_v12, %v6520_v13 }
 0xcc4   : > { %1844 = vperm.xlu1 %6183, %v1782_v26   ;;  %v1790_v52 = vrot.slane %v1726_v37, %v6513_v2  ;;  %v1786_v30 = vrot.slane %v1718_v34, %v6513_v2 }
 0xcc8   : > { %6184 = vset.pattern.permute.xlu1 %v6397_v3 }
 0xcc9   : > { %1924 = vperm.xlu1 %6184, %v1782_v26   ;;  %v7153_v26 = vrot.slane %v7106_v24, %v6520_v13 }
 0xccb   : > { %v1775_v37 = vcombine.high %v7153_v26, %v7153_v26 }
 0xccd   : > { %6185 = vset.pattern.permute.xlu1 %v6398_v4 }
 0xcce   : > { %1892 = vperm.xlu1 %6185, %v1830_v36  }
 0xccf   : > { %1888 = vperm.xlu0 %6189, %v1826_v45  }
 0xcd2   : > { %6186 = vset.pattern.permute.xlu1 %v6397_v3 }
 0xcd3   : > { %1972 = vperm.xlu1 %6186, %v1830_v36   ;;  %1852 = vperm.xlu0 %6189, %v1790_v52  }
 0xcd7   : > { %6187 = vset.pattern.permute.xlu1 %v6398_v4 }
 0xcd8   : > { %1848 = vperm.xlu1 %6187, %v1786_v30  }
 0xcdc   : > { %6188 = vset.pattern.permute.xlu1 %v6397_v3 }
 0xcdd   : > { %1928 = vperm.xlu1 %6188, %v1786_v30   ;;  %v1822_v30 = vrot.slane %v1775_v37, %v6513_v2 }
 0xd43   : > { %v1845_v10 = vpop.permute.xlu1 %1844 }
 0xd44   : > { %v1907_v5 = vmul.f32 %v6973_v29, %v1845_v10  ;;  %v1728_v10 = vcombine.high %v1718_v34, %v1718_v34 }
 0xd46   : > { %v2084_v33 = vpop.xlane.xlu0 %2083  ;;  %v1794_v24 = vrot.slane %v1728_v10, %v6513_v2 }
 0xd48   : > { %v1925_v32 = vpop.permute.xlu1 %1924 }
 0xd49   : > { %v1987_v35 = vmul.f32 %v6978_v58, %v1925_v32 }
 0xd4b   : > { %v2003_v48 = vadd.f32 %v1987_v35, %v1907_v5 }
 0xd4d   : > { %v2019_v47 = vmul.f32 %v2003_v48, %v6579_v50  ;;  %v1893_v54 = vpop.permute.xlu1 %1892  ;;  %v7139_v50 = vrot.slane %v2084_v33, %v6598_v22 }
 0xd4e   : > { %v1919_v8 = vmul.f32 %v6973_v29, %v1893_v54  ;;  %v1889_v5 = vpop.permute.xlu0 %1888 }
 0xd4f   : > { %v2020_v61 = vsel %vm639_vm1, %v2019_v47, 0.0  ;;  %v1918_v48 = vmul.f32 %v6973_v29, %v1889_v5 }
 0xd50   : > { %v2021_v38 = vrot.slane %v2020_v61, 4 }
 0xd52   : > { %v2022_v63 = vadd.f32 %v2021_v38, %v2020_v61  ;;  %v1973_v46 = vpop.permute.xlu1 %1972 }
 0xd53   : > { %v1999_v57 = vmul.f32 %v6978_v58, %v1973_v46  ;;  %v1853_v46 = vpop.permute.xlu0 %1852 }
 0xd54   : > { %v2023_v60 = vrot.slane %v2022_v63, 2 }
 0xd55   : > { %v7136_v62 = vadd.f32 %v1999_v57, %v1919_v8  ;;  %v1909_v8 = vmul.f32 %v6973_v29, %v1853_v46 }
 0xd56   : > { %v2024_v51 = vadd.f32 %v2023_v60, %v2022_v63  ;;  %v1681_v60 = vcombine.high %v7102_v19, %v7102_v19 }
 0xd57   : > { %v2108_v53 = vmul.f32 %v7139_v50, %v7136_v62  ;;  %v1849_v0 = vpop.permute.xlu1 %1848 }
 0xd58   : > { %v2025_v55 = vrot.slane %v2024_v51, 1  ;;  %v1908_v21 = vmul.f32 %v6973_v29, %v1849_v0 }
 0xd59   : > { %v2109_v42 = vsel %vm639_vm1, %v2108_v53, 0.0 }
 0xd5a   : > { %v2026_v14 = vadd.f32 %v2025_v55, %v2024_v51  ;;  %v1818_v51 = vrot.slane %v7115_v44, %v6513_v2  ;;  %v1695_v55 = vrot.slane %v1681_v60, %v6520_v13 }
 0xd5c   : > { %2032 = vbcast.lane.b32.xlu1 %v2026_v14, 256  ;;  %v1929_v7 = vpop.permute.xlu1 %1928  ;;  %v1697_v46 = vcombine.high %v1695_v55, %v1695_v55 }
 0xd5d   : > { %v1988_v11 = vmul.f32 %v6978_v58, %v1929_v7 }
 0xd5f   : > { %v7147_v9 = vadd.f32 %v1988_v11, %v1908_v21 }
 0xd80   : > { %2110 = vadd.xlane.f32.xlu1 %v2109_v42 }
 0xd91   : > { %1968 = vperm.xlu1 %6188, %v1826_v45   ;;  %v6345_v45 = vld [vmem:[%s8616_s3] sm:$0x3] }
 0xd92   : > { %v2409_v12 = vsel %vm1042_vm2, %v6345_v45, %v2026_v14  ;;  %v7184_v14 = vrot.slane %v1695_v55, %v6520_v13 }
 0xd94   : > { %v1798_v54 = vrot.slane %v7184_v14, %v6513_v2 }
 0xd95   : > { %1932 = vperm.xlu1 %6188, %v1790_v52  }
 0xd99   : > { %6193 = vset.pattern.permute.xlu1 %v6398_v4 }
 0xdce   : > { %v2033_v25 = vpop.permute.xlu1 %2032 }
 0xdcf   : > { %v2034_v28 = vmul.f32 %v2033_v25, %v7147_v9 }
 0xdd1   : > { %v2035_v43 = vsel %vm639_vm1, %v2034_v28, 0.0 }
 0xdd2   : > { %v2036_v23 = vrot.slane %v2035_v43, 4 }
 0xdd4   : > { %v2037_v39 = vadd.f32 %v2036_v23, %v2035_v43 }
 0xdd6   : > { %v2038_v59 = vrot.slane %v2037_v39, 2 }
 0xdd8   : > { %v2039_v41 = vadd.f32 %v2038_v59, %v2037_v39 }
 0xdda   : > { %v2040_v16 = vrot.slane %v2039_v41, 1 }
 0xddc   : > { %v2041_v36 = vadd.f32 %v2040_v16, %v2039_v41 }
 0xdde   : > { %v2410_v52 = vsel %vm1044_vm3, %v2409_v12, %v2041_v36  ;;  %2059 = vbcast.lane.b32.xlu0 %v2041_v36, 256 }
 0xde2   : > { %1884 = vperm.xlu0 %6189, %v1822_v30  }
 0xde6   : > { %6190 = vset.pattern.permute.xlu0 %v6397_v3 }
 0xde7   : > { %1964 = vperm.xlu0 %6190, %v1822_v30  }
 0xdeb   : > { %6191 = vset.pattern.permute.xlu0 %v6398_v4 }
 0xdec   : > { %1856 = vperm.xlu0 %6191, %v1794_v24  }
 0xdf0   : > { %6192 = vset.pattern.permute.xlu0 %v6397_v3 }
 0xdf1   : > { %1936 = vperm.xlu0 %6192, %v1794_v24  }
 0xe0d   : > { %v2111_v32 = vpop.xlane.xlu1 %2110 }
 0xe0e   : > { %v7170_v34 = vrot.slane %v2111_v32, %v6598_v22 }
 0xe11   : > { %v1969_v35 = vpop.permute.xlu1 %1968 }
 0xe12   : > { %v1998_v47 = vmul.f32 %v6978_v58, %v1969_v35 }
 0xe14   : > { %v7172_v61 = vadd.f32 %v1998_v47, %v1918_v48 }
 0xe15   : > { %v1933_v44 = vpop.permute.xlu1 %1932 }
 0xe16   : > { %v2135_v38 = vmul.f32 %v7170_v34, %v7172_v61  ;;  %v1989_v57 = vmul.f32 %v6978_v58, %v1933_v44 }
 0xe18   : > { %v2136_v63 = vsel %vm639_vm1, %v2135_v38, 0.0  ;;  %v7193_v33 = vadd.f32 %v1989_v57, %v1909_v8  ;;  %v1814_v8 = vrot.slane %v7153_v26, %v6513_v2 }
 0xe19   : > { %2137 = vadd.xlane.f32.xlu1 %v2136_v63 }
 0xe2a   : > { %1880 = vperm.xlu1 %6193, %v1818_v51  }
 0xe2e   : > { %6194 = vset.pattern.permute.xlu1 %v6397_v3 }
 0xe2f   : > { %1960 = vperm.xlu1 %6194, %v1818_v51  }
 0xe33   : > { %6195 = vset.pattern.permute.xlu1 %v6398_v4 }
 0xe34   : > { %1860 = vperm.xlu1 %6195, %v1798_v54  }
 0xe38   : > { %6196 = vset.pattern.permute.xlu1 %v6397_v3 }
 0xe39   : > { %1940 = vperm.xlu1 %6196, %v1798_v54  }
 0xe3d   : > { %6197 = vset.pattern.permute.xlu1 %v6398_v4 }
 0xe50   : > { %v2060_v53 = vpop.permute.xlu0 %2059 }
 0xe51   : > { %v2061_v42 = vmul.f32 %v2060_v53, %v7193_v33  ;;  %v1725_v53 = vrot.slane %v1697_v46, %v6520_v13 }
 0xe53   : > { %v2062_v0 = vsel %vm639_vm1, %v2061_v42, 0.0  ;;  %v1802_v42 = vrot.slane %v1725_v53, %v6513_v2 }
 0xe54   : > { %v2063_v7 = vrot.slane %v2062_v0, 4 }
 0xe56   : > { %v2064_v11 = vadd.f32 %v2063_v7, %v2062_v0 }
 0xe58   : > { %v2065_v21 = vrot.slane %v2064_v11, 2 }
 0xe5a   : > { %v2066_v25 = vadd.f32 %v2065_v21, %v2064_v11 }
 0xe5c   : > { %v2067_v28 = vrot.slane %v2066_v25, 1 }
 0xe5e   : > { %v2068_v43 = vadd.f32 %v2067_v28, %v2066_v25 }
 0xe60   : > { %2086 = vbcast.lane.b32.xlu0 %v2068_v43, 256  ;;  %v2411_v23 = vsel %vm1046_vm4, %v2410_v52, %v2068_v43 }
 0xe61   : > { %v1885_v39 = vpop.permute.xlu0 %1884 }
 0xe62   : > { %v1917_v16 = vmul.f32 %v6973_v29, %v1885_v39 }
 0xe66   : > { %v1965_v59 = vpop.permute.xlu0 %1964 }
 0xe67   : > { %v1997_v41 = vmul.f32 %v6978_v58, %v1965_v59 }
 0xe69   : > { %v7200_v37 = vadd.f32 %v1997_v41, %v1917_v16 }
 0xe6b   : > { %v1857_v10 = vpop.permute.xlu0 %1856 }
 0xe6c   : > { %v1910_v32 = vmul.f32 %v6973_v29, %v1857_v10 }
 0xe70   : > { %v1937_v52 = vpop.permute.xlu0 %1936 }
 0xe71   : > { %v1990_v24 = vmul.f32 %v6978_v58, %v1937_v52 }
 0xe73   : > { %v7210_v5 = vadd.f32 %v1990_v24, %v1910_v32 }
 0xea6   : > { %v2138_v36 = vpop.xlane.xlu1 %2137 }
 0xea7   : > { %v7203_v45 = vrot.slane %v2138_v36, %v6598_v22 }
 0xea9   : > { %v2162_v12 = vmul.f32 %v7203_v45, %v7200_v37 }
 0xeaa   : > { %v1881_v0 = vpop.permute.xlu1 %1880 }
 0xeab   : > { %v2163_v30 = vsel %vm639_vm1, %v2162_v12, 0.0  ;;  %v1916_v11 = vmul.f32 %v6973_v29, %v1881_v0  ;;  %v1729_v12 = vcombine.high %v1725_v53, %v1725_v53 }
 0xeac   : > { %2164 = vadd.xlane.f32.xlu0 %v2163_v30 }
 0xead   : > { %v1810_v24 = vrot.slane %v1729_v12, %v6513_v2 }
 0xeae   : > { %v1961_v7 = vpop.permute.xlu1 %1960 }
 0xeaf   : > { %v1996_v55 = vmul.f32 %v6978_v58, %v1961_v7 }
 0xeb1   : > { %v7223_v25 = vadd.f32 %v1996_v55, %v1916_v11 }
 0xed2   : > { %v2087_v35 = vpop.permute.xlu0 %2086 }
 0xed3   : > { %v2088_v48 = vmul.f32 %v2087_v35, %v7210_v5 }
 0xed5   : > { %v2089_v47 = vsel %vm639_vm1, %v2088_v48, 0.0 }
 0xed6   : > { %v2090_v38 = vrot.slane %v2089_v47, 4 }
 0xed8   : > { %v2091_v63 = vadd.f32 %v2090_v38, %v2089_v47  ;;  %v1727_v47 = vcombine.high %v7184_v14, %v7184_v14 }
 0xeda   : > { %v2092_v60 = vrot.slane %v2091_v63, 2 }
 0xedc   : > { %v2093_v51 = vadd.f32 %v2092_v60, %v2091_v63  ;;  %v1806_v60 = vrot.slane %v1727_v47, %v6513_v2 }
 0xede   : > { %v2094_v54 = vrot.slane %v2093_v51, 1 }
 0xee0   : > { %v2095_v44 = vadd.f32 %v2094_v54, %v2093_v51 }
 0xee2   : > { %2113 = vbcast.lane.b32.xlu1 %v2095_v44, 256  ;;  %v2412_v57 = vsel %vm1048_vm5, %v2411_v23, %v2095_v44  ;;  %v1861_v23 = vpop.permute.xlu1 %1860 }
 0xee3   : > { %v1911_v41 = vmul.f32 %v6973_v29, %v1861_v23 }
 0xee6   : > { %1876 = vperm.xlu1 %6197, %v1814_v8   ;;  %v1941_v39 = vpop.permute.xlu1 %1940 }
 0xee7   : > { %v1991_v59 = vmul.f32 %v6978_v58, %v1941_v39 }
 0xee9   : > { %v7233_v16 = vadd.f32 %v1991_v59, %v1911_v41 }
 0xeea   : > { %1864 = vperm.xlu1 %6197, %v1802_v42  }
 0xeee   : > { %6198 = vset.pattern.permute.xlu1 %v6397_v3 }
 0xeef   : > { %1944 = vperm.xlu1 %6198, %v1802_v42  }
 0xef3   : > { %6203 = vset.pattern.permute.xlu1 %v6398_v4 }
 0xf39   : > { %v2165_v21 = vpop.xlane.xlu0 %2164 }
 0xf3a   : > { %v7226_v26 = vrot.slane %v2165_v21, %v6598_v22 }
 0xf3c   : > { %v2189_v28 = vmul.f32 %v7226_v26, %v7223_v25 }
 0xf3e   : > { %v2190_v43 = vsel %vm639_vm1, %v2189_v28, 0.0 }
 0xf3f   : > { %2191 = vadd.xlane.f32.xlu0 %v2190_v43 }
 0xf54   : > { %v2114_v36 = vpop.permute.xlu1 %2113 }
 0xf55   : > { %v2115_v30 = vmul.f32 %v2114_v36, %v7233_v16  ;;  %1956 = vperm.xlu0 %6192, %v1814_v8  }
 0xf57   : > { %v2116_v10 = vsel %vm639_vm1, %v2115_v30, 0.0 }
 0xf58   : > { %v2117_v52 = vrot.slane %v2116_v10, 4 }
 0xf59   : > { %6199 = vset.pattern.permute.xlu0 %v6398_v4 }
 0xf5a   : > { %v2118_v32 = vadd.f32 %v2117_v52, %v2116_v10  ;;  %1872 = vperm.xlu0 %6199, %v1810_v24  }
 0xf5c   : > { %v2119_v35 = vrot.slane %v2118_v32, 2 }
 0xf5e   : > { %6200 = vset.pattern.permute.xlu0 %v6397_v3  ;;  %v2120_v48 = vadd.f32 %v2119_v35, %v2118_v32 }
 0xf5f   : > { %1952 = vperm.xlu0 %6200, %v1810_v24  }
 0xf60   : > { %v2121_v38 = vrot.slane %v2120_v48, 1 }
 0xf62   : > { %v2122_v63 = vadd.f32 %v2121_v38, %v2120_v48 }
 0xf63   : > { %6201 = vset.pattern.permute.xlu0 %v6398_v4 }
 0xf64   : > { %2140 = vbcast.lane.b32.xlu1 %v2122_v63, 256  ;;  %v2413_v51 = vsel %vm1050_vm6, %v2412_v57, %v2122_v63  ;;  %1868 = vperm.xlu0 %6201, %v1806_v60  }
 0xf65   : > { %v1877_v54 = vpop.permute.xlu1 %1876 }
 0xf66   : > { %v1915_v0 = vmul.f32 %v6973_v29, %v1877_v54 }
 0xf68   : > { %6202 = vset.pattern.permute.xlu0 %v6397_v3 }
 0xf69   : > { %1948 = vperm.xlu0 %6202, %v1806_v60   ;;  %v1865_v44 = vpop.permute.xlu1 %1864 }
 0xf6a   : > { %v1912_v53 = vmul.f32 %v6973_v29, %v1865_v44 }
 0xf6e   : > { %v1945_v46 = vpop.permute.xlu1 %1944 }
 0xf6f   : > { %v1992_v14 = vmul.f32 %v6978_v58, %v1945_v46 }
 0xf71   : > { %v7250_v55 = vadd.f32 %v1992_v14, %v1912_v53 }
 0xfcc   : > { %v2192_v8 = vpop.xlane.xlu0 %2191 }
 0xfcd   : > { %v7253_v11 = vrot.slane %v2192_v8, %v6598_v22 }
 0xfd4   : > { %v1957_v42 = vpop.permute.xlu0 %1956 }
 0xfd5   : > { %v1995_v7 = vmul.f32 %v6978_v58, %v1957_v42 }
 0xfd6   : > { %v2141_v57 = vpop.permute.xlu1 %2140 }
 0xfd7   : > { %v2011_v21 = vadd.f32 %v1995_v7, %v1915_v0  ;;  %v2142_v28 = vmul.f32 %v2141_v57, %v7250_v55 }
 0xfd9   : > { %v2143_v43 = vsel %vm639_vm1, %v2142_v28, 0.0  ;;  %v2216_v23 = vmul.f32 %v7253_v11, %v2011_v21  ;;  %v1873_v24 = vpop.permute.xlu0 %1872 }
 0xfda   : > { %v2144_v39 = vrot.slane %v2143_v43, 4  ;;  %v1914_v38 = vmul.f32 %v6973_v29, %v1873_v24 }
 0xfdb   : > { %v2217_v59 = vsel %vm639_vm1, %v2216_v23, 0.0 }
 0xfdc   : > { %v2145_v41 = vadd.f32 %v2144_v39, %v2143_v43  ;;  %2218 = vadd.xlane.f32.xlu1 %v2217_v59 }
 0xfde   : > { %v2146_v36 = vrot.slane %v2145_v41, 2  ;;  %v1953_v32 = vpop.permute.xlu0 %1952 }
 0xfdf   : > { %v1994_v47 = vmul.f32 %v6978_v58, %v1953_v32 }
 0xfe0   : > { %v2147_v12 = vadd.f32 %v2146_v36, %v2145_v41 }
 0xfe1   : > { %v2010_v54 = vadd.f32 %v1994_v47, %v1914_v38 }
 0xfe2   : > { %v2148_v30 = vrot.slane %v2147_v12, 1 }
 0xfe3   : > { %v1869_v35 = vpop.permute.xlu0 %1868 }
 0xfe4   : > { %v2149_v10 = vadd.f32 %v2148_v30, %v2147_v12  ;;  %v1913_v44 = vmul.f32 %v6973_v29, %v1869_v35 }
 0xfe6   : > { %v2414_v52 = vsel %vm8635_vm8, %v2413_v51, %v2149_v10  ;;  %vm8638_vm8 = vmmov %vm8636_vm7 }
 0xfe8   : > { %v1949_v48 = vpop.permute.xlu0 %1948 }
 0xfe9   : > { %v1993_v63 = vmul.f32 %v6978_v58, %v1949_v48 }
 0xfeb   : > { %v2009_v8 = vadd.f32 %v1993_v63, %v1913_v44 }
 0xfed   : > { %2167 = vbcast.lane.b32.xlu1 %v2149_v10, 256 }
0x1069   : > { %v2219_v60 = vpop.xlane.xlu1 %2218 }
0x106a   : > { %v7265_v46 = vrot.slane %v2219_v60, %v6598_v22 }
0x106c   : > { %v2243_v51 = vmul.f32 %v7265_v46, %v2010_v54 }
0x106d   : > { %v2168_v14 = vpop.permute.xlu1 %2167 }
0x106e   : > { %v2169_v53 = vmul.f32 %v2168_v14, %v2009_v8  ;;  %v2244_v42 = vsel %vm639_vm1, %v2243_v51, 0.0 }
0x106f   : > { %2245 = vadd.xlane.f32.xlu0 %v2244_v42 }
0x1070   : > { %v2170_v0 = vsel %vm639_vm1, %v2169_v53, 0.0 }
0x1071   : > { %v2171_v7 = vrot.slane %v2170_v0, 4 }
0x1073   : > { %v2172_v57 = vadd.f32 %v2171_v7, %v2170_v0 }
0x1075   : > { %v2173_v58 = vrot.slane %v2172_v57, 2 }
0x1077   : > { %v2174_v28 = vadd.f32 %v2173_v58, %v2172_v57 }
0x1079   : > { %v2175_v43 = vrot.slane %v2174_v28, 1 }
0x107b   : > { %v2176_v23 = vadd.f32 %v2175_v43, %v2174_v28 }
0x107d   : > { %2194 = vbcast.lane.b32.xlu1 %v2176_v23, 256  ;;  %v7271_v29 = vsel %vm8636_vm7, %v2414_v52, %v2176_v23  ;;  %vm8639_vm7 = vmmov %vm8637_vm12 }
0x10ef   : > { %v2195_v39 = vpop.permute.xlu1 %2194 }
0x10f0   : > { %v2196_v59 = vmul.f32 %v2195_v39, %v2010_v54 }
0x10f2   : > { %v2197_v41 = vsel %vm639_vm1, %v2196_v59, 0.0 }
0x10f3   : > { %v2198_v36 = vrot.slane %v2197_v41, 4 }
0x10f5   : > { %v2199_v12 = vadd.f32 %v2198_v36, %v2197_v41 }
0x10f7   : > { %v2200_v30 = vrot.slane %v2199_v12, 2 }
0x10f9   : > { %v2201_v10 = vadd.f32 %v2200_v30, %v2199_v12 }
0x10fb   : > { %v2202_v24 = vrot.slane %v2201_v10, 1 }
0x10fc   : > { %v2246_v32 = vpop.xlane.xlu0 %2245 }
0x10fd   : > { %v7275_v35 = vrot.slane %v2246_v32, %v6598_v22  ;;  %v2203_v48 = vadd.f32 %v2202_v24, %v2201_v10 }
0x10ff   : > { %2221 = vbcast.lane.b32.xlu0 %v2203_v48, 256  ;;  %v2270_v47 = vmul.f32 %v7275_v35, %v2009_v8 }
0x1101   : > { %v2271_v52 = vsel %vm639_vm1, %v2270_v47, 0.0 }
0x1102   : > { %2272 = vadd.xlane.f32.xlu1 %v2271_v52 }
0x1171   : > { %v2222_v38 = vpop.permute.xlu0 %2221 }
0x1172   : > { %v2223_v63 = vmul.f32 %v2222_v38, %v2011_v21 }
0x1174   : > { %v2224_v60 = vsel %vm639_vm1, %v2223_v63, 0.0 }
0x1175   : > { %v2225_v54 = vrot.slane %v2224_v60, 4 }
0x1177   : > { %v2226_v44 = vadd.f32 %v2225_v54, %v2224_v60 }
0x1179   : > { %v2227_v51 = vrot.slane %v2226_v44, 2 }
0x117b   : > { %v2228_v14 = vadd.f32 %v2227_v51, %v2226_v44 }
0x117d   : > { %v2229_v53 = vrot.slane %v2228_v14, 1 }
0x117f   : > { %v2230_v42 = vadd.f32 %v2229_v53, %v2228_v14 }
0x1181   : > { %2248 = vbcast.lane.b32.xlu1 %v2230_v42, 256  ;;  %v2416_v12 = vsel %vm1042_vm2, %v2203_v48, %v2230_v42 }
0x118f   : > { %v2273_v0 = vpop.xlane.xlu1 %2272 }
0x1190   : > { %v7281_v7 = vrot.slane %v2273_v0, %v6598_v22 }
0x1192   : > { %v2297_v8 = vmul.f32 %v7281_v7, %v7250_v55 }
0x1194   : > { %v2298_v57 = vsel %vm639_vm1, %v2297_v8, 0.0 }
0x1195   : > { %2299 = vadd.xlane.f32.xlu0 %v2298_v57 }
0x11f3   : > { %v2249_v21 = vpop.permute.xlu1 %2248 }
0x11f4   : > { %v2250_v58 = vmul.f32 %v2249_v21, %v7223_v25 }
0x11f6   : > { %v2251_v28 = vsel %vm639_vm1, %v2250_v58, 0.0 }
0x11f7   : > { %v2252_v43 = vrot.slane %v2251_v28, 4 }
0x11f9   : > { %v2253_v23 = vadd.f32 %v2252_v43, %v2251_v28 }
0x11fb   : > { %v2254_v39 = vrot.slane %v2253_v23, 2 }
0x11fd   : > { %v2255_v59 = vadd.f32 %v2254_v39, %v2253_v23 }
0x11ff   : > { %v2256_v41 = vrot.slane %v2255_v59, 1 }
0x1201   : > { %v2257_v36 = vadd.f32 %v2256_v41, %v2255_v59 }
0x1203   : > { %2275 = vbcast.lane.b32.xlu0 %v2257_v36, 256  ;;  %v2417_v30 = vsel %vm1044_vm3, %v2416_v12, %v2257_v36 }
0x1222   : > { %v2300_v55 = vpop.xlane.xlu0 %2299 }
0x1223   : > { %v7291_v10 = vrot.slane %v2300_v55, %v6598_v22 }
0x1225   : > { %v2324_v25 = vmul.f32 %v7291_v10, %v7233_v16 }
0x1227   : > { %v2325_v24 = vsel %vm639_vm1, %v2324_v25, 0.0 }
0x1228   : > { %2326 = vadd.xlane.f32.xlu1 %v2325_v24 }
0x1275   : > { %v2276_v32 = vpop.permute.xlu0 %2275 }
0x1276   : > { %v2277_v47 = vmul.f32 %v2276_v32, %v7200_v37  ;;  %v2450_v32 = vsel %vm1042_vm2, %v7253_v11, %v7226_v26 }
0x1278   : > { %v2278_v52 = vsel %vm639_vm1, %v2277_v47, 0.0 }
0x1279   : > { %v2279_v38 = vrot.slane %v2278_v52, 4 }
0x127b   : > { %v2280_v48 = vadd.f32 %v2279_v38, %v2278_v52 }
0x127d   : > { %v2281_v63 = vrot.slane %v2280_v48, 2 }
0x127f   : > { %v2282_v60 = vadd.f32 %v2281_v63, %v2280_v48 }
0x1281   : > { %v2283_v54 = vrot.slane %v2282_v60, 1 }
0x1283   : > { %v2284_v44 = vadd.f32 %v2283_v54, %v2282_v60 }
0x1285   : > { %2302 = vbcast.lane.b32.xlu1 %v2284_v44, 256  ;;  %v2418_v51 = vsel %vm1046_vm4, %v2417_v30, %v2284_v44 }
0x12b5   : > { %v2327_v14 = vpop.xlane.xlu1 %2326 }
0x12b6   : > { %v7300_v16 = vrot.slane %v2327_v14, %v6598_v22  ;;  %v7339_v14 = vld [vmem:[#allocation3 + $0x8] sm:$0xff] }
0x12b8   : > { %v2351_v53 = vmul.f32 %v7300_v16, %v7210_v5 }
0x12ba   : > { %v2352_v37 = vsel %vm639_vm1, %v2351_v53, 0.0  ;;  %v7344_v53 = vld [vmem:[#allocation3] sm:$0xff] }
0x12bb   : > { %2353 = vadd.xlane.f32.xlu0 %v2352_v37 }
0x12f7   : > { %v2303_v42 = vpop.permute.xlu1 %2302 }
0x12f8   : > { %v2304_v0 = vmul.f32 %v2303_v42, %v7172_v61 }
0x12fa   : > { %v2305_v8 = vsel %vm639_vm1, %v2304_v0, 0.0 }
0x12fb   : > { %v2306_v57 = vrot.slane %v2305_v8, 4 }
0x12fd   : > { %v2307_v21 = vadd.f32 %v2306_v57, %v2305_v8 }
0x12ff   : > { %v2308_v58 = vrot.slane %v2307_v21, 2 }
0x1301   : > { %v2309_v28 = vadd.f32 %v2308_v58, %v2307_v21 }
0x1303   : > { %v2310_v43 = vrot.slane %v2309_v28, 1 }
0x1305   : > { %v2311_v23 = vadd.f32 %v2310_v43, %v2309_v28 }
0x1307   : > { %2329 = vbcast.lane.b32.xlu0 %v2311_v23, 256  ;;  %v2419_v39 = vsel %vm1048_vm5, %v2418_v51, %v2311_v23 }
0x1348   : > { %v2354_v59 = vpop.xlane.xlu0 %2353 }
0x1349   : > { %v7309_v5 = vrot.slane %v2354_v59, %v6598_v22 }
0x134b   : > { %v2378_v41 = vmul.f32 %v7309_v5, %v7193_v33  ;;  %v2451_v33 = vsel %vm1044_vm3, %v2450_v32, %v7203_v45 }
0x134c   : > { %v2452_v48 = vsel %vm1046_vm4, %v2451_v33, %v7170_v34 }
0x134d   : > { %v2379_v61 = vsel %vm639_vm1, %v2378_v41, 0.0  ;;  %v2453_v63 = vsel %vm1048_vm5, %v2452_v48, %v7139_v50 }
0x134e   : > { %2380 = vadd.xlane.f32.xlu1 %v2379_v61  ;;  %v2454_v60 = vsel %vm1050_vm6, %v2453_v63, %v7095_v49 }
0x134f   : > { %v2455_v26 = vsel %vm8637_vm12, %v2454_v60, %v7083_v17  ;;  %vm8640_vm12 = vmmov %vm8638_vm8 }
0x1350   : > { %v2456_v45 = vsel %vm8638_vm8, %v2455_v26, %v1084_v31  ;;  %vm8641_vm8 = vcmask 1044484  }
0x1351   : > { %v2515_v11 = vrot.slane %v2456_v45, %v6520_v13  ;;  %v2508_v42 = vcombine.high %v2456_v45, %v2456_v45 }
0x1353   : > { %v2523_v34 = vcombine.high %v2515_v11, %v2515_v11  ;;  %v2531_v44 = vrot.slane %v2515_v11, %v6520_v13  ;;  %v2522_v21 = vrot.slane %v2508_v42, %v6520_v13 }
0x1355   : > { %v2545_v54 = vrot.slane %v2523_v34, %v6520_v13  ;;  %v2553_v50 = vcombine.high %v2531_v44, %v2531_v44  ;;  %v2538_v43 = vrot.slane %v2522_v21, %v6520_v13  ;;  %v2524_v41 = vcombine.high %v2522_v21, %v2522_v21 }
0x1357   : > { %v2596_v51 = vrot.slane %v2545_v54, %v6513_v2  ;;  %v2600_v17 = vrot.slane %v2553_v50, %v6513_v2  ;;  %v2555_v37 = vcombine.high %v2545_v54, %v2545_v54  ;;  %v2608_v59 = vrot.slane %v2538_v43, %v6513_v2 }
0x1358   : > { %v2592_v54 = vrot.slane %v2531_v44, %v6513_v2 }
0x1359   : > { %v2814_v49 = vmul.f32 %v7339_v14, %v2596_v51  ;;  %v2647_v31 = vmul.f32 %v7344_v53, %v2600_v17  ;;  %v2815_v8 = vmul.f32 %v7339_v14, %v2600_v17  ;;  %v2604_v57 = vrot.slane %v2555_v37, %v6513_v2 }
0x135a   : > { %v2645_v17 = vmul.f32 %v7344_v53, %v2592_v54  ;;  %v2813_v42 = vmul.f32 %v7339_v14, %v2592_v54 }
0x135b   : > { %v2848_v40 = vsel %vm639_vm1, %v2814_v49, 0.0  ;;  %v2683_v0 = vsel %vm639_vm1, %v2647_v31, 0.0  ;;  %v2851_v58 = vsel %vm639_vm1, %v2815_v8, 0.0  ;;  %v2648_v28 = vmul.f32 %v7344_v53, %v2604_v57 }
0x135c   : > { %v2646_v31 = vmul.f32 %v7344_v53, %v2596_v51 }
0x135d   : > { %v2686_v23 = vsel %vm639_vm1, %v2648_v28, 0.0 }
0x135e   : > { %v2680_v37 = vsel %vm639_vm1, %v2646_v31, 0.0 }
0x1379   : > { %v2330_v36 = vpop.permute.xlu0 %2329 }
0x137a   : > { %v2331_v12 = vmul.f32 %v2330_v36, %v7136_v62  ;;  %v2649_v36 = vmul.f32 %v7344_v53, %v2608_v59 }
0x137c   : > { %v2332_v30 = vsel %vm639_vm1, %v2331_v12, 0.0  ;;  %v2552_v12 = vrot.slane %v2524_v41, %v6520_v13 }
0x137d   : > { %v2333_v55 = vrot.slane %v2332_v30, 4 }
0x137f   : > { %v2334_v25 = vadd.f32 %v2333_v55, %v2332_v30  ;;  %v2689_v30 = vsel %vm639_vm1, %v2649_v36, 0.0  ;;  %v2817_v55 = vmul.f32 %v7339_v14, %v2608_v59 }
0x1381   : > { %v2335_v24 = vrot.slane %v2334_v25, 2 }
0x1383   : > { %v2336_v47 = vadd.f32 %v2335_v24, %v2334_v25  ;;  %v2612_v25 = vrot.slane %v2552_v12, %v6513_v2  ;;  %v2857_v24 = vsel %vm639_vm1, %v2817_v55, 0.0 }
0x1385   : > { %v2337_v52 = vrot.slane %v2336_v47, 1  ;;  %v2650_v32 = vmul.f32 %v7344_v53, %v2612_v25  ;;  %v2818_v33 = vmul.f32 %v7339_v14, %v2612_v25 }
0x1387   : > { %v2338_v38 = vadd.f32 %v2337_v52, %v2336_v47  ;;  %v2554_v47 = vcombine.high %v2538_v43, %v2538_v43  ;;  %v2692_v52 = vsel %vm639_vm1, %v2650_v32, 0.0  ;;  %v2860_v48 = vsel %vm639_vm1, %v2818_v33, 0.0 }
0x1389   : > { %2356 = vbcast.lane.b32.xlu1 %v2338_v38, 256  ;;  %v7324_v62 = vsel %vm1050_vm6, %v2419_v39, %v2338_v38  ;;  %v2816_v39 = vmul.f32 %v7339_v14, %v2604_v57  ;;  %v2616_v38 = vrot.slane %v2554_v47, %v6513_v2 }
0x138b   : > { %v2854_v61 = vsel %vm639_vm1, %v2816_v39, 0.0  ;;  %v2651_v63 = vmul.f32 %v7344_v53, %v2616_v38  ;;  %v2819_v26 = vmul.f32 %v7339_v14, %v2616_v38 }
0x138d   : > { %v2695_v60 = vsel %vm639_vm1, %v2651_v63, 0.0  ;;  %v2863_v45 = vsel %vm639_vm1, %v2819_v26, 0.0 }
0x13ad   : > { %2849 = vadd.xlane.f32.xlu1 %v2848_v40  ;;  %v2677_v40 = vsel %vm639_vm1, %v2645_v17, 0.0 }
0x13b1   : > { %2684 = vadd.xlane.f32.xlu1 %v2683_v0  ;;  %v2845_v0 = vsel %vm639_vm1, %v2813_v42, 0.0 }
0x13b5   : > { %2852 = vadd.xlane.f32.xlu1 %v2851_v58 }
0x13b9   : > { %2687 = vadd.xlane.f32.xlu1 %v2686_v23  ;;  %v2556_v23 = vcombine.high %v2552_v12, %v2552_v12 }
0x13bd   : > { %2855 = vadd.xlane.f32.xlu1 %v2854_v61 }
0x13c1   : > { %2690 = vadd.xlane.f32.xlu1 %v2689_v30 }
0x13c5   : > { %2858 = vadd.xlane.f32.xlu1 %v2857_v24 }
0x13c9   : > { %2693 = vadd.xlane.f32.xlu1 %v2692_v52 }
0x13cd   : > { %2861 = vadd.xlane.f32.xlu1 %v2860_v48 }
0x13d1   : > { %2696 = vadd.xlane.f32.xlu1 %v2695_v60 }
0x13d5   : > { %2864 = vadd.xlane.f32.xlu1 %v2863_v45 }
0x13db   : > { %v2381_v11 = vpop.xlane.xlu1 %2380 }
0x13dc   : > { %v2397_v34 = vrot.slane %v2381_v11, %v6598_v22 }
0x13de   : > { %v2405_v50 = vmul.f32 %v2397_v34, %v7147_v9 }
0x13e0   : > { %v2406_v49 = vsel %vm639_vm1, %v2405_v50, 0.0 }
0x13e1   : > { %2407 = vadd.xlane.f32.xlu0 %v2406_v49 }
0x13e5   : > { %2678 = vadd.xlane.f32.xlu0 %v2677_v40 }
0x13e9   : > { %2681 = vadd.xlane.f32.xlu0 %v2680_v37 }
0x13ed   : > { %2846 = vadd.xlane.f32.xlu0 %v2845_v0 }
0x146e   : > { %v2408_v44 = vpop.xlane.xlu0 %2407 }
0x146f   : > { %v2427_v9 = vrot.slane %v2408_v44, %v6598_v22 }
0x1471   : > { %v2443_v8 = vsel %vm1042_vm2, %v2427_v9, %v2397_v34 }
0x1472   : > { %v2444_v57 = vsel %vm1044_vm3, %v2443_v8, %v7309_v5 }
0x1473   : > { %v2445_v51 = vsel %vm1046_vm4, %v2444_v57, %v7300_v16  ;;  %v2620_v16 = vrot.slane %v2556_v23, %v6513_v2 }
0x1474   : > { %v2446_v21 = vsel %vm1048_vm5, %v2445_v51, %v7291_v10 }
0x1475   : > { %v2447_v58 = vsel %vm1050_vm6, %v2446_v21, %v7281_v7  ;;  %v2820_v32 = vmul.f32 %v7339_v14, %v2620_v16 }
0x1476   : > { %v2448_v28 = vsel %vm8639_vm7, %v2447_v58, %v7275_v35  ;;  %vm8642_vm7 = vcmask 1047559  }
0x1477   : > { %v2449_v43 = vsel %vm8640_vm12, %v2448_v28, %v7265_v46  ;;  %v2652_v46 = vmul.f32 %v7344_v53, %v2620_v16  ;;  %v2866_v48 = vsel %vm639_vm1, %v2820_v32, 0.0  ;;  %vm8643_vm12 = vmmov %vm8641_vm8 }
0x1478   : > { %v2466_v39 = vrot.slane %v2449_v43, %v6520_v13  ;;  %v2459_v36 = vcombine.high %v2449_v43, %v2449_v43 }
0x1479   : > { %v2698_v24 = vsel %vm639_vm1, %v2652_v46, 0.0 }
0x147a   : > { %v2482_v5 = vrot.slane %v2466_v39, %v6520_v13  ;;  %v2474_v59 = vcombine.high %v2466_v39, %v2466_v39  ;;  %v2473_v38 = vrot.slane %v2459_v36, %v6520_v13 }
0x147c   : > { %v2560_v41 = vrot.slane %v2482_v5, %v6513_v2  ;;  %v2496_v10 = vrot.slane %v2474_v59, %v6520_v13  ;;  %v2504_v25 = vcombine.high %v2482_v5, %v2482_v5  ;;  %v2489_v26 = vrot.slane %v2473_v38, %v6520_v13 }
0x147d   : > { %v2475_v37 = vcombine.high %v2473_v38, %v2473_v38  ;;  %v2679_v38 = vpop.xlane.xlu0 %2678 }
0x147e   : > { %v2805_v7 = vmul.f32 %v7339_v14, %v2560_v41  ;;  %v2637_v61 = vmul.f32 %v7344_v53, %v2560_v41  ;;  %v2564_v35 = vrot.slane %v2496_v10, %v6513_v2  ;;  %v2568_v33 = vrot.slane %v2504_v25, %v6513_v2 }
0x147f   : > { %v2576_v34 = vrot.slane %v2489_v26, %v6513_v2  ;;  %v2506_v49 = vcombine.high %v2496_v10, %v2496_v10  ;;  %v2503_v44 = vrot.slane %v2475_v37, %v6520_v13  ;;  %v2505_v58 = vcombine.high %v2489_v26, %v2489_v26 }
0x1480   : > { %v2821_v12 = vsel %vm639_vm1, %v2805_v7, 0.0  ;;  %v2653_v30 = vsel %vm639_vm1, %v2637_v61, 0.0  ;;  %v2638_v55 = vmul.f32 %v7344_v53, %v2564_v35  ;;  %v2806_v52 = vmul.f32 %v7339_v14, %v2564_v35  ;;  %v2357_v7 = vpop.permute.xlu1 %2356 }
0x1481   : > { %2822 = vadd.xlane.f32.xlu0 %v2821_v12  ;;  %2654 = vadd.xlane.f32.xlu1 %v2653_v30  ;;  %v2639_v60 = vmul.f32 %v7344_v53, %v2568_v33  ;;  %v2807_v11 = vmul.f32 %v7339_v14, %v2568_v33  ;;  %v2641_v50 = vmul.f32 %v7344_v53, %v2576_v34 }
0x1482   : > { %v2656_v47 = vsel %vm639_vm1, %v2638_v55, 0.0  ;;  %v2824_v63 = vsel %vm639_vm1, %v2806_v52, 0.0  ;;  %v2809_v40 = vmul.f32 %v7339_v14, %v2576_v34  ;;  %v2572_v31 = vrot.slane %v2506_v49, %v6513_v2 }
0x1483   : > { %v2659_v45 = vsel %vm639_vm1, %v2639_v60, 0.0  ;;  %v2827_v54 = vsel %vm639_vm1, %v2807_v11, 0.0  ;;  %v2665_v17 = vsel %vm639_vm1, %v2641_v50, 0.0  ;;  %v2580_v57 = vrot.slane %v2503_v44, %v6513_v2 }
0x1484   : > { %v2833_v42 = vsel %vm639_vm1, %v2809_v40, 0.0  ;;  %v2640_v0 = vmul.f32 %v7344_v53, %v2572_v31  ;;  %v2808_v8 = vmul.f32 %v7339_v14, %v2572_v31  ;;  %v2584_v23 = vrot.slane %v2505_v58, %v6513_v2 }
0x1485   : > { %2699 = vadd.xlane.f32.xlu1 %v2698_v24  ;;  %2657 = vadd.xlane.f32.xlu0 %v2656_v47  ;;  %v2642_v21 = vmul.f32 %v7344_v53, %v2580_v57  ;;  %v2810_v43 = vmul.f32 %v7339_v14, %v2580_v57  ;;  %v2507_v59 = vcombine.high %v2503_v44, %v2503_v44 }
0x1486   : > { %v2662_v9 = vsel %vm639_vm1, %v2640_v0, 0.0  ;;  %v2830_v51 = vsel %vm639_vm1, %v2808_v8, 0.0  ;;  %v2643_v5 = vmul.f32 %v7344_v53, %v2584_v23  ;;  %v2811_v41 = vmul.f32 %v7339_v14, %v2584_v23 }
0x1487   : > { %v2668_v28 = vsel %vm639_vm1, %v2642_v21, 0.0  ;;  %v2836_v39 = vsel %vm639_vm1, %v2810_v43, 0.0  ;;  %v2588_v10 = vrot.slane %v2507_v59, %v6513_v2  ;;  %v2358_v46 = vmul.f32 %v2357_v7, %v7097_v27  ;;  %v7453_v27 = vpop.xlane.xlu1 %2849 }
0x1488   : > { %v2671_v16 = vsel %vm639_vm1, %v2643_v5, 0.0  ;;  %v2839_v61 = vsel %vm639_vm1, %v2811_v41, 0.0 }
0x1489   : > { %2867 = vadd.xlane.f32.xlu1 %v2866_v48  ;;  %2825 = vadd.xlane.f32.xlu0 %v2824_v63  ;;  %v2644_v35 = vmul.f32 %v7344_v53, %v2588_v10  ;;  %v2812_v12 = vmul.f32 %v7339_v14, %v2588_v10  ;;  %v2359_v30 = vsel %vm639_vm1, %v2358_v46, 0.0  ;;  %v2682_v48 = vpop.xlane.xlu0 %2681 }
0x148a   : > { %v2360_v25 = vrot.slane %v2359_v30, 4 }
0x148b   : > { %v2674_v36 = vsel %vm639_vm1, %v2644_v35, 0.0  ;;  %v2842_v55 = vsel %vm639_vm1, %v2812_v12, 0.0  ;;  %v2685_v53 = vpop.xlane.xlu1 %2684 }
0x148c   : > { %v2361_v24 = vadd.f32 %v2360_v25, %v2359_v30  ;;  %v2756_v25 = vrot.slane %v2682_v48, %v6598_v22  ;;  %v2924_v48 = vrot.slane %v7453_v27, %v6598_v22 }
0x148d   : > { %2660 = vadd.xlane.f32.xlu0 %v2659_v45  ;;  %v2847_v60 = vpop.xlane.xlu0 %2846 }
0x148e   : > { %v2362_v32 = vrot.slane %v2361_v24, 2 }
0x148f   : > { %v7455_v14 = vpop.xlane.xlu1 %2852 }
0x1490   : > { %v2363_v47 = vadd.f32 %v2362_v32, %v2361_v24 }
0x1491   : > { %2828 = vadd.xlane.f32.xlu0 %v2827_v54 }
0x1492   : > { %v2364_v52 = vrot.slane %v2363_v47, 1 }
0x1493   : > { %v2688_v63 = vpop.xlane.xlu1 %2687 }
0x1494   : > { %v7450_v33 = vadd.f32 %v2364_v52, %v2363_v47  ;;  %v2752_v47 = vrot.slane %v2679_v38, %v6598_v22  ;;  %v2764_v38 = vrot.slane %v2688_v63, %v6598_v22 }
0x1495   : > { %2666 = vadd.xlane.f32.xlu0 %v2665_v17 }
0x1497   : > { %v7459_v45 = vpop.xlane.xlu1 %2855 }
0x1499   : > { %2834 = vadd.xlane.f32.xlu0 %v2833_v42 }
0x149b   : > { %v7461_v34 = vpop.xlane.xlu1 %2690 }
0x149c   : > { %v2768_v63 = vrot.slane %v7461_v34, %v6598_v22 }
0x149d   : > { %2663 = vadd.xlane.f32.xlu0 %v2662_v9 }
0x149f   : > { %v7463_v49 = vpop.xlane.xlu1 %2858 }
0x14a1   : > { %2831 = vadd.xlane.f32.xlu0 %v2830_v51 }
0x14a3   : > { %v7465_v40 = vpop.xlane.xlu1 %2693 }
0x14a5   : > { %2669 = vadd.xlane.f32.xlu0 %v2668_v28 }
0x14a7   : > { %v7469_v42 = vpop.xlane.xlu1 %2861 }
0x14a9   : > { %2837 = vadd.xlane.f32.xlu0 %v2836_v39 }
0x14ab   : > { %v7471_v44 = vpop.xlane.xlu1 %2696 }
0x14ad   : > { %2672 = vadd.xlane.f32.xlu0 %v2671_v16 }
0x14af   : > { %v7473_v57 = vpop.xlane.xlu1 %2864 }
0x14b1   : > { %2840 = vadd.xlane.f32.xlu0 %v2839_v61 }
0x14b5   : > { %2675 = vadd.xlane.f32.xlu0 %v2674_v36 }
0x14b9   : > { %2843 = vadd.xlane.f32.xlu0 %v2842_v55 }
0x14cf   : > { %2383 = vbcast.lane.b32.xlu0 %v7450_v33, 256 }
0x150e   : > { %v7457_v26 = vpop.xlane.xlu0 %2822  ;;  %v2655_v21 = vpop.xlane.xlu1 %2654 }
0x150f   : > { %v2720_v23 = vrot.slane %v2655_v21, %v6598_v22  ;;  %v2888_v27 = vrot.slane %v7457_v26, %v6598_v22  ;;  %v2772_v26 = vrot.slane %v7465_v40, %v6598_v22 }
0x1512   : > { %v2658_v11 = vpop.xlane.xlu0 %2657 }
0x1513   : > { %v2724_v58 = vrot.slane %v2658_v11, %v6598_v22  ;;  %v2788_v11 = vsel %vm673_vm9, %v2756_v25, %v2752_v47 }
0x1515   : > { %v2781_v5 = vsel %vm673_vm9, %v2724_v58, %v2720_v23  ;;  %v2928_v23 = vrot.slane %v7455_v14, %v6598_v22 }
0x1516   : > { %v2826_v54 = vpop.xlane.xlu0 %2825 }
0x151a   : > { %v2661_v50 = vpop.xlane.xlu0 %2660 }
0x151b   : > { %v2728_v28 = vrot.slane %v2661_v50, %v6598_v22 }
0x151d   : > { %v2782_v59 = vsel %vm8627_vm10, %v2728_v28, %v2781_v5  ;;  %v2892_v28 = vrot.slane %v2826_v54, %v6598_v22 }
0x151e   : > { %v2829_v17 = vpop.xlane.xlu0 %2828 }
0x1522   : > { %v2667_v31 = vpop.xlane.xlu0 %2666 }
0x1523   : > { %v2736_v7 = vrot.slane %v2667_v31, %v6598_v22  ;;  %v2760_v31 = vrot.slane %v2685_v53, %v6598_v22 }
0x1525   : > { %v2789_v21 = vsel %vm8627_vm10, %v2760_v31, %v2788_v11 }
0x1526   : > { %v7467_v37 = vpop.xlane.xlu0 %2834 }
0x152a   : > { %v2664_v0 = vpop.xlane.xlu0 %2663 }
0x152b   : > { %v2732_v39 = vrot.slane %v2664_v0, %v6598_v22  ;;  %v2920_v0 = vrot.slane %v2847_v60, %v6598_v22  ;;  %v2896_v60 = vrot.slane %v2829_v17, %v6598_v22  ;;  %v2700_v17 = vpop.xlane.xlu1 %2699 }
0x152d   : > { %v2783_v41 = vsel %vm8626_vm11, %v2732_v39, %v2782_v59  ;;  %v2956_v53 = vsel %vm673_vm9, %v2924_v48, %v2920_v0  ;;  %v2949_v59 = vsel %vm673_vm9, %v2892_v28, %v2888_v27 }
0x152e   : > { %v2832_v9 = vpop.xlane.xlu0 %2831  ;;  %v2784_v35 = vsel %vm8641_vm8, %v2736_v7, %v2783_v41  ;;  %v2957_v54 = vsel %vm8627_vm10, %v2928_v23, %v2956_v53  ;;  %v2932_v41 = vrot.slane %v7459_v45, %v6598_v22 }
0x152f   : > { %v2900_v39 = vrot.slane %v2832_v9, %v6598_v22  ;;  %v2868_v47 = vpop.xlane.xlu1 %2867 }
0x1532   : > { %v2670_v8 = vpop.xlane.xlu0 %2669 }
0x1533   : > { %v2740_v10 = vrot.slane %v2670_v8, %v6598_v22 }
0x1535   : > { %v2785_v36 = vsel %vm680_vm13, %v2740_v10, %v2784_v35  ;;  %v2950_v10 = vsel %vm8627_vm10, %v2896_v60, %v2949_v59  ;;  %v2958_v35 = vsel %vm8626_vm11, %v2932_v41, %v2957_v54 }
0x1536   : > { %v7475_v51 = vpop.xlane.xlu0 %2837  ;;  %v2951_v9 = vsel %vm8626_vm11, %v2900_v39, %v2950_v10 }
0x1537   : > { %v2908_v34 = vrot.slane %v7475_v51, %v6598_v22  ;;  %v2776_v51 = vrot.slane %v7471_v44, %v6598_v22 }
0x153a   : > { %v2673_v43 = vpop.xlane.xlu0 %2672 }
0x153b   : > { %v2744_v61 = vrot.slane %v2673_v43, %v6598_v22 }
0x153d   : > { %v2786_v30 = vsel %vm682_vm14, %v2744_v61, %v2785_v36  ;;  %v2780_v36 = vrot.slane %v2700_v17, %v6598_v22 }
0x153e   : > { %v2841_v16 = vpop.xlane.xlu0 %2840 }
0x153f   : > { %v2912_v45 = vrot.slane %v2841_v16, %v6598_v22 }
0x1542   : > { %v2676_v46 = vpop.xlane.xlu0 %2675 }
0x1543   : > { %v2748_v12 = vrot.slane %v2676_v46, %v6598_v22  ;;  %v2904_v46 = vrot.slane %v7467_v37, %v6598_v22 }
0x1545   : > { %v2787_v55 = vsel %vm8642_vm7, %v2748_v12, %v2786_v30  ;;  %v2952_v25 = vsel %vm8641_vm8, %v2904_v46, %v2951_v9  ;;  %vm8644_vm7 = vcmask 1045504  }
0x1546   : > { %v2844_v24 = vpop.xlane.xlu0 %2843  ;;  %v2797_v32 = vmul.f32 %v2787_v55, %v7271_v29  ;;  %v2936_v55 = vrot.slane %v7463_v49, %v6598_v22  ;;  %v2940_v49 = vrot.slane %v7469_v42, %v6598_v22 }
0x1547   : > { %v2916_v12 = vrot.slane %v2844_v24, %v6598_v22  ;;  %v2421_v24 = vsel %vm8644_vm7, %v7324_v62, %v7450_v33  ;;  %v2944_v62 = vrot.slane %v7473_v57, %v6598_v22 }
0x1548   : > { %v2799_v52 = vsel %vm639_vm1, %v2797_v32, 0.0  ;;  %v2953_v32 = vsel %vm680_vm13, %v2908_v34, %v2952_v25 }
0x1549   : > { %2800 = vadd.xlane.f32.xlu1 %v2799_v52  ;;  %v2954_v16 = vsel %vm682_vm14, %v2912_v45, %v2953_v32 }
0x154a   : > { %v2384_v50 = vpop.permute.xlu0 %2383 }
0x154b   : > { %v2385_v8 = vmul.f32 %v2384_v50, %v7085_v56  ;;  %v2790_v56 = vsel %vm8626_vm11, %v2764_v38, %v2789_v21  ;;  %vm8646_vm11 = vcmask 1046528  }
0x154c   : > { %v2791_v7 = vsel %vm8643_vm12, %v2768_v63, %v2790_v56  ;;  %vm8645_vm12 = vmmov %vm8641_vm8  ;;  %vm8647_vm8 = vcmask 1047559  }
0x154d   : > { %v2386_v58 = vsel %vm639_vm1, %v2385_v8, 0.0  ;;  %v2792_v40 = vsel %vm680_vm13, %v2772_v26, %v2791_v7  ;;  %v2959_v11 = vsel %vm8645_vm12, %v2936_v55, %v2958_v35  ;;  %vm8648_vm10 = vmmov %vm8647_vm8  ;;  %v2948_v8 = vrot.slane %v2868_v47, %v6598_v22 }
0x154e   : > { %v2387_v43 = vrot.slane %v2386_v58, 4  ;;  %v2793_v52 = vsel %vm682_vm14, %v2776_v51, %v2792_v40  ;;  %v2955_v31 = vsel %vm8648_vm10, %v2916_v12, %v2954_v16  ;;  %v2960_v48 = vsel %vm680_vm13, %v2940_v49, %v2959_v11 }
0x154f   : > { %v2794_v50 = vsel %vm8647_vm8, %v2780_v36, %v2793_v52  ;;  %v2965_v21 = vmul.f32 %v2955_v31, %v7271_v29  ;;  %v2961_v42 = vsel %vm682_vm14, %v2944_v62, %v2960_v48 }
0x1550   : > { %v2388_v5 = vadd.f32 %v2387_v43, %v2386_v58 }
0x1551   : > { %v2967_v38 = vsel %vm639_vm1, %v2965_v21, 0.0 }
0x1552   : > { %v2389_v14 = vrot.slane %v2388_v5, 2 }
0x1554   : > { %v2390_v61 = vadd.f32 %v2389_v14, %v2388_v5 }
0x1556   : > { %v2391_v30 = vrot.slane %v2390_v61, 1 }
0x1558   : > { %v2392_v37 = vadd.f32 %v2391_v30, %v2390_v61 }
0x155a   : > { %v2422_v44 = vsel %vm8646_vm11, %v2421_v24, %v2392_v37  ;;  %vm8649_vm11 = vmmov %vm8647_vm8 }
0x155b   : > { %v2798_v0 = vmul.f32 %v2794_v50, %v2422_v44  ;;  %v2962_v58 = vsel %vm8649_vm11, %v2948_v8, %v2961_v42 }
0x155c   : > { %v2966_v28 = vmul.f32 %v2962_v58, %v2422_v44 }
0x155d   : > { %v2802_v33 = vsel %vm639_vm1, %v2798_v0, 0.0 }
0x155e   : > { %2803 = vadd.xlane.f32.xlu1 %v2802_v33  ;;  %v2970_v43 = vsel %vm639_vm1, %v2966_v28, 0.0 }
0x1562   : > { %2968 = vadd.xlane.f32.xlu1 %v2967_v38 }
0x1566   : > { %2971 = vadd.xlane.f32.xlu1 %v2970_v43 }
0x15d6   : > { %v2801_v23 = vpop.xlane.xlu1 %2800 }
0x15eb   : > { %v2804_v53 = vpop.xlane.xlu1 %2803 }
0x15ef   : > { %v2969_v60 = vpop.xlane.xlu1 %2968 }
0x15f0   : > { %v2973_v57 = vsel %vm282_vm0, %v2801_v23, %v2969_v60 }
0x15f1   : > { %6271 = vtanh.f32 %v2973_v57 }
0x15f3   : > { %v2972_v56 = vpop.xlane.xlu1 %2971 }
0x15f4   : > { %v2974_v29 = vsel %vm282_vm0, %v2804_v53, %v2972_v56 }
0x15f5   : > { %6273 = vtanh.f32 %v2974_v29 }
0x15fb   : > { %v6272_v27 = vpop.eup %6271 }
0x15fc   : > { %v2977_v39 = vmul.f32 %v6272_v27, %v6272_v27 }
0x15fe   : > { %v2979_v5 = vsel %vm1622_vm15, %v2977_v39, 0.0 }
0x15ff   : > { %v6274_v63 = vpop.eup %6273  ;;  %2980 = vadd.xlane.f32.xlu1 %v2979_v5  ;;  %v3377_v5 = vsub.s32 1, %v6506_v1 }
0x1600   : > { %v2978_v54 = vmul.f32 %v6274_v63, %v6274_v63 }
0x1602   : > { %v2982_v59 = vsel %vm1622_vm15, %v2978_v54, 0.0 }
0x1603   : > { %2983 = vadd.xlane.f32.xlu0 %v2982_v59 }
0x168c   : > { %v2981_v14 = vpop.xlane.xlu1 %2980 }
0x168d   : > { %6275 = vrsqrt.f32 %v2981_v14  ;;  %vm2987_vm10 = vcmp.eq.f32.partialorder %v2981_v14, inf  ;;  %v2990_v7 = vand.u32 2147483648, %v2981_v14  ;;  %vm2989_vm7 = vcmp.eq.f32.partialorder %v2981_v14, 0.0 }
0x1690   : > { %v2984_v41 = vpop.xlane.xlu0 %2983 }
0x1691   : > { %6277 = vrsqrt.f32 %v2984_v41  ;;  %vm2994_vm12 = vcmp.eq.f32.partialorder %v2984_v41, inf  ;;  %v2997_v46 = vand.u32 2147483648, %v2984_v41  ;;  %vm2996_vm8 = vcmp.eq.f32.partialorder %v2984_v41, 0.0 }
0x1697   : > { %v6276_v17 = vpop.eup %6275 }
0x1698   : > { %v2986_v10 = vmul.f32 %v6276_v17, %v2981_v14 }
0x169a   : > { %v2988_v26 = vsel %vm2987_vm10, %v2981_v14, %v2986_v10  ;;  %v7593_v14 = vld [vmem:[%s8616_s3] sm:$0x3] }
0x169b   : > { %v6278_v9 = vpop.eup %6277  ;;  %v2991_v34 = vsel %vm2989_vm7, %v2990_v7, %v2988_v26 }
0x169c   : > { %v2999_v61 = vadd.f32 1e-06, %v2991_v34  ;;  %v2993_v35 = vmul.f32 %v6278_v9, %v2984_v41  ;;  %v7602_v34 = vld [vmem:[#allocation3 + $0x18] sm:$0xff] }
0x169e   : > { %6279 = vrcp.f32 %v2999_v61  ;;  %v2995_v45 = vsel %vm2994_vm12, %v2984_v41, %v2993_v35  ;;  %v3378_v41 = vrot.slane %v7593_v14, %v3377_v5  ;;  %v7604_v61 = vld [vmem:[#allocation3 + $0x10] sm:$0xff] }
0x169f   : > { %v2998_v36 = vsel %vm2996_vm8, %v2997_v46, %v2995_v45  ;;  %vm8650_vm8 = vcmask 1045504  }
0x16a0   : > { %v3000_v12 = vadd.f32 1e-06, %v2998_v36 }
0x16a2   : > { %6281 = vrcp.f32 %v3000_v12 }
0x16a8   : > { %v6280_v30 = vpop.eup %6279 }
0x16a9   : > { %v3002_v40 = vmul.f32 %v6280_v30, %v6272_v27 }
0x16ab   : > { %v3005_v55 = vadd.f32 %v3002_v40, %v7102_v19  ;;  %v7613_v40 = vld [vmem:[%s8617_s4] sm:$0x3] }
0x16ac   : > { %v6282_v51 = vpop.eup %6281 }
0x16ad   : > { %v3007_v25 = vmul.f32 %v3005_v55, %v3005_v55  ;;  %v3004_v32 = vmul.f32 %v6282_v51, %v6274_v63 }
0x16af   : > { %v3009_v37 = vsel %vm1622_vm15, %v3007_v25, 0.0  ;;  %v3006_v47 = vadd.f32 %v3004_v32, %v7059_v6 }
0x16b0   : > { %3010 = vadd.xlane.f32.xlu1 %v3009_v37 }
0x16b1   : > { %v3008_v16 = vmul.f32 %v3006_v47, %v3006_v47 }
0x16b3   : > { %v3012_v24 = vsel %vm1622_vm15, %v3008_v16, 0.0 }
0x16b4   : > { %3013 = vadd.xlane.f32.xlu1 %v3012_v24 }
0x173d   : > { %v3011_v52 = vpop.xlane.xlu1 %3010 }
0x173e   : > { %6283 = vrsqrt.f32 %v3011_v52  ;;  %vm3017_vm11 = vcmp.eq.f32.partialorder %v3011_v52, inf  ;;  %v3020_v19 = vand.u32 2147483648, %v3011_v52  ;;  %vm3019_vm10 = vcmp.eq.f32.partialorder %v3011_v52, 0.0 }
0x1741   : > { %v3014_v11 = vpop.xlane.xlu1 %3013 }
0x1742   : > { %6285 = vrsqrt.f32 %v3014_v11  ;;  %vm3024_vm7 = vcmp.eq.f32.partialorder %v3014_v11, inf  ;;  %v3027_v6 = vand.u32 2147483648, %v3014_v11  ;;  %vm3026_vm12 = vcmp.eq.f32.partialorder %v3014_v11, 0.0 }
0x1748   : > { %v6284_v49 = vpop.eup %6283 }
0x1749   : > { %v3016_v44 = vmul.f32 %v6284_v49, %v3011_v52 }
0x174b   : > { %v3018_v50 = vsel %vm3017_vm11, %v3011_v52, %v3016_v44  ;;  %vm8651_vm11 = vcmask 1046528  }
0x174c   : > { %v6286_v31 = vpop.eup %6285  ;;  %v3021_v0 = vsel %vm3019_vm10, %v3020_v19, %v3018_v50  ;;  %vm8652_vm10 = vmmov %vm8650_vm8 }
0x174d   : > { %v3029_v8 = vadd.f32 1e-06, %v3021_v0  ;;  %v3023_v48 = vmul.f32 %v6286_v31, %v3014_v11 }
0x174f   : > { %6287 = vrcp.f32 %v3029_v8  ;;  %v3025_v62 = vsel %vm3024_vm7, %v3014_v11, %v3023_v48  ;;  %vm8653_vm7 = vmmov %vm8651_vm11 }
0x1750   : > { %v3028_v33 = vsel %vm3026_vm12, %v3027_v6, %v3025_v62  ;;  %vm8654_vm12 = vmmov %vm8650_vm8 }
0x1751   : > { %v3030_v21 = vadd.f32 1e-06, %v3028_v33 }
0x1753   : > { %6289 = vrcp.f32 %v3030_v21 }
0x1759   : > { %v6288_v42 = vpop.eup %6287 }
0x175a   : > { %v7569_v58 = vmul.f32 %v6288_v42, %v3005_v55  ;;  %v7616_v55 = vrot.slane %v7613_v40, %v3377_v5 }
0x175c   : > { %v3044_v38 = vrot.slane %v7569_v58, %v6520_v13 }
0x175d   : > { %v6290_v28 = vpop.eup %6289 }
0x175e   : > { %v3060_v43 = vrot.slane %v3044_v38, %v6520_v13  ;;  %v7574_v23 = vmul.f32 %v6290_v28, %v3006_v47  ;;  %v3052_v59 = vcombine.high %v3044_v38, %v3044_v38 }
0x1760   : > { %v3138_v53 = vrot.slane %v3060_v43, %v6513_v2  ;;  %v3086_v60 = vcombine.high %v7574_v23, %v7574_v23  ;;  %v3074_v10 = vrot.slane %v3052_v59, %v6520_v13  ;;  %v3082_v31 = vcombine.high %v3060_v43, %v3060_v43 }
0x1762   : > { %3200 = vperm.xlu1 %6203, %v3138_v53   ;;  %v3100_v57 = vrot.slane %v3086_v60, %v6520_v13  ;;  %v3142_v7 = vrot.slane %v3074_v10, %v6513_v2  ;;  %v3146_v0 = vrot.slane %v3082_v31, %v6513_v2  ;;  %v3084_v48 = vcombine.high %v3074_v10, %v3074_v10 }
0x1764   : > { %v3102_v56 = vcombine.high %v3100_v57, %v3100_v57  ;;  %v7583_v27 = vrot.slane %v3100_v57, %v6520_v13  ;;  %v3150_v6 = vrot.slane %v3084_v48, %v6513_v2 }
0x1766   : > { %6204 = vset.pattern.permute.xlu1 %v6397_v3  ;;  %v3130_v29 = vrot.slane %v3102_v56, %v6520_v13  ;;  %v3132_v54 = vcombine.high %v7583_v27, %v7583_v27 }
0x1767   : > { %3280 = vperm.xlu1 %6204, %v3138_v53  }
0x1768   : > { %v3134_v39 = vcombine.high %v3130_v29, %v3130_v29  ;;  %v3194_v17 = vrot.slane %v3132_v54, %v6513_v2  ;;  %v3190_v8 = vrot.slane %v3130_v29, %v6513_v2 }
0x176a   : > { %v3198_v63 = vrot.slane %v3134_v39, %v6513_v2 }
0x176b   : > { %6205 = vset.pattern.permute.xlu1 %v6398_v4 }
0x176c   : > { %3340 = vperm.xlu0 %6202, %v3198_v63   ;;  %3260 = vperm.xlu1 %6205, %v3198_v63   ;;  %v3777_v63 = vrot.slane %v7593_v14, 1 }
0x1770   : > { %3336 = vperm.xlu0 %6202, %v3194_v17   ;;  %3380 = vbcast.lane.b32.xlu1 %v3378_v41, 256 }
0x1774   : > { %6207 = vset.pattern.permute.xlu0 %v6398_v4  ;;  %3204 = vperm.xlu1 %6205, %v3142_v7  }
0x1775   : > { %3256 = vperm.xlu0 %6207, %v3194_v17  }
0x1778   : > { %6206 = vset.pattern.permute.xlu1 %v6397_v3 }
0x1779   : > { %3284 = vperm.xlu1 %6206, %v3142_v7  }
0x177d   : > { %6211 = vset.pattern.permute.xlu1 %v6398_v4 }
0x17e1   : > { %v3201_v26 = vpop.permute.xlu1 %3200 }
0x17e2   : > { %v3263_v36 = vmul.f32 %v3201_v26, %v7604_v61 }
0x17e6   : > { %v3281_v9 = vpop.permute.xlu1 %3280 }
0x17e7   : > { %v3343_v35 = vmul.f32 %v3281_v9, %v7602_v34 }
0x17e9   : > { %v3359_v51 = vadd.f32 %v3343_v35, %v3263_v36 }
0x17eb   : > { %v3341_v46 = vpop.permute.xlu0 %3340  ;;  %v3261_v45 = vpop.permute.xlu1 %3260 }
0x17ec   : > { %v3358_v12 = vmul.f32 %v3341_v46, %v7602_v34  ;;  %v3278_v30 = vmul.f32 %v3261_v45, %v7604_v61 }
0x17ee   : > { %v3374_v25 = vadd.f32 %v3358_v12, %v3278_v30 }
0x17ef   : > { %v7618_v32 = vpop.permute.xlu1 %3380  ;;  %v3337_v33 = vpop.permute.xlu0 %3336 }
0x17f0   : > { %v3382_v37 = vmul.f32 %v7618_v32, %v3359_v51  ;;  %v3394_v47 = vmul.f32 %v7616_v55, %v3374_v25  ;;  %v3357_v41 = vmul.f32 %v3337_v33, %v7602_v34 }
0x17f2   : > { %v3383_v16 = vsel %vm639_vm1, %v3382_v37, 0.0  ;;  %v3395_v24 = vsel %vm639_vm1, %v3394_v47, 0.0 }
0x17f3   : > { %v3384_v52 = vrot.slane %v3383_v16, 4  ;;  %3396 = vadd.xlane.f32.xlu1 %v3395_v24  ;;  %v3205_v62 = vpop.permute.xlu1 %3204 }
0x17f4   : > { %v3257_v38 = vpop.permute.xlu0 %3256  ;;  %v3264_v28 = vmul.f32 %v3205_v62, %v7604_v61 }
0x17f5   : > { %v3385_v11 = vadd.f32 %v3384_v52, %v3383_v16  ;;  %v3277_v54 = vmul.f32 %v3257_v38, %v7604_v61 }
0x17f7   : > { %v3386_v49 = vrot.slane %v3385_v11, 2  ;;  %v7643_v26 = vadd.f32 %v3357_v41, %v3277_v54 }
0x17f8   : > { %v3285_v21 = vpop.permute.xlu1 %3284 }
0x17f9   : > { %v3387_v44 = vadd.f32 %v3386_v49, %v3385_v11  ;;  %v3344_v42 = vmul.f32 %v3285_v21, %v7602_v34 }
0x17fb   : > { %v3388_v19 = vrot.slane %v3387_v44, 1  ;;  %v7633_v43 = vadd.f32 %v3344_v42, %v3264_v28  ;;  %v3037_v42 = vcombine.high %v7569_v58, %v7569_v58 }
0x17fd   : > { %v3389_v50 = vadd.f32 %v3388_v19, %v3387_v44 }
0x17ff   : > { %3399 = vbcast.lane.b32.xlu0 %v3389_v50, 256  ;;  %v3779_v10 = vsel %vm1042_vm2, %v3777_v63, %v3389_v50 }
0x1803   : > { %3208 = vperm.xlu0 %6207, %v3146_v0  }
0x1807   : > { %6208 = vset.pattern.permute.xlu0 %v6397_v3 }
0x1808   : > { %3288 = vperm.xlu0 %6208, %v3146_v0  }
0x180c   : > { %6209 = vset.pattern.permute.xlu0 %v6398_v4 }
0x180d   : > { %3252 = vperm.xlu0 %6209, %v3190_v8  }
0x1811   : > { %6210 = vset.pattern.permute.xlu0 %v6397_v3 }
0x1812   : > { %3332 = vperm.xlu0 %6210, %v3190_v8  }
0x1816   : > { %3292 = vperm.xlu0 %6210, %v3150_v6  }
0x181a   : > { %6215 = vset.pattern.permute.xlu0 %v6398_v4 }
0x1871   : > { %v3400_v53 = vpop.permute.xlu0 %3399 }
0x1872   : > { %v3401_v60 = vmul.f32 %v3400_v53, %v7633_v43 }
0x1874   : > { %v3402_v57 = vsel %vm639_vm1, %v3401_v60, 0.0  ;;  %v3051_v60 = vrot.slane %v3037_v42, %v6520_v13 }
0x1875   : > { %v3403_v56 = vrot.slane %v3402_v57, 4 }
0x1877   : > { %v3404_v29 = vadd.f32 %v3403_v56, %v3402_v57  ;;  %v3186_v56 = vrot.slane %v7583_v27, %v6513_v2 }
0x1879   : > { %v3405_v39 = vrot.slane %v3404_v29, 2 }
0x187b   : > { %v3406_v5 = vadd.f32 %v3405_v39, %v3404_v29  ;;  %v3053_v39 = vcombine.high %v3051_v60, %v3051_v60 }
0x187d   : > { %v3407_v59 = vrot.slane %v3406_v5, 1  ;;  %v7683_v54 = vrot.slane %v3053_v39, %v6520_v13 }
0x187f   : > { %v3408_v17 = vadd.f32 %v3407_v59, %v3406_v5  ;;  %v3067_v59 = vrot.slane %v3051_v60, %v6520_v13  ;;  %v3158_v27 = vrot.slane %v7683_v54, %v6513_v2 }
0x1880   : > { %v3397_v7 = vpop.xlane.xlu1 %3396 }
0x1881   : > { %v7646_v9 = vrot.slane %v3397_v7, %v6598_v22  ;;  %v3780_v35 = vsel %vm1044_vm3, %v3779_v10, %v3408_v17 }
0x1882   : > { %v3209_v36 = vpop.permute.xlu0 %3208 }
0x1883   : > { %v3421_v46 = vmul.f32 %v7646_v9, %v7643_v26  ;;  %v3265_v24 = vmul.f32 %v3209_v36, %v7604_v61 }
0x1885   : > { %v3422_v45 = vsel %vm639_vm1, %v3421_v46, 0.0 }
0x1886   : > { %3423 = vadd.xlane.f32.xlu1 %v3422_v45 }
0x1887   : > { %v3289_v12 = vpop.permute.xlu0 %3288 }
0x1888   : > { %v3345_v37 = vmul.f32 %v3289_v12, %v7602_v34 }
0x188a   : > { %v7661_v49 = vadd.f32 %v3345_v37, %v3265_v24 }
0x188c   : > { %v3253_v30 = vpop.permute.xlu0 %3252 }
0x188d   : > { %v3276_v47 = vmul.f32 %v3253_v30, %v7604_v61 }
0x1891   : > { %v3333_v51 = vpop.permute.xlu0 %3332 }
0x1892   : > { %v3356_v25 = vmul.f32 %v3333_v51, %v7602_v34 }
0x1894   : > { %v7656_v52 = vadd.f32 %v3356_v25, %v3276_v47 }
0x1895   : > { %v3293_v36 = vpop.permute.xlu0 %3292 }
0x1896   : > { %v3346_v30 = vmul.f32 %v3293_v36, %v7602_v34 }
0x1897   : > { %3426 = vbcast.lane.b32.xlu1 %v3408_v17, 256  ;;  %v3154_v17 = vrot.slane %v3067_v59, %v6513_v2 }
0x189b   : > { %3212 = vperm.xlu1 %6211, %v3150_v6   ;;  %v3093_v6 = vrot.slane %v7574_v23, %v6520_v13 }
0x189d   : > { %v3101_v21 = vcombine.high %v3093_v6, %v3093_v6  ;;  %v7688_v41 = vrot.slane %v3093_v6, %v6520_v13 }
0x189f   : > { %v7673_v53 = vrot.slane %v3101_v21, %v6520_v13  ;;  %v3131_v10 = vcombine.high %v7688_v41, %v7688_v41 }
0x18a1   : > { %v3133_v29 = vcombine.high %v7673_v53, %v7673_v53  ;;  %v3178_v7 = vrot.slane %v3131_v10, %v6513_v2 }
0x18a3   : > { %v3182_v5 = vrot.slane %v3133_v29, %v6513_v2 }
0x1913   : > { %v3424_v16 = vpop.xlane.xlu1 %3423 }
0x1914   : > { %v7659_v11 = vrot.slane %v3424_v16, %v6598_v22 }
0x1916   : > { %v3448_v44 = vmul.f32 %v7659_v11, %v7656_v52 }
0x1917   : > { %v3427_v19 = vpop.permute.xlu1 %3426 }
0x1918   : > { %v3428_v50 = vmul.f32 %v3427_v19, %v7661_v49  ;;  %v3449_v31 = vsel %vm639_vm1, %v3448_v44, 0.0 }
0x1919   : > { %3450 = vadd.xlane.f32.xlu0 %v3449_v31 }
0x191a   : > { %v3429_v0 = vsel %vm639_vm1, %v3428_v50, 0.0 }
0x191b   : > { %v3430_v8 = vrot.slane %v3429_v0, 4  ;;  %v3213_v45 = vpop.permute.xlu1 %3212 }
0x191c   : > { %v3266_v12 = vmul.f32 %v3213_v45, %v7604_v61 }
0x191d   : > { %v3431_v48 = vadd.f32 %v3430_v8, %v3429_v0 }
0x191e   : > { %v7707_v51 = vadd.f32 %v3346_v30, %v3266_v12 }
0x191f   : > { %v3432_v62 = vrot.slane %v3431_v48, 2 }
0x1921   : > { %v3433_v33 = vadd.f32 %v3432_v62, %v3431_v48 }
0x1923   : > { %v3434_v38 = vrot.slane %v3433_v33, 1 }
0x1925   : > { %v3435_v28 = vadd.f32 %v3434_v38, %v3433_v33 }
0x1927   : > { %3453 = vbcast.lane.b32.xlu1 %v3435_v28, 256  ;;  %v3781_v57 = vsel %vm1046_vm4, %v3780_v35, %v3435_v28  ;;  %v3083_v35 = vcombine.high %v3067_v59, %v3067_v59 }
0x1929   : > { %v3162_v46 = vrot.slane %v3083_v35, %v6513_v2 }
0x192b   : > { %3248 = vperm.xlu1 %6211, %v3186_v56  }
0x192f   : > { %3244 = vperm.xlu0 %6215, %v3182_v5   ;;  %6212 = vset.pattern.permute.xlu1 %v6397_v3 }
0x1930   : > { %3328 = vperm.xlu1 %6212, %v3186_v56  }
0x1933   : > { %6217 = vset.pattern.permute.xlu0 %v6397_v3 }
0x1934   : > { %3300 = vperm.xlu0 %6217, %v3158_v27   ;;  %6213 = vset.pattern.permute.xlu1 %v6398_v4 }
0x1935   : > { %3216 = vperm.xlu1 %6213, %v3154_v17  }
0x1938   : > { %6218 = vset.pattern.permute.xlu0 %v6398_v4 }
0x1939   : > { %3240 = vperm.xlu0 %6218, %v3178_v7   ;;  %6214 = vset.pattern.permute.xlu1 %v6397_v3 }
0x193a   : > { %3296 = vperm.xlu1 %6214, %v3154_v17  }
0x193d   : > { %6219 = vset.pattern.permute.xlu0 %v6397_v3 }
0x193e   : > { %3320 = vperm.xlu0 %6219, %v3178_v7  }
0x1942   : > { %6220 = vset.pattern.permute.xlu0 %v6398_v4 }
0x1943   : > { %3224 = vperm.xlu0 %6220, %v3162_v46  }
0x1947   : > { %6221 = vset.pattern.permute.xlu0 %v6397_v3 }
0x1948   : > { %3304 = vperm.xlu0 %6221, %v3162_v46  }
0x194c   : > { %6222 = vset.pattern.permute.xlu0 %v6398_v4 }
0x1999   : > { %v3454_v25 = vpop.permute.xlu1 %3453 }
0x199a   : > { %v3455_v37 = vmul.f32 %v3454_v25, %v7707_v51 }
0x199c   : > { %v3456_v47 = vsel %vm639_vm1, %v3455_v37, 0.0 }
0x199d   : > { %v3457_v16 = vrot.slane %v3456_v47, 4 }
0x199f   : > { %v3458_v24 = vadd.f32 %v3457_v16, %v3456_v47 }
0x19a1   : > { %v3459_v44 = vrot.slane %v3458_v24, 2 }
0x19a3   : > { %v3460_v19 = vadd.f32 %v3459_v44, %v3458_v24 }
0x19a5   : > { %v3461_v50 = vrot.slane %v3460_v19, 1 }
0x19a6   : > { %v3451_v33 = vpop.xlane.xlu0 %3450 }
0x19a7   : > { %v3462_v31 = vadd.f32 %v3461_v50, %v3460_v19  ;;  %v7717_v42 = vrot.slane %v3451_v33, %v6598_v22 }
0x19a9   : > { %3480 = vbcast.lane.b32.xlu1 %v3462_v31, 256  ;;  %v3782_v0 = vsel %vm1048_vm5, %v3781_v57, %v3462_v31 }
0x19aa   : > { %v3249_v8 = vpop.permute.xlu1 %3248 }
0x19ab   : > { %v3275_v62 = vmul.f32 %v3249_v8, %v7604_v61 }
0x19ae   : > { %v3245_v30 = vpop.permute.xlu0 %3244 }
0x19af   : > { %v3329_v48 = vpop.permute.xlu1 %3328  ;;  %v3274_v37 = vmul.f32 %v3245_v30, %v7604_v61 }
0x19b0   : > { %v3355_v6 = vmul.f32 %v3329_v48, %v7602_v34 }
0x19b2   : > { %v7714_v21 = vadd.f32 %v3355_v6, %v3275_v62 }
0x19b3   : > { %v3301_v31 = vpop.permute.xlu0 %3300 }
0x19b4   : > { %v3475_v38 = vmul.f32 %v7717_v42, %v7714_v21  ;;  %v3217_v60 = vpop.permute.xlu1 %3216  ;;  %v3348_v8 = vmul.f32 %v3301_v31, %v7602_v34 }
0x19b5   : > { %v3267_v29 = vmul.f32 %v3217_v60, %v7604_v61 }
0x19b6   : > { %v3476_v28 = vsel %vm639_vm1, %v3475_v38, 0.0 }
0x19b9   : > { %v3297_v57 = vpop.permute.xlu1 %3296 }
0x19ba   : > { %v3347_v56 = vmul.f32 %v3297_v57, %v7602_v34 }
0x19bc   : > { %v7726_v39 = vadd.f32 %v3347_v56, %v3267_v29 }
0x19cd   : > { %3477 = vadd.xlane.f32.xlu1 %v3476_v28 }
0x19de   : > { %3324 = vperm.xlu1 %6214, %v3182_v5  }
0x19e2   : > { %6216 = vset.pattern.permute.xlu1 %v6398_v4 }
0x19e3   : > { %3220 = vperm.xlu1 %6216, %v3158_v27  }
0x19e7   : > { %6223 = vset.pattern.permute.xlu1 %v6397_v3 }
0x1a1b   : > { %v3481_v59 = vpop.permute.xlu1 %3480 }
0x1a1c   : > { %v3482_v17 = vmul.f32 %v3481_v59, %v7726_v39 }
0x1a1e   : > { %v3483_v10 = vsel %vm639_vm1, %v3482_v17, 0.0  ;;  %v3174_v17 = vrot.slane %v7673_v53, %v6513_v2 }
0x1a1f   : > { %v3484_v7 = vrot.slane %v3483_v10, 4 }
0x1a21   : > { %v3485_v5 = vadd.f32 %v3484_v7, %v3483_v10  ;;  %v3085_v10 = vcombine.high %v7683_v54, %v7683_v54 }
0x1a23   : > { %v3486_v35 = vrot.slane %v3485_v5, 2  ;;  %v3166_v7 = vrot.slane %v3085_v10, %v6513_v2 }
0x1a25   : > { %v3487_v46 = vadd.f32 %v3486_v35, %v3485_v5  ;;  %v3241_v5 = vpop.permute.xlu0 %3240 }
0x1a27   : > { %v3488_v27 = vrot.slane %v3487_v46, 1 }
0x1a29   : > { %v3489_v45 = vadd.f32 %v3488_v27, %v3487_v46  ;;  %v3321_v35 = vpop.permute.xlu0 %3320  ;;  %v3273_v27 = vmul.f32 %v3241_v5, %v7604_v61 }
0x1a2a   : > { %v3353_v46 = vmul.f32 %v3321_v35, %v7602_v34 }
0x1a2b   : > { %3507 = vbcast.lane.b32.xlu1 %v3489_v45, 256  ;;  %v3783_v36 = vsel %vm1050_vm6, %v3782_v0, %v3489_v45 }
0x1a2c   : > { %v7757_v53 = vadd.f32 %v3353_v46, %v3273_v27 }
0x1a2d   : > { %v3225_v30 = vpop.permute.xlu0 %3224 }
0x1a5a   : > { %v3478_v12 = vpop.xlane.xlu1 %3477 }
0x1a5b   : > { %v7734_v16 = vrot.slane %v3478_v12, %v6598_v22 }
0x1a5e   : > { %v3325_v25 = vpop.permute.xlu1 %3324 }
0x1a5f   : > { %v3354_v47 = vmul.f32 %v3325_v25, %v7602_v34  ;;  %v3305_v25 = vpop.permute.xlu0 %3304 }
0x1a61   : > { %v7736_v24 = vadd.f32 %v3354_v47, %v3274_v37  ;;  %v3349_v37 = vmul.f32 %v3305_v25, %v7602_v34  ;;  %v3269_v47 = vmul.f32 %v3225_v30, %v7604_v61 }
0x1a62   : > { %v3221_v50 = vpop.permute.xlu1 %3220 }
0x1a63   : > { %v3502_v44 = vmul.f32 %v7734_v16, %v7736_v24  ;;  %v3268_v0 = vmul.f32 %v3221_v50, %v7604_v61 }
0x1a65   : > { %v3503_v19 = vsel %vm639_vm1, %v3502_v44, 0.0  ;;  %v7743_v48 = vadd.f32 %v3348_v8, %v3268_v0  ;;  %v7767_v44 = vadd.f32 %v3349_v37, %v3269_v47 }
0x1a66   : > { %3504 = vadd.xlane.f32.xlu1 %v3503_v19 }
0x1a9d   : > { %v3508_v6 = vpop.permute.xlu1 %3507 }
0x1a9e   : > { %v3509_v62 = vmul.f32 %v3508_v6, %v7743_v48 }
0x1aa0   : > { %v3510_v33 = vsel %vm639_vm1, %v3509_v62, 0.0 }
0x1aa1   : > { %v3511_v38 = vrot.slane %v3510_v33, 4 }
0x1aa3   : > { %v3512_v28 = vadd.f32 %v3511_v38, %v3510_v33 }
0x1aa5   : > { %v3513_v60 = vrot.slane %v3512_v28, 2 }
0x1aa7   : > { %v3514_v57 = vadd.f32 %v3513_v60, %v3512_v28  ;;  %v3170_v60 = vrot.slane %v7688_v41, %v6513_v2 }
0x1aa9   : > { %v3515_v56 = vrot.slane %v3514_v57, 1 }
0x1aab   : > { %v3516_v29 = vadd.f32 %v3515_v56, %v3514_v57 }
0x1aad   : > { %3534 = vbcast.lane.b32.xlu0 %v3516_v29, 256  ;;  %v3784_v59 = vsel %vm8650_vm8, %v3783_v36, %v3516_v29  ;;  %vm8655_vm8 = vcmask 1042434  }
0x1ab1   : > { %3236 = vperm.xlu0 %6222, %v3174_v17  }
0x1ab5   : > { %3228 = vperm.xlu0 %6222, %v3166_v7  }
0x1ab9   : > { %6224 = vset.pattern.permute.xlu0 %v6397_v3 }
0x1aba   : > { %3308 = vperm.xlu0 %6224, %v3166_v7  }
0x1abe   : > { %6225 = vset.pattern.permute.xlu0 %v6398_v4 }
0x1af3   : > { %v3505_v45 = vpop.xlane.xlu1 %3504 }
0x1af4   : > { %v7760_v54 = vrot.slane %v3505_v45, %v6598_v22 }
0x1af6   : > { %v3529_v36 = vmul.f32 %v7760_v54, %v7757_v53 }
0x1af8   : > { %v3530_v12 = vsel %vm639_vm1, %v3529_v36, 0.0 }
0x1af9   : > { %3531 = vadd.xlane.f32.xlu1 %v3530_v12 }
0x1b0a   : > { %3316 = vperm.xlu1 %6223, %v3174_v17  }
0x1b1f   : > { %v3535_v19 = vpop.permute.xlu0 %3534 }
0x1b20   : > { %v3536_v50 = vmul.f32 %v3535_v19, %v7767_v44 }
0x1b22   : > { %v3537_v31 = vsel %vm639_vm1, %v3536_v50, 0.0 }
0x1b23   : > { %v3538_v0 = vrot.slane %v3537_v31, 4 }
0x1b25   : > { %v3539_v8 = vadd.f32 %v3538_v0, %v3537_v31 }
0x1b27   : > { %v3540_v6 = vrot.slane %v3539_v8, 2 }
0x1b29   : > { %v3541_v62 = vadd.f32 %v3540_v6, %v3539_v8 }
0x1b2b   : > { %v3542_v33 = vrot.slane %v3541_v62, 1 }
0x1b2d   : > { %v3543_v38 = vadd.f32 %v3542_v33, %v3541_v62 }
0x1b2f   : > { %3561 = vbcast.lane.b32.xlu0 %v3543_v38, 256  ;;  %v7772_v28 = vsel %vm8651_vm11, %v3784_v59, %v3543_v38  ;;  %vm8656_vm11 = vcmask 1043459  }
0x1b30   : > { %v3237_v56 = vpop.permute.xlu0 %3236 }
0x1b31   : > { %v3272_v17 = vmul.f32 %v3237_v56, %v7604_v61 }
0x1b33   : > { %3232 = vperm.xlu0 %6225, %v3170_v60  }
0x1b34   : > { %v3229_v35 = vpop.permute.xlu0 %3228 }
0x1b35   : > { %v3270_v45 = vmul.f32 %v3229_v35, %v7604_v61 }
0x1b37   : > { %6226 = vset.pattern.permute.xlu0 %v6397_v3 }
0x1b38   : > { %3312 = vperm.xlu0 %6226, %v3170_v60  }
0x1b39   : > { %v3309_v46 = vpop.permute.xlu0 %3308 }
0x1b3a   : > { %v3350_v27 = vmul.f32 %v3309_v46, %v7602_v34 }
0x1b3c   : > { %6227 = vset.pattern.permute.xlu0 %v6398_v4  ;;  %v3366_v36 = vadd.f32 %v3350_v27, %v3270_v45 }
0x1b86   : > { %v3532_v57 = vpop.xlane.xlu1 %3531 }
0x1b87   : > { %v7781_v7 = vrot.slane %v3532_v57, %v6598_v22 }
0x1b8a   : > { %v3317_v29 = vpop.permute.xlu1 %3316 }
0x1b8b   : > { %v3352_v10 = vmul.f32 %v3317_v29, %v7602_v34 }
0x1b8d   : > { %v3368_v59 = vadd.f32 %v3352_v10, %v3272_v17 }
0x1b8f   : > { %v3556_v5 = vmul.f32 %v7781_v7, %v3368_v59 }
0x1b91   : > { %v3557_v41 = vsel %vm639_vm1, %v3556_v5, 0.0 }
0x1b92   : > { %3558 = vadd.xlane.f32.xlu1 %v3557_v41 }
0x1ba1   : > { %v3562_v12 = vpop.permute.xlu0 %3561 }
0x1ba2   : > { %v3563_v30 = vmul.f32 %v3562_v12, %v3366_v36 }
0x1ba4   : > { %v3564_v25 = vsel %vm639_vm1, %v3563_v30, 0.0 }
0x1ba5   : > { %v3565_v37 = vrot.slane %v3564_v25, 4 }
0x1ba7   : > { %v3566_v47 = vadd.f32 %v3565_v37, %v3564_v25 }
0x1ba9   : > { %v3567_v19 = vrot.slane %v3566_v47, 2 }
0x1bab   : > { %v3568_v50 = vadd.f32 %v3567_v19, %v3566_v47 }
0x1bad   : > { %v3569_v31 = vrot.slane %v3568_v50, 1 }
0x1baf   : > { %v3570_v0 = vadd.f32 %v3569_v31, %v3568_v50 }
0x1bb1   : > { %3588 = vbcast.lane.b32.xlu0 %v3570_v0, 256 }
0x1bb2   : > { %v3233_v8 = vpop.permute.xlu0 %3232 }
0x1bb3   : > { %v3271_v33 = vmul.f32 %v3233_v8, %v7604_v61 }
0x1bb7   : > { %v3313_v6 = vpop.permute.xlu0 %3312 }
0x1bb8   : > { %v3351_v62 = vmul.f32 %v3313_v6, %v7602_v34 }
0x1bba   : > { %v3367_v57 = vadd.f32 %v3351_v62, %v3271_v33 }
0x1c1f   : > { %v3559_v38 = vpop.xlane.xlu1 %3558 }
0x1c20   : > { %v7791_v60 = vrot.slane %v3559_v38, %v6598_v22 }
0x1c22   : > { %v3583_v56 = vmul.f32 %v7791_v60, %v3367_v57 }
0x1c23   : > { %v3589_v29 = vpop.permute.xlu0 %3588 }
0x1c24   : > { %v3590_v17 = vmul.f32 %v3589_v29, %v3367_v57  ;;  %v3584_v10 = vsel %vm639_vm1, %v3583_v56, 0.0 }
0x1c25   : > { %3585 = vadd.xlane.f32.xlu0 %v3584_v10 }
0x1c26   : > { %v3591_v5 = vsel %vm639_vm1, %v3590_v17, 0.0 }
0x1c27   : > { %v3592_v41 = vrot.slane %v3591_v5, 4 }
0x1c29   : > { %v3593_v35 = vadd.f32 %v3592_v41, %v3591_v5 }
0x1c2b   : > { %v3594_v46 = vrot.slane %v3593_v35, 2 }
0x1c2d   : > { %v3595_v27 = vadd.f32 %v3594_v46, %v3593_v35 }
0x1c2f   : > { %v3596_v45 = vrot.slane %v3595_v27, 1 }
0x1c31   : > { %v3597_v12 = vadd.f32 %v3596_v45, %v3595_v27 }
0x1c33   : > { %3615 = vbcast.lane.b32.xlu1 %v3597_v12, 256  ;;  %v3786_v38 = vsel %vm1042_vm2, %v3570_v0, %v3597_v12 }
0x1ca5   : > { %v3616_v30 = vpop.permute.xlu1 %3615 }
0x1ca6   : > { %v3617_v25 = vmul.f32 %v3616_v30, %v3368_v59 }
0x1ca8   : > { %v3618_v37 = vsel %vm639_vm1, %v3617_v25, 0.0 }
0x1ca9   : > { %v3619_v47 = vrot.slane %v3618_v37, 4 }
0x1cab   : > { %v3620_v19 = vadd.f32 %v3619_v47, %v3618_v37 }
0x1cad   : > { %v3621_v50 = vrot.slane %v3620_v19, 2 }
0x1caf   : > { %v3622_v31 = vadd.f32 %v3621_v50, %v3620_v19 }
0x1cb1   : > { %v3623_v8 = vrot.slane %v3622_v31, 1 }
0x1cb2   : > { %v3586_v6 = vpop.xlane.xlu0 %3585 }
0x1cb3   : > { %v7798_v62 = vrot.slane %v3586_v6, %v6598_v22  ;;  %v3624_v33 = vadd.f32 %v3623_v8, %v3622_v31 }
0x1cb5   : > { %3642 = vbcast.lane.b32.xlu0 %v3624_v33, 256  ;;  %v3787_v57 = vsel %vm1044_vm3, %v3786_v38, %v3624_v33  ;;  %v3610_v56 = vmul.f32 %v7798_v62, %v3366_v36 }
0x1cb7   : > { %v3611_v59 = vsel %vm639_vm1, %v3610_v56, 0.0 }
0x1cb8   : > { %3612 = vadd.xlane.f32.xlu1 %v3611_v59 }
0x1d27   : > { %v3643_v29 = vpop.permute.xlu0 %3642 }
0x1d28   : > { %v3644_v17 = vmul.f32 %v3643_v29, %v7757_v53 }
0x1d2a   : > { %v3645_v10 = vsel %vm639_vm1, %v3644_v17, 0.0 }
0x1d2b   : > { %v3646_v5 = vrot.slane %v3645_v10, 4 }
0x1d2d   : > { %v3647_v41 = vadd.f32 %v3646_v5, %v3645_v10 }
0x1d2f   : > { %v3648_v35 = vrot.slane %v3647_v41, 2 }
0x1d31   : > { %v3649_v46 = vadd.f32 %v3648_v35, %v3647_v41 }
0x1d33   : > { %v3650_v27 = vrot.slane %v3649_v46, 1 }
0x1d35   : > { %v3651_v45 = vadd.f32 %v3650_v27, %v3649_v46 }
0x1d37   : > { %3669 = vbcast.lane.b32.xlu1 %v3651_v45, 256  ;;  %v3788_v0 = vsel %vm1046_vm4, %v3787_v57, %v3651_v45 }
0x1d45   : > { %v3613_v12 = vpop.xlane.xlu1 %3612 }
0x1d46   : > { %v7808_v36 = vrot.slane %v3613_v12, %v6598_v22 }
0x1d48   : > { %v3637_v30 = vmul.f32 %v7808_v36, %v7767_v44 }
0x1d4a   : > { %v3638_v53 = vsel %vm639_vm1, %v3637_v30, 0.0 }
0x1d4b   : > { %3639 = vadd.xlane.f32.xlu0 %v3638_v53  ;;  %v3813_v53 = vrot.slane %v7613_v40, 2 }
0x1da9   : > { %v3670_v25 = vpop.permute.xlu1 %3669 }
0x1daa   : > { %v3671_v37 = vmul.f32 %v3670_v25, %v7736_v24 }
0x1dac   : > { %v3672_v47 = vsel %vm639_vm1, %v3671_v37, 0.0 }
0x1dad   : > { %v3673_v19 = vrot.slane %v3672_v47, 4 }
0x1daf   : > { %v3674_v50 = vadd.f32 %v3673_v19, %v3672_v47 }
0x1db1   : > { %v3675_v31 = vrot.slane %v3674_v50, 2 }
0x1db3   : > { %v3676_v8 = vadd.f32 %v3675_v31, %v3674_v50 }
0x1db5   : > { %v3677_v6 = vrot.slane %v3676_v8, 1 }
0x1db7   : > { %v3678_v33 = vadd.f32 %v3677_v6, %v3676_v8 }
0x1db9   : > { %3696 = vbcast.lane.b32.xlu0 %v3678_v33, 256  ;;  %v3789_v38 = vsel %vm1048_vm5, %v3788_v0, %v3678_v33 }
0x1dd8   : > { %v3640_v57 = vpop.xlane.xlu0 %3639 }
0x1dd9   : > { %v7817_v44 = vrot.slane %v3640_v57, %v6598_v22 }
0x1ddb   : > { %v3664_v56 = vmul.f32 %v7817_v44, %v7743_v48  ;;  %v3822_v48 = vsel %vm1042_vm2, %v7791_v60, %v7781_v7 }
0x1ddc   : > { %v3823_v0 = vsel %vm1044_vm3, %v3822_v48, %v7760_v54 }
0x1ddd   : > { %v3665_v24 = vsel %vm639_vm1, %v3664_v56, 0.0 }
0x1dde   : > { %3666 = vadd.xlane.f32.xlu1 %v3665_v24 }
0x1e2b   : > { %v3697_v59 = vpop.permute.xlu0 %3696 }
0x1e2c   : > { %v3698_v29 = vmul.f32 %v3697_v59, %v7714_v21  ;;  %v3824_v21 = vsel %vm1046_vm4, %v3823_v0, %v7734_v16 }
0x1e2d   : > { %v3825_v12 = vsel %vm1048_vm5, %v3824_v21, %v7717_v42 }
0x1e2e   : > { %v3699_v17 = vsel %vm639_vm1, %v3698_v29, 0.0  ;;  %v3826_v30 = vsel %vm1050_vm6, %v3825_v12, %v7659_v11 }
0x1e2f   : > { %v3700_v10 = vrot.slane %v3699_v17, 4  ;;  %v3827_v25 = vsel %vm8652_vm10, %v3826_v30, %v7646_v9  ;;  %vm8657_vm10 = vcmask 1044484  }
0x1e30   : > { %v3828_v7 = vsel %vm8653_vm7, %v3827_v25, %v3813_v53 }
0x1e31   : > { %v3701_v5 = vadd.f32 %v3700_v10, %v3699_v17  ;;  %v3887_v54 = vrot.slane %v3828_v7, %v6520_v13  ;;  %v3880_v10 = vcombine.high %v3828_v7, %v3828_v7 }
0x1e33   : > { %v3702_v41 = vrot.slane %v3701_v5, 2  ;;  %v3903_v60 = vrot.slane %v3887_v54, %v6520_v13  ;;  %v3895_v16 = vcombine.high %v3887_v54, %v3887_v54 }
0x1e35   : > { %v3703_v35 = vadd.f32 %v3702_v41, %v3701_v5  ;;  %v3964_v11 = vrot.slane %v3903_v60, %v6513_v2  ;;  %v3917_v47 = vrot.slane %v3895_v16, %v6520_v13  ;;  %v3925_v57 = vcombine.high %v3903_v60, %v3903_v60 }
0x1e37   : > { %v3704_v46 = vrot.slane %v3703_v35, 1  ;;  %v4017_v50 = vmul.f32 %v3964_v11, %v7604_v61  ;;  %v3968_v31 = vrot.slane %v3917_v47, %v6513_v2  ;;  %v3972_v24 = vrot.slane %v3925_v57, %v6513_v2 }
0x1e38   : > { %v3927_v17 = vcombine.high %v3917_v47, %v3917_v47 }
0x1e39   : > { %v3705_v27 = vadd.f32 %v3704_v46, %v3703_v35  ;;  %v4049_v8 = vsel %vm639_vm1, %v4017_v50, 0.0  ;;  %v4018_v6 = vmul.f32 %v3968_v31, %v7604_v61  ;;  %v4186_v56 = vmul.f32 %v3968_v31, %v7602_v34 }
0x1e3a   : > { %v4019_v29 = vmul.f32 %v3972_v24, %v7604_v61  ;;  %v4187_v41 = vmul.f32 %v3972_v24, %v7602_v34  ;;  %v3976_v35 = vrot.slane %v3927_v17, %v6513_v2  ;;  %v3894_v46 = vrot.slane %v3880_v10, %v6520_v13 }
0x1e3b   : > { %3723 = vbcast.lane.b32.xlu1 %v3705_v27, 256  ;;  %v7825_v45 = vsel %vm1050_vm6, %v3789_v38, %v3705_v27  ;;  %v4052_v33 = vsel %vm639_vm1, %v4018_v6, 0.0  ;;  %v4185_v38 = vmul.f32 %v3964_v11, %v7602_v34  ;;  %v4220_v59 = vsel %vm639_vm1, %v4186_v56, 0.0 }
0x1e3c   : > { %v4055_v5 = vsel %vm639_vm1, %v4019_v29, 0.0  ;;  %v4223_v27 = vsel %vm639_vm1, %v4187_v41, 0.0  ;;  %v4020_v48 = vmul.f32 %v3976_v35, %v7604_v61  ;;  %v3910_v0 = vrot.slane %v3894_v46, %v6520_v13 }
0x1e3d   : > { %v3896_v21 = vcombine.high %v3894_v46, %v3894_v46  ;;  %v4188_v30 = vmul.f32 %v3976_v35, %v7602_v34 }
0x1e3e   : > { %v4058_v12 = vsel %vm639_vm1, %v4020_v48, 0.0  ;;  %v3980_v25 = vrot.slane %v3910_v0, %v6513_v2 }
0x1e3f   : > { %v3924_v7 = vrot.slane %v3896_v21, %v6520_v13  ;;  %v4226_v54 = vsel %vm639_vm1, %v4188_v30, 0.0 }
0x1e40   : > { %v4021_v60 = vmul.f32 %v3980_v25, %v7604_v61 }
0x1e41   : > { %v3984_v16 = vrot.slane %v3924_v7, %v6513_v2 }
0x1e42   : > { %v4061_v11 = vsel %vm639_vm1, %v4021_v60, 0.0 }
0x1e43   : > { %v4022_v47 = vmul.f32 %v3984_v16, %v7604_v61 }
0x1e45   : > { %v4064_v50 = vsel %vm639_vm1, %v4022_v47, 0.0 }
0x1e6b   : > { %v3667_v37 = vpop.xlane.xlu1 %3666 }
0x1e6c   : > { %v7847_v42 = vrot.slane %v3667_v37, %v6598_v22  ;;  %v3926_v37 = vcombine.high %v3910_v0, %v3910_v0  ;;  %v4190_v0 = vmul.f32 %v3984_v16, %v7602_v34 }
0x1e6e   : > { %v3691_v9 = vmul.f32 %v7847_v42, %v7726_v39  ;;  %v4217_v39 = vsel %vm639_vm1, %v4185_v38, 0.0  ;;  %v4232_v21 = vsel %vm639_vm1, %v4190_v0, 0.0 }
0x1e70   : > { %v3692_v19 = vsel %vm639_vm1, %v3691_v9, 0.0  ;;  %v3988_v9 = vrot.slane %v3926_v37, %v6513_v2 }
0x1e71   : > { %3693 = vadd.xlane.f32.xlu0 %v3692_v19  ;;  %v3928_v19 = vcombine.high %v3924_v7, %v3924_v7 }
0x1e72   : > { %v4023_v31 = vmul.f32 %v3988_v9, %v7604_v61 }
0x1e74   : > { %v4067_v6 = vsel %vm639_vm1, %v4023_v31, 0.0 }
0x1e75   : > { %4050 = vadd.xlane.f32.xlu0 %v4049_v8  ;;  %v3992_v8 = vrot.slane %v3928_v19, %v6513_v2 }
0x1e77   : > { %v4192_v30 = vmul.f32 %v3992_v8, %v7602_v34 }
0x1e79   : > { %4053 = vadd.xlane.f32.xlu0 %v4052_v33  ;;  %v4024_v33 = vmul.f32 %v3992_v8, %v7604_v61 }
0x1e7b   : > { %v4070_v38 = vsel %vm639_vm1, %v4024_v33, 0.0 }
0x1e7d   : > { %4218 = vadd.xlane.f32.xlu0 %v4217_v39 }
0x1e81   : > { %4221 = vadd.xlane.f32.xlu0 %v4220_v59 }
0x1e85   : > { %4056 = vadd.xlane.f32.xlu0 %v4055_v5 }
0x1e89   : > { %4224 = vadd.xlane.f32.xlu0 %v4223_v27  ;;  %v4189_v27 = vmul.f32 %v3980_v25, %v7602_v34 }
0x1e8b   : > { %v4229_v48 = vsel %vm639_vm1, %v4189_v27, 0.0 }
0x1e8d   : > { %4059 = vadd.xlane.f32.xlu0 %v4058_v12 }
0x1e91   : > { %4227 = vadd.xlane.f32.xlu0 %v4226_v54 }
0x1e95   : > { %4062 = vadd.xlane.f32.xlu0 %v4061_v11 }
0x1e99   : > { %4065 = vadd.xlane.f32.xlu0 %v4064_v50 }
0x1e9d   : > { %4068 = vadd.xlane.f32.xlu0 %v4067_v6 }
0x1ea1   : > { %4071 = vadd.xlane.f32.xlu0 %v4070_v38 }
0x1ead   : > { %v3724_v57 = vpop.permute.xlu1 %3723 }
0x1eae   : > { %v3725_v39 = vmul.f32 %v3724_v57, %v7656_v52 }
0x1eb0   : > { %v3726_v56 = vsel %vm639_vm1, %v3725_v39, 0.0 }
0x1eb1   : > { %v3727_v24 = vrot.slane %v3726_v56, 4 }
0x1eb3   : > { %v3728_v59 = vadd.f32 %v3727_v24, %v3726_v56 }
0x1eb5   : > { %v3729_v29 = vrot.slane %v3728_v59, 2 }
0x1eb7   : > { %v3730_v17 = vadd.f32 %v3729_v29, %v3728_v59 }
0x1eb9   : > { %v3731_v10 = vrot.slane %v3730_v17, 1 }
0x1ebb   : > { %v3732_v5 = vadd.f32 %v3731_v10, %v3730_v17 }
0x1ebd   : > { %3750 = vbcast.lane.b32.xlu0 %v3732_v5, 256  ;;  %v3791_v41 = vsel %vm8654_vm12, %v7825_v45, %v3732_v5  ;;  %v4191_v45 = vmul.f32 %v3988_v9, %v7602_v34  ;;  %vm8658_vm12 = vcmask 1047559  }
0x1ebf   : > { %v4235_v12 = vsel %vm639_vm1, %v4191_v45, 0.0 }
0x1efe   : > { %v3694_v61 = vpop.xlane.xlu0 %3693 }
0x1eff   : > { %v7893_v35 = vrot.slane %v3694_v61, %v6598_v22 }
0x1f01   : > { %v3718_v46 = vmul.f32 %v7893_v35, %v7707_v51  ;;  %v4238_v51 = vsel %vm639_vm1, %v4192_v30, 0.0 }
0x1f02   : > { %v4051_v25 = vpop.xlane.xlu0 %4050 }
0x1f03   : > { %v3719_v52 = vsel %vm639_vm1, %v3718_v46, 0.0  ;;  %v4124_v29 = vrot.slane %v4051_v25, %v6598_v22 }
0x1f04   : > { %3720 = vadd.xlane.f32.xlu1 %v3719_v52 }
0x1f06   : > { %v4054_v7 = vpop.xlane.xlu0 %4053 }
0x1f07   : > { %v4128_v56 = vrot.slane %v4054_v7, %v6598_v22 }
0x1f08   : > { %4230 = vadd.xlane.f32.xlu1 %v4229_v48 }
0x1f09   : > { %v4160_v5 = vsel %vm673_vm9, %v4128_v56, %v4124_v29 }
0x1f0a   : > { %v4219_v54 = vpop.xlane.xlu0 %4218 }
0x1f0c   : > { %4233 = vadd.xlane.f32.xlu1 %v4232_v21 }
0x1f0e   : > { %v4222_v60 = vpop.xlane.xlu0 %4221 }
0x1f10   : > { %4236 = vadd.xlane.f32.xlu1 %v4235_v12 }
0x1f12   : > { %v4057_v37 = vpop.xlane.xlu0 %4056 }
0x1f13   : > { %v4132_v59 = vrot.slane %v4057_v37, %v6598_v22 }
0x1f14   : > { %4239 = vadd.xlane.f32.xlu1 %v4238_v51 }
0x1f15   : > { %v4161_v46 = vsel %vm8655_vm8, %v4132_v59, %v4160_v5 }
0x1f16   : > { %v4225_v16 = vpop.xlane.xlu0 %4224 }
0x1f1a   : > { %v4060_v11 = vpop.xlane.xlu0 %4059 }
0x1f1b   : > { %v4136_v17 = vrot.slane %v4060_v11, %v6598_v22 }
0x1f1d   : > { %v4162_v27 = vsel %vm8656_vm11, %v4136_v17, %v4161_v46 }
0x1f1e   : > { %v4228_v47 = vpop.xlane.xlu0 %4227 }
0x1f22   : > { %v4063_v19 = vpop.xlane.xlu0 %4062 }
0x1f23   : > { %v4140_v10 = vrot.slane %v4063_v19, %v6598_v22 }
0x1f25   : > { %v4163_v21 = vsel %vm8657_vm10, %v4140_v10, %v4162_v27 }
0x1f26   : > { %v4066_v50 = vpop.xlane.xlu0 %4065 }
0x1f2a   : > { %v4069_v9 = vpop.xlane.xlu0 %4068 }
0x1f2b   : > { %v4148_v52 = vrot.slane %v4069_v9, %v6598_v22  ;;  %v4296_v9 = vrot.slane %v4222_v60, %v6598_v22 }
0x1f2e   : > { %v4072_v31 = vpop.xlane.xlu0 %4071 }
0x1f2f   : > { %v4152_v48 = vrot.slane %v4072_v31, %v6598_v22 }
0x1f32   : > { %v3751_v6 = vpop.permute.xlu0 %3750 }
0x1f33   : > { %v3752_v33 = vmul.f32 %v3751_v6, %v7643_v26  ;;  %v4144_v26 = vrot.slane %v4066_v50, %v6598_v22  ;;  %v4300_v6 = vrot.slane %v4225_v16, %v6598_v22 }
0x1f35   : > { %v3753_v34 = vsel %vm639_vm1, %v3752_v33, 0.0  ;;  %v4164_v12 = vsel %vm680_vm13, %v4144_v26, %v4163_v21  ;;  %v4304_v33 = vrot.slane %v4228_v47, %v6598_v22 }
0x1f36   : > { %v3754_v8 = vrot.slane %v3753_v34, 4  ;;  %v4165_v51 = vsel %vm682_vm14, %v4148_v52, %v4164_v12 }
0x1f37   : > { %v4166_v37 = vsel %vm8658_vm12, %v4152_v48, %v4165_v51 }
0x1f38   : > { %v3755_v38 = vadd.f32 %v3754_v8, %v3753_v34 }
0x1f3a   : > { %v3756_v57 = vrot.slane %v3755_v38, 2 }
0x1f3c   : > { %v3757_v39 = vadd.f32 %v3756_v57, %v3755_v38 }
0x1f3e   : > { %v3758_v24 = vrot.slane %v3757_v39, 1 }
0x1f40   : > { %v3759_v61 = vadd.f32 %v3758_v24, %v3757_v39 }
0x1f42   : > { %v3792_v30 = vsel %vm8653_vm7, %v3791_v41, %v3759_v61  ;;  %v4292_v41 = vrot.slane %v4219_v54, %v6598_v22  ;;  %vm8659_vm7 = vmmov %vm8658_vm12  ;;  %vm8660_vm12 = vcmask 1045504  }
0x1f43   : > { %v4170_v19 = vmul.f32 %v4166_v37, %v3792_v30 }
0x1f44   : > { %v4328_v8 = vsel %vm673_vm9, %v4296_v9, %v4292_v41 }
0x1f45   : > { %v4174_v31 = vsel %vm639_vm1, %v4170_v19, 0.0  ;;  %v4329_v57 = vsel %vm8655_vm8, %v4300_v6, %v4328_v8  ;;  %vm8661_vm8 = vcmask 1046528  }
0x1f46   : > { %v4330_v39 = vsel %vm8656_vm11, %v4304_v33, %v4329_v57  ;;  %v7972_v33 = vld [vmem:[#allocation3 + $0x18] sm:$0xff] }
0x1f91   : > { %v3721_v0 = vpop.xlane.xlu1 %3720 }
0x1f92   : > { %v3737_v45 = vrot.slane %v3721_v0, %v6598_v22 }
0x1f94   : > { %v3745_v25 = vmul.f32 %v3737_v45, %v7661_v49 }
0x1f95   : > { %v4231_v7 = vpop.xlane.xlu1 %4230 }
0x1f96   : > { %v3746_v11 = vsel %vm639_vm1, %v3745_v25, 0.0  ;;  %v4308_v49 = vrot.slane %v4231_v7, %v6598_v22 }
0x1f97   : > { %3747 = vadd.xlane.f32.xlu1 %v3746_v11 }
0x1f98   : > { %v4331_v16 = vsel %vm8657_vm10, %v4308_v49, %v4330_v39 }
0x1f99   : > { %v4234_v50 = vpop.xlane.xlu1 %4233 }
0x1f9a   : > { %v4312_v38 = vrot.slane %v4234_v50, %v6598_v22 }
0x1f9b   : > { %4175 = vadd.xlane.f32.xlu1 %v4174_v31 }
0x1f9c   : > { %v4332_v54 = vsel %vm680_vm13, %v4312_v38, %v4331_v16 }
0x1f9d   : > { %v4237_v34 = vpop.xlane.xlu1 %4236 }
0x1f9e   : > { %v4316_v60 = vrot.slane %v4237_v34, %v6598_v22 }
0x1fa0   : > { %v4333_v24 = vsel %vm682_vm14, %v4316_v60, %v4332_v54 }
0x1fa1   : > { %v4240_v56 = vpop.xlane.xlu1 %4239 }
0x1fa2   : > { %v4320_v47 = vrot.slane %v4240_v56, %v6598_v22 }
0x1fa4   : > { %v4334_v59 = vsel %vm8659_vm7, %v4320_v47, %v4333_v24  ;;  %vm8662_vm7 = vcmask 1042434  }
0x1fa5   : > { %v4338_v29 = vmul.f32 %v4334_v59, %v3792_v30 }
0x1fa7   : > { %v4342_v17 = vsel %vm639_vm1, %v4338_v29, 0.0 }
0x1fa8   : > { %4343 = vadd.xlane.f32.xlu1 %v4342_v17 }
0x2024   : > { %v3748_v10 = vpop.xlane.xlu1 %3747 }
0x2025   : > { %v3764_v5 = vrot.slane %v3748_v10, %v6598_v22 }
0x2027   : > { %v3772_v26 = vmul.f32 %v3764_v5, %v7633_v43 }
0x2028   : > { %v4176_v46 = vpop.xlane.xlu1 %4175 }
0x2029   : > { %v3773_v61 = vsel %vm639_vm1, %v3772_v26, 0.0 }
0x202a   : > { %3774 = vadd.xlane.f32.xlu1 %v3773_v61 }
0x2035   : > { %v4344_v52 = vpop.xlane.xlu1 %4343 }
0x2036   : > { %v4346_v27 = vsel %vm282_vm0, %v4176_v46, %v4344_v52 }
0x2037   : > { %6291 = vtanh.f32 %v4346_v27 }
0x2041   : > { %v7948_v48 = vpop.eup %6291 }
0x2042   : > { %v4350_v0 = vmul.f32 %v7948_v48, %v7948_v48 }
0x2044   : > { %v4354_v21 = vsel %vm1622_vm15, %v4350_v0, 0.0 }
0x2045   : > { %4355 = vadd.xlane.f32.xlu1 %v4354_v21 }
0x20b7   : > { %v3775_v12 = vpop.xlane.xlu1 %3774 }
0x20b8   : > { %v3797_v30 = vrot.slane %v3775_v12, %v6598_v22 }
0x20ba   : > { %v3815_v43 = vsel %vm1042_vm2, %v3797_v30, %v3764_v5 }
0x20bb   : > { %v3816_v51 = vsel %vm1044_vm3, %v3815_v43, %v3737_v45 }
0x20bc   : > { %v3817_v25 = vsel %vm1046_vm4, %v3816_v51, %v7893_v35 }
0x20bd   : > { %v3818_v7 = vsel %vm1048_vm5, %v3817_v25, %v7847_v42 }
0x20be   : > { %v3819_v37 = vsel %vm1050_vm6, %v3818_v7, %v7817_v44 }
0x20bf   : > { %v3820_v11 = vsel %vm8660_vm12, %v3819_v37, %v7808_v36  ;;  %vm8663_vm12 = vcmask 1043459  }
0x20c0   : > { %v3821_v19 = vsel %vm8661_vm8, %v3820_v11, %v7798_v62  ;;  %v7975_v62 = vld [vmem:[#allocation3 + $0x10] sm:$0xff]  ;;  %vm8664_vm8 = vcmask 1044484  }
0x20c1   : > { %v3838_v50 = vrot.slane %v3821_v19, %v6520_v13  ;;  %v3831_v9 = vcombine.high %v3821_v19, %v3821_v19 }
0x20c3   : > { %v3854_v45 = vrot.slane %v3838_v50, %v6520_v13  ;;  %v3846_v31 = vcombine.high %v3838_v50, %v3838_v50  ;;  %v3845_v35 = vrot.slane %v3831_v9, %v6520_v13 }
0x20c5   : > { %v3932_v6 = vrot.slane %v3854_v45, %v6513_v2  ;;  %v3868_v42 = vrot.slane %v3846_v31, %v6520_v13  ;;  %v3861_v44 = vrot.slane %v3845_v35, %v6520_v13  ;;  %v3847_v41 = vcombine.high %v3845_v35, %v3845_v35 }
0x20c6   : > { %v3876_v57 = vcombine.high %v3854_v45, %v3854_v45 }
0x20c7   : > { %v4177_v36 = vmul.f32 %v7972_v33, %v3932_v6  ;;  %v4009_v49 = vmul.f32 %v7975_v62, %v3932_v6  ;;  %v3936_v34 = vrot.slane %v3868_v42, %v6513_v2  ;;  %v3948_v8 = vrot.slane %v3861_v44, %v6513_v2 }
0x20c8   : > { %v3875_v38 = vrot.slane %v3847_v41, %v6520_v13  ;;  %v3877_v60 = vcombine.high %v3861_v44, %v3861_v44  ;;  %v3940_v29 = vrot.slane %v3876_v57, %v6513_v2  ;;  %v3878_v12 = vcombine.high %v3868_v42, %v3868_v42 }
0x20c9   : > { %v4193_v39 = vsel %vm639_vm1, %v4177_v36, 0.0  ;;  %v4025_v16 = vsel %vm639_vm1, %v4009_v49, 0.0  ;;  %v4010_v56 = vmul.f32 %v7975_v62, %v3936_v34  ;;  %v4181_v54 = vmul.f32 %v7972_v33, %v3948_v8 }
0x20ca   : > { %4194 = vadd.xlane.f32.xlu1 %v4193_v39  ;;  %4026 = vadd.xlane.f32.xlu0 %v4025_v16  ;;  %v3952_v47 = vrot.slane %v3875_v38, %v6513_v2  ;;  %v4178_v59 = vmul.f32 %v7972_v33, %v3936_v34  ;;  %v3956_v5 = vrot.slane %v3877_v60, %v6513_v2 }
0x20cb   : > { %v4028_v24 = vsel %vm639_vm1, %v4010_v56, 0.0  ;;  %v4205_v17 = vsel %vm639_vm1, %v4181_v54, 0.0  ;;  %v3879_v26 = vcombine.high %v3875_v38, %v3875_v38  ;;  %v4011_v61 = vmul.f32 %v7975_v62, %v3940_v29 }
0x20cc   : > { %v4182_v10 = vmul.f32 %v7972_v33, %v3952_v47  ;;  %v4196_v46 = vsel %vm639_vm1, %v4178_v59, 0.0  ;;  %v4183_v27 = vmul.f32 %v7972_v33, %v3956_v5  ;;  %v4179_v51 = vmul.f32 %v7972_v33, %v3940_v29 }
0x20cd   : > { %v3960_v0 = vrot.slane %v3879_v26, %v6513_v2  ;;  %v4031_v30 = vsel %vm639_vm1, %v4011_v61, 0.0  ;;  %v4013_v11 = vmul.f32 %v7975_v62, %v3948_v8  ;;  %v3944_v19 = vrot.slane %v3878_v12, %v6513_v2 }
0x20ce   : > { %4029 = vadd.xlane.f32.xlu1 %v4028_v24  ;;  %4206 = vadd.xlane.f32.xlu0 %v4205_v17  ;;  %v4208_v52 = vsel %vm639_vm1, %v4182_v10, 0.0  ;;  %v4211_v43 = vsel %vm639_vm1, %v4183_v27, 0.0  ;;  %v4199_v7 = vsel %vm639_vm1, %v4179_v51, 0.0  ;;  %v4014_v34 = vmul.f32 %v7975_v62, %v3952_v47 }
0x20cf   : > { %v4184_v25 = vmul.f32 %v7972_v33, %v3960_v0  ;;  %v4037_v9 = vsel %vm639_vm1, %v4013_v11, 0.0  ;;  %v4012_v45 = vmul.f32 %v7975_v62, %v3944_v19  ;;  %v4180_v41 = vmul.f32 %v7972_v33, %v3944_v19 }
0x20d0   : > { %v4040_v8 = vsel %vm639_vm1, %v4014_v34, 0.0  ;;  %v4015_v38 = vmul.f32 %v7975_v62, %v3956_v5  ;;  %v4016_v60 = vmul.f32 %v7975_v62, %v3960_v0 }
0x20d1   : > { %v4214_v37 = vsel %vm639_vm1, %v4184_v25, 0.0  ;;  %v4034_v44 = vsel %vm639_vm1, %v4012_v45, 0.0  ;;  %v4202_v49 = vsel %vm639_vm1, %v4180_v41, 0.0 }
0x20d2   : > { %4197 = vadd.xlane.f32.xlu1 %v4196_v46  ;;  %4209 = vadd.xlane.f32.xlu0 %v4208_v52  ;;  %v4356_v21 = vpop.xlane.xlu1 %4355  ;;  %v4043_v57 = vsel %vm639_vm1, %v4015_v38, 0.0  ;;  %v4046_v56 = vsel %vm639_vm1, %v4016_v60, 0.0 }
0x20d3   : > { %6293 = vrsqrt.f32 %v4356_v21  ;;  %vm4366_vm11 = vcmp.eq.f32.partialorder %v4356_v21, inf  ;;  %v4369_v35 = vand.u32 2147483648, %v4356_v21  ;;  %vm4368_vm10 = vcmp.eq.f32.partialorder %v4356_v21, 0.0 }
0x20d6   : > { %4032 = vadd.xlane.f32.xlu1 %v4031_v30  ;;  %4212 = vadd.xlane.f32.xlu0 %v4211_v43 }
0x20da   : > { %4200 = vadd.xlane.f32.xlu1 %v4199_v7  ;;  %4215 = vadd.xlane.f32.xlu0 %v4214_v37 }
0x20dd   : > { %v6294_v50 = vpop.eup %6293 }
0x20de   : > { %v4365_v31 = vmul.f32 %v6294_v50, %v4356_v21  ;;  %4038 = vadd.xlane.f32.xlu1 %v4037_v9 }
0x20e0   : > { %v4367_v6 = vsel %vm4366_vm11, %v4356_v21, %v4365_v31  ;;  %vm8665_vm11 = vcmask 1047559  }
0x20e1   : > { %v4370_v42 = vsel %vm4368_vm10, %v4369_v35, %v4367_v6  ;;  %vm8666_vm10 = vmmov %vm8662_vm7 }
0x20e2   : > { %v4372_v36 = vadd.f32 1e-06, %v4370_v42  ;;  %4035 = vadd.xlane.f32.xlu1 %v4034_v44 }
0x20e4   : > { %6295 = vrcp.f32 %v4372_v36 }
0x20e6   : > { %4203 = vadd.xlane.f32.xlu1 %v4202_v49 }
0x20ea   : > { %4041 = vadd.xlane.f32.xlu1 %v4040_v8 }
0x20ee   : > { %v6296_v39 = vpop.eup %6295  ;;  %4044 = vadd.xlane.f32.xlu1 %v4043_v57 }
0x20ef   : > { %v4376_v16 = vmul.f32 %v6296_v39, %v7948_v48 }
0x20f1   : > { %v8018_v54 = vadd.f32 %v4376_v16, %v7574_v23 }
0x20f2   : > { %4047 = vadd.xlane.f32.xlu1 %v4046_v56 }
0x20f3   : > { %v4380_v47 = vmul.f32 %v8018_v54, %v8018_v54 }
0x20f5   : > { %v4384_v24 = vsel %vm1622_vm15, %v4380_v47, 0.0 }
0x20f6   : > { %4385 = vadd.xlane.f32.xlu1 %v4384_v24 }
0x2157   : > { %v4195_v59 = vpop.xlane.xlu1 %4194  ;;  %v4027_v17 = vpop.xlane.xlu0 %4026 }
0x2158   : > { %v4260_v21 = vrot.slane %v4195_v59, %v6598_v22  ;;  %v4092_v35 = vrot.slane %v4027_v17, %v6598_v22 }
0x215b   : > { %v4030_v29 = vpop.xlane.xlu1 %4029  ;;  %v4207_v5 = vpop.xlane.xlu0 %4206 }
0x215c   : > { %v4276_v51 = vrot.slane %v4207_v5, %v6598_v22  ;;  %v4096_v37 = vrot.slane %v4030_v29, %v6598_v22 }
0x215e   : > { %v4153_v36 = vsel %vm673_vm9, %v4096_v37, %v4092_v35 }
0x215f   : > { %v4198_v10 = vpop.xlane.xlu1 %4197  ;;  %v4210_v48 = vpop.xlane.xlu0 %4209 }
0x2160   : > { %v4264_v23 = vrot.slane %v4198_v10, %v6598_v22  ;;  %v4280_v11 = vrot.slane %v4210_v48, %v6598_v22 }
0x2162   : > { %v4321_v30 = vsel %vm673_vm9, %v4264_v23, %v4260_v21 }
0x2163   : > { %v4033_v26 = vpop.xlane.xlu1 %4032  ;;  %v4213_v52 = vpop.xlane.xlu0 %4212 }
0x2164   : > { %v4284_v50 = vrot.slane %v4213_v52, %v6598_v22  ;;  %v4100_v9 = vrot.slane %v4033_v26, %v6598_v22 }
0x2166   : > { %v4154_v34 = vsel %vm8666_vm10, %v4100_v9, %v4153_v36 }
0x2167   : > { %v4201_v61 = vpop.xlane.xlu1 %4200  ;;  %v4216_v25 = vpop.xlane.xlu0 %4215 }
0x2168   : > { %v4268_v0 = vrot.slane %v4201_v61, %v6598_v22  ;;  %v4288_v6 = vrot.slane %v4216_v25, %v6598_v22 }
0x216a   : > { %v4322_v7 = vsel %vm8662_vm7, %v4268_v0, %v4321_v30  ;;  %vm8667_vm7 = vmmov %vm8663_vm12 }
0x216b   : > { %v4039_v46 = vpop.xlane.xlu1 %4038 }
0x216c   : > { %v4108_v39 = vrot.slane %v4039_v46, %v6598_v22 }
0x216f   : > { %v4036_v27 = vpop.xlane.xlu1 %4035 }
0x2170   : > { %v4104_v42 = vrot.slane %v4036_v27, %v6598_v22 }
0x2172   : > { %v4155_v57 = vsel %vm8667_vm7, %v4104_v42, %v4154_v34 }
0x2173   : > { %v4204_v12 = vpop.xlane.xlu1 %4203 }
0x2174   : > { %v4272_v43 = vrot.slane %v4204_v12, %v6598_v22 }
0x2176   : > { %v4323_v19 = vsel %vm8663_vm12, %v4272_v43, %v4322_v7  ;;  %vm8668_vm12 = vmmov %vm8664_vm8 }
0x2177   : > { %v4324_v45 = vsel %vm8664_vm8, %v4276_v51, %v4323_v19  ;;  %v4042_v31 = vpop.xlane.xlu1 %4041  ;;  %v4156_v47 = vsel %vm8668_vm12, %v4108_v39, %v4155_v57  ;;  %vm8669_vm8 = vmmov %vm8665_vm11 }
0x2178   : > { %v4325_v44 = vsel %vm680_vm13, %v4280_v11, %v4324_v45  ;;  %v4112_v60 = vrot.slane %v4042_v31, %v6598_v22 }
0x2179   : > { %v4326_v41 = vsel %vm682_vm14, %v4284_v50, %v4325_v44 }
0x217a   : > { %v4327_v49 = vsel %vm8665_vm11, %v4288_v6, %v4326_v41  ;;  %v4157_v59 = vsel %vm680_vm13, %v4112_v60, %v4156_v47 }
0x217b   : > { %v4045_v8 = vpop.xlane.xlu1 %4044  ;;  %v4337_v38 = vmul.f32 %v4327_v49, %v7772_v28 }
0x217c   : > { %v4116_v16 = vrot.slane %v4045_v8, %v6598_v22 }
0x217d   : > { %v4339_v56 = vsel %vm639_vm1, %v4337_v38, 0.0 }
0x217e   : > { %4340 = vadd.xlane.f32.xlu1 %v4339_v56  ;;  %v4158_v17 = vsel %vm682_vm14, %v4116_v16, %v4157_v59 }
0x217f   : > { %v4048_v24 = vpop.xlane.xlu1 %4047 }
0x2180   : > { %v4120_v29 = vrot.slane %v4048_v24, %v6598_v22 }
0x2182   : > { %v4159_v10 = vsel %vm8669_vm8, %v4120_v29, %v4158_v17 }
0x2183   : > { %v4386_v5 = vpop.xlane.xlu1 %4385  ;;  %v4169_v26 = vmul.f32 %v4159_v10, %v7772_v28 }
0x2184   : > { %6297 = vrsqrt.f32 %v4386_v5  ;;  %vm4396_vm11 = vcmp.eq.f32.partialorder %v4386_v5, inf  ;;  %v4399_v52 = vand.u32 2147483648, %v4386_v5  ;;  %vm4398_vm10 = vcmp.eq.f32.partialorder %v4386_v5, 0.0 }
0x2185   : > { %v4171_v61 = vsel %vm639_vm1, %v4169_v26, 0.0 }
0x2186   : > { %4172 = vadd.xlane.f32.xlu0 %v4171_v61 }
0x218e   : > { %v6298_v48 = vpop.eup %6297 }
0x218f   : > { %v4395_v46 = vmul.f32 %v6298_v48, %v4386_v5 }
0x2191   : > { %v4397_v27 = vsel %vm4396_vm11, %v4386_v5, %v4395_v46 }
0x2192   : > { %v4400_v23 = vsel %vm4398_vm10, %v4399_v52, %v4397_v27  ;;  %vm8670_vm10 = vcmask 1045504  }
0x2193   : > { %v4402_v0 = vadd.f32 1e-06, %v4400_v23 }
0x2195   : > { %6299 = vrcp.f32 %v4402_v0 }
0x219f   : > { %v6300_v21 = vpop.eup %6299 }
0x21a0   : > { %v8058_v12 = vmul.f32 %v6300_v21, %v8018_v54 }
0x21a2   : > { %v4458_v28 = vcombine.high %v8058_v12, %v8058_v12 }
0x21a4   : > { %v4472_v30 = vrot.slane %v4458_v28, %v6520_v13 }
0x21a6   : > { %v4474_v43 = vcombine.high %v4472_v30, %v4472_v30  ;;  %v8069_v45 = vrot.slane %v4472_v30, %v6520_v13 }
0x21a8   : > { %v4502_v51 = vrot.slane %v4474_v43, %v6520_v13  ;;  %v4504_v44 = vcombine.high %v8069_v45, %v8069_v45 }
0x21aa   : > { %v4506_v25 = vcombine.high %v4502_v51, %v4502_v51  ;;  %v4566_v36 = vrot.slane %v4504_v44, %v6513_v2  ;;  %v4562_v23 = vrot.slane %v4502_v51, %v6513_v2 }
0x21ac   : > { %v4570_v7 = vrot.slane %v4506_v25, %v6513_v2 }
0x21ae   : > { %4712 = vperm.xlu1 %6223, %v4570_v7   ;;  %4632 = vperm.xlu0 %6227, %v4570_v7  }
0x21b2   : > { %6228 = vset.pattern.permute.xlu1 %v6398_v4 }
0x220b   : > { %v4341_v37 = vpop.xlane.xlu1 %4340 }
0x2213   : > { %v4173_v11 = vpop.xlane.xlu0 %4172 }
0x2214   : > { %v4345_v54 = vsel %vm282_vm0, %v4173_v11, %v4341_v37 }
0x2215   : > { %6301 = vtanh.f32 %v4345_v54 }
0x221f   : > { %v6302_v19 = vpop.eup %6301 }
0x2220   : > { %v4349_v50 = vmul.f32 %v6302_v19, %v6302_v19 }
0x2222   : > { %v4351_v9 = vsel %vm1622_vm15, %v4349_v50, 0.0 }
0x2223   : > { %4352 = vadd.xlane.f32.xlu1 %v4351_v9 }
0x222d   : > { %v4633_v31 = vpop.permute.xlu0 %4632  ;;  %v4713_v35 = vpop.permute.xlu1 %4712 }
0x222e   : > { %v4650_v6 = vmul.f32 %v7975_v62, %v4633_v31  ;;  %v4730_v42 = vmul.f32 %v7972_v33, %v4713_v35 }
0x2230   : > { %v4746_v41 = vadd.f32 %v4730_v42, %v4650_v6 }
0x2232   : > { %v4755_v49 = vmul.f32 %v4746_v41, %v7616_v55 }
0x2234   : > { %4628 = vperm.xlu1 %6228, %v4566_v36   ;;  %v4756_v34 = vsel %vm639_vm1, %v4755_v49, 0.0 }
0x2235   : > { %4757 = vadd.xlane.f32.xlu0 %v4756_v34 }
0x2238   : > { %6229 = vset.pattern.permute.xlu1 %v6397_v3 }
0x2239   : > { %4708 = vperm.xlu1 %6229, %v4566_v36  }
0x22b0   : > { %v4353_v8 = vpop.xlane.xlu1 %4352 }
0x22b1   : > { %6303 = vrsqrt.f32 %v4353_v8  ;;  %vm4359_vm7 = vcmp.eq.f32.partialorder %v4353_v8, inf  ;;  %v4362_v16 = vand.u32 2147483648, %v4353_v8  ;;  %vm4361_vm12 = vcmp.eq.f32.partialorder %v4353_v8, 0.0 }
0x22b4   : > { %v4629_v38 = vpop.permute.xlu1 %4628 }
0x22b5   : > { %v4649_v59 = vmul.f32 %v7975_v62, %v4629_v38 }
0x22b8   : > { %v4709_v39 = vpop.permute.xlu1 %4708 }
0x22b9   : > { %v4729_v55 = vmul.f32 %v7972_v33, %v4709_v39 }
0x22bb   : > { %v6304_v57 = vpop.eup %6303  ;;  %v8081_v17 = vadd.f32 %v4729_v55, %v4649_v59 }
0x22bc   : > { %v4358_v60 = vmul.f32 %v6304_v57, %v4353_v8 }
0x22be   : > { %v4360_v56 = vsel %vm4359_vm7, %v4353_v8, %v4358_v60  ;;  %vm8671_vm7 = vcmask 1046528  }
0x22bf   : > { %v4363_v47 = vsel %vm4361_vm12, %v4362_v16, %v4360_v56  ;;  %v4465_v56 = vrot.slane %v8058_v12, %v6520_v13  ;;  %vm8672_vm12 = vmmov %vm8670_vm10 }
0x22c0   : > { %v4371_v24 = vadd.f32 1e-06, %v4363_v47 }
0x22c1   : > { %v4473_v59 = vcombine.high %v4465_v56, %v4465_v56 }
0x22c2   : > { %6305 = vrcp.f32 %v4371_v24  ;;  %v4758_v29 = vpop.xlane.xlu0 %4757 }
0x22c3   : > { %v8084_v10 = vrot.slane %v4758_v29, %v6598_v22 }
0x22c5   : > { %v4782_v5 = vmul.f32 %v8084_v10, %v8081_v17 }
0x22c7   : > { %v4783_v26 = vsel %vm639_vm1, %v4782_v5, 0.0 }
0x22c8   : > { %4784 = vadd.xlane.f32.xlu1 %v4783_v26  ;;  %v8127_v26 = vrot.slane %v4473_v59, %v6520_v13 }
0x22cc   : > { %v6306_v61 = vpop.eup %6305 }
0x22cd   : > { %v4374_v48 = vmul.f32 %v6306_v61, %v6302_v19  ;;  %v4558_v19 = vrot.slane %v8069_v45, %v6513_v2 }
0x22cf   : > { %v4377_v46 = vadd.f32 %v4374_v48, %v7569_v58 }
0x22d1   : > { %v4379_v52 = vmul.f32 %v4377_v46, %v4377_v46 }
0x22d3   : > { %v4381_v27 = vsel %vm1622_vm15, %v4379_v52, 0.0 }
0x22d4   : > { %4382 = vadd.xlane.f32.xlu0 %v4381_v27 }
0x22ea   : > { %4624 = vperm.xlu0 %6227, %v4562_v23  }
0x22ee   : > { %6230 = vset.pattern.permute.xlu0 %v6397_v3 }
0x22ef   : > { %4704 = vperm.xlu0 %6230, %v4562_v23  }
0x22f3   : > { %6231 = vset.pattern.permute.xlu0 %v6398_v4 }
0x2355   : > { %v4785_v44 = vpop.xlane.xlu1 %4784 }
0x2356   : > { %v8114_v36 = vrot.slane %v4785_v44, %v6598_v22 }
0x2361   : > { %v4383_v0 = vpop.xlane.xlu0 %4382 }
0x2362   : > { %6307 = vrsqrt.f32 %v4383_v0  ;;  %vm4389_vm8 = vcmp.eq.f32.partialorder %v4383_v0, inf  ;;  %v4392_v30 = vand.u32 2147483648, %v4383_v0  ;;  %vm4391_vm11 = vcmp.eq.f32.partialorder %v4383_v0, 0.0 }
0x2369   : > { %v4625_v9 = vpop.permute.xlu0 %4624 }
0x236a   : > { %v4648_v42 = vmul.f32 %v7975_v62, %v4625_v9 }
0x236c   : > { %v6308_v21 = vpop.eup %6307 }
0x236d   : > { %v4388_v28 = vmul.f32 %v6308_v21, %v4383_v0 }
0x236e   : > { %v4705_v6 = vpop.permute.xlu0 %4704 }
0x236f   : > { %v4390_v43 = vsel %vm4389_vm8, %v4383_v0, %v4388_v28  ;;  %v4728_v45 = vmul.f32 %v7972_v33, %v4705_v6  ;;  %vm8673_vm8 = vmmov %vm8671_vm7 }
0x2370   : > { %v4393_v58 = vsel %vm4391_vm11, %v4392_v30, %v4390_v43  ;;  %vm8674_vm11 = vmmov %vm8670_vm10 }
0x2371   : > { %v4401_v25 = vadd.f32 1e-06, %v4393_v58  ;;  %v8111_v41 = vadd.f32 %v4728_v45, %v4648_v42 }
0x2373   : > { %6309 = vrcp.f32 %v4401_v25  ;;  %v4809_v49 = vmul.f32 %v8114_v36, %v8111_v41 }
0x2375   : > { %v4810_v34 = vsel %vm639_vm1, %v4809_v49, 0.0 }
0x237d   : > { %v6310_v7 = vpop.eup %6309 }
0x237e   : > { %v8094_v37 = vmul.f32 %v6310_v7, %v4377_v46  ;;  %v4505_v46 = vcombine.high %v8127_v26, %v8127_v26 }
0x2380   : > { %v4416_v51 = vrot.slane %v8094_v37, %v6520_v13 }
0x2382   : > { %v4432_v11 = vrot.slane %v4416_v51, %v6520_v13  ;;  %v4424_v50 = vcombine.high %v4416_v51, %v4416_v51  ;;  %v8145_v51 = vrot.slane %v4465_v56, %v6520_v13 }
0x2384   : > { %v4510_v54 = vrot.slane %v4432_v11, %v6513_v2  ;;  %v4446_v31 = vrot.slane %v4424_v50, %v6520_v13  ;;  %v4454_v52 = vcombine.high %v4432_v11, %v4432_v11  ;;  %v4503_v11 = vcombine.high %v8145_v51, %v8145_v51 }
0x2386   : > { %4572 = vperm.xlu0 %6231, %v4510_v54   ;;  %4652 = vperm.xlu1 %6229, %v4510_v54   ;;  %v4514_v35 = vrot.slane %v4446_v31, %v6513_v2  ;;  %v4518_v27 = vrot.slane %v4454_v52, %v6513_v2  ;;  %v4550_v54 = vrot.slane %v4503_v11, %v6513_v2 }
0x238a   : > { %6232 = vset.pattern.permute.xlu1 %v6398_v4  ;;  %6237 = vset.pattern.permute.xlu0 %v6397_v3 }
0x238b   : > { %4620 = vperm.xlu1 %6232, %v4558_v19  }
0x238f   : > { %6233 = vset.pattern.permute.xlu1 %v6397_v3 }
0x2390   : > { %4700 = vperm.xlu1 %6233, %v4558_v19   ;;  %v4456_v19 = vcombine.high %v4446_v31, %v4446_v31 }
0x2392   : > { %v4522_v50 = vrot.slane %v4456_v19, %v6513_v2 }
0x2394   : > { %6234 = vset.pattern.permute.xlu1 %v6398_v4 }
0x2395   : > { %4576 = vperm.xlu1 %6234, %v4514_v35  }
0x2399   : > { %6235 = vset.pattern.permute.xlu1 %v6397_v3 }
0x239a   : > { %4656 = vperm.xlu1 %6235, %v4514_v35  }
0x239e   : > { %6236 = vset.pattern.permute.xlu1 %v6398_v4 }
0x23a5   : > { %4811 = vadd.xlane.f32.xlu0 %v4810_v34 }
0x2405   : > { %v4573_v8 = vpop.permute.xlu0 %4572  ;;  %v4653_v38 = vpop.permute.xlu1 %4652 }
0x2406   : > { %v4635_v57 = vmul.f32 %v7975_v62, %v4573_v8  ;;  %v4715_v60 = vmul.f32 %v7972_v33, %v4653_v38 }
0x2408   : > { %v4731_v39 = vadd.f32 %v4715_v60, %v4635_v57 }
0x240a   : > { %v4747_v16 = vmul.f32 %v4731_v39, %v7618_v32  ;;  %v4554_v32 = vrot.slane %v4505_v46, %v6513_v2  ;;  %v4621_v23 = vpop.permute.xlu1 %4620 }
0x240b   : > { %v4647_v28 = vmul.f32 %v7975_v62, %v4621_v23 }
0x240c   : > { %v4748_v47 = vsel %vm639_vm1, %v4747_v16, 0.0 }
0x240d   : > { %v4749_v55 = vrot.slane %v4748_v47, 4 }
0x240f   : > { %v4750_v24 = vadd.f32 %v4749_v55, %v4748_v47  ;;  %v4701_v0 = vpop.permute.xlu1 %4700 }
0x2410   : > { %v4727_v21 = vmul.f32 %v7972_v33, %v4701_v0 }
0x2411   : > { %v4751_v29 = vrot.slane %v4750_v24, 2 }
0x2412   : > { %v8136_v43 = vadd.f32 %v4727_v21, %v4647_v28 }
0x2413   : > { %v4752_v5 = vadd.f32 %v4751_v29, %v4750_v24 }
0x2414   : > { %v4577_v9 = vpop.permute.xlu1 %4576 }
0x2415   : > { %v4753_v61 = vrot.slane %v4752_v5, 1  ;;  %v4636_v45 = vmul.f32 %v7975_v62, %v4577_v9  ;;  %v4546_v9 = vrot.slane %v8127_v26, %v6513_v2 }
0x2417   : > { %v4754_v48 = vadd.f32 %v4753_v61, %v4752_v5 }
0x2419   : > { %4760 = vbcast.lane.b32.xlu1 %v4754_v48, 256  ;;  %v4657_v35 = vpop.permute.xlu1 %4656  ;;  %v5137_v16 = vsel %vm1042_vm2, %v3777_v63, %v4754_v48 }
0x241a   : > { %v4716_v6 = vmul.f32 %v7972_v33, %v4657_v35 }
0x241c   : > { %v8156_v42 = vadd.f32 %v4716_v6, %v4636_v45 }
0x241d   : > { %4616 = vperm.xlu1 %6236, %v4554_v32  }
0x2421   : > { %4580 = vperm.xlu1 %6236, %v4518_v27  }
0x2425   : > { %6238 = vset.pattern.permute.xlu1 %v6397_v3 }
0x2426   : > { %4660 = vperm.xlu1 %6238, %v4518_v27  }
0x2432   : > { %v4812_v30 = vpop.xlane.xlu0 %4811 }
0x2433   : > { %v8139_v58 = vrot.slane %v4812_v30, %v6598_v22 }
0x2435   : > { %v4836_v25 = vmul.f32 %v8139_v58, %v8136_v43 }
0x2437   : > { %v4837_v7 = vsel %vm639_vm1, %v4836_v25, 0.0 }
0x2438   : > { %4838 = vadd.xlane.f32.xlu0 %v4837_v7 }
0x244e   : > { %4696 = vperm.xlu0 %6237, %v4554_v32  }
0x2452   : > { %6239 = vset.pattern.permute.xlu0 %v6398_v4 }
0x2453   : > { %4612 = vperm.xlu0 %6239, %v4550_v54  }
0x2457   : > { %4584 = vperm.xlu0 %6239, %v4522_v50  }
0x245b   : > { %6240 = vset.pattern.permute.xlu0 %v6397_v3 }
0x245c   : > { %4664 = vperm.xlu0 %6240, %v4522_v50   ;;  %v4409_v50 = vcombine.high %v8094_v37, %v8094_v37 }
0x245e   : > { %v4423_v35 = vrot.slane %v4409_v50, %v6520_v13 }
0x2460   : > { %6241 = vset.pattern.permute.xlu0 %v6398_v4  ;;  %v8188_v6 = vrot.slane %v4423_v35, %v6520_v13 }
0x2462   : > { %v4526_v45 = vrot.slane %v8188_v6, %v6513_v2 }
0x248b   : > { %v4761_v31 = vpop.permute.xlu1 %4760 }
0x248c   : > { %v4762_v44 = vmul.f32 %v4761_v31, %v8156_v42 }
0x248e   : > { %v4763_v49 = vsel %vm639_vm1, %v4762_v44, 0.0 }
0x248f   : > { %v4764_v34 = vrot.slane %v4763_v49, 4 }
0x2491   : > { %v4765_v8 = vadd.f32 %v4764_v34, %v4763_v49 }
0x2493   : > { %v4766_v38 = vrot.slane %v4765_v8, 2 }
0x2495   : > { %v4767_v57 = vadd.f32 %v4766_v38, %v4765_v8 }
0x2497   : > { %v4768_v60 = vrot.slane %v4767_v57, 1 }
0x2499   : > { %v4769_v39 = vadd.f32 %v4768_v60, %v4767_v57 }
0x249b   : > { %4787 = vbcast.lane.b32.xlu1 %v4769_v39, 256  ;;  %v5138_v56 = vsel %vm1044_vm3, %v5137_v16, %v4769_v39 }
0x249c   : > { %v4617_v55 = vpop.permute.xlu1 %4616 }
0x249d   : > { %v4646_v59 = vmul.f32 %v7975_v62, %v4617_v55 }
0x24a0   : > { %v4581_v48 = vpop.permute.xlu1 %4580 }
0x24a1   : > { %v4637_v52 = vmul.f32 %v7975_v62, %v4581_v48 }
0x24a5   : > { %v4661_v46 = vpop.permute.xlu1 %4660 }
0x24a6   : > { %v4717_v32 = vmul.f32 %v7972_v33, %v4661_v46 }
0x24a8   : > { %v8176_v27 = vadd.f32 %v4717_v32, %v4637_v52 }
0x24c5   : > { %v4839_v47 = vpop.xlane.xlu0 %4838 }
0x24c6   : > { %v8167_v5 = vrot.slane %v4839_v47, %v6598_v22 }
0x24cd   : > { %v4697_v24 = vpop.permute.xlu0 %4696 }
0x24ce   : > { %v4726_v29 = vmul.f32 %v7972_v33, %v4697_v24 }
0x24d0   : > { %v8169_v61 = vadd.f32 %v4726_v29, %v4646_v59 }
0x24d2   : > { %v4863_v14 = vmul.f32 %v8167_v5, %v8169_v61  ;;  %v4613_v31 = vpop.permute.xlu0 %4612 }
0x24d3   : > { %v4645_v49 = vmul.f32 %v7975_v62, %v4613_v31 }
0x24d4   : > { %v4864_v63 = vsel %vm639_vm1, %v4863_v14, 0.0 }
0x24d5   : > { %4865 = vadd.xlane.f32.xlu1 %v4864_v63 }
0x24d6   : > { %v4585_v39 = vpop.permute.xlu0 %4584 }
0x24d7   : > { %v4638_v47 = vmul.f32 %v7975_v62, %v4585_v39 }
0x24db   : > { %v4665_v16 = vpop.permute.xlu0 %4664 }
0x24e6   : > { %4692 = vperm.xlu1 %6238, %v4550_v54  }
0x250d   : > { %v4788_v23 = vpop.permute.xlu1 %4787 }
0x250e   : > { %v4789_v0 = vmul.f32 %v4788_v23, %v8176_v27  ;;  %v4425_v23 = vcombine.high %v4423_v35, %v4423_v35 }
0x2510   : > { %v4790_v21 = vsel %vm639_vm1, %v4789_v0, 0.0 }
0x2511   : > { %v4791_v28 = vrot.slane %v4790_v21, 4 }
0x2513   : > { %v4792_v30 = vadd.f32 %v4791_v28, %v4790_v21  ;;  %v4542_v21 = vrot.slane %v8145_v51, %v6513_v2  ;;  %v4453_v28 = vrot.slane %v4425_v23, %v6520_v13 }
0x2515   : > { %v4793_v25 = vrot.slane %v4792_v30, 2 }
0x2517   : > { %v4794_v7 = vadd.f32 %v4793_v25, %v4792_v30  ;;  %v4530_v30 = vrot.slane %v4453_v28, %v6513_v2 }
0x2519   : > { %v4795_v11 = vrot.slane %v4794_v7, 1 }
0x251b   : > { %v4796_v19 = vadd.f32 %v4795_v11, %v4794_v7 }
0x251d   : > { %4814 = vbcast.lane.b32.xlu0 %v4796_v19, 256  ;;  %v5139_v54 = vsel %vm1046_vm4, %v5138_v56, %v4796_v19  ;;  %v4718_v56 = vmul.f32 %v7972_v33, %v4665_v16 }
0x251f   : > { %v8207_v55 = vadd.f32 %v4718_v56, %v4638_v47 }
0x2521   : > { %4608 = vperm.xlu0 %6241, %v4546_v9  }
0x2525   : > { %6242 = vset.pattern.permute.xlu0 %v6397_v3 }
0x2526   : > { %4688 = vperm.xlu0 %6242, %v4546_v9  }
0x252a   : > { %6243 = vset.pattern.permute.xlu0 %v6398_v4 }
0x252b   : > { %4588 = vperm.xlu0 %6243, %v4526_v45  }
0x252f   : > { %6244 = vset.pattern.permute.xlu0 %v6397_v3 }
0x2530   : > { %4668 = vperm.xlu0 %6244, %v4526_v45  }
0x2534   : > { %6245 = vset.pattern.permute.xlu0 %v6398_v4 }
0x2562   : > { %v4866_v26 = vpop.xlane.xlu1 %4865 }
0x2563   : > { %v8198_v8 = vrot.slane %v4866_v26, %v6598_v22 }
0x2566   : > { %v4693_v44 = vpop.permute.xlu1 %4692 }
0x2567   : > { %v4725_v34 = vmul.f32 %v7972_v33, %v4693_v44 }
0x2569   : > { %v8200_v38 = vadd.f32 %v4725_v34, %v4645_v49 }
0x256b   : > { %v4890_v57 = vmul.f32 %v8198_v8, %v8200_v38 }
0x256d   : > { %v4891_v60 = vsel %vm639_vm1, %v4890_v57, 0.0 }
0x256e   : > { %4892 = vadd.xlane.f32.xlu1 %v4891_v60 }
0x258f   : > { %v4815_v24 = vpop.permute.xlu0 %4814 }
0x2590   : > { %v4816_v59 = vmul.f32 %v4815_v24, %v8207_v55 }
0x2592   : > { %v4817_v29 = vsel %vm639_vm1, %v4816_v59, 0.0 }
0x2593   : > { %v4818_v14 = vrot.slane %v4817_v29, 4 }
0x2595   : > { %v4819_v63 = vadd.f32 %v4818_v14, %v4817_v29  ;;  %v4457_v29 = vcombine.high %v4453_v28, %v4453_v28 }
0x2597   : > { %v4820_v48 = vrot.slane %v4819_v63, 2 }
0x2599   : > { %v4821_v46 = vadd.f32 %v4820_v48, %v4819_v63  ;;  %v4538_v63 = vrot.slane %v4457_v29, %v6513_v2  ;;  %v4455_v48 = vcombine.high %v8188_v6, %v8188_v6 }
0x259b   : > { %v4822_v32 = vrot.slane %v4821_v46, 1 }
0x259d   : > { %v4823_v52 = vadd.f32 %v4822_v32, %v4821_v46  ;;  %v4534_v46 = vrot.slane %v4455_v48, %v6513_v2 }
0x259f   : > { %4841 = vbcast.lane.b32.xlu0 %v4823_v52, 256  ;;  %v5140_v0 = vsel %vm1048_vm5, %v5139_v54, %v4823_v52 }
0x25a0   : > { %v4609_v25 = vpop.permute.xlu0 %4608 }
0x25a1   : > { %v4644_v19 = vmul.f32 %v7975_v62, %v4609_v25 }
0x25a3   : > { %4604 = vperm.xlu0 %6245, %v4542_v21  }
0x25a5   : > { %v4689_v7 = vpop.permute.xlu0 %4688 }
0x25a6   : > { %v4724_v11 = vmul.f32 %v7972_v33, %v4689_v7 }
0x25a7   : > { %4592 = vperm.xlu0 %6245, %v4530_v30  }
0x25a8   : > { %v8219_v54 = vadd.f32 %v4724_v11, %v4644_v19 }
0x25aa   : > { %v4589_v45 = vpop.permute.xlu0 %4588 }
0x25ab   : > { %6246 = vset.pattern.permute.xlu0 %v6397_v3  ;;  %v4639_v44 = vmul.f32 %v7975_v62, %v4589_v45 }
0x25ac   : > { %4672 = vperm.xlu0 %6246, %v4530_v30  }
0x25af   : > { %v4669_v26 = vpop.permute.xlu0 %4668 }
0x25b0   : > { %v4719_v31 = vmul.f32 %v7972_v33, %v4669_v26 }
0x25b2   : > { %v8229_v49 = vadd.f32 %v4719_v31, %v4639_v44 }
0x25fb   : > { %v4893_v50 = vpop.xlane.xlu1 %4892 }
0x25fc   : > { %v8222_v51 = vrot.slane %v4893_v50, %v6598_v22 }
0x25fe   : > { %v4917_v9 = vmul.f32 %v8222_v51, %v8219_v54 }
0x2600   : > { %v4918_v35 = vsel %vm639_vm1, %v4917_v9, 0.0 }
0x2601   : > { %4919 = vadd.xlane.f32.xlu1 %v4918_v35 }
0x2611   : > { %v4842_v34 = vpop.permute.xlu0 %4841 }
0x2612   : > { %v4843_v57 = vmul.f32 %v4842_v34, %v8229_v49  ;;  %4684 = vperm.xlu1 %6238, %v4542_v21  }
0x2614   : > { %v4844_v60 = vsel %vm639_vm1, %v4843_v57, 0.0 }
0x2615   : > { %v4845_v39 = vrot.slane %v4844_v60, 4 }
0x2616   : > { %6247 = vset.pattern.permute.xlu1 %v6398_v4 }
0x2617   : > { %v4846_v16 = vadd.f32 %v4845_v39, %v4844_v60 }
0x2619   : > { %v4847_v56 = vrot.slane %v4846_v16, 2 }
0x261b   : > { %v4848_v47 = vadd.f32 %v4847_v56, %v4846_v16 }
0x261d   : > { %v4849_v24 = vrot.slane %v4848_v47, 1 }
0x261f   : > { %v4850_v59 = vadd.f32 %v4849_v24, %v4848_v47 }
0x2621   : > { %v5141_v14 = vsel %vm1050_vm6, %v5140_v0, %v4850_v59  ;;  %4868 = vbcast.lane.b32.xlu1 %v4850_v59, 256 }
0x2622   : > { %v4605_v32 = vpop.permute.xlu0 %4604 }
0x2623   : > { %v4643_v30 = vmul.f32 %v7975_v62, %v4605_v32 }
0x2625   : > { %4600 = vperm.xlu1 %6247, %v4538_v63  }
0x2626   : > { %v4593_v52 = vpop.permute.xlu0 %4592 }
0x2627   : > { %v4640_v6 = vmul.f32 %v7975_v62, %v4593_v52 }
0x2629   : > { %6248 = vset.pattern.permute.xlu1 %v6397_v3 }
0x262a   : > { %4680 = vperm.xlu1 %6248, %v4538_v63  }
0x262b   : > { %v4673_v23 = vpop.permute.xlu0 %4672 }
0x262c   : > { %v4720_v21 = vmul.f32 %v7972_v33, %v4673_v23 }
0x262e   : > { %6249 = vset.pattern.permute.xlu1 %v6398_v4  ;;  %v8246_v7 = vadd.f32 %v4720_v21, %v4640_v6 }
0x262f   : > { %4596 = vperm.xlu1 %6249, %v4534_v46  }
0x2633   : > { %6250 = vset.pattern.permute.xlu1 %v6397_v3 }
0x2634   : > { %4676 = vperm.xlu1 %6250, %v4534_v46  }
0x268e   : > { %v4920_v0 = vpop.xlane.xlu1 %4919 }
0x268f   : > { %v8249_v4 = vrot.slane %v4920_v0, %v6598_v22 }
0x2692   : > { %v4685_v28 = vpop.permute.xlu1 %4684 }
0x2693   : > { %v4723_v25 = vmul.f32 %v7972_v33, %v4685_v28 }
0x2695   : > { %v4739_v3 = vadd.f32 %v4723_v25, %v4643_v30 }
0x2696   : > { %v4869_v11 = vpop.permute.xlu1 %4868 }
0x2697   : > { %v4870_v19 = vmul.f32 %v4869_v11, %v8246_v7  ;;  %v4944_v50 = vmul.f32 %v8249_v4, %v4739_v3 }
0x2699   : > { %v4871_v9 = vsel %vm639_vm1, %v4870_v19, 0.0  ;;  %v4945_v35 = vsel %vm639_vm1, %v4944_v50, 0.0 }
0x269a   : > { %v4872_v45 = vrot.slane %v4871_v9, 4  ;;  %4946 = vadd.xlane.f32.xlu0 %v4945_v35 }
0x269c   : > { %v4873_v26 = vadd.f32 %v4872_v45, %v4871_v9 }
0x269e   : > { %v4874_v31 = vrot.slane %v4873_v26, 2 }
0x26a0   : > { %v4875_v44 = vadd.f32 %v4874_v31, %v4873_v26 }
0x26a2   : > { %v4876_v34 = vrot.slane %v4875_v44, 1 }
0x26a4   : > { %v4877_v57 = vadd.f32 %v4876_v34, %v4875_v44  ;;  %v4601_v39 = vpop.permute.xlu1 %4600 }
0x26a5   : > { %v4642_v28 = vmul.f32 %v7975_v62, %v4601_v39 }
0x26a6   : > { %4895 = vbcast.lane.b32.xlu1 %v4877_v57, 256  ;;  %v5142_v60 = vsel %vm8670_vm10, %v5141_v14, %v4877_v57  ;;  %vm8680_vm10 = vcmask 1044484  }
0x26a9   : > { %v4681_v16 = vpop.permute.xlu1 %4680 }
0x26aa   : > { %v4722_v21 = vmul.f32 %v7972_v33, %v4681_v16 }
0x26ac   : > { %v4738_v25 = vadd.f32 %v4722_v21, %v4642_v28 }
0x26ae   : > { %v4597_v56 = vpop.permute.xlu1 %4596 }
0x26af   : > { %v4641_v59 = vmul.f32 %v7975_v62, %v4597_v56 }
0x26b3   : > { %v4677_v47 = vpop.permute.xlu1 %4676 }
0x26b4   : > { %v4721_v24 = vmul.f32 %v7972_v33, %v4677_v47 }
0x26b6   : > { %v4737_v29 = vadd.f32 %v4721_v24, %v4641_v59 }
0x2718   : > { %v4896_v63 = vpop.permute.xlu1 %4895 }
0x2719   : > { %v4897_v48 = vmul.f32 %v4896_v63, %v4737_v29 }
0x271b   : > { %v4898_v46 = vsel %vm639_vm1, %v4897_v48, 0.0 }
0x271c   : > { %v4899_v32 = vrot.slane %v4898_v46, 4 }
0x271e   : > { %v4900_v52 = vadd.f32 %v4899_v32, %v4898_v46 }
0x2720   : > { %v4901_v23 = vrot.slane %v4900_v52, 2 }
0x2722   : > { %v4902_v0 = vadd.f32 %v4901_v23, %v4900_v52 }
0x2724   : > { %v4903_v14 = vrot.slane %v4902_v0, 1 }
0x2726   : > { %v4904_v30 = vadd.f32 %v4903_v14, %v4902_v0 }
0x2727   : > { %v4947_v6 = vpop.xlane.xlu0 %4946 }
0x2728   : > { %v8262_v11 = vrot.slane %v4947_v6, %v6598_v22  ;;  %4922 = vbcast.lane.b32.xlu0 %v4904_v30, 256  ;;  %v8265_v19 = vsel %vm8671_vm7, %v5142_v60, %v4904_v30 }
0x272a   : > { %v4971_v50 = vmul.f32 %v8262_v11, %v4738_v25 }
0x272c   : > { %v4972_v9 = vsel %vm639_vm1, %v4971_v50, 0.0 }
0x272d   : > { %4973 = vadd.xlane.f32.xlu1 %v4972_v9 }
0x279a   : > { %v4923_v35 = vpop.permute.xlu0 %4922 }
0x279b   : > { %v4924_v33 = vmul.f32 %v4923_v35, %v4738_v25 }
0x279d   : > { %v4925_v45 = vsel %vm639_vm1, %v4924_v33, 0.0 }
0x279e   : > { %v4926_v62 = vrot.slane %v4925_v45, 4 }
0x27a0   : > { %v4927_v26 = vadd.f32 %v4926_v62, %v4925_v45 }
0x27a2   : > { %v4928_v31 = vrot.slane %v4927_v26, 2 }
0x27a4   : > { %v4929_v44 = vadd.f32 %v4928_v31, %v4927_v26 }
0x27a6   : > { %v4930_v34 = vrot.slane %v4929_v44, 1 }
0x27a8   : > { %v4931_v57 = vadd.f32 %v4930_v34, %v4929_v44 }
0x27aa   : > { %4949 = vbcast.lane.b32.xlu1 %v4931_v57, 256 }
0x27ba   : > { %v4974_v39 = vpop.xlane.xlu1 %4973 }
0x27bb   : > { %v8271_v60 = vrot.slane %v4974_v39, %v6598_v22 }
0x27bd   : > { %v4998_v16 = vmul.f32 %v8271_v60, %v4737_v29 }
0x27bf   : > { %v4999_v56 = vsel %vm639_vm1, %v4998_v16, 0.0 }
0x27c0   : > { %5000 = vadd.xlane.f32.xlu0 %v4999_v56 }
0x281c   : > { %v4950_v47 = vpop.permute.xlu1 %4949 }
0x281d   : > { %v4951_v24 = vmul.f32 %v4950_v47, %v4739_v3 }
0x281f   : > { %v4952_v59 = vsel %vm639_vm1, %v4951_v24, 0.0 }
0x2820   : > { %v4953_v63 = vrot.slane %v4952_v59, 4 }
0x2822   : > { %v4954_v48 = vadd.f32 %v4953_v63, %v4952_v59 }
0x2824   : > { %v4955_v46 = vrot.slane %v4954_v48, 2 }
0x2826   : > { %v4956_v32 = vadd.f32 %v4955_v46, %v4954_v48 }
0x2828   : > { %v4957_v52 = vrot.slane %v4956_v32, 1 }
0x282a   : > { %v4958_v23 = vadd.f32 %v4957_v52, %v4956_v32 }
0x282c   : > { %4976 = vbcast.lane.b32.xlu0 %v4958_v23, 256  ;;  %v5144_v45 = vsel %vm1042_vm2, %v4931_v57, %v4958_v23 }
0x284d   : > { %v5001_v0 = vpop.xlane.xlu0 %5000 }
0x284e   : > { %v8277_v21 = vrot.slane %v5001_v0, %v6598_v22 }
0x2850   : > { %v5025_v29 = vmul.f32 %v8277_v21, %v8246_v7 }
0x2852   : > { %v5026_v14 = vsel %vm639_vm1, %v5025_v29, 0.0 }
0x2853   : > { %5027 = vadd.xlane.f32.xlu1 %v5026_v14 }
0x289e   : > { %v4977_v3 = vpop.permute.xlu0 %4976 }
0x289f   : > { %v4978_v28 = vmul.f32 %v4977_v3, %v8219_v54 }
0x28a1   : > { %v4979_v30 = vsel %vm639_vm1, %v4978_v28, 0.0 }
0x28a2   : > { %v4980_v6 = vrot.slane %v4979_v30, 4 }
0x28a4   : > { %v4981_v25 = vadd.f32 %v4980_v6, %v4979_v30 }
0x28a6   : > { %v4982_v50 = vrot.slane %v4981_v25, 2 }
0x28a8   : > { %v4983_v9 = vadd.f32 %v4982_v50, %v4981_v25 }
0x28aa   : > { %v4984_v35 = vrot.slane %v4983_v9, 1 }
0x28ac   : > { %v4985_v33 = vadd.f32 %v4984_v35, %v4983_v9 }
0x28ae   : > { %5003 = vbcast.lane.b32.xlu1 %v4985_v33, 256  ;;  %v5145_v62 = vsel %vm1044_vm3, %v5144_v45, %v4985_v33 }
0x28e0   : > { %v5028_v7 = vpop.xlane.xlu1 %5027 }
0x28e1   : > { %v8287_v26 = vrot.slane %v5028_v7, %v6598_v22 }
0x28e3   : > { %v5052_v54 = vmul.f32 %v8287_v26, %v8229_v49 }
0x28e5   : > { %v5053_v31 = vsel %vm639_vm1, %v5052_v54, 0.0 }
0x28e6   : > { %5054 = vadd.xlane.f32.xlu0 %v5053_v31 }
0x2920   : > { %v5004_v44 = vpop.permute.xlu1 %5003 }
0x2921   : > { %v5005_v34 = vmul.f32 %v5004_v44, %v8200_v38 }
0x2923   : > { %v5006_v39 = vsel %vm639_vm1, %v5005_v34, 0.0 }
0x2924   : > { %v5007_v16 = vrot.slane %v5006_v39, 4 }
0x2926   : > { %v5008_v57 = vadd.f32 %v5007_v16, %v5006_v39 }
0x2928   : > { %v5009_v56 = vrot.slane %v5008_v57, 2 }
0x292a   : > { %v5010_v47 = vadd.f32 %v5009_v56, %v5008_v57 }
0x292c   : > { %v5011_v24 = vrot.slane %v5010_v47, 1 }
0x292e   : > { %v5012_v59 = vadd.f32 %v5011_v24, %v5010_v47 }
0x2930   : > { %5030 = vbcast.lane.b32.xlu0 %v5012_v59, 256  ;;  %v5146_v63 = vsel %vm1046_vm4, %v5145_v62, %v5012_v59  ;;  %v8341_v59 = vld [vmem:[#allocation3 + $0x10] sm:$0xff] }
0x2973   : > { %v5055_v48 = vpop.xlane.xlu0 %5054 }
0x2974   : > { %v8296_v49 = vrot.slane %v5055_v48, %v6598_v22 }
0x2976   : > { %v5079_v46 = vmul.f32 %v8296_v49, %v8207_v55 }
0x2978   : > { %v5080_v38 = vsel %vm639_vm1, %v5079_v46, 0.0 }
0x2979   : > { %5081 = vadd.xlane.f32.xlu1 %v5080_v38 }
0x29a2   : > { %v5031_v32 = vpop.permute.xlu0 %5030 }
0x29a3   : > { %v5032_v52 = vmul.f32 %v5031_v32, %v8169_v61  ;;  %v8348_v32 = vld [vmem:[#allocation3 + $0x18] sm:$0xff] }
0x29a5   : > { %v5033_v23 = vsel %vm639_vm1, %v5032_v52, 0.0 }
0x29a6   : > { %v5034_v0 = vrot.slane %v5033_v23, 4 }
0x29a8   : > { %v5035_v29 = vadd.f32 %v5034_v0, %v5033_v23 }
0x29aa   : > { %v5036_v14 = vrot.slane %v5035_v29, 2 }
0x29ac   : > { %v5037_v3 = vadd.f32 %v5036_v14, %v5035_v29 }
0x29ae   : > { %v5038_v28 = vrot.slane %v5037_v3, 1 }
0x29b0   : > { %v5039_v30 = vadd.f32 %v5038_v28, %v5037_v3 }
0x29b2   : > { %5057 = vbcast.lane.b32.xlu1 %v5039_v30, 256  ;;  %v5147_v6 = vsel %vm1048_vm5, %v5146_v63, %v5039_v30 }
0x2a06   : > { %v5082_v25 = vpop.xlane.xlu1 %5081 }
0x2a07   : > { %v8305_v55 = vrot.slane %v5082_v25, %v6598_v22 }
0x2a09   : > { %v5106_v50 = vmul.f32 %v8305_v55, %v8176_v27  ;;  %v5178_v27 = vsel %vm1042_vm2, %v8249_v4, %v8222_v51 }
0x2a0a   : > { %v5179_v39 = vsel %vm1044_vm3, %v5178_v27, %v8198_v8 }
0x2a0b   : > { %v5107_v61 = vsel %vm639_vm1, %v5106_v50, 0.0 }
0x2a0c   : > { %5108 = vadd.xlane.f32.xlu0 %v5107_v61 }
0x2a24   : > { %v5058_v9 = vpop.permute.xlu1 %5057 }
0x2a25   : > { %v5059_v35 = vmul.f32 %v5058_v9, %v8136_v43  ;;  %v5180_v43 = vsel %vm1046_vm4, %v5179_v39, %v8167_v5 }
0x2a26   : > { %v5181_v16 = vsel %vm1048_vm5, %v5180_v43, %v8139_v58 }
0x2a27   : > { %v5060_v33 = vsel %vm639_vm1, %v5059_v35, 0.0  ;;  %v5182_v57 = vsel %vm1050_vm6, %v5181_v16, %v8114_v36 }
0x2a28   : > { %v5061_v45 = vrot.slane %v5060_v33, 4  ;;  %v5183_v56 = vsel %vm8672_vm12, %v5182_v57, %v8084_v10 }
0x2a29   : > { %v5184_v47 = vsel %vm8673_vm8, %v5183_v56, %v3813_v53 }
0x2a2a   : > { %v5062_v62 = vadd.f32 %v5061_v45, %v5060_v33  ;;  %v5243_v51 = vrot.slane %v5184_v47, %v6520_v13  ;;  %v5236_v30 = vcombine.high %v5184_v47, %v5184_v47 }
0x2a2c   : > { %v5063_v7 = vrot.slane %v5062_v62, 2  ;;  %v5259_v8 = vrot.slane %v5243_v51, %v6520_v13  ;;  %v5251_v4 = vcombine.high %v5243_v51, %v5243_v51  ;;  %v5250_v61 = vrot.slane %v5236_v30, %v6520_v13 }
0x2a2e   : > { %v5064_v54 = vadd.f32 %v5063_v7, %v5062_v62  ;;  %v5320_v58 = vrot.slane %v5259_v8, %v6513_v2  ;;  %v5273_v36 = vrot.slane %v5251_v4, %v6520_v13  ;;  %v5281_v52 = vcombine.high %v5259_v8, %v5259_v8 }
0x2a2f   : > { %v5266_v33 = vrot.slane %v5250_v61, %v6520_v13 }
0x2a30   : > { %v5065_v31 = vrot.slane %v5064_v54, 1  ;;  %v5373_v53 = vmul.f32 %v8341_v59, %v5320_v58  ;;  %v5324_v63 = vrot.slane %v5273_v36, %v6513_v2  ;;  %v5328_v29 = vrot.slane %v5281_v52, %v6513_v2 }
0x2a31   : > { %v5283_v28 = vcombine.high %v5273_v36, %v5273_v36  ;;  %v5336_v7 = vrot.slane %v5266_v33, %v6513_v2  ;;  %v5282_v47 = vcombine.high %v5266_v33, %v5266_v33 }
0x2a32   : > { %v5066_v44 = vadd.f32 %v5065_v31, %v5064_v54  ;;  %v5405_v48 = vsel %vm639_vm1, %v5373_v53, 0.0  ;;  %v5374_v46 = vmul.f32 %v8341_v59, %v5324_v63  ;;  %v5542_v0 = vmul.f32 %v8348_v32, %v5324_v63 }
0x2a33   : > { %v5375_v3 = vmul.f32 %v8341_v59, %v5328_v29  ;;  %v5543_v25 = vmul.f32 %v8348_v32, %v5328_v29  ;;  %v5332_v50 = vrot.slane %v5283_v28, %v6513_v2  ;;  %v5252_v54 = vcombine.high %v5250_v61, %v5250_v61 }
0x2a34   : > { %5084 = vbcast.lane.b32.xlu0 %v5066_v44, 256  ;;  %v8313_v34 = vsel %vm1050_vm6, %v5147_v6, %v5066_v44  ;;  %v5408_v38 = vsel %vm639_vm1, %v5374_v46, 0.0  ;;  %v5576_v14 = vsel %vm639_vm1, %v5542_v0, 0.0  ;;  %v5377_v44 = vmul.f32 %v8341_v59, %v5336_v7 }
0x2a35   : > { %v5411_v6 = vsel %vm639_vm1, %v5375_v3, 0.0  ;;  %v5579_v9 = vsel %vm639_vm1, %v5543_v25, 0.0  ;;  %v5376_v35 = vmul.f32 %v8341_v59, %v5332_v50  ;;  %v5544_v62 = vmul.f32 %v8348_v32, %v5332_v50 }
0x2a36   : > { %v8369_v27 = vrot.slane %v5252_v54, %v6520_v13  ;;  %v5417_v39 = vsel %vm639_vm1, %v5377_v44, 0.0  ;;  %v5545_v43 = vmul.f32 %v8348_v32, %v5336_v7  ;;  %v5344_v4 = vrot.slane %v5282_v47, %v6513_v2 }
0x2a37   : > { %v5414_v45 = vsel %vm639_vm1, %v5376_v35, 0.0  ;;  %v5582_v31 = vsel %vm639_vm1, %v5544_v62, 0.0 }
0x2a38   : > { %v5340_v16 = vrot.slane %v8369_v27, %v6513_v2  ;;  %v5585_v57 = vsel %vm639_vm1, %v5545_v43, 0.0  ;;  %v5284_v7 = vcombine.high %v8369_v27, %v8369_v27 }
0x2a3a   : > { %v5378_v56 = vmul.f32 %v8341_v59, %v5340_v16  ;;  %v5546_v8 = vmul.f32 %v8348_v32, %v5340_v16  ;;  %v5348_v47 = vrot.slane %v5284_v7, %v6513_v2 }
0x2a3c   : > { %v5420_v51 = vsel %vm639_vm1, %v5378_v56, 0.0 }
0x2a99   : > { %v5109_v24 = vpop.xlane.xlu0 %5108 }
0x2a9a   : > { %v8334_v5 = vrot.slane %v5109_v24, %v6598_v22  ;;  %v5588_v24 = vsel %vm639_vm1, %v5546_v8, 0.0 }
0x2a9c   : > { %v5133_v10 = vmul.f32 %v8334_v5, %v8156_v42  ;;  %v5541_v42 = vmul.f32 %v8348_v32, %v5320_v58  ;;  %v5379_v58 = vmul.f32 %v8341_v59, %v5344_v4 }
0x2a9e   : > { %v5134_v40 = vsel %vm639_vm1, %v5133_v10, 0.0  ;;  %v5573_v23 = vsel %vm639_vm1, %v5541_v42, 0.0  ;;  %v5423_v36 = vsel %vm639_vm1, %v5379_v58, 0.0  ;;  %v5547_v10 = vmul.f32 %v8348_v32, %v5344_v4 }
0x2a9f   : > { %5135 = vadd.xlane.f32.xlu1 %v5134_v40 }
0x2aa0   : > { %v5591_v40 = vsel %vm639_vm1, %v5547_v10, 0.0 }
0x2aa3   : > { %5406 = vadd.xlane.f32.xlu1 %v5405_v48 }
0x2aa7   : > { %5409 = vadd.xlane.f32.xlu1 %v5408_v38 }
0x2aab   : > { %5574 = vadd.xlane.f32.xlu1 %v5573_v23 }
0x2aaf   : > { %5577 = vadd.xlane.f32.xlu1 %v5576_v14 }
0x2ab3   : > { %5412 = vadd.xlane.f32.xlu1 %v5411_v6 }
0x2ab7   : > { %5580 = vadd.xlane.f32.xlu1 %v5579_v9 }
0x2abb   : > { %5415 = vadd.xlane.f32.xlu1 %v5414_v45 }
0x2abf   : > { %5583 = vadd.xlane.f32.xlu1 %v5582_v31 }
0x2ac3   : > { %5418 = vadd.xlane.f32.xlu1 %v5417_v39 }
0x2ac7   : > { %5586 = vadd.xlane.f32.xlu1 %v5585_v57 }
0x2acb   : > { %5421 = vadd.xlane.f32.xlu1 %v5420_v51 }
0x2acf   : > { %5589 = vadd.xlane.f32.xlu1 %v5588_v24 }
0x2ad3   : > { %5424 = vadd.xlane.f32.xlu1 %v5423_v36 }
0x2ad7   : > { %5592 = vadd.xlane.f32.xlu1 %v5591_v40  ;;  %v5380_v40 = vmul.f32 %v8341_v59, %v5348_v47 }
0x2b2c   : > { %v5136_v53 = vpop.xlane.xlu1 %5135 }
0x2b2d   : > { %v5155_v63 = vrot.slane %v5136_v53, %v6598_v22 }
0x2b2f   : > { %v5171_v48 = vsel %vm1042_vm2, %v5155_v63, %v8334_v5  ;;  %vm8675_vm2 = vmmov %vm8671_vm7  ;;  %vm8681_vm7 = vcmask 1047559  }
0x2b30   : > { %v5172_v46 = vsel %vm1044_vm3, %v5171_v48, %v8305_v55  ;;  %v5407_v38 = vpop.xlane.xlu1 %5406  ;;  %vm8676_vm3 = vcmask 1042434  }
0x2b31   : > { %v5173_v42 = vsel %vm1046_vm4, %v5172_v46, %v8296_v49  ;;  %v5480_v14 = vrot.slane %v5407_v38, %v6598_v22  ;;  %vm8677_vm4 = vmmov %vm8676_vm3 }
0x2b32   : > { %v5174_v52 = vsel %vm1048_vm5, %v5173_v42, %v8287_v26  ;;  %v5426_v42 = vsel %vm639_vm1, %v5380_v40, 0.0  ;;  %vm8678_vm5 = vmmov %vm8676_vm3 }
0x2b33   : > { %v5175_v23 = vsel %vm1050_vm6, %v5174_v52, %v8277_v21  ;;  %v5548_v52 = vmul.f32 %v8348_v32, %v5348_v47  ;;  %vm8679_vm6 = vcmask 1043459  }
0x2b34   : > { %v5410_v0 = vpop.xlane.xlu1 %5409  ;;  %v5176_v29 = vsel %vm8674_vm11, %v5175_v23, %v8271_v60  ;;  %vm8682_vm12 = vmmov %vm8679_vm6 }
0x2b35   : > { %v5484_v5 = vrot.slane %v5410_v0, %v6598_v22  ;;  %v5177_v55 = vsel %vm8675_vm2, %v5176_v29, %v8262_v11  ;;  %vm8683_vm8 = vmmov %vm8679_vm6 }
0x2b36   : > { %v5194_v3 = vrot.slane %v5177_v55, %v6520_v13  ;;  %v5187_v49 = vcombine.high %v5177_v55, %v5177_v55  ;;  %vm8685_vm11 = vmmov %vm8679_vm6 }
0x2b37   : > { %v5516_v28 = vsel %vm673_vm9, %v5484_v5, %v5480_v14  ;;  %v5594_v5 = vsel %vm639_vm1, %v5548_v52, 0.0  ;;  %vm8686_vm2 = vmmov %vm8680_vm10 }
0x2b38   : > { %v5575_v26 = vpop.xlane.xlu1 %5574  ;;  %v5210_v30 = vrot.slane %v5194_v3, %v6520_v13  ;;  %v5202_v21 = vcombine.high %v5194_v3, %v5194_v3  ;;  %v5201_v6 = vrot.slane %v5187_v49, %v6520_v13 }
0x2b39   : > { %v5648_v45 = vrot.slane %v5575_v26, %v6598_v22 }
0x2b3a   : > { %v5288_v60 = vrot.slane %v5210_v30, %v6513_v2  ;;  %v5232_v25 = vcombine.high %v5210_v30, %v5210_v30  ;;  %v5224_v50 = vrot.slane %v5202_v21, %v6520_v13  ;;  %v5217_v54 = vrot.slane %v5201_v6, %v6520_v13 }
0x2b3b   : > { %v5203_v14 = vcombine.high %v5201_v6, %v5201_v6 }
0x2b3c   : > { %v5578_v61 = vpop.xlane.xlu1 %5577  ;;  %v5533_v9 = vmul.f32 %v8348_v32, %v5288_v60  ;;  %v5365_v11 = vmul.f32 %v8341_v59, %v5288_v60  ;;  %v5296_v35 = vrot.slane %v5232_v25, %v6513_v2  ;;  %v5292_v33 = vrot.slane %v5224_v50, %v6513_v2 }
0x2b3d   : > { %v5652_v62 = vrot.slane %v5578_v61, %v6598_v22  ;;  %v5304_v27 = vrot.slane %v5217_v54, %v6513_v2  ;;  %v5234_v46 = vcombine.high %v5224_v50, %v5224_v50  ;;  %v5231_v49 = vrot.slane %v5203_v14, %v6520_v13 }
0x2b3e   : > { %v5549_v31 = vsel %vm639_vm1, %v5533_v9, 0.0  ;;  %v5381_v44 = vsel %vm639_vm1, %v5365_v11, 0.0  ;;  %v5367_v39 = vmul.f32 %v8341_v59, %v5296_v35  ;;  %v5366_v43 = vmul.f32 %v8341_v59, %v5292_v33 }
0x2b3f   : > { %v5684_v16 = vsel %vm673_vm9, %v5652_v62, %v5648_v45  ;;  %5550 = vadd.xlane.f32.xlu1 %v5549_v31  ;;  %5382 = vadd.xlane.f32.xlu0 %v5381_v44  ;;  %v5535_v4 = vmul.f32 %v8348_v32, %v5296_v35  ;;  %v5534_v24 = vmul.f32 %v8348_v32, %v5292_v33  ;;  %v5085_v62 = vpop.permute.xlu0 %5084 }
0x2b40   : > { %v5413_v57 = vpop.xlane.xlu1 %5412  ;;  %v5387_v51 = vsel %vm639_vm1, %v5367_v39, 0.0  ;;  %v5384_v8 = vsel %vm639_vm1, %v5366_v43, 0.0  ;;  %v5369_v48 = vmul.f32 %v8341_v59, %v5304_v27  ;;  %v5537_v0 = vmul.f32 %v8348_v32, %v5304_v27 }
0x2b41   : > { %v5488_v56 = vrot.slane %v5413_v57, %v6598_v22  ;;  %v5555_v53 = vsel %vm639_vm1, %v5535_v4, 0.0  ;;  %v5552_v63 = vsel %vm639_vm1, %v5534_v24, 0.0  ;;  %v5300_v29 = vrot.slane %v5234_v46, %v6513_v2 }
0x2b42   : > { %v5393_v23 = vsel %vm639_vm1, %v5369_v48, 0.0  ;;  %v5561_v55 = vsel %vm639_vm1, %v5537_v0, 0.0  ;;  %v5308_v30 = vrot.slane %v5231_v49, %v6513_v2  ;;  %v5233_v60 = vcombine.high %v5217_v54, %v5217_v54 }
0x2b43   : > { %v8430_v58 = vsel %vm8676_vm3, %v5488_v56, %v5516_v28  ;;  %5388 = vadd.xlane.f32.xlu0 %v5387_v51  ;;  %5385 = vadd.xlane.f32.xlu1 %v5384_v8  ;;  %v5368_v3 = vmul.f32 %v8341_v59, %v5300_v29  ;;  %v5536_v26 = vmul.f32 %v8348_v32, %v5300_v29 }
0x2b44   : > { %v5581_v36 = vpop.xlane.xlu1 %5580  ;;  %v5370_v6 = vmul.f32 %v8341_v59, %v5308_v30  ;;  %v5538_v50 = vmul.f32 %v8348_v32, %v5308_v30  ;;  %v5312_v13 = vrot.slane %v5233_v60, %v6513_v2  ;;  %v5235_v11 = vcombine.high %v5231_v49, %v5231_v49 }
0x2b45   : > { %v5656_v10 = vrot.slane %v5581_v36, %v6598_v22  ;;  %v5390_v28 = vsel %vm639_vm1, %v5368_v3, 0.0  ;;  %v5558_v21 = vsel %vm639_vm1, %v5536_v26, 0.0  ;;  %v5086_v31 = vmul.f32 %v5085_v62, %v8111_v41 }
0x2b46   : > { %v5396_v25 = vsel %vm639_vm1, %v5370_v6, 0.0  ;;  %v5564_v61 = vsel %vm639_vm1, %v5538_v50, 0.0  ;;  %v5371_v9 = vmul.f32 %v8341_v59, %v5312_v13  ;;  %v5539_v33 = vmul.f32 %v8348_v32, %v5312_v13 }
0x2b47   : > { %v8438_v38 = vsel %vm8677_vm4, %v5656_v10, %v5684_v16  ;;  %5556 = vadd.xlane.f32.xlu0 %v5555_v53  ;;  %5553 = vadd.xlane.f32.xlu1 %v5552_v63  ;;  %v5316_v45 = vrot.slane %v5235_v11, %v6513_v2  ;;  %v5087_v43 = vsel %vm639_vm1, %v5086_v31, 0.0  ;;  %vm8688_vm4 = vmmov %vm8686_vm2 }
0x2b48   : > { %v5399_v35 = vsel %vm639_vm1, %v5371_v9, 0.0  ;;  %v5567_v7 = vsel %vm639_vm1, %v5539_v33, 0.0  ;;  %v5088_v57 = vrot.slane %v5087_v43, 4  ;;  %v5416_v41 = vpop.xlane.xlu1 %5415 }
0x2b49   : > { %v5372_v54 = vmul.f32 %v8341_v59, %v5316_v45  ;;  %v5540_v39 = vmul.f32 %v8348_v32, %v5316_v45 }
0x2b4a   : > { %v5089_v2 = vadd.f32 %v5088_v57, %v5087_v43  ;;  %v5492_v57 = vrot.slane %v5416_v41, %v6598_v22 }
0x2b4b   : > { %5427 = vadd.xlane.f32.xlu1 %v5426_v42  ;;  %5394 = vadd.xlane.f32.xlu0 %v5393_v23  ;;  %v5402_v44 = vsel %vm639_vm1, %v5372_v54, 0.0  ;;  %v5570_v16 = vsel %vm639_vm1, %v5540_v39, 0.0 }
0x2b4c   : > { %v5090_v56 = vrot.slane %v5089_v2, 2  ;;  %v5584_v59 = vpop.xlane.xlu1 %5583 }
0x2b4e   : > { %v5091_v47 = vadd.f32 %v5090_v56, %v5089_v2  ;;  %v5660_v2 = vrot.slane %v5584_v59, %v6598_v22 }
0x2b4f   : > { %5595 = vadd.xlane.f32.xlu1 %v5594_v5  ;;  %5562 = vadd.xlane.f32.xlu0 %v5561_v55 }
0x2b50   : > { %v5092_v27 = vrot.slane %v5091_v47, 1  ;;  %v8472_v8 = vpop.xlane.xlu1 %5418 }
0x2b51   : > { %v5496_v41 = vrot.slane %v8472_v8, %v6598_v22 }
0x2b52   : > { %v8469_v51 = vadd.f32 %v5092_v27, %v5091_v47 }
0x2b53   : > { %5391 = vadd.xlane.f32.xlu0 %v5390_v28 }
0x2b54   : > { %v8474_v32 = vpop.xlane.xlu1 %5586 }
0x2b55   : > { %v5664_v59 = vrot.slane %v8474_v32, %v6598_v22 }
0x2b57   : > { %5559 = vadd.xlane.f32.xlu0 %v5558_v21 }
0x2b58   : > { %v8476_v24 = vpop.xlane.xlu1 %5421 }
0x2b5b   : > { %5397 = vadd.xlane.f32.xlu0 %v5396_v25 }
0x2b5c   : > { %v8478_v10 = vpop.xlane.xlu1 %5589 }
0x2b5f   : > { %5565 = vadd.xlane.f32.xlu0 %v5564_v61 }
0x2b60   : > { %v8480_v63 = vpop.xlane.xlu1 %5424 }
0x2b61   : > { %v5504_v8 = vrot.slane %v8480_v63, %v6598_v22 }
0x2b63   : > { %5400 = vadd.xlane.f32.xlu0 %v5399_v35 }
0x2b64   : > { %v8484_v46 = vpop.xlane.xlu1 %5592 }
0x2b65   : > { %v5672_v32 = vrot.slane %v8484_v46, %v6598_v22 }
0x2b67   : > { %5568 = vadd.xlane.f32.xlu0 %v5567_v7 }
0x2b6b   : > { %5403 = vadd.xlane.f32.xlu0 %v5402_v44 }
0x2b6f   : > { %5571 = vadd.xlane.f32.xlu0 %v5570_v16 }
0x2b85   : > { %5111 = vbcast.lane.b32.xlu0 %v8469_v51, 256 }
0x2bcc   : > { %v5383_v4 = vpop.xlane.xlu0 %5382  ;;  %v5551_v52 = vpop.xlane.xlu1 %5550 }
0x2bcd   : > { %v5448_v55 = vrot.slane %v5383_v4, %v6598_v22  ;;  %v5616_v56 = vrot.slane %v5551_v52, %v6598_v22 }
0x2bd0   : > { %v5389_v36 = vpop.xlane.xlu0 %5388  ;;  %v5386_v29 = vpop.xlane.xlu1 %5385 }
0x2bd1   : > { %v5452_v5 = vrot.slane %v5386_v29, %v6598_v22  ;;  %v5456_v3 = vrot.slane %v5389_v36, %v6598_v22  ;;  %v5668_v29 = vrot.slane %v8478_v10, %v6598_v22 }
0x2bd3   : > { %v5509_v28 = vsel %vm673_vm9, %v5452_v5, %v5448_v55 }
0x2bd4   : > { %v5557_v40 = vpop.xlane.xlu0 %5556  ;;  %v5510_v30 = vsel %vm8678_vm5, %v5456_v3, %v5509_v28  ;;  %v5554_v7 = vpop.xlane.xlu1 %5553  ;;  %vm8689_vm5 = vcmask 1045504  }
0x2bd5   : > { %v5620_v39 = vrot.slane %v5554_v7, %v6598_v22  ;;  %v5624_v27 = vrot.slane %v5557_v40, %v6598_v22  ;;  %v5500_v40 = vrot.slane %v8476_v24, %v6598_v22 }
0x2bd7   : > { %v5677_v4 = vsel %vm673_vm9, %v5620_v39, %v5616_v56  ;;  %vm8684_vm9 = vmmov %vm8676_vm3 }
0x2bd8   : > { %v5395_v53 = vpop.xlane.xlu0 %5394  ;;  %v5428_v43 = vpop.xlane.xlu1 %5427  ;;  %vm8687_vm3 = vmmov %vm8686_vm2 }
0x2bd9   : > { %v5464_v25 = vrot.slane %v5395_v53, %v6598_v22  ;;  %v5508_v3 = vrot.slane %v5428_v43, %v6598_v22 }
0x2bdc   : > { %v8482_v48 = vpop.xlane.xlu0 %5562  ;;  %v5596_v52 = vpop.xlane.xlu1 %5595 }
0x2bdd   : > { %v5632_v24 = vrot.slane %v8482_v48, %v6598_v22  ;;  %v5676_v10 = vrot.slane %v5596_v52, %v6598_v22 }
0x2be0   : > { %v5392_v42 = vpop.xlane.xlu0 %5391 }
0x2be1   : > { %v5460_v26 = vrot.slane %v5392_v42, %v6598_v22  ;;  %v5686_v42 = vsel %vm8683_vm8, %v5660_v2, %v8438_v38 }
0x2be3   : > { %v5511_v6 = vsel %vm8679_vm6, %v5460_v26, %v5510_v30  ;;  %v5687_v26 = vsel %vm8687_vm3, %v5664_v59, %v5686_v42  ;;  %vm8690_vm6 = vcmask 1046528  }
0x2be4   : > { %v5560_v23 = vpop.xlane.xlu0 %5559  ;;  %v5512_v13 = vsel %vm8680_vm10, %v5464_v25, %v5511_v6  ;;  %v5688_v30 = vsel %vm680_vm13, %v5668_v29, %v5687_v26  ;;  %v5149_v25 = vsel %vm8689_vm5, %v8313_v34, %v8469_v51  ;;  %vm8691_vm10 = vmmov %vm8681_vm7 }
0x2be5   : > { %v5628_v36 = vrot.slane %v5560_v23, %v6598_v22  ;;  %v5678_v23 = vsel %vm8684_vm9, %v5624_v27, %v5677_v4 }
0x2be8   : > { %v5398_v0 = vpop.xlane.xlu0 %5397 }
0x2be9   : > { %v5468_v60 = vrot.slane %v5398_v0, %v6598_v22 }
0x2beb   : > { %v5513_v9 = vsel %vm680_vm13, %v5468_v60, %v5512_v13  ;;  %v5689_v60 = vsel %vm682_vm14, %v5672_v32, %v5688_v30 }
0x2bec   : > { %v8486_v14 = vpop.xlane.xlu0 %5565 }
0x2bed   : > { %v5636_v38 = vrot.slane %v8486_v14, %v6598_v22 }
0x2bf0   : > { %v5401_v49 = vpop.xlane.xlu0 %5400 }
0x2bf1   : > { %v5472_v50 = vrot.slane %v5401_v49, %v6598_v22 }
0x2bf3   : > { %v5514_v35 = vsel %vm682_vm14, %v5472_v50, %v5513_v9 }
0x2bf4   : > { %v5569_v21 = vpop.xlane.xlu0 %5568 }
0x2bf5   : > { %v5640_v55 = vrot.slane %v5569_v21, %v6598_v22 }
0x2bf8   : > { %v5404_v61 = vpop.xlane.xlu0 %5403 }
0x2bf9   : > { %v5476_v11 = vrot.slane %v5404_v61, %v6598_v22 }
0x2bfb   : > { %v5515_v33 = vsel %vm8681_vm7, %v5476_v11, %v5514_v35 }
0x2bfc   : > { %v5572_v45 = vpop.xlane.xlu0 %5571  ;;  %v5525_v62 = vmul.f32 %v5515_v33, %v8265_v19 }
0x2bfd   : > { %v5644_v49 = vrot.slane %v5572_v45, %v6598_v22 }
0x2bfe   : > { %v5527_v54 = vsel %vm639_vm1, %v5525_v62, 0.0 }
0x2bff   : > { %5528 = vadd.xlane.f32.xlu1 %v5527_v54 }
0x2c00   : > { %v5112_v31 = vpop.permute.xlu0 %5111 }
0x2c01   : > { %v5113_v44 = vmul.f32 %v5112_v31, %v8081_v17  ;;  %v5518_v17 = vsel %vm8682_vm12, %v5492_v57, %v8430_v58  ;;  %v5679_v58 = vsel %vm8685_vm11, %v5628_v36, %v5678_v23  ;;  %vm8692_vm12 = vmmov %vm8681_vm7 }
0x2c02   : > { %v5519_v14 = vsel %vm8686_vm2, %v5496_v41, %v5518_v17  ;;  %v5680_v63 = vsel %vm8688_vm4, %v5632_v24, %v5679_v58  ;;  %v5690_v9 = vsel %vm8692_vm12, %v5676_v10, %v5689_v60  ;;  %vm5993_vm12 = vcmask 48128  }
0x2c03   : > { %v5114_v16 = vsel %vm639_vm1, %v5113_v44, 0.0  ;;  %v5520_v46 = vsel %vm680_vm13, %v5500_v40, %v5519_v14  ;;  %v5681_v48 = vsel %vm680_vm13, %v5636_v38, %v5680_v63 }
0x2c04   : > { %v5115_v47 = vrot.slane %v5114_v16, 4  ;;  %v5521_v6 = vsel %vm682_vm14, %v5504_v8, %v5520_v46  ;;  %v5682_v22 = vsel %vm682_vm14, %v5640_v55, %v5681_v48 }
0x2c05   : > { %v5522_v13 = vsel %vm8691_vm10, %v5508_v3, %v5521_v6  ;;  %v5683_v61 = vsel %vm8681_vm7, %v5644_v49, %v5682_v22  ;;  %vm5991_vm7 = vcmask 31744  }
0x2c06   : > { %v5116_v53 = vadd.f32 %v5115_v47, %v5114_v16  ;;  %v5693_v45 = vmul.f32 %v5683_v61, %v8265_v19 }
0x2c08   : > { %v5117_v0 = vrot.slane %v5116_v53, 2  ;;  %v5695_v62 = vsel %vm639_vm1, %v5693_v45, 0.0 }
0x2c0a   : > { %v5118_v5 = vadd.f32 %v5117_v0, %v5116_v53 }
0x2c0c   : > { %v5119_v28 = vrot.slane %v5118_v5, 1 }
0x2c0e   : > { %v5120_v21 = vadd.f32 %v5119_v28, %v5118_v5 }
0x2c10   : > { %v5150_v50 = vsel %vm8690_vm6, %v5149_v25, %v5120_v21 }
0x2c11   : > { %v5526_v11 = vmul.f32 %v5522_v13, %v5150_v50  ;;  %v5694_v35 = vmul.f32 %v5690_v9, %v5150_v50  ;;  %v5764_v50 = vstv %s5763_s30 }
0x2c12   : > { %v5765_v61 = vmul.f32 %v5764_v50, %v6523_v15 }
0x2c13   : > { %v5530_v33 = vsel %vm639_vm1, %v5526_v11, 0.0  ;;  %v5698_v34 = vsel %vm639_vm1, %v5694_v35, 0.0 }
0x2c14   : > { %5531 = vadd.xlane.f32.xlu1 %v5530_v33  ;;  %v5766_v33 = vmul.f32 %v5764_v50, %v6529_v20 }
0x2c18   : > { %5696 = vadd.xlane.f32.xlu1 %v5695_v62 }
0x2c1c   : > { %5699 = vadd.xlane.f32.xlu1 %v5698_v34 }
0x2c8c   : > { %v5529_v51 = vpop.xlane.xlu1 %5528 }
0x2ca1   : > { %v5532_v7 = vpop.xlane.xlu1 %5531 }
0x2ca5   : > { %v5697_v54 = vpop.xlane.xlu1 %5696 }
0x2ca6   : > { %v5701_v31 = vsel %vm282_vm0, %v5529_v51, %v5697_v54 }
0x2ca7   : > { %6311 = vtanh.f32 %v5701_v31 }
0x2ca9   : > { %v5700_v44 = vpop.xlane.xlu1 %5699 }
0x2caa   : > { %v5702_v39 = vsel %vm282_vm0, %v5532_v7, %v5700_v44 }
0x2cab   : > { %6313 = vtanh.f32 %v5702_v39 }
0x2cb1   : > { %v6312_v43 = vpop.eup %6311 }
0x2cb2   : > { %v5705_v16 = vmul.f32 %v6312_v43, %v6312_v43 }
0x2cb4   : > { %v5707_v19 = vsel %vm1622_vm15, %v5705_v16, 0.0 }
0x2cb5   : > { %v6314_v57 = vpop.eup %6313  ;;  %5708 = vadd.xlane.f32.xlu1 %v5707_v19 }
0x2cb6   : > { %v5706_v2 = vmul.f32 %v6314_v57, %v6314_v57 }
0x2cb8   : > { %v5710_v56 = vsel %vm1622_vm15, %v5706_v2, 0.0 }
0x2cb9   : > { %5711 = vadd.xlane.f32.xlu0 %v5710_v56 }
0x2d42   : > { %v5709_v47 = vpop.xlane.xlu1 %5708 }
0x2d43   : > { %6315 = vrsqrt.f32 %v5709_v47  ;;  %vm5715_vm13 = vcmp.eq.f32.partialorder %v5709_v47, inf  ;;  %v5718_v53 = vand.u32 2147483648, %v5709_v47  ;;  %vm5717_vm0 = vcmp.eq.f32.partialorder %v5709_v47, 0.0 }
0x2d46   : > { %v5712_v27 = vpop.xlane.xlu0 %5711 }
0x2d47   : > { %6317 = vrsqrt.f32 %v5712_v27  ;;  %vm5722_vm14 = vcmp.eq.f32.partialorder %v5712_v27, inf  ;;  %v5725_v40 = vand.u32 2147483648, %v5712_v27  ;;  %vm5724_vm8 = vcmp.eq.f32.partialorder %v5712_v27, 0.0 }
0x2d4d   : > { %v6316_v4 = vpop.eup %6315 }
0x2d4e   : > { %v5714_v36 = vmul.f32 %v6316_v4, %v5709_v47 }
0x2d50   : > { %v5716_v17 = vsel %vm5715_vm13, %v5709_v47, %v5714_v36  ;;  %vm5996_vm13 = vcmask 80896  }
0x2d51   : > { %v6318_v42 = vpop.eup %6317  ;;  %v5719_v0 = vsel %vm5717_vm0, %v5718_v53, %v5716_v17  ;;  %v6401_v53 = vmov 1934713408   ;;  %vm5998_vm0 = vcmask 97280  }
0x2d52   : > { %v5727_v41 = vadd.f32 1e-06, %v5719_v0  ;;  %v5721_v59 = vmul.f32 %v6318_v42, %v5712_v27  ;;  %v5849_v17 = vunpack.c.l.s4 %v6401_v53 }
0x2d54   : > { %6319 = vrcp.f32 %v5727_v41  ;;  %v5723_v52 = vsel %vm5722_vm14, %v5712_v27, %v5721_v59  ;;  %v6400_v27 = vmov 1983009808   ;;  %v5850_v59 = vunpack.c.0.s8 %v5849_v17 }
0x2d55   : > { %v5726_v23 = vsel %vm5724_vm8, %v5725_v40, %v5723_v52  ;;  %v5834_v4 = vunpack.c.l.s4 %v6400_v27  ;;  %vm6002_vm8 = vcmask 130048  }
0x2d56   : > { %v5728_v29 = vadd.f32 1e-06, %v5726_v23 }
0x2d57   : > { %v5835_v36 = vunpack.c.0.s8 %v5834_v4 }
0x2d58   : > { %6321 = vrcp.f32 %v5728_v29 }
0x2d59   : > { %v5838_v41 = vsub.s32 %v5835_v36, %v6506_v1  ;;  %v6020_v36 = vadd.s32 4294967264, %v6594_v18 }
0x2d5e   : > { %v6320_v58 = vpop.eup %6319 }
0x2d5f   : > { %v5730_v38 = vmul.f32 %v6320_v58, %v6312_v43  ;;  %v5853_v58 = vsub.s32 %v5850_v59, %v6506_v1 }
0x2d61   : > { %v5733_v5 = vadd.f32 %v5730_v38, %v8094_v37  ;;  %v6117_v38 = vld [vmem:[%s8618_s5] ss:$0 sm:$0xff] }
0x2d62   : > { %v6322_v8 = vpop.eup %6321 }
0x2d63   : > { %v5735_v32 = vmul.f32 %v5733_v5, %v5733_v5  ;;  %v5732_v24 = vmul.f32 %v6322_v8, %v6314_v57 }
0x2d65   : > { %v5737_v55 = vsel %vm1622_vm15, %v5735_v32, 0.0  ;;  %v5734_v3 = vadd.f32 %v5732_v24, %v8058_v12 }
0x2d66   : > { %5738 = vadd.xlane.f32.xlu1 %v5737_v55 }
0x2d67   : > { %v5736_v10 = vmul.f32 %v5734_v3, %v5734_v3 }
0x2d69   : > { %v5740_v49 = vsel %vm1622_vm15, %v5736_v10, 0.0 }
0x2d6a   : > { %5741 = vadd.xlane.f32.xlu1 %v5740_v49  ;;  %v6402_v49 = vmov 0.0  }
0x2df3   : > { %v5739_v28 = vpop.xlane.xlu1 %5738 }
0x2df4   : > { %6323 = vrsqrt.f32 %v5739_v28  ;;  %vm5745_vm9 = vcmp.eq.f32.partialorder %v5739_v28, inf  ;;  %v5748_v37 = vand.u32 2147483648, %v5739_v28  ;;  %vm5747_vm11 = vcmp.eq.f32.partialorder %v5739_v28, 0.0 }
0x2df7   : > { %v5742_v14 = vpop.xlane.xlu1 %5741 }
0x2df8   : > { %6325 = vrsqrt.f32 %v5742_v14  ;;  %vm5752_vm2 = vcmp.eq.f32.partialorder %v5742_v14, inf  ;;  %v5755_v12 = vand.u32 2147483648, %v5742_v14  ;;  %vm5754_vm3 = vcmp.eq.f32.partialorder %v5742_v14, 0.0 }
0x2dfe   : > { %v6324_v26 = vpop.eup %6323 }
0x2dff   : > { %v5744_v63 = vmul.f32 %v6324_v26, %v5739_v28 }
0x2e01   : > { %v5746_v46 = vsel %vm5745_vm9, %v5739_v28, %v5744_v63  ;;  %vm6004_vm9 = vcmask 146432  }
0x2e02   : > { %v6326_v30 = vpop.eup %6325  ;;  %v5749_v48 = vsel %vm5747_vm11, %v5748_v37, %v5746_v46  ;;  %vm6006_vm11 = vcmask 162816  }
0x2e03   : > { %v5757_v21 = vadd.f32 1e-06, %v5749_v48  ;;  %v5751_v6 = vmul.f32 %v6326_v30, %v5742_v14 }
0x2e05   : > { %6327 = vrcp.f32 %v5757_v21  ;;  %v5753_v60 = vsel %vm5752_vm2, %v5742_v14, %v5751_v6 }
0x2e06   : > { %v5756_v22 = vsel %vm5754_vm3, %v5755_v12, %v5753_v60  ;;  %vm6008_vm3 = vcmask 179200  }
0x2e07   : > { %v5758_v25 = vadd.f32 1e-06, %v5756_v22 }
0x2e09   : > { %6329 = vrcp.f32 %v5758_v25 }
0x2e0f   : > { %v6328_v13 = vpop.eup %6327 }
0x2e10   : > { %v5760_v9 = vmul.f32 %v6328_v13, %v5733_v5 }
0x2e12   : > { %v5767_v11 = vadd.f32 %v5765_v61, %v5760_v9 }
0x2e13   : > { %v6330_v35 = vpop.eup %6329 }
0x2e14   : > { %v5769_v45 = vmul.f32 %v5767_v11, %v5767_v11  ;;  %v5762_v62 = vmul.f32 %v6330_v35, %v5734_v3 }
0x2e16   : > { %v5771_v34 = vsel %vm1622_vm15, %v5769_v45, 0.0  ;;  %v5768_v51 = vadd.f32 %v5766_v33, %v5762_v62 }
0x2e17   : > { %5772 = vadd.xlane.f32.xlu1 %v5771_v34 }
0x2e18   : > { %v5770_v7 = vmul.f32 %v5768_v51, %v5768_v51 }
0x2e1a   : > { %v5774_v54 = vsel %vm1622_vm15, %v5770_v7, 0.0 }
0x2e1b   : > { %5775 = vadd.xlane.f32.xlu1 %v5774_v54 }
0x2ea4   : > { %v5773_v31 = vpop.xlane.xlu1 %5772 }
0x2ea5   : > { %6331 = vrsqrt.f32 %v5773_v31  ;;  %vm5779_vm4 = vcmp.eq.f32.partialorder %v5773_v31, inf  ;;  %v5782_v43 = vand.u32 2147483648, %v5773_v31  ;;  %vm5781_vm5 = vcmp.eq.f32.partialorder %v5773_v31, 0.0 }
0x2ea8   : > { %v5776_v44 = vpop.xlane.xlu1 %5775 }
0x2ea9   : > { %6333 = vrsqrt.f32 %v5776_v44  ;;  %vm5786_vm6 = vcmp.eq.f32.partialorder %v5776_v44, inf  ;;  %v5789_v2 = vand.u32 2147483648, %v5776_v44  ;;  %vm5788_vm10 = vcmp.eq.f32.partialorder %v5776_v44, 0.0 }
0x2eaf   : > { %v6332_v15 = vpop.eup %6331 }
0x2eb0   : > { %v5778_v39 = vmul.f32 %v6332_v15, %v5773_v31 }
0x2eb2   : > { %v5780_v16 = vsel %vm5779_vm4, %v5773_v31, %v5778_v39  ;;  %vm6010_vm4 = vcmask 195584  }
0x2eb3   : > { %v6334_v20 = vpop.eup %6333  ;;  %v5783_v19 = vsel %vm5781_vm5, %v5782_v43, %v5780_v16 }
0x2eb4   : > { %6335 = vrcp.f32 %v5783_v19  ;;  %v5785_v57 = vmul.f32 %v6334_v20, %v5776_v44 }
0x2eb6   : > { %v5787_v56 = vsel %vm5786_vm6, %v5776_v44, %v5785_v57  ;;  %vm6012_vm6 = vcmask 211968  }
0x2eb7   : > { %v5790_v47 = vsel %vm5788_vm10, %v5789_v2, %v5787_v56  ;;  %vm6014_vm10 = vcmask 228352  }
0x2eb8   : > { %6337 = vrcp.f32 %v5790_v47 }
0x2ebe   : > { %v6336_v42 = vpop.eup %6335 }
0x2ebf   : > { %v5792_v0 = vmul.f32 %v6336_v42, %v5767_v11  ;;  %v6025_v42 = vadd.s32 4294967256, %v6594_v18 }
0x2ec1   : > { %v5810_v40 = vmul.f32 %v5792_v0, %v5792_v0  ;;  %v5839_v5 = vrot.slane %v5792_v0, %v5838_v41  ;;  %v5802_v24 = vmul.f32 %v6117_v38, %v5792_v0  ;;  %v5832_v28 = vcombine.high %v5792_v0, %v6402_v49 }
0x2ec2   : > { %v6338_v52 = vpop.eup %6337 }
0x2ec3   : > { %v5812_v23 = vsel %vm1622_vm15, %v5810_v40, 0.0  ;;  %v5794_v29 = vmul.f32 %v6338_v52, %v5768_v51  ;;  %v8579_v10 = vrot.slane %v5839_v5, %v5853_v58  ;;  %v5804_v14 = vsel %vm1622_vm15, %v5802_v24, 0.0 }
0x2ec4   : > { %5813 = vadd.xlane.f32.xlu1 %v5812_v23  ;;  %v5846_v37 = vrot.slane %v5832_v28, %v5838_v41  ;;  %v5847_v13 = vcombine.high %v5839_v5, %v6402_v49  ;;  %v6040_v40 = vadd.s32 4294967240, %v6594_v18 }
0x2ec5   : > { %v5811_v8 = vmul.f32 %v5794_v29, %v5794_v29  ;;  %v5888_v32 = vrot.slane %v5794_v29, %v5838_v41  ;;  %v5877_v26 = vcombine.high %v8579_v10, %v6402_v49  ;;  %v5803_v63 = vmul.f32 %v6117_v38, %v5794_v29 }
0x2ec6   : > { %v5869_v30 = vrot.slane %v5846_v37, %v5853_v58  ;;  %v5862_v6 = vcombine.high %v5846_v37, %v6402_v49  ;;  %v5881_v12 = vcombine.high %v5794_v29, %v6402_v49  ;;  %v5861_v9 = vrot.slane %v5847_v13, %v5853_v58 }
0x2ec7   : > { %v5815_v55 = vsel %vm1622_vm15, %v5811_v8, 0.0  ;;  %v5903_v3 = vrot.slane %v5888_v32, %v5853_v58  ;;  %v5807_v46 = vsel %vm1622_vm15, %v5803_v63, 0.0  ;;  %v5896_v48 = vcombine.high %v5888_v32, %v6402_v49 }
0x2ec8   : > { %5816 = vadd.xlane.f32.xlu1 %v5815_v55  ;;  %v5876_v60 = vrot.slane %v5862_v6, %v5853_v58  ;;  %v5895_v22 = vrot.slane %v5881_v12, %v5838_v41  ;;  %v5878_v35 = vcombine.high %v5861_v9, %v6402_v49  ;;  %v5879_v33 = vcombine.high %v5869_v30, %v6402_v49 }
0x2ec9   : > { %5959 = vrot.lane.b32.xlu0 %v5903_v3, %s6403_s9  ;;  %v5910_v21 = vrot.slane %v5896_v48, %v5853_v58  ;;  %v5926_v11 = vcombine.high %v5903_v3, %v6402_v49  ;;  %v6023_v29 = vsub.s32 %v6020_v36, %v6506_v1  ;;  %v6035_v38 = vadd.s32 4294967248, %v6594_v18 }
0x2eca   : > { %v5918_v25 = vrot.slane %v5895_v22, %v5853_v58  ;;  %v5911_v50 = vcombine.high %v5895_v22, %v6402_v49  ;;  %v5880_v62 = vcombine.high %v5876_v60, %v6402_v49  ;;  %v6043_v24 = vsub.s32 %v6040_v40, %v6506_v1 }
0x2ecb   : > { %v5927_v45 = vcombine.high %v5910_v21, %v6402_v49 }
0x2ecc   : > { %5805 = vadd.xlane.f32.xlu1 %v5804_v14  ;;  %v5925_v61 = vrot.slane %v5911_v50, %v5853_v58  ;;  %v5928_v34 = vcombine.high %v5918_v25, %v6402_v49  ;;  %v6028_v58 = vsub.s32 %v6025_v42, %v6506_v1 }
0x2ecd   : > { %5931 = vrot.lane.b32.xlu0 %v5877_v26, %s6404_s10 }
0x2ece   : > { %v5929_v51 = vcombine.high %v5925_v61, %v6402_v49 }
0x2ed0   : > { %5808 = vadd.xlane.f32.xlu1 %v5807_v46  ;;  %v6038_v46 = vsub.s32 %v6035_v38, %v6506_v1 }
0x2ed1   : > { %5943 = vrot.lane.b32.xlu0 %v5869_v30, %s6405_s11 }
0x2ed5   : > { %5967 = vrot.lane.b32.xlu0 %v5910_v21, %s6406_s12 }
0x2ed9   : > { %5951 = vrot.lane.b32.xlu0 %v5876_v60, %s6407_s13 }
0x2edd   : > { %5975 = vrot.lane.b32.xlu0 %v5918_v25, %s6408_s14 }
0x2ee1   : > { %5983 = vrot.lane.b32.xlu0 %v5925_v61, %s6409_s15  ;;  %5935 = vrot.lane.b32.xlu1 %v5861_v9, %s6410_s16 }
0x2ee5   : > { %5963 = vrot.lane.b32.xlu1 %v5926_v11, %s6411_s17 }
0x2ee9   : > { %5939 = vrot.lane.b32.xlu1 %v5878_v35, %s6412_s18 }
0x2eed   : > { %5947 = vrot.lane.b32.xlu1 %v5879_v33, %s6413_s19 }
0x2ef1   : > { %5971 = vrot.lane.b32.xlu1 %v5927_v45, %s6414_s20 }
0x2ef5   : > { %5955 = vrot.lane.b32.xlu1 %v5880_v62, %s6415_s21 }
0x2ef9   : > { %5979 = vrot.lane.b32.xlu1 %v5928_v34, %s6416_s22 }
0x2efd   : > { %5987 = vrot.lane.b32.xlu1 %v5929_v51, %s6417_s25 }
0x2f3b   : > { %v5960_v31 = vpop.permute.xlu0 %5959 }
0x2f3f   : > { %v5932_v39 = vpop.permute.xlu0 %5931 }
0x2f40   : > { %v5990_v2 = vsel %vm1622_vm15, %v8579_v10, %v5932_v39  ;;  %vm6000_vm15 = vcmask 113664  }
0x2f43   : > { %v5944_v16 = vpop.permute.xlu0 %5943 }
0x2f47   : > { %v5968_v57 = vpop.permute.xlu0 %5967 }
0x2f4b   : > { %v5952_v17 = vpop.permute.xlu0 %5951 }
0x2f4f   : > { %v5976_v55 = vpop.permute.xlu0 %5975 }
0x2f51   : > { %v8584_v7 = vpop.xlane.xlu1 %5813 }
0x2f52   : > { %v5823_v14 = vand.u32 2147483648, %v8584_v7  ;;  %vm5822_vm5 = vcmp.eq.f32.partialorder %v8584_v7, 0.0 }
0x2f53   : > { %v5984_v60 = vpop.permute.xlu0 %5983 }
0x2f55   : > { %v5817_v54 = vpop.xlane.xlu1 %5816 }
0x2f56   : > { %6339 = vrsqrt.f32 %v5817_v54  ;;  %vm5827_vm14 = vcmp.eq.f32.partialorder %v5817_v54, inf  ;;  %v5830_v3 = vand.u32 2147483648, %v5817_v54  ;;  %vm5829_vm2 = vcmp.eq.f32.partialorder %v5817_v54, 0.0 }
0x2f57   : > { %6341 = vrsqrt.f32 %v8584_v7 }
0x2f59   : > { %v8586_v44 = vpop.xlane.xlu1 %5805 }
0x2f5a   : > { %v6024_v22 = vrot.slane %v8586_v44, %v6023_v29 }
0x2f5d   : > { %v5809_v15 = vpop.xlane.xlu1 %5808 }
0x2f5e   : > { %v6029_v30 = vrot.slane %v5809_v15, %v6028_v58 }
0x2f60   : > { %v6340_v27 = vpop.eup %6339 }
0x2f61   : > { %v5936_v43 = vpop.permute.xlu1 %5935  ;;  %v6342_v53 = vpop.eup %6341  ;;  %v5826_v0 = vmul.f32 %v6340_v27, %v5817_v54 }
0x2f62   : > { %v5992_v56 = vsel %vm5991_vm7, %v5990_v2, %v5936_v43  ;;  %v5819_v23 = vmul.f32 %v6342_v53, %v8584_v7  ;;  %vm6030_vm7 = vcmask 392512  }
0x2f63   : > { %v5828_v5 = vsel %vm5827_vm14, %v5817_v54, %v5826_v0  ;;  %v6031_v1 = vsel %vm6030_vm7, %v6029_v30, %v6024_v22  ;;  %vm6052_vm14 = vcmask 516096  }
0x2f64   : > { %v5831_v26 = vsel %vm5829_vm2, %v5830_v3, %v5828_v5 }
0x2f65   : > { %v5964_v20 = vpop.permute.xlu1 %5963  ;;  %v6044_v12 = vrot.slane %v5831_v26, %v6043_v24 }
0x2f69   : > { %v5940_v19 = vpop.permute.xlu1 %5939 }
0x2f6a   : > { %v5994_v4 = vsel %vm5993_vm12, %v5992_v56, %v5940_v19  ;;  %vm6016_vm12 = vcmask 244736  }
0x2f6b   : > { %v5995_v41 = vsel %vm639_vm1, %v5994_v4, %v5944_v16  ;;  %vm5820_vm1 = vcmp.eq.f32.partialorder %v8584_v7, inf }
0x2f6c   : > { %v5821_v49 = vsel %vm5820_vm1, %v8584_v7, %v5819_v23 }
0x2f6d   : > { %v5948_v47 = vpop.permute.xlu1 %5947  ;;  %v5824_v21 = vsel %vm5822_vm5, %v5823_v14, %v5821_v49 }
0x2f6e   : > { %v5997_v52 = vsel %vm5996_vm13, %v5995_v41, %v5948_v47  ;;  %vm6045_vm13 = vcmask 523712   ;;  %v6039_v13 = vrot.slane %v5824_v21, %v6038_v46 }
0x2f6f   : > { %v5999_v8 = vsel %vm5998_vm0, %v5997_v52, %v5952_v17  ;;  %vm6048_vm0 = vcmask 261120  }
0x2f70   : > { %v6046_v11 = vsel %vm6045_vm13, %v6044_v12, %v6039_v13 }
0x2f71   : > { %v5972_v59 = vpop.permute.xlu1 %5971 }
0x2f75   : > { %v5956_v32 = vpop.permute.xlu1 %5955 }
0x2f76   : > { %v6001_v10 = vsel %vm6000_vm15, %v5999_v8, %v5956_v32  ;;  %vm6050_vm15 = vcmask 392192  }
0x2f77   : > { %v6003_v28 = vsel %vm6002_vm8, %v6001_v10, %v5960_v31 }
0x2f78   : > { %v6005_v18 = vsel %vm6004_vm9, %v6003_v28, %v5964_v20 }
0x2f79   : > { %v6007_v63 = vsel %vm6006_vm11, %v6005_v18, %v5968_v57  ;;  %v5980_v37 = vpop.permute.xlu1 %5979 }
0x2f7a   : > { %v6009_v48 = vsel %vm6008_vm3, %v6007_v63, %v5972_v59 }
0x2f7b   : > { %v6011_v6 = vsel %vm6010_vm4, %v6009_v48, %v5976_v55 }
0x2f7c   : > { %v6013_v25 = vsel %vm6012_vm6, %v6011_v6, %v5980_v37 }
0x2f7d   : > { %v6015_v50 = vsel %vm6014_vm10, %v6013_v25, %v5984_v60  ;;  %v5988_v61 = vpop.permute.xlu1 %5987 }
0x2f7e   : > { %v6017_v9 = vsel %vm6016_vm12, %v6015_v50, %v5988_v61 }
0x2f7f   : > { %v6049_v35 = vsel %vm6048_vm0, %v6017_v9, %v6031_v1 }
0x2f80   : > { %v6051_v33 = vsel %vm6050_vm15, %v6049_v35, %v6046_v11 }
0x2f81   : > { %6053 = vst.msk [vmem:[%s257_s27] sm:$0x1] %vm6052_vm14, %v6051_v33 }
0x2f82 PF: > { %s18_s23 = sadd.s32 1, %s6392_s23  }
0x2f83   : > { %p15_p3 = scmp.ge.s32.totalorder %s18_s23, 4  }
0x2f85   :  { %17 = sbr.rel (!%p15_p3) target bundleno = 3 (0x3), region = 79 }
0x2f8c   :  { %6071 = vsyncpa [#allocation4], 1 }
0x2f8d   :  { %6073 = vsyncpa [#allocation4 + $0x1], 1 }

</bundles_post_ra>
